<compile_context>
chip_gen: v5e
topology: v5e:2x2
jax: 0.10.0
libtpu: 0.0.40
codegen_flags: <defaults>
</compile_context>

<pallas_src>
import math

import jax
import jax.numpy as jnp
from jax.experimental import pallas as pl
from jax.experimental.pallas import tpu as pltpu  # noqa: F401  (kept for TPU-only deps)

# Small problem sizes consistent with the module.
B, N, M = 2, 8, 8                # batch, |X| set size, |Y| set size
D, H, HID, O = 32, 4, 32, 1      # latent_size, num_heads, hidden_size, output_size
NUM_BLOCKS = 2                   # encoder CSAB blocks
DH = D // H
SCALE = 1.0 / math.sqrt(D)       # MHA divides by sqrt(latent_size), not sqrt(head_dim)
N_MAB = 4 * NUM_BLOCKS + 2       # 4 MABs per CSAB block + PMA_X + PMA_Y


# ----------------------------------------------------------------------------------
# Fused Pallas kernel: the entire MultiSetTransformer forward in one invocation.
# ----------------------------------------------------------------------------------
def _mst_kernel(x_ref, y_ref,
                w_attn_ref, b_attn_ref, w_fc1_ref, b_fc1_ref, w_fc2_ref, b_fc2_ref,
                w_mrg_ref, b_mrg_ref, seed_ref, w_dec_ref, b_dec_ref,
                out_ref, zx_ref, zy_ref):

    def mab(q3, k3, idx):
        """MAB(Q, K) with weight set `idx`.  q3: (b, nq, D), k3: (b, nk, D)."""
        b_, nq, _ = q3.shape
        _, nk, _ = k3.shape
        q2 = q3.reshape(b_ * nq, D)
        k2 = k3.reshape(b_ * nk, D)
        # Q/K/V projections over all batch rows at once (weights are batch-shared).
        q_p = (jnp.dot(q2, w_attn_ref[4 * idx + 0], preferred_element_type=jnp.float32)
               + b_attn_ref[pl.ds(4 * idx + 0, 1), :])
        k_p = (jnp.dot(k2, w_attn_ref[4 * idx + 1], preferred_element_type=jnp.float32)
               + b_attn_ref[pl.ds(4 * idx + 1, 1), :])
        v_p = (jnp.dot(k2, w_attn_ref[4 * idx + 2], preferred_element_type=jnp.float32)
               + b_attn_ref[pl.ds(4 * idx + 2, 1), :])
        wo = w_attn_ref[4 * idx + 3]

        # Multi-head attention, static unroll over heads; the output projection is
        # folded into the loop (no head concat), scores via batched einsum (no K^T).
        attn = jnp.zeros((b_ * nq, D), jnp.float32)
        for h in range(H):
            sl = slice(h * DH, (h + 1) * DH)
            qh = q_p[:, sl].reshape(b_, nq, DH)
            kh = k_p[:, sl].reshape(b_, nk, DH)
            vh = v_p[:, sl].reshape(b_, nk, DH)
            e = jnp.einsum("bqd,bkd->bqk", qh, kh,
                           preferred_element_type=jnp.float32) * SCALE
            e = e - jnp.max(e, axis=-1, keepdims=True)   # cheap; kept for robustness
            p = jnp.exp(e)
            a = p * pl.reciprocal(jnp.sum(p, axis=-1, keepdims=True), approx=True)
            oh = jnp.einsum("bqk,bkd->bqd", a, vh, preferred_element_type=jnp.float32)
            attn = attn + jnp.dot(oh.reshape(b_ * nq, DH), wo[sl, :],
                                  preferred_element_type=jnp.float32)

        xr = q2 + attn + b_attn_ref[pl.ds(4 * idx + 3, 1), :]            # residual 0
        h1 = jnp.maximum(
            jnp.dot(xr, w_fc1_ref[idx], preferred_element_type=jnp.float32)
            + b_fc1_ref[pl.ds(idx, 1), :], 0.0)
        out2 = (xr + jnp.dot(h1, w_fc2_ref[idx], preferred_element_type=jnp.float32)
                + b_fc2_ref[pl.ds(idx, 1), :])                           # residual 1
        return out2.reshape(b_, nq, D)

    def csab(x3, y3, blk):
        base = 4 * blk
        xx = mab(x3, x3, base + 0)
        xy = mab(x3, y3, base + 1)
        yx = mab(y3, x3, base + 2)
        yy = mab(y3, y3, base + 3)
        wmx = w_mrg_ref[2 * blk + 0]                       # (2D, D)
        wmy = w_mrg_ref[2 * blk + 1]
        bmx = b_mrg_ref[pl.ds(2 * blk + 0, 1), :]
        bmy = b_mrg_ref[pl.ds(2 * blk + 1, 1), :]
        bn_x = x3.shape[0] * x3.shape[1]
        bn_y = y3.shape[0] * y3.shape[1]
        # Linear(concat([A, B], -1)) folded into two matmuls on the halves of W.
        x_new = x3.reshape(bn_x, D) + (
            jnp.dot(xx.reshape(bn_x, D), wmx[:D, :], preferred_element_type=jnp.float32)
            + jnp.dot(xy.reshape(bn_x, D), wmx[D:, :], preferred_element_type=jnp.float32)
            + bmx)
        y_new = y3.reshape(bn_y, D) + (
            jnp.dot(yy.reshape(bn_y, D), wmy[:D, :], preferred_element_type=jnp.float32)
            + jnp.dot(yx.reshape(bn_y, D), wmy[D:, :], preferred_element_type=jnp.float32)
            + bmy)
        return x_new.reshape(x3.shape), y_new.reshape(y3.shape)

    # Encoder: stack of CSAB blocks (intermediates never leave the chip).
    zx = x_ref[...]
    zy = y_ref[...]
    for blk in range(NUM_BLOCKS):
        zx, zy = csab(zx, zy, blk)
    zx_ref[...] = zx          # tiny diagnostic outputs (2 KB each), used for checking
    zy_ref[...] = zy

    # PMA pooling: MAB(seed, Z) with one learned seed per set.
    sx = jnp.broadcast_to(seed_ref[pl.ds(0, 1), :].reshape(1, 1, D), (B, 1, D))
    sy = jnp.broadcast_to(seed_ref[pl.ds(1, 1), :].reshape(1, 1, D), (B, 1, D))
    px = mab(sx, zx, 4 * NUM_BLOCKS + 0).reshape(B, D)
    py = mab(sy, zy, 4 * NUM_BLOCKS + 1).reshape(B, D)

    # Decoder: Linear(2D -> O) on concat([pool_x, pool_y]) (concat folded again).
    w_dec = w_dec_ref[...]
    out_ref[...] = (jnp.dot(px, w_dec[:D, :], preferred_element_type=jnp.float32)
                    + jnp.dot(py, w_dec[D:, :], preferred_element_type=jnp.float32)
                    + b_dec_ref[...])


# ----------------------------------------------------------------------------------
# Wrapper: single pallas_call, no grid (whole problem is resident in VMEM, <1 MiB).
# ----------------------------------------------------------------------------------
@jax.jit
def multiset_transformer_forward(X, Y, params):
    out, zx, zy = pl.pallas_call(
        _mst_kernel,
        out_shape=(jax.ShapeDtypeStruct((B, O), jnp.float32),      # decoder output
                   jax.ShapeDtypeStruct((B, N, D), jnp.float32),   # encoded X (diag)
                   jax.ShapeDtypeStruct((B, M, D), jnp.float32)),  # encoded Y (diag)
    )(X, Y,
      params["w_attn"], params["b_attn"],
      params["w_fc1"], params["b_fc1"], params["w_fc2"], params["b_fc2"],
      params["w_merge"], params["b_merge"],
      params["seeds"], params["w_dec"], params["b_dec"])
    return out, zx, zy


# ----------------------------------------------------------------------------------
# Deterministic parameter init (PyTorch nn.Linear-style uniform), stacked per kind so
# the kernel gets a few contiguous weight slabs instead of ~80 tiny arrays.
# MAB index map: block b -> XX=4b, XY=4b+1, YX=4b+2, YY=4b+3; PMA_X=4*NB, PMA_Y=4*NB+1.
# ----------------------------------------------------------------------------------
def _init_linear(key, fan_in, fan_out):
    bound = 1.0 / math.sqrt(fan_in)
    kw, kb = jax.random.split(key)
    w = jax.random.uniform(kw, (fan_in, fan_out), jnp.float32, -bound, bound)
    b = jax.random.uniform(kb, (fan_out,), jnp.float32, -bound, bound)
    return w, b


def _init_params(key):
    keys = iter(jax.random.split(key, 8 * N_MAB + 2 * NUM_BLOCKS + 8))
    wa, ba, w1s, b1s, w2s, b2s = [], [], [], [], [], []
    for _ in range(N_MAB):
        for _ in range(4):                                   # w_q, w_k, w_v, w_o
            w, b = _init_linear(next(keys), D, D)
            wa.append(w); ba.append(b)
        w, b = _init_linear(next(keys), D, HID); w1s.append(w); b1s.append(b)
        w, b = _init_linear(next(keys), HID, D); w2s.append(w); b2s.append(b)
    wms, bms = [], []
    for _ in range(2 * NUM_BLOCKS):                          # fc_X / fc_Y per block
        w, b = _init_linear(next(keys), 2 * D, D)
        wms.append(w); bms.append(b)
    sbound = math.sqrt(6.0 / (2 * D))                        # xavier_uniform PMA seeds
    seeds = jax.random.uniform(next(keys), (2, D), jnp.float32, -sbound, sbound)
    w_dec, b_dec = _init_linear(next(keys), 2 * D, O)
    return {
        "w_attn": jnp.stack(wa),   "b_attn": jnp.stack(ba),     # (4*N_MAB, D, D), (4*N_MAB, D)
        "w_fc1": jnp.stack(w1s),   "b_fc1": jnp.stack(b1s),     # (N_MAB, D, HID), (N_MAB, HID)
        "w_fc2": jnp.stack(w2s),   "b_fc2": jnp.stack(b2s),     # (N_MAB, HID, D), (N_MAB, D)
        "w_merge": jnp.stack(wms), "b_merge": jnp.stack(bms),   # (2*NB, 2D, D), (2*NB, D)
        "seeds": seeds,                                         # (2, D)
        "w_dec": w_dec, "b_dec": b_dec.reshape(1, O),           # (2D, O), (1, O)
    }


# ----------------------------------------------------------------------------------
# Pure-JAX reference (independent formulation: head stack/transpose + explicit concat).
# ----------------------------------------------------------------------------------
def _mab_ref(q, k, idx, p):
    wa, ba = p["w_attn"], p["b_attn"]
    qp = q @ wa[4 * idx + 0] + ba[4 * idx + 0]
    kp = k @ wa[4 * idx + 1] + ba[4 * idx + 1]
    vp = k @ wa[4 * idx + 2] + ba[4 * idx + 2]
    bsz, n, _ = q.shape
    m = k.shape[1]
    qh = qp.reshape(bsz, n, H, DH).transpose(0, 2, 1, 3)
    kh = kp.reshape(bsz, m, H, DH).transpose(0, 2, 1, 3)
    vh = vp.reshape(bsz, m, H, DH).transpose(0, 2, 1, 3)
    e = jnp.einsum("bhnd,bhmd->bhnm", qh, kh) * SCALE
    a = jax.nn.softmax(e, axis=-1)
    o = jnp.einsum("bhnm,bhmd->bhnd", a, vh).transpose(0, 2, 1, 3).reshape(bsz, n, D)
    o = o @ wa[4 * idx + 3] + ba[4 * idx + 3]
    x = q + o
    h1 = jax.nn.relu(x @ p["w_fc1"][idx] + p["b_fc1"][idx])
    return x + h1 @ p["w_fc2"][idx] + p["b_fc2"][idx]


def _csab_ref(X, Y, blk, p):
    base = 4 * blk
    XX = _mab_ref(X, X, base + 0, p)
    XY = _mab_ref(X, Y, base + 1, p)
    YX = _mab_ref(Y, X, base + 2, p)
    YY = _mab_ref(Y, Y, base + 3, p)
    X_out = X + jnp.concatenate([XX, XY], -1) @ p["w_merge"][2 * blk + 0] + p["b_merge"][2 * blk + 0]
    Y_out = Y + jnp.concatenate([YY, YX], -1) @ p["w_merge"][2 * blk + 1] + p["b_merge"][2 * blk + 1]
    return X_out, Y_out


def _model_ref(X, Y, p):
    ZX, ZY = X, Y
    for blk in range(NUM_BLOCKS):
        ZX, ZY = _csab_ref(ZX, ZY, blk, p)
    sx = jnp.broadcast_to(p["seeds"][0][None, None, :], (X.shape[0], 1, D))
    sy = jnp.broadcast_to(p["seeds"][1][None, None, :], (Y.shape[0], 1, D))
    PX = _mab_ref(sx, ZX, 4 * NUM_BLOCKS + 0, p)     # (B, 1, D)
    PY = _mab_ref(sy, ZY, 4 * NUM_BLOCKS + 1, p)     # (B, 1, D)
    dec = jnp.concatenate([PX, PY], -1) @ p["w_dec"] + p["b_dec"]   # (B, 1, O)
    return dec[:, 0, :], ZX, ZY                      # squeeze seed dim -> (B, O)


# ----------------------------------------------------------------------------------
if __name__ == "__main__":
    key = jax.random.PRNGKey(0)
    k_params, k_x, k_y = jax.random.split(key, 3)
    params = _init_params(k_params)
    X = jax.random.normal(k_x, (B, N, D), jnp.float32)
    Y = jax.random.normal(k_y, (B, M, D), jnp.float32)

    out, zx, zy = multiset_transformer_forward(X, Y, params)
    jax.block_until_ready((out, zx, zy))

    out_ref, zx_ref, zy_ref = _model_ref(X, Y, params)
    assert jnp.allclose(zx, zx_ref, rtol=2e-2, atol=2e-2), "encoder X mismatch"
    assert jnp.allclose(zy, zy_ref, rtol=2e-2, atol=2e-2), "encoder Y mismatch"
    assert jnp.allclose(out, out_ref, rtol=2e-2, atol=2e-2), "decoder output mismatch"

    print("KERNEL_OK")
</pallas_src>

<mosaic_0001>
module attributes {stable_mosaic.version = 11 : i64} {
  func.func @_mst_kernel(%arg0: memref<2x8x32xf32, #tpu.memory_space<vmem>>, %arg1: memref<2x8x32xf32, #tpu.memory_space<vmem>>, %arg2: memref<40x32x32xf32, #tpu.memory_space<vmem>>, %arg3: memref<40x32xf32, #tpu.memory_space<vmem>>, %arg4: memref<10x32x32xf32, #tpu.memory_space<vmem>>, %arg5: memref<10x32xf32, #tpu.memory_space<vmem>>, %arg6: memref<10x32x32xf32, #tpu.memory_space<vmem>>, %arg7: memref<10x32xf32, #tpu.memory_space<vmem>>, %arg8: memref<4x64x32xf32, #tpu.memory_space<vmem>>, %arg9: memref<4x32xf32, #tpu.memory_space<vmem>>, %arg10: memref<2x32xf32, #tpu.memory_space<vmem>>, %arg11: memref<64x1xf32, #tpu.memory_space<vmem>>, %arg12: memref<1x1xf32, #tpu.memory_space<vmem>>, %arg13: memref<2x1xf32, #tpu.memory_space<vmem>>, %arg14: memref<2x8x32xf32, #tpu.memory_space<vmem>>, %arg15: memref<2x8x32xf32, #tpu.memory_space<vmem>>) attributes {dimension_semantics = [], scalar_prefetch = 0 : i64, scratch_operands = 0 : i64, tpu.core_type = #tpu.core_type<tc>} {
    %c0 = arith.constant 0 : index
    %c0_0 = arith.constant 0 : index
    %c0_1 = arith.constant 0 : index
    %0 = vector.load %arg0[%c0, %c0_0, %c0_1] : memref<2x8x32xf32, #tpu.memory_space<vmem>>, vector<2x8x32xf32>
    %c0_2 = arith.constant 0 : index
    %c0_3 = arith.constant 0 : index
    %c0_4 = arith.constant 0 : index
    %1 = vector.load %arg1[%c0_2, %c0_3, %c0_4] : memref<2x8x32xf32, #tpu.memory_space<vmem>>, vector<2x8x32xf32>
    %2 = vector.shape_cast %0 : vector<2x8x32xf32> to vector<16x32xf32>
    %3 = vector.shape_cast %0 : vector<2x8x32xf32> to vector<16x32xf32>
    %c0_5 = arith.constant 0 : index
    %c0_6 = arith.constant 0 : index
    %c0_7 = arith.constant 0 : index
    %4 = vector.load %arg2[%c0_5, %c0_6, %c0_7] : memref<40x32x32xf32, #tpu.memory_space<vmem>>, vector<1x32x32xf32>
    %5 = vector.shape_cast %4 : vector<1x32x32xf32> to vector<32x32xf32>
    %cst = arith.constant dense<0.000000e+00> : vector<16x32xf32>
    %6 = tpu.matmul %2, %5, %cst {dimension_numbers = #tpu.dot_dimension_numbers<[1], [0], [0], [1], [0, 0, 1, 1], [], []>} : vector<16x32xf32>, vector<32x32xf32>, vector<16x32xf32> -> vector<16x32xf32>
    %c0_8 = arith.constant 0 : index
    %c0_9 = arith.constant 0 : index
    %7 = vector.load %arg3[%c0_8, %c0_9] : memref<40x32xf32, #tpu.memory_space<vmem>>, vector<1x32xf32>
    %8 = vector.broadcast %7 : vector<1x32xf32> to vector<16x32xf32>
    %9 = arith.addf %6, %8 : vector<16x32xf32>
    %c1 = arith.constant 1 : index
    %c0_10 = arith.constant 0 : index
    %c0_11 = arith.constant 0 : index
    %10 = vector.load %arg2[%c1, %c0_10, %c0_11] : memref<40x32x32xf32, #tpu.memory_space<vmem>>, vector<1x32x32xf32>
    %11 = vector.shape_cast %10 : vector<1x32x32xf32> to vector<32x32xf32>
    %cst_12 = arith.constant dense<0.000000e+00> : vector<16x32xf32>
    %12 = tpu.matmul %3, %11, %cst_12 {dimension_numbers = #tpu.dot_dimension_numbers<[1], [0], [0], [1], [0, 0, 1, 1], [], []>} : vector<16x32xf32>, vector<32x32xf32>, vector<16x32xf32> -> vector<16x32xf32>
    %c1_13 = arith.constant 1 : index
    %c0_14 = arith.constant 0 : index
    %13 = vector.load %arg3[%c1_13, %c0_14] : memref<40x32xf32, #tpu.memory_space<vmem>>, vector<1x32xf32>
    %14 = vector.broadcast %13 : vector<1x32xf32> to vector<16x32xf32>
    %15 = arith.addf %12, %14 : vector<16x32xf32>
    %c2 = arith.constant 2 : index
    %c0_15 = arith.constant 0 : index
    %c0_16 = arith.constant 0 : index
    %16 = vector.load %arg2[%c2, %c0_15, %c0_16] : memref<40x32x32xf32, #tpu.memory_space<vmem>>, vector<1x32x32xf32>
    %17 = vector.shape_cast %16 : vector<1x32x32xf32> to vector<32x32xf32>
    %cst_17 = arith.constant dense<0.000000e+00> : vector<16x32xf32>
    %18 = tpu.matmul %3, %17, %cst_17 {dimension_numbers = #tpu.dot_dimension_numbers<[1], [0], [0], [1], [0, 0, 1, 1], [], []>} : vector<16x32xf32>, vector<32x32xf32>, vector<16x32xf32> -> vector<16x32xf32>
    %c2_18 = arith.constant 2 : index
    %c0_19 = arith.constant 0 : index
    %19 = vector.load %arg3[%c2_18, %c0_19] : memref<40x32xf32, #tpu.memory_space<vmem>>, vector<1x32xf32>
    %20 = vector.broadcast %19 : vector<1x32xf32> to vector<16x32xf32>
    %21 = arith.addf %18, %20 : vector<16x32xf32>
    %c3 = arith.constant 3 : index
    %c0_20 = arith.constant 0 : index
    %c0_21 = arith.constant 0 : index
    %22 = vector.load %arg2[%c3, %c0_20, %c0_21] : memref<40x32x32xf32, #tpu.memory_space<vmem>>, vector<1x32x32xf32>
    %23 = vector.shape_cast %22 : vector<1x32x32xf32> to vector<32x32xf32>
    %cst_22 = arith.constant 0.000000e+00 : f32
    %24 = vector.broadcast %cst_22 : f32 to vector<16x32xf32>
    %25 = vector.extract_strided_slice %9 {offsets = [0, 0], sizes = [16, 8], strides = [1, 1]} : vector<16x32xf32> to vector<16x8xf32>
    %26 = vector.shape_cast %25 : vector<16x8xf32> to vector<2x8x8xf32>
    %27 = vector.extract_strided_slice %15 {offsets = [0, 0], sizes = [16, 8], strides = [1, 1]} : vector<16x32xf32> to vector<16x8xf32>
    %28 = vector.shape_cast %27 : vector<16x8xf32> to vector<2x8x8xf32>
    %29 = vector.extract_strided_slice %21 {offsets = [0, 0], sizes = [16, 8], strides = [1, 1]} : vector<16x32xf32> to vector<16x8xf32>
    %30 = vector.shape_cast %29 : vector<16x8xf32> to vector<2x8x8xf32>
    "tpu.trace_start"() <{level = 10 : i32, message = "bqd,bkd->bqk"}> : () -> ()
    %cst_23 = arith.constant dense<0.000000e+00> : vector<2x8x8xf32>
    %31 = tpu.matmul %26, %28, %cst_23 {dimension_numbers = #tpu.dot_dimension_numbers<[2], [2], [1], [1], [0, 0, 0, 1, 1, 1], [0], [0]>} : vector<2x8x8xf32>, vector<2x8x8xf32>, vector<2x8x8xf32> -> vector<2x8x8xf32>
    "tpu.trace_stop"() : () -> ()
    %cst_24 = arith.constant 0.176776692 : f32
    %32 = vector.broadcast %cst_24 : f32 to vector<2x8x8xf32>
    %33 = arith.mulf %31, %32 : vector<2x8x8xf32>
    %cst_25 = arith.constant dense<0xFF800000> : vector<2x8xf32>
    %34 = vector.multi_reduction <maximumf>, %33, %cst_25 [2] : vector<2x8x8xf32> to vector<2x8xf32>
    %35 = vector.shape_cast %34 : vector<2x8xf32> to vector<2x8x1xf32>
    %36 = vector.broadcast %35 : vector<2x8x1xf32> to vector<2x8x8xf32>
    %37 = arith.subf %33, %36 : vector<2x8x8xf32>
    %38 = math.exp %37 : vector<2x8x8xf32>
    %cst_26 = arith.constant dense<0.000000e+00> : vector<2x8xf32>
    %39 = vector.multi_reduction <add>, %38, %cst_26 [2] : vector<2x8x8xf32> to vector<2x8xf32>
    %40 = vector.shape_cast %39 : vector<2x8xf32> to vector<2x8x1xf32>
    %41 = tpu.reciprocal %40 {approx = true} : vector<2x8x1xf32> -> vector<2x8x1xf32>
    %42 = vector.broadcast %41 : vector<2x8x1xf32> to vector<2x8x8xf32>
    %43 = arith.mulf %38, %42 : vector<2x8x8xf32>
    "tpu.trace_start"() <{level = 10 : i32, message = "bqk,bkd->bqd"}> : () -> ()
    %cst_27 = arith.constant dense<0.000000e+00> : vector<2x8x8xf32>
    %44 = tpu.matmul %43, %30, %cst_27 {dimension_numbers = #tpu.dot_dimension_numbers<[2], [1], [1], [2], [0, 0, 0, 1, 1, 2], [0], [0]>} : vector<2x8x8xf32>, vector<2x8x8xf32>, vector<2x8x8xf32> -> vector<2x8x8xf32>
    "tpu.trace_stop"() : () -> ()
    %45 = vector.shape_cast %44 : vector<2x8x8xf32> to vector<16x8xf32>
    %46 = vector.extract_strided_slice %23 {offsets = [0, 0], sizes = [8, 32], strides = [1, 1]} : vector<32x32xf32> to vector<8x32xf32>
    %cst_28 = arith.constant dense<0.000000e+00> : vector<16x32xf32>
    %47 = tpu.matmul %45, %46, %cst_28 {dimension_numbers = #tpu.dot_dimension_numbers<[1], [0], [0], [1], [0, 0, 1, 1], [], []>} : vector<16x8xf32>, vector<8x32xf32>, vector<16x32xf32> -> vector<16x32xf32>
    %48 = arith.addf %24, %47 : vector<16x32xf32>
    %49 = vector.extract_strided_slice %9 {offsets = [0, 8], sizes = [16, 8], strides = [1, 1]} : vector<16x32xf32> to vector<16x8xf32>
    %50 = vector.shape_cast %49 : vector<16x8xf32> to vector<2x8x8xf32>
    %51 = vector.extract_strided_slice %15 {offsets = [0, 8], sizes = [16, 8], strides = [1, 1]} : vector<16x32xf32> to vector<16x8xf32>
    %52 = vector.shape_cast %51 : vector<16x8xf32> to vector<2x8x8xf32>
    %53 = vector.extract_strided_slice %21 {offsets = [0, 8], sizes = [16, 8], strides = [1, 1]} : vector<16x32xf32> to vector<16x8xf32>
    %54 = vector.shape_cast %53 : vector<16x8xf32> to vector<2x8x8xf32>
    "tpu.trace_start"() <{level = 10 : i32, message = "bqd,bkd->bqk"}> : () -> ()
    %cst_29 = arith.constant dense<0.000000e+00> : vector<2x8x8xf32>
    %55 = tpu.matmul %50, %52, %cst_29 {dimension_numbers = #tpu.dot_dimension_numbers<[2], [2], [1], [1], [0, 0, 0, 1, 1, 1], [0], [0]>} : vector<2x8x8xf32>, vector<2x8x8xf32>, vector<2x8x8xf32> -> vector<2x8x8xf32>
    "tpu.trace_stop"() : () -> ()
    %cst_30 = arith.constant 0.176776692 : f32
    %56 = vector.broadcast %cst_30 : f32 to vector<2x8x8xf32>
    %57 = arith.mulf %55, %56 : vector<2x8x8xf32>
    %cst_31 = arith.constant dense<0xFF800000> : vector<2x8xf32>
    %58 = vector.multi_reduction <maximumf>, %57, %cst_31 [2] : vector<2x8x8xf32> to vector<2x8xf32>
    %59 = vector.shape_cast %58 : vector<2x8xf32> to vector<2x8x1xf32>
    %60 = vector.broadcast %59 : vector<2x8x1xf32> to vector<2x8x8xf32>
    %61 = arith.subf %57, %60 : vector<2x8x8xf32>
    %62 = math.exp %61 : vector<2x8x8xf32>
    %cst_32 = arith.constant dense<0.000000e+00> : vector<2x8xf32>
    %63 = vector.multi_reduction <add>, %62, %cst_32 [2] : vector<2x8x8xf32> to vector<2x8xf32>
    %64 = vector.shape_cast %63 : vector<2x8xf32> to vector<2x8x1xf32>
    %65 = tpu.reciprocal %64 {approx = true} : vector<2x8x1xf32> -> vector<2x8x1xf32>
    %66 = vector.broadcast %65 : vector<2x8x1xf32> to vector<2x8x8xf32>
    %67 = arith.mulf %62, %66 : vector<2x8x8xf32>
    "tpu.trace_start"() <{level = 10 : i32, message = "bqk,bkd->bqd"}> : () -> ()
    %cst_33 = arith.constant dense<0.000000e+00> : vector<2x8x8xf32>
    %68 = tpu.matmul %67, %54, %cst_33 {dimension_numbers = #tpu.dot_dimension_numbers<[2], [1], [1], [2], [0, 0, 0, 1, 1, 2], [0], [0]>} : vector<2x8x8xf32>, vector<2x8x8xf32>, vector<2x8x8xf32> -> vector<2x8x8xf32>
    "tpu.trace_stop"() : () -> ()
    %69 = vector.shape_cast %68 : vector<2x8x8xf32> to vector<16x8xf32>
    %70 = vector.extract_strided_slice %23 {offsets = [8, 0], sizes = [8, 32], strides = [1, 1]} : vector<32x32xf32> to vector<8x32xf32>
    %cst_34 = arith.constant dense<0.000000e+00> : vector<16x32xf32>
    %71 = tpu.matmul %69, %70, %cst_34 {dimension_numbers = #tpu.dot_dimension_numbers<[1], [0], [0], [1], [0, 0, 1, 1], [], []>} : vector<16x8xf32>, vector<8x32xf32>, vector<16x32xf32> -> vector<16x32xf32>
    %72 = arith.addf %48, %71 : vector<16x32xf32>
    %73 = vector.extract_strided_slice %9 {offsets = [0, 16], sizes = [16, 8], strides = [1, 1]} : vector<16x32xf32> to vector<16x8xf32>
    %74 = vector.shape_cast %73 : vector<16x8xf32> to vector<2x8x8xf32>
    %75 = vector.extract_strided_slice %15 {offsets = [0, 16], sizes = [16, 8], strides = [1, 1]} : vector<16x32xf32> to vector<16x8xf32>
    %76 = vector.shape_cast %75 : vector<16x8xf32> to vector<2x8x8xf32>
    %77 = vector.extract_strided_slice %21 {offsets = [0, 16], sizes = [16, 8], strides = [1, 1]} : vector<16x32xf32> to vector<16x8xf32>
    %78 = vector.shape_cast %77 : vector<16x8xf32> to vector<2x8x8xf32>
    "tpu.trace_start"() <{level = 10 : i32, message = "bqd,bkd->bqk"}> : () -> ()
    %cst_35 = arith.constant dense<0.000000e+00> : vector<2x8x8xf32>
    %79 = tpu.matmul %74, %76, %cst_35 {dimension_numbers = #tpu.dot_dimension_numbers<[2], [2], [1], [1], [0, 0, 0, 1, 1, 1], [0], [0]>} : vector<2x8x8xf32>, vector<2x8x8xf32>, vector<2x8x8xf32> -> vector<2x8x8xf32>
    "tpu.trace_stop"() : () -> ()
    %cst_36 = arith.constant 0.176776692 : f32
    %80 = vector.broadcast %cst_36 : f32 to vector<2x8x8xf32>
    %81 = arith.mulf %79, %80 : vector<2x8x8xf32>
    %cst_37 = arith.constant dense<0xFF800000> : vector<2x8xf32>
    %82 = vector.multi_reduction <maximumf>, %81, %cst_37 [2] : vector<2x8x8xf32> to vector<2x8xf32>
    %83 = vector.shape_cast %82 : vector<2x8xf32> to vector<2x8x1xf32>
    %84 = vector.broadcast %83 : vector<2x8x1xf32> to vector<2x8x8xf32>
    %85 = arith.subf %81, %84 : vector<2x8x8xf32>
    %86 = math.exp %85 : vector<2x8x8xf32>
    %cst_38 = arith.constant dense<0.000000e+00> : vector<2x8xf32>
    %87 = vector.multi_reduction <add>, %86, %cst_38 [2] : vector<2x8x8xf32> to vector<2x8xf32>
    %88 = vector.shape_cast %87 : vector<2x8xf32> to vector<2x8x1xf32>
    %89 = tpu.reciprocal %88 {approx = true} : vector<2x8x1xf32> -> vector<2x8x1xf32>
    %90 = vector.broadcast %89 : vector<2x8x1xf32> to vector<2x8x8xf32>
    %91 = arith.mulf %86, %90 : vector<2x8x8xf32>
    "tpu.trace_start"() <{level = 10 : i32, message = "bqk,bkd->bqd"}> : () -> ()
    %cst_39 = arith.constant dense<0.000000e+00> : vector<2x8x8xf32>
    %92 = tpu.matmul %91, %78, %cst_39 {dimension_numbers = #tpu.dot_dimension_numbers<[2], [1], [1], [2], [0, 0, 0, 1, 1, 2], [0], [0]>} : vector<2x8x8xf32>, vector<2x8x8xf32>, vector<2x8x8xf32> -> vector<2x8x8xf32>
    "tpu.trace_stop"() : () -> ()
    %93 = vector.shape_cast %92 : vector<2x8x8xf32> to vector<16x8xf32>
    %94 = vector.extract_strided_slice %23 {offsets = [16, 0], sizes = [8, 32], strides = [1, 1]} : vector<32x32xf32> to vector<8x32xf32>
    %cst_40 = arith.constant dense<0.000000e+00> : vector<16x32xf32>
    %95 = tpu.matmul %93, %94, %cst_40 {dimension_numbers = #tpu.dot_dimension_numbers<[1], [0], [0], [1], [0, 0, 1, 1], [], []>} : vector<16x8xf32>, vector<8x32xf32>, vector<16x32xf32> -> vector<16x32xf32>
    %96 = arith.addf %72, %95 : vector<16x32xf32>
    %97 = vector.extract_strided_slice %9 {offsets = [0, 24], sizes = [16, 8], strides = [1, 1]} : vector<16x32xf32> to vector<16x8xf32>
    %98 = vector.shape_cast %97 : vector<16x8xf32> to vector<2x8x8xf32>
    %99 = vector.extract_strided_slice %15 {offsets = [0, 24], sizes = [16, 8], strides = [1, 1]} : vector<16x32xf32> to vector<16x8xf32>
    %100 = vector.shape_cast %99 : vector<16x8xf32> to vector<2x8x8xf32>
    %101 = vector.extract_strided_slice %21 {offsets = [0, 24], sizes = [16, 8], strides = [1, 1]} : vector<16x32xf32> to vector<16x8xf32>
    %102 = vector.shape_cast %101 : vector<16x8xf32> to vector<2x8x8xf32>
    "tpu.trace_start"() <{level = 10 : i32, message = "bqd,bkd->bqk"}> : () -> ()
    %cst_41 = arith.constant dense<0.000000e+00> : vector<2x8x8xf32>
    %103 = tpu.matmul %98, %100, %cst_41 {dimension_numbers = #tpu.dot_dimension_numbers<[2], [2], [1], [1], [0, 0, 0, 1, 1, 1], [0], [0]>} : vector<2x8x8xf32>, vector<2x8x8xf32>, vector<2x8x8xf32> -> vector<2x8x8xf32>
    "tpu.trace_stop"() : () -> ()
    %cst_42 = arith.constant 0.176776692 : f32
    %104 = vector.broadcast %cst_42 : f32 to vector<2x8x8xf32>
    %105 = arith.mulf %103, %104 : vector<2x8x8xf32>
    %cst_43 = arith.constant dense<0xFF800000> : vector<2x8xf32>
    %106 = vector.multi_reduction <maximumf>, %105, %cst_43 [2] : vector<2x8x8xf32> to vector<2x8xf32>
    %107 = vector.shape_cast %106 : vector<2x8xf32> to vector<2x8x1xf32>
    %108 = vector.broadcast %107 : vector<2x8x1xf32> to vector<2x8x8xf32>
    %109 = arith.subf %105, %108 : vector<2x8x8xf32>
    %110 = math.exp %109 : vector<2x8x8xf32>
    %cst_44 = arith.constant dense<0.000000e+00> : vector<2x8xf32>
    %111 = vector.multi_reduction <add>, %110, %cst_44 [2] : vector<2x8x8xf32> to vector<2x8xf32>
    %112 = vector.shape_cast %111 : vector<2x8xf32> to vector<2x8x1xf32>
    %113 = tpu.reciprocal %112 {approx = true} : vector<2x8x1xf32> -> vector<2x8x1xf32>
    %114 = vector.broadcast %113 : vector<2x8x1xf32> to vector<2x8x8xf32>
    %115 = arith.mulf %110, %114 : vector<2x8x8xf32>
    "tpu.trace_start"() <{level = 10 : i32, message = "bqk,bkd->bqd"}> : () -> ()
    %cst_45 = arith.constant dense<0.000000e+00> : vector<2x8x8xf32>
    %116 = tpu.matmul %115, %102, %cst_45 {dimension_numbers = #tpu.dot_dimension_numbers<[2], [1], [1], [2], [0, 0, 0, 1, 1, 2], [0], [0]>} : vector<2x8x8xf32>, vector<2x8x8xf32>, vector<2x8x8xf32> -> vector<2x8x8xf32>
    "tpu.trace_stop"() : () -> ()
    %117 = vector.shape_cast %116 : vector<2x8x8xf32> to vector<16x8xf32>
    %118 = vector.extract_strided_slice %23 {offsets = [24, 0], sizes = [8, 32], strides = [1, 1]} : vector<32x32xf32> to vector<8x32xf32>
    %cst_46 = arith.constant dense<0.000000e+00> : vector<16x32xf32>
    %119 = tpu.matmul %117, %118, %cst_46 {dimension_numbers = #tpu.dot_dimension_numbers<[1], [0], [0], [1], [0, 0, 1, 1], [], []>} : vector<16x8xf32>, vector<8x32xf32>, vector<16x32xf32> -> vector<16x32xf32>
    %120 = arith.addf %96, %119 : vector<16x32xf32>
    %121 = arith.addf %2, %120 : vector<16x32xf32>
    %c3_47 = arith.constant 3 : index
    %c0_48 = arith.constant 0 : index
    %122 = vector.load %arg3[%c3_47, %c0_48] : memref<40x32xf32, #tpu.memory_space<vmem>>, vector<1x32xf32>
    %123 = vector.broadcast %122 : vector<1x32xf32> to vector<16x32xf32>
    %124 = arith.addf %121, %123 : vector<16x32xf32>
    %c0_49 = arith.constant 0 : index
    %c0_50 = arith.constant 0 : index
    %c0_51 = arith.constant 0 : index
    %125 = vector.load %arg4[%c0_49, %c0_50, %c0_51] : memref<10x32x32xf32, #tpu.memory_space<vmem>>, vector<1x32x32xf32>
    %126 = vector.shape_cast %125 : vector<1x32x32xf32> to vector<32x32xf32>
    %cst_52 = arith.constant dense<0.000000e+00> : vector<16x32xf32>
    %127 = tpu.matmul %124, %126, %cst_52 {dimension_numbers = #tpu.dot_dimension_numbers<[1], [0], [0], [1], [0, 0, 1, 1], [], []>} : vector<16x32xf32>, vector<32x32xf32>, vector<16x32xf32> -> vector<16x32xf32>
    %c0_53 = arith.constant 0 : index
    %c0_54 = arith.constant 0 : index
    %128 = vector.load %arg5[%c0_53, %c0_54] : memref<10x32xf32, #tpu.memory_space<vmem>>, vector<1x32xf32>
    %129 = vector.broadcast %128 : vector<1x32xf32> to vector<16x32xf32>
    %130 = arith.addf %127, %129 : vector<16x32xf32>
    %cst_55 = arith.constant 0.000000e+00 : f32
    %131 = vector.broadcast %cst_55 : f32 to vector<16x32xf32>
    %132 = arith.maximumf %130, %131 : vector<16x32xf32>
    %c0_56 = arith.constant 0 : index
    %c0_57 = arith.constant 0 : index
    %c0_58 = arith.constant 0 : index
    %133 = vector.load %arg6[%c0_56, %c0_57, %c0_58] : memref<10x32x32xf32, #tpu.memory_space<vmem>>, vector<1x32x32xf32>
    %134 = vector.shape_cast %133 : vector<1x32x32xf32> to vector<32x32xf32>
    %cst_59 = arith.constant dense<0.000000e+00> : vector<16x32xf32>
    %135 = tpu.matmul %132, %134, %cst_59 {dimension_numbers = #tpu.dot_dimension_numbers<[1], [0], [0], [1], [0, 0, 1, 1], [], []>} : vector<16x32xf32>, vector<32x32xf32>, vector<16x32xf32> -> vector<16x32xf32>
    %136 = arith.addf %124, %135 : vector<16x32xf32>
    %c0_60 = arith.constant 0 : index
    %c0_61 = arith.constant 0 : index
    %137 = vector.load %arg7[%c0_60, %c0_61] : memref<10x32xf32, #tpu.memory_space<vmem>>, vector<1x32xf32>
    %138 = vector.broadcast %137 : vector<1x32xf32> to vector<16x32xf32>
    %139 = arith.addf %136, %138 : vector<16x32xf32>
    %140 = vector.shape_cast %139 : vector<16x32xf32> to vector<2x8x32xf32>
    %141 = vector.shape_cast %0 : vector<2x8x32xf32> to vector<16x32xf32>
    %142 = vector.shape_cast %1 : vector<2x8x32xf32> to vector<16x32xf32>
    %c4 = arith.constant 4 : index
    %c0_62 = arith.constant 0 : index
    %c0_63 = arith.constant 0 : index
    %143 = vector.load %arg2[%c4, %c0_62, %c0_63] : memref<40x32x32xf32, #tpu.memory_space<vmem>>, vector<1x32x32xf32>
    %144 = vector.shape_cast %143 : vector<1x32x32xf32> to vector<32x32xf32>
    %cst_64 = arith.constant dense<0.000000e+00> : vector<16x32xf32>
    %145 = tpu.matmul %141, %144, %cst_64 {dimension_numbers = #tpu.dot_dimension_numbers<[1], [0], [0], [1], [0, 0, 1, 1], [], []>} : vector<16x32xf32>, vector<32x32xf32>, vector<16x32xf32> -> vector<16x32xf32>
    %c4_65 = arith.constant 4 : index
    %c0_66 = arith.constant 0 : index
    %146 = vector.load %arg3[%c4_65, %c0_66] : memref<40x32xf32, #tpu.memory_space<vmem>>, vector<1x32xf32>
    %147 = vector.broadcast %146 : vector<1x32xf32> to vector<16x32xf32>
    %148 = arith.addf %145, %147 : vector<16x32xf32>
    %c5 = arith.constant 5 : index
    %c0_67 = arith.constant 0 : index
    %c0_68 = arith.constant 0 : index
    %149 = vector.load %arg2[%c5, %c0_67, %c0_68] : memref<40x32x32xf32, #tpu.memory_space<vmem>>, vector<1x32x32xf32>
    %150 = vector.shape_cast %149 : vector<1x32x32xf32> to vector<32x32xf32>
    %cst_69 = arith.constant dense<0.000000e+00> : vector<16x32xf32>
    %151 = tpu.matmul %142, %150, %cst_69 {dimension_numbers = #tpu.dot_dimension_numbers<[1], [0], [0], [1], [0, 0, 1, 1], [], []>} : vector<16x32xf32>, vector<32x32xf32>, vector<16x32xf32> -> vector<16x32xf32>
    %c5_70 = arith.constant 5 : index
    %c0_71 = arith.constant 0 : index
    %152 = vector.load %arg3[%c5_70, %c0_71] : memref<40x32xf32, #tpu.memory_space<vmem>>, vector<1x32xf32>
    %153 = vector.broadcast %152 : vector<1x32xf32> to vector<16x32xf32>
    %154 = arith.addf %151, %153 : vector<16x32xf32>
    %c6 = arith.constant 6 : index
    %c0_72 = arith.constant 0 : index
    %c0_73 = arith.constant 0 : index
    %155 = vector.load %arg2[%c6, %c0_72, %c0_73] : memref<40x32x32xf32, #tpu.memory_space<vmem>>, vector<1x32x32xf32>
    %156 = vector.shape_cast %155 : vector<1x32x32xf32> to vector<32x32xf32>
    %cst_74 = arith.constant dense<0.000000e+00> : vector<16x32xf32>
    %157 = tpu.matmul %142, %156, %cst_74 {dimension_numbers = #tpu.dot_dimension_numbers<[1], [0], [0], [1], [0, 0, 1, 1], [], []>} : vector<16x32xf32>, vector<32x32xf32>, vector<16x32xf32> -> vector<16x32xf32>
    %c6_75 = arith.constant 6 : index
    %c0_76 = arith.constant 0 : index
    %158 = vector.load %arg3[%c6_75, %c0_76] : memref<40x32xf32, #tpu.memory_space<vmem>>, vector<1x32xf32>
    %159 = vector.broadcast %158 : vector<1x32xf32> to vector<16x32xf32>
    %160 = arith.addf %157, %159 : vector<16x32xf32>
    %c7 = arith.constant 7 : index
    %c0_77 = arith.constant 0 : index
    %c0_78 = arith.constant 0 : index
    %161 = vector.load %arg2[%c7, %c0_77, %c0_78] : memref<40x32x32xf32, #tpu.memory_space<vmem>>, vector<1x32x32xf32>
    %162 = vector.shape_cast %161 : vector<1x32x32xf32> to vector<32x32xf32>
    %cst_79 = arith.constant 0.000000e+00 : f32
    %163 = vector.broadcast %cst_79 : f32 to vector<16x32xf32>
    %164 = vector.extract_strided_slice %148 {offsets = [0, 0], sizes = [16, 8], strides = [1, 1]} : vector<16x32xf32> to vector<16x8xf32>
    %165 = vector.shape_cast %164 : vector<16x8xf32> to vector<2x8x8xf32>
    %166 = vector.extract_strided_slice %154 {offsets = [0, 0], sizes = [16, 8], strides = [1, 1]} : vector<16x32xf32> to vector<16x8xf32>
    %167 = vector.shape_cast %166 : vector<16x8xf32> to vector<2x8x8xf32>
    %168 = vector.extract_strided_slice %160 {offsets = [0, 0], sizes = [16, 8], strides = [1, 1]} : vector<16x32xf32> to vector<16x8xf32>
    %169 = vector.shape_cast %168 : vector<16x8xf32> to vector<2x8x8xf32>
    "tpu.trace_start"() <{level = 10 : i32, message = "bqd,bkd->bqk"}> : () -> ()
    %cst_80 = arith.constant dense<0.000000e+00> : vector<2x8x8xf32>
    %170 = tpu.matmul %165, %167, %cst_80 {dimension_numbers = #tpu.dot_dimension_numbers<[2], [2], [1], [1], [0, 0, 0, 1, 1, 1], [0], [0]>} : vector<2x8x8xf32>, vector<2x8x8xf32>, vector<2x8x8xf32> -> vector<2x8x8xf32>
    "tpu.trace_stop"() : () -> ()
    %cst_81 = arith.constant 0.176776692 : f32
    %171 = vector.broadcast %cst_81 : f32 to vector<2x8x8xf32>
    %172 = arith.mulf %170, %171 : vector<2x8x8xf32>
    %cst_82 = arith.constant dense<0xFF800000> : vector<2x8xf32>
    %173 = vector.multi_reduction <maximumf>, %172, %cst_82 [2] : vector<2x8x8xf32> to vector<2x8xf32>
    %174 = vector.shape_cast %173 : vector<2x8xf32> to vector<2x8x1xf32>
    %175 = vector.broadcast %174 : vector<2x8x1xf32> to vector<2x8x8xf32>
    %176 = arith.subf %172, %175 : vector<2x8x8xf32>
    %177 = math.exp %176 : vector<2x8x8xf32>
    %cst_83 = arith.constant dense<0.000000e+00> : vector<2x8xf32>
    %178 = vector.multi_reduction <add>, %177, %cst_83 [2] : vector<2x8x8xf32> to vector<2x8xf32>
    %179 = vector.shape_cast %178 : vector<2x8xf32> to vector<2x8x1xf32>
    %180 = tpu.reciprocal %179 {approx = true} : vector<2x8x1xf32> -> vector<2x8x1xf32>
    %181 = vector.broadcast %180 : vector<2x8x1xf32> to vector<2x8x8xf32>
    %182 = arith.mulf %177, %181 : vector<2x8x8xf32>
    "tpu.trace_start"() <{level = 10 : i32, message = "bqk,bkd->bqd"}> : () -> ()
    %cst_84 = arith.constant dense<0.000000e+00> : vector<2x8x8xf32>
    %183 = tpu.matmul %182, %169, %cst_84 {dimension_numbers = #tpu.dot_dimension_numbers<[2], [1], [1], [2], [0, 0, 0, 1, 1, 2], [0], [0]>} : vector<2x8x8xf32>, vector<2x8x8xf32>, vector<2x8x8xf32> -> vector<2x8x8xf32>
    "tpu.trace_stop"() : () -> ()
    %184 = vector.shape_cast %183 : vector<2x8x8xf32> to vector<16x8xf32>
    %185 = vector.extract_strided_slice %162 {offsets = [0, 0], sizes = [8, 32], strides = [1, 1]} : vector<32x32xf32> to vector<8x32xf32>
    %cst_85 = arith.constant dense<0.000000e+00> : vector<16x32xf32>
    %186 = tpu.matmul %184, %185, %cst_85 {dimension_numbers = #tpu.dot_dimension_numbers<[1], [0], [0], [1], [0, 0, 1, 1], [], []>} : vector<16x8xf32>, vector<8x32xf32>, vector<16x32xf32> -> vector<16x32xf32>
    %187 = arith.addf %163, %186 : vector<16x32xf32>
    %188 = vector.extract_strided_slice %148 {offsets = [0, 8], sizes = [16, 8], strides = [1, 1]} : vector<16x32xf32> to vector<16x8xf32>
    %189 = vector.shape_cast %188 : vector<16x8xf32> to vector<2x8x8xf32>
    %190 = vector.extract_strided_slice %154 {offsets = [0, 8], sizes = [16, 8], strides = [1, 1]} : vector<16x32xf32> to vector<16x8xf32>
    %191 = vector.shape_cast %190 : vector<16x8xf32> to vector<2x8x8xf32>
    %192 = vector.extract_strided_slice %160 {offsets = [0, 8], sizes = [16, 8], strides = [1, 1]} : vector<16x32xf32> to vector<16x8xf32>
    %193 = vector.shape_cast %192 : vector<16x8xf32> to vector<2x8x8xf32>
    "tpu.trace_start"() <{level = 10 : i32, message = "bqd,bkd->bqk"}> : () -> ()
    %cst_86 = arith.constant dense<0.000000e+00> : vector<2x8x8xf32>
    %194 = tpu.matmul %189, %191, %cst_86 {dimension_numbers = #tpu.dot_dimension_numbers<[2], [2], [1], [1], [0, 0, 0, 1, 1, 1], [0], [0]>} : vector<2x8x8xf32>, vector<2x8x8xf32>, vector<2x8x8xf32> -> vector<2x8x8xf32>
    "tpu.trace_stop"() : () -> ()
    %cst_87 = arith.constant 0.176776692 : f32
    %195 = vector.broadcast %cst_87 : f32 to vector<2x8x8xf32>
    %196 = arith.mulf %194, %195 : vector<2x8x8xf32>
    %cst_88 = arith.constant dense<0xFF800000> : vector<2x8xf32>
    %197 = vector.multi_reduction <maximumf>, %196, %cst_88 [2] : vector<2x8x8xf32> to vector<2x8xf32>
    %198 = vector.shape_cast %197 : vector<2x8xf32> to vector<2x8x1xf32>
    %199 = vector.broadcast %198 : vector<2x8x1xf32> to vector<2x8x8xf32>
    %200 = arith.subf %196, %199 : vector<2x8x8xf32>
    %201 = math.exp %200 : vector<2x8x8xf32>
    %cst_89 = arith.constant dense<0.000000e+00> : vector<2x8xf32>
    %202 = vector.multi_reduction <add>, %201, %cst_89 [2] : vector<2x8x8xf32> to vector<2x8xf32>
    %203 = vector.shape_cast %202 : vector<2x8xf32> to vector<2x8x1xf32>
    %204 = tpu.reciprocal %203 {approx = true} : vector<2x8x1xf32> -> vector<2x8x1xf32>
    %205 = vector.broadcast %204 : vector<2x8x1xf32> to vector<2x8x8xf32>
    %206 = arith.mulf %201, %205 : vector<2x8x8xf32>
    "tpu.trace_start"() <{level = 10 : i32, message = "bqk,bkd->bqd"}> : () -> ()
    %cst_90 = arith.constant dense<0.000000e+00> : vector<2x8x8xf32>
    %207 = tpu.matmul %206, %193, %cst_90 {dimension_numbers = #tpu.dot_dimension_numbers<[2], [1], [1], [2], [0, 0, 0, 1, 1, 2], [0], [0]>} : vector<2x8x8xf32>, vector<2x8x8xf32>, vector<2x8x8xf32> -> vector<2x8x8xf32>
    "tpu.trace_stop"() : () -> ()
    %208 = vector.shape_cast %207 : vector<2x8x8xf32> to vector<16x8xf32>
    %209 = vector.extract_strided_slice %162 {offsets = [8, 0], sizes = [8, 32], strides = [1, 1]} : vector<32x32xf32> to vector<8x32xf32>
    %cst_91 = arith.constant dense<0.000000e+00> : vector<16x32xf32>
    %210 = tpu.matmul %208, %209, %cst_91 {dimension_numbers = #tpu.dot_dimension_numbers<[1], [0], [0], [1], [0, 0, 1, 1], [], []>} : vector<16x8xf32>, vector<8x32xf32>, vector<16x32xf32> -> vector<16x32xf32>
    %211 = arith.addf %187, %210 : vector<16x32xf32>
    %212 = vector.extract_strided_slice %148 {offsets = [0, 16], sizes = [16, 8], strides = [1, 1]} : vector<16x32xf32> to vector<16x8xf32>
    %213 = vector.shape_cast %212 : vector<16x8xf32> to vector<2x8x8xf32>
    %214 = vector.extract_strided_slice %154 {offsets = [0, 16], sizes = [16, 8], strides = [1, 1]} : vector<16x32xf32> to vector<16x8xf32>
    %215 = vector.shape_cast %214 : vector<16x8xf32> to vector<2x8x8xf32>
    %216 = vector.extract_strided_slice %160 {offsets = [0, 16], sizes = [16, 8], strides = [1, 1]} : vector<16x32xf32> to vector<16x8xf32>
    %217 = vector.shape_cast %216 : vector<16x8xf32> to vector<2x8x8xf32>
    "tpu.trace_start"() <{level = 10 : i32, message = "bqd,bkd->bqk"}> : () -> ()
    %cst_92 = arith.constant dense<0.000000e+00> : vector<2x8x8xf32>
    %218 = tpu.matmul %213, %215, %cst_92 {dimension_numbers = #tpu.dot_dimension_numbers<[2], [2], [1], [1], [0, 0, 0, 1, 1, 1], [0], [0]>} : vector<2x8x8xf32>, vector<2x8x8xf32>, vector<2x8x8xf32> -> vector<2x8x8xf32>
    "tpu.trace_stop"() : () -> ()
    %cst_93 = arith.constant 0.176776692 : f32
    %219 = vector.broadcast %cst_93 : f32 to vector<2x8x8xf32>
    %220 = arith.mulf %218, %219 : vector<2x8x8xf32>
    %cst_94 = arith.constant dense<0xFF800000> : vector<2x8xf32>
    %221 = vector.multi_reduction <maximumf>, %220, %cst_94 [2] : vector<2x8x8xf32> to vector<2x8xf32>
    %222 = vector.shape_cast %221 : vector<2x8xf32> to vector<2x8x1xf32>
    %223 = vector.broadcast %222 : vector<2x8x1xf32> to vector<2x8x8xf32>
    %224 = arith.subf %220, %223 : vector<2x8x8xf32>
    %225 = math.exp %224 : vector<2x8x8xf32>
    %cst_95 = arith.constant dense<0.000000e+00> : vector<2x8xf32>
    %226 = vector.multi_reduction <add>, %225, %cst_95 [2] : vector<2x8x8xf32> to vector<2x8xf32>
    %227 = vector.shape_cast %226 : vector<2x8xf32> to vector<2x8x1xf32>
    %228 = tpu.reciprocal %227 {approx = true} : vector<2x8x1xf32> -> vector<2x8x1xf32>
    %229 = vector.broadcast %228 : vector<2x8x1xf32> to vector<2x8x8xf32>
    %230 = arith.mulf %225, %229 : vector<2x8x8xf32>
    "tpu.trace_start"() <{level = 10 : i32, message = "bqk,bkd->bqd"}> : () -> ()
    %cst_96 = arith.constant dense<0.000000e+00> : vector<2x8x8xf32>
    %231 = tpu.matmul %230, %217, %cst_96 {dimension_numbers = #tpu.dot_dimension_numbers<[2], [1], [1], [2], [0, 0, 0, 1, 1, 2], [0], [0]>} : vector<2x8x8xf32>, vector<2x8x8xf32>, vector<2x8x8xf32> -> vector<2x8x8xf32>
    "tpu.trace_stop"() : () -> ()
    %232 = vector.shape_cast %231 : vector<2x8x8xf32> to vector<16x8xf32>
    %233 = vector.extract_strided_slice %162 {offsets = [16, 0], sizes = [8, 32], strides = [1, 1]} : vector<32x32xf32> to vector<8x32xf32>
    %cst_97 = arith.constant dense<0.000000e+00> : vector<16x32xf32>
    %234 = tpu.matmul %232, %233, %cst_97 {dimension_numbers = #tpu.dot_dimension_numbers<[1], [0], [0], [1], [0, 0, 1, 1], [], []>} : vector<16x8xf32>, vector<8x32xf32>, vector<16x32xf32> -> vector<16x32xf32>
    %235 = arith.addf %211, %234 : vector<16x32xf32>
    %236 = vector.extract_strided_slice %148 {offsets = [0, 24], sizes = [16, 8], strides = [1, 1]} : vector<16x32xf32> to vector<16x8xf32>
    %237 = vector.shape_cast %236 : vector<16x8xf32> to vector<2x8x8xf32>
    %238 = vector.extract_strided_slice %154 {offsets = [0, 24], sizes = [16, 8], strides = [1, 1]} : vector<16x32xf32> to vector<16x8xf32>
    %239 = vector.shape_cast %238 : vector<16x8xf32> to vector<2x8x8xf32>
    %240 = vector.extract_strided_slice %160 {offsets = [0, 24], sizes = [16, 8], strides = [1, 1]} : vector<16x32xf32> to vector<16x8xf32>
    %241 = vector.shape_cast %240 : vector<16x8xf32> to vector<2x8x8xf32>
    "tpu.trace_start"() <{level = 10 : i32, message = "bqd,bkd->bqk"}> : () -> ()
    %cst_98 = arith.constant dense<0.000000e+00> : vector<2x8x8xf32>
    %242 = tpu.matmul %237, %239, %cst_98 {dimension_numbers = #tpu.dot_dimension_numbers<[2], [2], [1], [1], [0, 0, 0, 1, 1, 1], [0], [0]>} : vector<2x8x8xf32>, vector<2x8x8xf32>, vector<2x8x8xf32> -> vector<2x8x8xf32>
    "tpu.trace_stop"() : () -> ()
    %cst_99 = arith.constant 0.176776692 : f32
    %243 = vector.broadcast %cst_99 : f32 to vector<2x8x8xf32>
    %244 = arith.mulf %242, %243 : vector<2x8x8xf32>
    %cst_100 = arith.constant dense<0xFF800000> : vector<2x8xf32>
    %245 = vector.multi_reduction <maximumf>, %244, %cst_100 [2] : vector<2x8x8xf32> to vector<2x8xf32>
    %246 = vector.shape_cast %245 : vector<2x8xf32> to vector<2x8x1xf32>
    %247 = vector.broadcast %246 : vector<2x8x1xf32> to vector<2x8x8xf32>
    %248 = arith.subf %244, %247 : vector<2x8x8xf32>
    %249 = math.exp %248 : vector<2x8x8xf32>
    %cst_101 = arith.constant dense<0.000000e+00> : vector<2x8xf32>
    %250 = vector.multi_reduction <add>, %249, %cst_101 [2] : vector<2x8x8xf32> to vector<2x8xf32>
    %251 = vector.shape_cast %250 : vector<2x8xf32> to vector<2x8x1xf32>
    %252 = tpu.reciprocal %251 {approx = true} : vector<2x8x1xf32> -> vector<2x8x1xf32>
    %253 = vector.broadcast %252 : vector<2x8x1xf32> to vector<2x8x8xf32>
    %254 = arith.mulf %249, %253 : vector<2x8x8xf32>
    "tpu.trace_start"() <{level = 10 : i32, message = "bqk,bkd->bqd"}> : () -> ()
    %cst_102 = arith.constant dense<0.000000e+00> : vector<2x8x8xf32>
    %255 = tpu.matmul %254, %241, %cst_102 {dimension_numbers = #tpu.dot_dimension_numbers<[2], [1], [1], [2], [0, 0, 0, 1, 1, 2], [0], [0]>} : vector<2x8x8xf32>, vector<2x8x8xf32>, vector<2x8x8xf32> -> vector<2x8x8xf32>
    "tpu.trace_stop"() : () -> ()
    %256 = vector.shape_cast %255 : vector<2x8x8xf32> to vector<16x8xf32>
    %257 = vector.extract_strided_slice %162 {offsets = [24, 0], sizes = [8, 32], strides = [1, 1]} : vector<32x32xf32> to vector<8x32xf32>
    %cst_103 = arith.constant dense<0.000000e+00> : vector<16x32xf32>
    %258 = tpu.matmul %256, %257, %cst_103 {dimension_numbers = #tpu.dot_dimension_numbers<[1], [0], [0], [1], [0, 0, 1, 1], [], []>} : vector<16x8xf32>, vector<8x32xf32>, vector<16x32xf32> -> vector<16x32xf32>
    %259 = arith.addf %235, %258 : vector<16x32xf32>
    %260 = arith.addf %141, %259 : vector<16x32xf32>
    %c7_104 = arith.constant 7 : index
    %c0_105 = arith.constant 0 : index
    %261 = vector.load %arg3[%c7_104, %c0_105] : memref<40x32xf32, #tpu.memory_space<vmem>>, vector<1x32xf32>
    %262 = vector.broadcast %261 : vector<1x32xf32> to vector<16x32xf32>
    %263 = arith.addf %260, %262 : vector<16x32xf32>
    %c1_106 = arith.constant 1 : index
    %c0_107 = arith.constant 0 : index
    %c0_108 = arith.constant 0 : index
    %264 = vector.load %arg4[%c1_106, %c0_107, %c0_108] : memref<10x32x32xf32, #tpu.memory_space<vmem>>, vector<1x32x32xf32>
    %265 = vector.shape_cast %264 : vector<1x32x32xf32> to vector<32x32xf32>
    %cst_109 = arith.constant dense<0.000000e+00> : vector<16x32xf32>
    %266 = tpu.matmul %263, %265, %cst_109 {dimension_numbers = #tpu.dot_dimension_numbers<[1], [0], [0], [1], [0, 0, 1, 1], [], []>} : vector<16x32xf32>, vector<32x32xf32>, vector<16x32xf32> -> vector<16x32xf32>
    %c1_110 = arith.constant 1 : index
    %c0_111 = arith.constant 0 : index
    %267 = vector.load %arg5[%c1_110, %c0_111] : memref<10x32xf32, #tpu.memory_space<vmem>>, vector<1x32xf32>
    %268 = vector.broadcast %267 : vector<1x32xf32> to vector<16x32xf32>
    %269 = arith.addf %266, %268 : vector<16x32xf32>
    %cst_112 = arith.constant 0.000000e+00 : f32
    %270 = vector.broadcast %cst_112 : f32 to vector<16x32xf32>
    %271 = arith.maximumf %269, %270 : vector<16x32xf32>
    %c1_113 = arith.constant 1 : index
    %c0_114 = arith.constant 0 : index
    %c0_115 = arith.constant 0 : index
    %272 = vector.load %arg6[%c1_113, %c0_114, %c0_115] : memref<10x32x32xf32, #tpu.memory_space<vmem>>, vector<1x32x32xf32>
    %273 = vector.shape_cast %272 : vector<1x32x32xf32> to vector<32x32xf32>
    %cst_116 = arith.constant dense<0.000000e+00> : vector<16x32xf32>
    %274 = tpu.matmul %271, %273, %cst_116 {dimension_numbers = #tpu.dot_dimension_numbers<[1], [0], [0], [1], [0, 0, 1, 1], [], []>} : vector<16x32xf32>, vector<32x32xf32>, vector<16x32xf32> -> vector<16x32xf32>
    %275 = arith.addf %263, %274 : vector<16x32xf32>
    %c1_117 = arith.constant 1 : index
    %c0_118 = arith.constant 0 : index
    %276 = vector.load %arg7[%c1_117, %c0_118] : memref<10x32xf32, #tpu.memory_space<vmem>>, vector<1x32xf32>
    %277 = vector.broadcast %276 : vector<1x32xf32> to vector<16x32xf32>
    %278 = arith.addf %275, %277 : vector<16x32xf32>
    %279 = vector.shape_cast %278 : vector<16x32xf32> to vector<2x8x32xf32>
    %280 = vector.shape_cast %1 : vector<2x8x32xf32> to vector<16x32xf32>
    %281 = vector.shape_cast %0 : vector<2x8x32xf32> to vector<16x32xf32>
    %c8 = arith.constant 8 : index
    %c0_119 = arith.constant 0 : index
    %c0_120 = arith.constant 0 : index
    %282 = vector.load %arg2[%c8, %c0_119, %c0_120] : memref<40x32x32xf32, #tpu.memory_space<vmem>>, vector<1x32x32xf32>
    %283 = vector.shape_cast %282 : vector<1x32x32xf32> to vector<32x32xf32>
    %cst_121 = arith.constant dense<0.000000e+00> : vector<16x32xf32>
    %284 = tpu.matmul %280, %283, %cst_121 {dimension_numbers = #tpu.dot_dimension_numbers<[1], [0], [0], [1], [0, 0, 1, 1], [], []>} : vector<16x32xf32>, vector<32x32xf32>, vector<16x32xf32> -> vector<16x32xf32>
    %c8_122 = arith.constant 8 : index
    %c0_123 = arith.constant 0 : index
    %285 = vector.load %arg3[%c8_122, %c0_123] : memref<40x32xf32, #tpu.memory_space<vmem>>, vector<1x32xf32>
    %286 = vector.broadcast %285 : vector<1x32xf32> to vector<16x32xf32>
    %287 = arith.addf %284, %286 : vector<16x32xf32>
    %c9 = arith.constant 9 : index
    %c0_124 = arith.constant 0 : index
    %c0_125 = arith.constant 0 : index
    %288 = vector.load %arg2[%c9, %c0_124, %c0_125] : memref<40x32x32xf32, #tpu.memory_space<vmem>>, vector<1x32x32xf32>
    %289 = vector.shape_cast %288 : vector<1x32x32xf32> to vector<32x32xf32>
    %cst_126 = arith.constant dense<0.000000e+00> : vector<16x32xf32>
    %290 = tpu.matmul %281, %289, %cst_126 {dimension_numbers = #tpu.dot_dimension_numbers<[1], [0], [0], [1], [0, 0, 1, 1], [], []>} : vector<16x32xf32>, vector<32x32xf32>, vector<16x32xf32> -> vector<16x32xf32>
    %c9_127 = arith.constant 9 : index
    %c0_128 = arith.constant 0 : index
    %291 = vector.load %arg3[%c9_127, %c0_128] : memref<40x32xf32, #tpu.memory_space<vmem>>, vector<1x32xf32>
    %292 = vector.broadcast %291 : vector<1x32xf32> to vector<16x32xf32>
    %293 = arith.addf %290, %292 : vector<16x32xf32>
    %c10 = arith.constant 10 : index
    %c0_129 = arith.constant 0 : index
    %c0_130 = arith.constant 0 : index
    %294 = vector.load %arg2[%c10, %c0_129, %c0_130] : memref<40x32x32xf32, #tpu.memory_space<vmem>>, vector<1x32x32xf32>
    %295 = vector.shape_cast %294 : vector<1x32x32xf32> to vector<32x32xf32>
    %cst_131 = arith.constant dense<0.000000e+00> : vector<16x32xf32>
    %296 = tpu.matmul %281, %295, %cst_131 {dimension_numbers = #tpu.dot_dimension_numbers<[1], [0], [0], [1], [0, 0, 1, 1], [], []>} : vector<16x32xf32>, vector<32x32xf32>, vector<16x32xf32> -> vector<16x32xf32>
    %c10_132 = arith.constant 10 : index
    %c0_133 = arith.constant 0 : index
    %297 = vector.load %arg3[%c10_132, %c0_133] : memref<40x32xf32, #tpu.memory_space<vmem>>, vector<1x32xf32>
    %298 = vector.broadcast %297 : vector<1x32xf32> to vector<16x32xf32>
    %299 = arith.addf %296, %298 : vector<16x32xf32>
    %c11 = arith.constant 11 : index
    %c0_134 = arith.constant 0 : index
    %c0_135 = arith.constant 0 : index
    %300 = vector.load %arg2[%c11, %c0_134, %c0_135] : memref<40x32x32xf32, #tpu.memory_space<vmem>>, vector<1x32x32xf32>
    %301 = vector.shape_cast %300 : vector<1x32x32xf32> to vector<32x32xf32>
    %cst_136 = arith.constant 0.000000e+00 : f32
    %302 = vector.broadcast %cst_136 : f32 to vector<16x32xf32>
    %303 = vector.extract_strided_slice %287 {offsets = [0, 0], sizes = [16, 8], strides = [1, 1]} : vector<16x32xf32> to vector<16x8xf32>
    %304 = vector.shape_cast %303 : vector<16x8xf32> to vector<2x8x8xf32>
    %305 = vector.extract_strided_slice %293 {offsets = [0, 0], sizes = [16, 8], strides = [1, 1]} : vector<16x32xf32> to vector<16x8xf32>
    %306 = vector.shape_cast %305 : vector<16x8xf32> to vector<2x8x8xf32>
    %307 = vector.extract_strided_slice %299 {offsets = [0, 0], sizes = [16, 8], strides = [1, 1]} : vector<16x32xf32> to vector<16x8xf32>
    %308 = vector.shape_cast %307 : vector<16x8xf32> to vector<2x8x8xf32>
    "tpu.trace_start"() <{level = 10 : i32, message = "bqd,bkd->bqk"}> : () -> ()
    %cst_137 = arith.constant dense<0.000000e+00> : vector<2x8x8xf32>
    %309 = tpu.matmul %304, %306, %cst_137 {dimension_numbers = #tpu.dot_dimension_numbers<[2], [2], [1], [1], [0, 0, 0, 1, 1, 1], [0], [0]>} : vector<2x8x8xf32>, vector<2x8x8xf32>, vector<2x8x8xf32> -> vector<2x8x8xf32>
    "tpu.trace_stop"() : () -> ()
    %cst_138 = arith.constant 0.176776692 : f32
    %310 = vector.broadcast %cst_138 : f32 to vector<2x8x8xf32>
    %311 = arith.mulf %309, %310 : vector<2x8x8xf32>
    %cst_139 = arith.constant dense<0xFF800000> : vector<2x8xf32>
    %312 = vector.multi_reduction <maximumf>, %311, %cst_139 [2] : vector<2x8x8xf32> to vector<2x8xf32>
    %313 = vector.shape_cast %312 : vector<2x8xf32> to vector<2x8x1xf32>
    %314 = vector.broadcast %313 : vector<2x8x1xf32> to vector<2x8x8xf32>
    %315 = arith.subf %311, %314 : vector<2x8x8xf32>
    %316 = math.exp %315 : vector<2x8x8xf32>
    %cst_140 = arith.constant dense<0.000000e+00> : vector<2x8xf32>
    %317 = vector.multi_reduction <add>, %316, %cst_140 [2] : vector<2x8x8xf32> to vector<2x8xf32>
    %318 = vector.shape_cast %317 : vector<2x8xf32> to vector<2x8x1xf32>
    %319 = tpu.reciprocal %318 {approx = true} : vector<2x8x1xf32> -> vector<2x8x1xf32>
    %320 = vector.broadcast %319 : vector<2x8x1xf32> to vector<2x8x8xf32>
    %321 = arith.mulf %316, %320 : vector<2x8x8xf32>
    "tpu.trace_start"() <{level = 10 : i32, message = "bqk,bkd->bqd"}> : () -> ()
    %cst_141 = arith.constant dense<0.000000e+00> : vector<2x8x8xf32>
    %322 = tpu.matmul %321, %308, %cst_141 {dimension_numbers = #tpu.dot_dimension_numbers<[2], [1], [1], [2], [0, 0, 0, 1, 1, 2], [0], [0]>} : vector<2x8x8xf32>, vector<2x8x8xf32>, vector<2x8x8xf32> -> vector<2x8x8xf32>
    "tpu.trace_stop"() : () -> ()
    %323 = vector.shape_cast %322 : vector<2x8x8xf32> to vector<16x8xf32>
    %324 = vector.extract_strided_slice %301 {offsets = [0, 0], sizes = [8, 32], strides = [1, 1]} : vector<32x32xf32> to vector<8x32xf32>
    %cst_142 = arith.constant dense<0.000000e+00> : vector<16x32xf32>
    %325 = tpu.matmul %323, %324, %cst_142 {dimension_numbers = #tpu.dot_dimension_numbers<[1], [0], [0], [1], [0, 0, 1, 1], [], []>} : vector<16x8xf32>, vector<8x32xf32>, vector<16x32xf32> -> vector<16x32xf32>
    %326 = arith.addf %302, %325 : vector<16x32xf32>
    %327 = vector.extract_strided_slice %287 {offsets = [0, 8], sizes = [16, 8], strides = [1, 1]} : vector<16x32xf32> to vector<16x8xf32>
    %328 = vector.shape_cast %327 : vector<16x8xf32> to vector<2x8x8xf32>
    %329 = vector.extract_strided_slice %293 {offsets = [0, 8], sizes = [16, 8], strides = [1, 1]} : vector<16x32xf32> to vector<16x8xf32>
    %330 = vector.shape_cast %329 : vector<16x8xf32> to vector<2x8x8xf32>
    %331 = vector.extract_strided_slice %299 {offsets = [0, 8], sizes = [16, 8], strides = [1, 1]} : vector<16x32xf32> to vector<16x8xf32>
    %332 = vector.shape_cast %331 : vector<16x8xf32> to vector<2x8x8xf32>
    "tpu.trace_start"() <{level = 10 : i32, message = "bqd,bkd->bqk"}> : () -> ()
    %cst_143 = arith.constant dense<0.000000e+00> : vector<2x8x8xf32>
    %333 = tpu.matmul %328, %330, %cst_143 {dimension_numbers = #tpu.dot_dimension_numbers<[2], [2], [1], [1], [0, 0, 0, 1, 1, 1], [0], [0]>} : vector<2x8x8xf32>, vector<2x8x8xf32>, vector<2x8x8xf32> -> vector<2x8x8xf32>
    "tpu.trace_stop"() : () -> ()
    %cst_144 = arith.constant 0.176776692 : f32
    %334 = vector.broadcast %cst_144 : f32 to vector<2x8x8xf32>
    %335 = arith.mulf %333, %334 : vector<2x8x8xf32>
    %cst_145 = arith.constant dense<0xFF800000> : vector<2x8xf32>
    %336 = vector.multi_reduction <maximumf>, %335, %cst_145 [2] : vector<2x8x8xf32> to vector<2x8xf32>
    %337 = vector.shape_cast %336 : vector<2x8xf32> to vector<2x8x1xf32>
    %338 = vector.broadcast %337 : vector<2x8x1xf32> to vector<2x8x8xf32>
    %339 = arith.subf %335, %338 : vector<2x8x8xf32>
    %340 = math.exp %339 : vector<2x8x8xf32>
    %cst_146 = arith.constant dense<0.000000e+00> : vector<2x8xf32>
    %341 = vector.multi_reduction <add>, %340, %cst_146 [2] : vector<2x8x8xf32> to vector<2x8xf32>
    %342 = vector.shape_cast %341 : vector<2x8xf32> to vector<2x8x1xf32>
    %343 = tpu.reciprocal %342 {approx = true} : vector<2x8x1xf32> -> vector<2x8x1xf32>
    %344 = vector.broadcast %343 : vector<2x8x1xf32> to vector<2x8x8xf32>
    %345 = arith.mulf %340, %344 : vector<2x8x8xf32>
    "tpu.trace_start"() <{level = 10 : i32, message = "bqk,bkd->bqd"}> : () -> ()
    %cst_147 = arith.constant dense<0.000000e+00> : vector<2x8x8xf32>
    %346 = tpu.matmul %345, %332, %cst_147 {dimension_numbers = #tpu.dot_dimension_numbers<[2], [1], [1], [2], [0, 0, 0, 1, 1, 2], [0], [0]>} : vector<2x8x8xf32>, vector<2x8x8xf32>, vector<2x8x8xf32> -> vector<2x8x8xf32>
    "tpu.trace_stop"() : () -> ()
    %347 = vector.shape_cast %346 : vector<2x8x8xf32> to vector<16x8xf32>
    %348 = vector.extract_strided_slice %301 {offsets = [8, 0], sizes = [8, 32], strides = [1, 1]} : vector<32x32xf32> to vector<8x32xf32>
    %cst_148 = arith.constant dense<0.000000e+00> : vector<16x32xf32>
    %349 = tpu.matmul %347, %348, %cst_148 {dimension_numbers = #tpu.dot_dimension_numbers<[1], [0], [0], [1], [0, 0, 1, 1], [], []>} : vector<16x8xf32>, vector<8x32xf32>, vector<16x32xf32> -> vector<16x32xf32>
    %350 = arith.addf %326, %349 : vector<16x32xf32>
    %351 = vector.extract_strided_slice %287 {offsets = [0, 16], sizes = [16, 8], strides = [1, 1]} : vector<16x32xf32> to vector<16x8xf32>
    %352 = vector.shape_cast %351 : vector<16x8xf32> to vector<2x8x8xf32>
    %353 = vector.extract_strided_slice %293 {offsets = [0, 16], sizes = [16, 8], strides = [1, 1]} : vector<16x32xf32> to vector<16x8xf32>
    %354 = vector.shape_cast %353 : vector<16x8xf32> to vector<2x8x8xf32>
    %355 = vector.extract_strided_slice %299 {offsets = [0, 16], sizes = [16, 8], strides = [1, 1]} : vector<16x32xf32> to vector<16x8xf32>
    %356 = vector.shape_cast %355 : vector<16x8xf32> to vector<2x8x8xf32>
    "tpu.trace_start"() <{level = 10 : i32, message = "bqd,bkd->bqk"}> : () -> ()
    %cst_149 = arith.constant dense<0.000000e+00> : vector<2x8x8xf32>
    %357 = tpu.matmul %352, %354, %cst_149 {dimension_numbers = #tpu.dot_dimension_numbers<[2], [2], [1], [1], [0, 0, 0, 1, 1, 1], [0], [0]>} : vector<2x8x8xf32>, vector<2x8x8xf32>, vector<2x8x8xf32> -> vector<2x8x8xf32>
    "tpu.trace_stop"() : () -> ()
    %cst_150 = arith.constant 0.176776692 : f32
    %358 = vector.broadcast %cst_150 : f32 to vector<2x8x8xf32>
    %359 = arith.mulf %357, %358 : vector<2x8x8xf32>
    %cst_151 = arith.constant dense<0xFF800000> : vector<2x8xf32>
    %360 = vector.multi_reduction <maximumf>, %359, %cst_151 [2] : vector<2x8x8xf32> to vector<2x8xf32>
    %361 = vector.shape_cast %360 : vector<2x8xf32> to vector<2x8x1xf32>
    %362 = vector.broadcast %361 : vector<2x8x1xf32> to vector<2x8x8xf32>
    %363 = arith.subf %359, %362 : vector<2x8x8xf32>
    %364 = math.exp %363 : vector<2x8x8xf32>
    %cst_152 = arith.constant dense<0.000000e+00> : vector<2x8xf32>
    %365 = vector.multi_reduction <add>, %364, %cst_152 [2] : vector<2x8x8xf32> to vector<2x8xf32>
    %366 = vector.shape_cast %365 : vector<2x8xf32> to vector<2x8x1xf32>
    %367 = tpu.reciprocal %366 {approx = true} : vector<2x8x1xf32> -> vector<2x8x1xf32>
    %368 = vector.broadcast %367 : vector<2x8x1xf32> to vector<2x8x8xf32>
    %369 = arith.mulf %364, %368 : vector<2x8x8xf32>
    "tpu.trace_start"() <{level = 10 : i32, message = "bqk,bkd->bqd"}> : () -> ()
    %cst_153 = arith.constant dense<0.000000e+00> : vector<2x8x8xf32>
    %370 = tpu.matmul %369, %356, %cst_153 {dimension_numbers = #tpu.dot_dimension_numbers<[2], [1], [1], [2], [0, 0, 0, 1, 1, 2], [0], [0]>} : vector<2x8x8xf32>, vector<2x8x8xf32>, vector<2x8x8xf32> -> vector<2x8x8xf32>
    "tpu.trace_stop"() : () -> ()
    %371 = vector.shape_cast %370 : vector<2x8x8xf32> to vector<16x8xf32>
    %372 = vector.extract_strided_slice %301 {offsets = [16, 0], sizes = [8, 32], strides = [1, 1]} : vector<32x32xf32> to vector<8x32xf32>
    %cst_154 = arith.constant dense<0.000000e+00> : vector<16x32xf32>
    %373 = tpu.matmul %371, %372, %cst_154 {dimension_numbers = #tpu.dot_dimension_numbers<[1], [0], [0], [1], [0, 0, 1, 1], [], []>} : vector<16x8xf32>, vector<8x32xf32>, vector<16x32xf32> -> vector<16x32xf32>
    %374 = arith.addf %350, %373 : vector<16x32xf32>
    %375 = vector.extract_strided_slice %287 {offsets = [0, 24], sizes = [16, 8], strides = [1, 1]} : vector<16x32xf32> to vector<16x8xf32>
    %376 = vector.shape_cast %375 : vector<16x8xf32> to vector<2x8x8xf32>
    %377 = vector.extract_strided_slice %293 {offsets = [0, 24], sizes = [16, 8], strides = [1, 1]} : vector<16x32xf32> to vector<16x8xf32>
    %378 = vector.shape_cast %377 : vector<16x8xf32> to vector<2x8x8xf32>
    %379 = vector.extract_strided_slice %299 {offsets = [0, 24], sizes = [16, 8], strides = [1, 1]} : vector<16x32xf32> to vector<16x8xf32>
    %380 = vector.shape_cast %379 : vector<16x8xf32> to vector<2x8x8xf32>
    "tpu.trace_start"() <{level = 10 : i32, message = "bqd,bkd->bqk"}> : () -> ()
    %cst_155 = arith.constant dense<0.000000e+00> : vector<2x8x8xf32>
    %381 = tpu.matmul %376, %378, %cst_155 {dimension_numbers = #tpu.dot_dimension_numbers<[2], [2], [1], [1], [0, 0, 0, 1, 1, 1], [0], [0]>} : vector<2x8x8xf32>, vector<2x8x8xf32>, vector<2x8x8xf32> -> vector<2x8x8xf32>
    "tpu.trace_stop"() : () -> ()
    %cst_156 = arith.constant 0.176776692 : f32
    %382 = vector.broadcast %cst_156 : f32 to vector<2x8x8xf32>
    %383 = arith.mulf %381, %382 : vector<2x8x8xf32>
    %cst_157 = arith.constant dense<0xFF800000> : vector<2x8xf32>
    %384 = vector.multi_reduction <maximumf>, %383, %cst_157 [2] : vector<2x8x8xf32> to vector<2x8xf32>
    %385 = vector.shape_cast %384 : vector<2x8xf32> to vector<2x8x1xf32>
    %386 = vector.broadcast %385 : vector<2x8x1xf32> to vector<2x8x8xf32>
    %387 = arith.subf %383, %386 : vector<2x8x8xf32>
    %388 = math.exp %387 : vector<2x8x8xf32>
    %cst_158 = arith.constant dense<0.000000e+00> : vector<2x8xf32>
    %389 = vector.multi_reduction <add>, %388, %cst_158 [2] : vector<2x8x8xf32> to vector<2x8xf32>
    %390 = vector.shape_cast %389 : vector<2x8xf32> to vector<2x8x1xf32>
    %391 = tpu.reciprocal %390 {approx = true} : vector<2x8x1xf32> -> vector<2x8x1xf32>
    %392 = vector.broadcast %391 : vector<2x8x1xf32> to vector<2x8x8xf32>
    %393 = arith.mulf %388, %392 : vector<2x8x8xf32>
    "tpu.trace_start"() <{level = 10 : i32, message = "bqk,bkd->bqd"}> : () -> ()
    %cst_159 = arith.constant dense<0.000000e+00> : vector<2x8x8xf32>
    %394 = tpu.matmul %393, %380, %cst_159 {dimension_numbers = #tpu.dot_dimension_numbers<[2], [1], [1], [2], [0, 0, 0, 1, 1, 2], [0], [0]>} : vector<2x8x8xf32>, vector<2x8x8xf32>, vector<2x8x8xf32> -> vector<2x8x8xf32>
    "tpu.trace_stop"() : () -> ()
    %395 = vector.shape_cast %394 : vector<2x8x8xf32> to vector<16x8xf32>
    %396 = vector.extract_strided_slice %301 {offsets = [24, 0], sizes = [8, 32], strides = [1, 1]} : vector<32x32xf32> to vector<8x32xf32>
    %cst_160 = arith.constant dense<0.000000e+00> : vector<16x32xf32>
    %397 = tpu.matmul %395, %396, %cst_160 {dimension_numbers = #tpu.dot_dimension_numbers<[1], [0], [0], [1], [0, 0, 1, 1], [], []>} : vector<16x8xf32>, vector<8x32xf32>, vector<16x32xf32> -> vector<16x32xf32>
    %398 = arith.addf %374, %397 : vector<16x32xf32>
    %399 = arith.addf %280, %398 : vector<16x32xf32>
    %c11_161 = arith.constant 11 : index
    %c0_162 = arith.constant 0 : index
    %400 = vector.load %arg3[%c11_161, %c0_162] : memref<40x32xf32, #tpu.memory_space<vmem>>, vector<1x32xf32>
    %401 = vector.broadcast %400 : vector<1x32xf32> to vector<16x32xf32>
    %402 = arith.addf %399, %401 : vector<16x32xf32>
    %c2_163 = arith.constant 2 : index
    %c0_164 = arith.constant 0 : index
    %c0_165 = arith.constant 0 : index
    %403 = vector.load %arg4[%c2_163, %c0_164, %c0_165] : memref<10x32x32xf32, #tpu.memory_space<vmem>>, vector<1x32x32xf32>
    %404 = vector.shape_cast %403 : vector<1x32x32xf32> to vector<32x32xf32>
    %cst_166 = arith.constant dense<0.000000e+00> : vector<16x32xf32>
    %405 = tpu.matmul %402, %404, %cst_166 {dimension_numbers = #tpu.dot_dimension_numbers<[1], [0], [0], [1], [0, 0, 1, 1], [], []>} : vector<16x32xf32>, vector<32x32xf32>, vector<16x32xf32> -> vector<16x32xf32>
    %c2_167 = arith.constant 2 : index
    %c0_168 = arith.constant 0 : index
    %406 = vector.load %arg5[%c2_167, %c0_168] : memref<10x32xf32, #tpu.memory_space<vmem>>, vector<1x32xf32>
    %407 = vector.broadcast %406 : vector<1x32xf32> to vector<16x32xf32>
    %408 = arith.addf %405, %407 : vector<16x32xf32>
    %cst_169 = arith.constant 0.000000e+00 : f32
    %409 = vector.broadcast %cst_169 : f32 to vector<16x32xf32>
    %410 = arith.maximumf %408, %409 : vector<16x32xf32>
    %c2_170 = arith.constant 2 : index
    %c0_171 = arith.constant 0 : index
    %c0_172 = arith.constant 0 : index
    %411 = vector.load %arg6[%c2_170, %c0_171, %c0_172] : memref<10x32x32xf32, #tpu.memory_space<vmem>>, vector<1x32x32xf32>
    %412 = vector.shape_cast %411 : vector<1x32x32xf32> to vector<32x32xf32>
    %cst_173 = arith.constant dense<0.000000e+00> : vector<16x32xf32>
    %413 = tpu.matmul %410, %412, %cst_173 {dimension_numbers = #tpu.dot_dimension_numbers<[1], [0], [0], [1], [0, 0, 1, 1], [], []>} : vector<16x32xf32>, vector<32x32xf32>, vector<16x32xf32> -> vector<16x32xf32>
    %414 = arith.addf %402, %413 : vector<16x32xf32>
    %c2_174 = arith.constant 2 : index
    %c0_175 = arith.constant 0 : index
    %415 = vector.load %arg7[%c2_174, %c0_175] : memref<10x32xf32, #tpu.memory_space<vmem>>, vector<1x32xf32>
    %416 = vector.broadcast %415 : vector<1x32xf32> to vector<16x32xf32>
    %417 = arith.addf %414, %416 : vector<16x32xf32>
    %418 = vector.shape_cast %417 : vector<16x32xf32> to vector<2x8x32xf32>
    %419 = vector.shape_cast %1 : vector<2x8x32xf32> to vector<16x32xf32>
    %420 = vector.shape_cast %1 : vector<2x8x32xf32> to vector<16x32xf32>
    %c12 = arith.constant 12 : index
    %c0_176 = arith.constant 0 : index
    %c0_177 = arith.constant 0 : index
    %421 = vector.load %arg2[%c12, %c0_176, %c0_177] : memref<40x32x32xf32, #tpu.memory_space<vmem>>, vector<1x32x32xf32>
    %422 = vector.shape_cast %421 : vector<1x32x32xf32> to vector<32x32xf32>
    %cst_178 = arith.constant dense<0.000000e+00> : vector<16x32xf32>
    %423 = tpu.matmul %419, %422, %cst_178 {dimension_numbers = #tpu.dot_dimension_numbers<[1], [0], [0], [1], [0, 0, 1, 1], [], []>} : vector<16x32xf32>, vector<32x32xf32>, vector<16x32xf32> -> vector<16x32xf32>
    %c12_179 = arith.constant 12 : index
    %c0_180 = arith.constant 0 : index
    %424 = vector.load %arg3[%c12_179, %c0_180] : memref<40x32xf32, #tpu.memory_space<vmem>>, vector<1x32xf32>
    %425 = vector.broadcast %424 : vector<1x32xf32> to vector<16x32xf32>
    %426 = arith.addf %423, %425 : vector<16x32xf32>
    %c13 = arith.constant 13 : index
    %c0_181 = arith.constant 0 : index
    %c0_182 = arith.constant 0 : index
    %427 = vector.load %arg2[%c13, %c0_181, %c0_182] : memref<40x32x32xf32, #tpu.memory_space<vmem>>, vector<1x32x32xf32>
    %428 = vector.shape_cast %427 : vector<1x32x32xf32> to vector<32x32xf32>
    %cst_183 = arith.constant dense<0.000000e+00> : vector<16x32xf32>
    %429 = tpu.matmul %420, %428, %cst_183 {dimension_numbers = #tpu.dot_dimension_numbers<[1], [0], [0], [1], [0, 0, 1, 1], [], []>} : vector<16x32xf32>, vector<32x32xf32>, vector<16x32xf32> -> vector<16x32xf32>
    %c13_184 = arith.constant 13 : index
    %c0_185 = arith.constant 0 : index
    %430 = vector.load %arg3[%c13_184, %c0_185] : memref<40x32xf32, #tpu.memory_space<vmem>>, vector<1x32xf32>
    %431 = vector.broadcast %430 : vector<1x32xf32> to vector<16x32xf32>
    %432 = arith.addf %429, %431 : vector<16x32xf32>
    %c14 = arith.constant 14 : index
    %c0_186 = arith.constant 0 : index
    %c0_187 = arith.constant 0 : index
    %433 = vector.load %arg2[%c14, %c0_186, %c0_187] : memref<40x32x32xf32, #tpu.memory_space<vmem>>, vector<1x32x32xf32>
    %434 = vector.shape_cast %433 : vector<1x32x32xf32> to vector<32x32xf32>
    %cst_188 = arith.constant dense<0.000000e+00> : vector<16x32xf32>
    %435 = tpu.matmul %420, %434, %cst_188 {dimension_numbers = #tpu.dot_dimension_numbers<[1], [0], [0], [1], [0, 0, 1, 1], [], []>} : vector<16x32xf32>, vector<32x32xf32>, vector<16x32xf32> -> vector<16x32xf32>
    %c14_189 = arith.constant 14 : index
    %c0_190 = arith.constant 0 : index
    %436 = vector.load %arg3[%c14_189, %c0_190] : memref<40x32xf32, #tpu.memory_space<vmem>>, vector<1x32xf32>
    %437 = vector.broadcast %436 : vector<1x32xf32> to vector<16x32xf32>
    %438 = arith.addf %435, %437 : vector<16x32xf32>
    %c15 = arith.constant 15 : index
    %c0_191 = arith.constant 0 : index
    %c0_192 = arith.constant 0 : index
    %439 = vector.load %arg2[%c15, %c0_191, %c0_192] : memref<40x32x32xf32, #tpu.memory_space<vmem>>, vector<1x32x32xf32>
    %440 = vector.shape_cast %439 : vector<1x32x32xf32> to vector<32x32xf32>
    %cst_193 = arith.constant 0.000000e+00 : f32
    %441 = vector.broadcast %cst_193 : f32 to vector<16x32xf32>
    %442 = vector.extract_strided_slice %426 {offsets = [0, 0], sizes = [16, 8], strides = [1, 1]} : vector<16x32xf32> to vector<16x8xf32>
    %443 = vector.shape_cast %442 : vector<16x8xf32> to vector<2x8x8xf32>
    %444 = vector.extract_strided_slice %432 {offsets = [0, 0], sizes = [16, 8], strides = [1, 1]} : vector<16x32xf32> to vector<16x8xf32>
    %445 = vector.shape_cast %444 : vector<16x8xf32> to vector<2x8x8xf32>
    %446 = vector.extract_strided_slice %438 {offsets = [0, 0], sizes = [16, 8], strides = [1, 1]} : vector<16x32xf32> to vector<16x8xf32>
    %447 = vector.shape_cast %446 : vector<16x8xf32> to vector<2x8x8xf32>
    "tpu.trace_start"() <{level = 10 : i32, message = "bqd,bkd->bqk"}> : () -> ()
    %cst_194 = arith.constant dense<0.000000e+00> : vector<2x8x8xf32>
    %448 = tpu.matmul %443, %445, %cst_194 {dimension_numbers = #tpu.dot_dimension_numbers<[2], [2], [1], [1], [0, 0, 0, 1, 1, 1], [0], [0]>} : vector<2x8x8xf32>, vector<2x8x8xf32>, vector<2x8x8xf32> -> vector<2x8x8xf32>
    "tpu.trace_stop"() : () -> ()
    %cst_195 = arith.constant 0.176776692 : f32
    %449 = vector.broadcast %cst_195 : f32 to vector<2x8x8xf32>
    %450 = arith.mulf %448, %449 : vector<2x8x8xf32>
    %cst_196 = arith.constant dense<0xFF800000> : vector<2x8xf32>
    %451 = vector.multi_reduction <maximumf>, %450, %cst_196 [2] : vector<2x8x8xf32> to vector<2x8xf32>
    %452 = vector.shape_cast %451 : vector<2x8xf32> to vector<2x8x1xf32>
    %453 = vector.broadcast %452 : vector<2x8x1xf32> to vector<2x8x8xf32>
    %454 = arith.subf %450, %453 : vector<2x8x8xf32>
    %455 = math.exp %454 : vector<2x8x8xf32>
    %cst_197 = arith.constant dense<0.000000e+00> : vector<2x8xf32>
    %456 = vector.multi_reduction <add>, %455, %cst_197 [2] : vector<2x8x8xf32> to vector<2x8xf32>
    %457 = vector.shape_cast %456 : vector<2x8xf32> to vector<2x8x1xf32>
    %458 = tpu.reciprocal %457 {approx = true} : vector<2x8x1xf32> -> vector<2x8x1xf32>
    %459 = vector.broadcast %458 : vector<2x8x1xf32> to vector<2x8x8xf32>
    %460 = arith.mulf %455, %459 : vector<2x8x8xf32>
    "tpu.trace_start"() <{level = 10 : i32, message = "bqk,bkd->bqd"}> : () -> ()
    %cst_198 = arith.constant dense<0.000000e+00> : vector<2x8x8xf32>
    %461 = tpu.matmul %460, %447, %cst_198 {dimension_numbers = #tpu.dot_dimension_numbers<[2], [1], [1], [2], [0, 0, 0, 1, 1, 2], [0], [0]>} : vector<2x8x8xf32>, vector<2x8x8xf32>, vector<2x8x8xf32> -> vector<2x8x8xf32>
    "tpu.trace_stop"() : () -> ()
    %462 = vector.shape_cast %461 : vector<2x8x8xf32> to vector<16x8xf32>
    %463 = vector.extract_strided_slice %440 {offsets = [0, 0], sizes = [8, 32], strides = [1, 1]} : vector<32x32xf32> to vector<8x32xf32>
    %cst_199 = arith.constant dense<0.000000e+00> : vector<16x32xf32>
    %464 = tpu.matmul %462, %463, %cst_199 {dimension_numbers = #tpu.dot_dimension_numbers<[1], [0], [0], [1], [0, 0, 1, 1], [], []>} : vector<16x8xf32>, vector<8x32xf32>, vector<16x32xf32> -> vector<16x32xf32>
    %465 = arith.addf %441, %464 : vector<16x32xf32>
    %466 = vector.extract_strided_slice %426 {offsets = [0, 8], sizes = [16, 8], strides = [1, 1]} : vector<16x32xf32> to vector<16x8xf32>
    %467 = vector.shape_cast %466 : vector<16x8xf32> to vector<2x8x8xf32>
    %468 = vector.extract_strided_slice %432 {offsets = [0, 8], sizes = [16, 8], strides = [1, 1]} : vector<16x32xf32> to vector<16x8xf32>
    %469 = vector.shape_cast %468 : vector<16x8xf32> to vector<2x8x8xf32>
    %470 = vector.extract_strided_slice %438 {offsets = [0, 8], sizes = [16, 8], strides = [1, 1]} : vector<16x32xf32> to vector<16x8xf32>
    %471 = vector.shape_cast %470 : vector<16x8xf32> to vector<2x8x8xf32>
    "tpu.trace_start"() <{level = 10 : i32, message = "bqd,bkd->bqk"}> : () -> ()
    %cst_200 = arith.constant dense<0.000000e+00> : vector<2x8x8xf32>
    %472 = tpu.matmul %467, %469, %cst_200 {dimension_numbers = #tpu.dot_dimension_numbers<[2], [2], [1], [1], [0, 0, 0, 1, 1, 1], [0], [0]>} : vector<2x8x8xf32>, vector<2x8x8xf32>, vector<2x8x8xf32> -> vector<2x8x8xf32>
    "tpu.trace_stop"() : () -> ()
    %cst_201 = arith.constant 0.176776692 : f32
    %473 = vector.broadcast %cst_201 : f32 to vector<2x8x8xf32>
    %474 = arith.mulf %472, %473 : vector<2x8x8xf32>
    %cst_202 = arith.constant dense<0xFF800000> : vector<2x8xf32>
    %475 = vector.multi_reduction <maximumf>, %474, %cst_202 [2] : vector<2x8x8xf32> to vector<2x8xf32>
    %476 = vector.shape_cast %475 : vector<2x8xf32> to vector<2x8x1xf32>
    %477 = vector.broadcast %476 : vector<2x8x1xf32> to vector<2x8x8xf32>
    %478 = arith.subf %474, %477 : vector<2x8x8xf32>
    %479 = math.exp %478 : vector<2x8x8xf32>
    %cst_203 = arith.constant dense<0.000000e+00> : vector<2x8xf32>
    %480 = vector.multi_reduction <add>, %479, %cst_203 [2] : vector<2x8x8xf32> to vector<2x8xf32>
    %481 = vector.shape_cast %480 : vector<2x8xf32> to vector<2x8x1xf32>
    %482 = tpu.reciprocal %481 {approx = true} : vector<2x8x1xf32> -> vector<2x8x1xf32>
    %483 = vector.broadcast %482 : vector<2x8x1xf32> to vector<2x8x8xf32>
    %484 = arith.mulf %479, %483 : vector<2x8x8xf32>
    "tpu.trace_start"() <{level = 10 : i32, message = "bqk,bkd->bqd"}> : () -> ()
    %cst_204 = arith.constant dense<0.000000e+00> : vector<2x8x8xf32>
    %485 = tpu.matmul %484, %471, %cst_204 {dimension_numbers = #tpu.dot_dimension_numbers<[2], [1], [1], [2], [0, 0, 0, 1, 1, 2], [0], [0]>} : vector<2x8x8xf32>, vector<2x8x8xf32>, vector<2x8x8xf32> -> vector<2x8x8xf32>
    "tpu.trace_stop"() : () -> ()
    %486 = vector.shape_cast %485 : vector<2x8x8xf32> to vector<16x8xf32>
    %487 = vector.extract_strided_slice %440 {offsets = [8, 0], sizes = [8, 32], strides = [1, 1]} : vector<32x32xf32> to vector<8x32xf32>
    %cst_205 = arith.constant dense<0.000000e+00> : vector<16x32xf32>
    %488 = tpu.matmul %486, %487, %cst_205 {dimension_numbers = #tpu.dot_dimension_numbers<[1], [0], [0], [1], [0, 0, 1, 1], [], []>} : vector<16x8xf32>, vector<8x32xf32>, vector<16x32xf32> -> vector<16x32xf32>
    %489 = arith.addf %465, %488 : vector<16x32xf32>
    %490 = vector.extract_strided_slice %426 {offsets = [0, 16], sizes = [16, 8], strides = [1, 1]} : vector<16x32xf32> to vector<16x8xf32>
    %491 = vector.shape_cast %490 : vector<16x8xf32> to vector<2x8x8xf32>
    %492 = vector.extract_strided_slice %432 {offsets = [0, 16], sizes = [16, 8], strides = [1, 1]} : vector<16x32xf32> to vector<16x8xf32>
    %493 = vector.shape_cast %492 : vector<16x8xf32> to vector<2x8x8xf32>
    %494 = vector.extract_strided_slice %438 {offsets = [0, 16], sizes = [16, 8], strides = [1, 1]} : vector<16x32xf32> to vector<16x8xf32>
    %495 = vector.shape_cast %494 : vector<16x8xf32> to vector<2x8x8xf32>
    "tpu.trace_start"() <{level = 10 : i32, message = "bqd,bkd->bqk"}> : () -> ()
    %cst_206 = arith.constant dense<0.000000e+00> : vector<2x8x8xf32>
    %496 = tpu.matmul %491, %493, %cst_206 {dimension_numbers = #tpu.dot_dimension_numbers<[2], [2], [1], [1], [0, 0, 0, 1, 1, 1], [0], [0]>} : vector<2x8x8xf32>, vector<2x8x8xf32>, vector<2x8x8xf32> -> vector<2x8x8xf32>
    "tpu.trace_stop"() : () -> ()
    %cst_207 = arith.constant 0.176776692 : f32
    %497 = vector.broadcast %cst_207 : f32 to vector<2x8x8xf32>
    %498 = arith.mulf %496, %497 : vector<2x8x8xf32>
    %cst_208 = arith.constant dense<0xFF800000> : vector<2x8xf32>
    %499 = vector.multi_reduction <maximumf>, %498, %cst_208 [2] : vector<2x8x8xf32> to vector<2x8xf32>
    %500 = vector.shape_cast %499 : vector<2x8xf32> to vector<2x8x1xf32>
    %501 = vector.broadcast %500 : vector<2x8x1xf32> to vector<2x8x8xf32>
    %502 = arith.subf %498, %501 : vector<2x8x8xf32>
    %503 = math.exp %502 : vector<2x8x8xf32>
    %cst_209 = arith.constant dense<0.000000e+00> : vector<2x8xf32>
    %504 = vector.multi_reduction <add>, %503, %cst_209 [2] : vector<2x8x8xf32> to vector<2x8xf32>
    %505 = vector.shape_cast %504 : vector<2x8xf32> to vector<2x8x1xf32>
    %506 = tpu.reciprocal %505 {approx = true} : vector<2x8x1xf32> -> vector<2x8x1xf32>
    %507 = vector.broadcast %506 : vector<2x8x1xf32> to vector<2x8x8xf32>
    %508 = arith.mulf %503, %507 : vector<2x8x8xf32>
    "tpu.trace_start"() <{level = 10 : i32, message = "bqk,bkd->bqd"}> : () -> ()
    %cst_210 = arith.constant dense<0.000000e+00> : vector<2x8x8xf32>
    %509 = tpu.matmul %508, %495, %cst_210 {dimension_numbers = #tpu.dot_dimension_numbers<[2], [1], [1], [2], [0, 0, 0, 1, 1, 2], [0], [0]>} : vector<2x8x8xf32>, vector<2x8x8xf32>, vector<2x8x8xf32> -> vector<2x8x8xf32>
    "tpu.trace_stop"() : () -> ()
    %510 = vector.shape_cast %509 : vector<2x8x8xf32> to vector<16x8xf32>
    %511 = vector.extract_strided_slice %440 {offsets = [16, 0], sizes = [8, 32], strides = [1, 1]} : vector<32x32xf32> to vector<8x32xf32>
    %cst_211 = arith.constant dense<0.000000e+00> : vector<16x32xf32>
    %512 = tpu.matmul %510, %511, %cst_211 {dimension_numbers = #tpu.dot_dimension_numbers<[1], [0], [0], [1], [0, 0, 1, 1], [], []>} : vector<16x8xf32>, vector<8x32xf32>, vector<16x32xf32> -> vector<16x32xf32>
    %513 = arith.addf %489, %512 : vector<16x32xf32>
    %514 = vector.extract_strided_slice %426 {offsets = [0, 24], sizes = [16, 8], strides = [1, 1]} : vector<16x32xf32> to vector<16x8xf32>
    %515 = vector.shape_cast %514 : vector<16x8xf32> to vector<2x8x8xf32>
    %516 = vector.extract_strided_slice %432 {offsets = [0, 24], sizes = [16, 8], strides = [1, 1]} : vector<16x32xf32> to vector<16x8xf32>
    %517 = vector.shape_cast %516 : vector<16x8xf32> to vector<2x8x8xf32>
    %518 = vector.extract_strided_slice %438 {offsets = [0, 24], sizes = [16, 8], strides = [1, 1]} : vector<16x32xf32> to vector<16x8xf32>
    %519 = vector.shape_cast %518 : vector<16x8xf32> to vector<2x8x8xf32>
    "tpu.trace_start"() <{level = 10 : i32, message = "bqd,bkd->bqk"}> : () -> ()
    %cst_212 = arith.constant dense<0.000000e+00> : vector<2x8x8xf32>
    %520 = tpu.matmul %515, %517, %cst_212 {dimension_numbers = #tpu.dot_dimension_numbers<[2], [2], [1], [1], [0, 0, 0, 1, 1, 1], [0], [0]>} : vector<2x8x8xf32>, vector<2x8x8xf32>, vector<2x8x8xf32> -> vector<2x8x8xf32>
    "tpu.trace_stop"() : () -> ()
    %cst_213 = arith.constant 0.176776692 : f32
    %521 = vector.broadcast %cst_213 : f32 to vector<2x8x8xf32>
    %522 = arith.mulf %520, %521 : vector<2x8x8xf32>
    %cst_214 = arith.constant dense<0xFF800000> : vector<2x8xf32>
    %523 = vector.multi_reduction <maximumf>, %522, %cst_214 [2] : vector<2x8x8xf32> to vector<2x8xf32>
    %524 = vector.shape_cast %523 : vector<2x8xf32> to vector<2x8x1xf32>
    %525 = vector.broadcast %524 : vector<2x8x1xf32> to vector<2x8x8xf32>
    %526 = arith.subf %522, %525 : vector<2x8x8xf32>
    %527 = math.exp %526 : vector<2x8x8xf32>
    %cst_215 = arith.constant dense<0.000000e+00> : vector<2x8xf32>
    %528 = vector.multi_reduction <add>, %527, %cst_215 [2] : vector<2x8x8xf32> to vector<2x8xf32>
    %529 = vector.shape_cast %528 : vector<2x8xf32> to vector<2x8x1xf32>
    %530 = tpu.reciprocal %529 {approx = true} : vector<2x8x1xf32> -> vector<2x8x1xf32>
    %531 = vector.broadcast %530 : vector<2x8x1xf32> to vector<2x8x8xf32>
    %532 = arith.mulf %527, %531 : vector<2x8x8xf32>
    "tpu.trace_start"() <{level = 10 : i32, message = "bqk,bkd->bqd"}> : () -> ()
    %cst_216 = arith.constant dense<0.000000e+00> : vector<2x8x8xf32>
    %533 = tpu.matmul %532, %519, %cst_216 {dimension_numbers = #tpu.dot_dimension_numbers<[2], [1], [1], [2], [0, 0, 0, 1, 1, 2], [0], [0]>} : vector<2x8x8xf32>, vector<2x8x8xf32>, vector<2x8x8xf32> -> vector<2x8x8xf32>
    "tpu.trace_stop"() : () -> ()
    %534 = vector.shape_cast %533 : vector<2x8x8xf32> to vector<16x8xf32>
    %535 = vector.extract_strided_slice %440 {offsets = [24, 0], sizes = [8, 32], strides = [1, 1]} : vector<32x32xf32> to vector<8x32xf32>
    %cst_217 = arith.constant dense<0.000000e+00> : vector<16x32xf32>
    %536 = tpu.matmul %534, %535, %cst_217 {dimension_numbers = #tpu.dot_dimension_numbers<[1], [0], [0], [1], [0, 0, 1, 1], [], []>} : vector<16x8xf32>, vector<8x32xf32>, vector<16x32xf32> -> vector<16x32xf32>
    %537 = arith.addf %513, %536 : vector<16x32xf32>
    %538 = arith.addf %419, %537 : vector<16x32xf32>
    %c15_218 = arith.constant 15 : index
    %c0_219 = arith.constant 0 : index
    %539 = vector.load %arg3[%c15_218, %c0_219] : memref<40x32xf32, #tpu.memory_space<vmem>>, vector<1x32xf32>
    %540 = vector.broadcast %539 : vector<1x32xf32> to vector<16x32xf32>
    %541 = arith.addf %538, %540 : vector<16x32xf32>
    %c3_220 = arith.constant 3 : index
    %c0_221 = arith.constant 0 : index
    %c0_222 = arith.constant 0 : index
    %542 = vector.load %arg4[%c3_220, %c0_221, %c0_222] : memref<10x32x32xf32, #tpu.memory_space<vmem>>, vector<1x32x32xf32>
    %543 = vector.shape_cast %542 : vector<1x32x32xf32> to vector<32x32xf32>
    %cst_223 = arith.constant dense<0.000000e+00> : vector<16x32xf32>
    %544 = tpu.matmul %541, %543, %cst_223 {dimension_numbers = #tpu.dot_dimension_numbers<[1], [0], [0], [1], [0, 0, 1, 1], [], []>} : vector<16x32xf32>, vector<32x32xf32>, vector<16x32xf32> -> vector<16x32xf32>
    %c3_224 = arith.constant 3 : index
    %c0_225 = arith.constant 0 : index
    %545 = vector.load %arg5[%c3_224, %c0_225] : memref<10x32xf32, #tpu.memory_space<vmem>>, vector<1x32xf32>
    %546 = vector.broadcast %545 : vector<1x32xf32> to vector<16x32xf32>
    %547 = arith.addf %544, %546 : vector<16x32xf32>
    %cst_226 = arith.constant 0.000000e+00 : f32
    %548 = vector.broadcast %cst_226 : f32 to vector<16x32xf32>
    %549 = arith.maximumf %547, %548 : vector<16x32xf32>
    %c3_227 = arith.constant 3 : index
    %c0_228 = arith.constant 0 : index
    %c0_229 = arith.constant 0 : index
    %550 = vector.load %arg6[%c3_227, %c0_228, %c0_229] : memref<10x32x32xf32, #tpu.memory_space<vmem>>, vector<1x32x32xf32>
    %551 = vector.shape_cast %550 : vector<1x32x32xf32> to vector<32x32xf32>
    %cst_230 = arith.constant dense<0.000000e+00> : vector<16x32xf32>
    %552 = tpu.matmul %549, %551, %cst_230 {dimension_numbers = #tpu.dot_dimension_numbers<[1], [0], [0], [1], [0, 0, 1, 1], [], []>} : vector<16x32xf32>, vector<32x32xf32>, vector<16x32xf32> -> vector<16x32xf32>
    %553 = arith.addf %541, %552 : vector<16x32xf32>
    %c3_231 = arith.constant 3 : index
    %c0_232 = arith.constant 0 : index
    %554 = vector.load %arg7[%c3_231, %c0_232] : memref<10x32xf32, #tpu.memory_space<vmem>>, vector<1x32xf32>
    %555 = vector.broadcast %554 : vector<1x32xf32> to vector<16x32xf32>
    %556 = arith.addf %553, %555 : vector<16x32xf32>
    %557 = vector.shape_cast %556 : vector<16x32xf32> to vector<2x8x32xf32>
    %c0_233 = arith.constant 0 : index
    %c0_234 = arith.constant 0 : index
    %c0_235 = arith.constant 0 : index
    %558 = vector.load %arg8[%c0_233, %c0_234, %c0_235] : memref<4x64x32xf32, #tpu.memory_space<vmem>>, vector<1x64x32xf32>
    %559 = vector.shape_cast %558 : vector<1x64x32xf32> to vector<64x32xf32>
    %c1_236 = arith.constant 1 : index
    %c0_237 = arith.constant 0 : index
    %c0_238 = arith.constant 0 : index
    %560 = vector.load %arg8[%c1_236, %c0_237, %c0_238] : memref<4x64x32xf32, #tpu.memory_space<vmem>>, vector<1x64x32xf32>
    %561 = vector.shape_cast %560 : vector<1x64x32xf32> to vector<64x32xf32>
    %c0_239 = arith.constant 0 : index
    %c0_240 = arith.constant 0 : index
    %562 = vector.load %arg9[%c0_239, %c0_240] : memref<4x32xf32, #tpu.memory_space<vmem>>, vector<1x32xf32>
    %c1_241 = arith.constant 1 : index
    %c0_242 = arith.constant 0 : index
    %563 = vector.load %arg9[%c1_241, %c0_242] : memref<4x32xf32, #tpu.memory_space<vmem>>, vector<1x32xf32>
    %564 = vector.shape_cast %0 : vector<2x8x32xf32> to vector<16x32xf32>
    %565 = vector.shape_cast %140 : vector<2x8x32xf32> to vector<16x32xf32>
    %566 = vector.extract_strided_slice %559 {offsets = [0, 0], sizes = [32, 32], strides = [1, 1]} : vector<64x32xf32> to vector<32x32xf32>
    %cst_243 = arith.constant dense<0.000000e+00> : vector<16x32xf32>
    %567 = tpu.matmul %565, %566, %cst_243 {dimension_numbers = #tpu.dot_dimension_numbers<[1], [0], [0], [1], [0, 0, 1, 1], [], []>} : vector<16x32xf32>, vector<32x32xf32>, vector<16x32xf32> -> vector<16x32xf32>
    %568 = vector.shape_cast %279 : vector<2x8x32xf32> to vector<16x32xf32>
    %569 = vector.extract_strided_slice %559 {offsets = [32, 0], sizes = [32, 32], strides = [1, 1]} : vector<64x32xf32> to vector<32x32xf32>
    %cst_244 = arith.constant dense<0.000000e+00> : vector<16x32xf32>
    %570 = tpu.matmul %568, %569, %cst_244 {dimension_numbers = #tpu.dot_dimension_numbers<[1], [0], [0], [1], [0, 0, 1, 1], [], []>} : vector<16x32xf32>, vector<32x32xf32>, vector<16x32xf32> -> vector<16x32xf32>
    %571 = arith.addf %567, %570 : vector<16x32xf32>
    %572 = vector.broadcast %562 : vector<1x32xf32> to vector<16x32xf32>
    %573 = arith.addf %571, %572 : vector<16x32xf32>
    %574 = arith.addf %564, %573 : vector<16x32xf32>
    %575 = vector.shape_cast %1 : vector<2x8x32xf32> to vector<16x32xf32>
    %576 = vector.shape_cast %557 : vector<2x8x32xf32> to vector<16x32xf32>
    %577 = vector.extract_strided_slice %561 {offsets = [0, 0], sizes = [32, 32], strides = [1, 1]} : vector<64x32xf32> to vector<32x32xf32>
    %cst_245 = arith.constant dense<0.000000e+00> : vector<16x32xf32>
    %578 = tpu.matmul %576, %577, %cst_245 {dimension_numbers = #tpu.dot_dimension_numbers<[1], [0], [0], [1], [0, 0, 1, 1], [], []>} : vector<16x32xf32>, vector<32x32xf32>, vector<16x32xf32> -> vector<16x32xf32>
    %579 = vector.shape_cast %418 : vector<2x8x32xf32> to vector<16x32xf32>
    %580 = vector.extract_strided_slice %561 {offsets = [32, 0], sizes = [32, 32], strides = [1, 1]} : vector<64x32xf32> to vector<32x32xf32>
    %cst_246 = arith.constant dense<0.000000e+00> : vector<16x32xf32>
    %581 = tpu.matmul %579, %580, %cst_246 {dimension_numbers = #tpu.dot_dimension_numbers<[1], [0], [0], [1], [0, 0, 1, 1], [], []>} : vector<16x32xf32>, vector<32x32xf32>, vector<16x32xf32> -> vector<16x32xf32>
    %582 = arith.addf %578, %581 : vector<16x32xf32>
    %583 = vector.broadcast %563 : vector<1x32xf32> to vector<16x32xf32>
    %584 = arith.addf %582, %583 : vector<16x32xf32>
    %585 = arith.addf %575, %584 : vector<16x32xf32>
    %586 = vector.shape_cast %574 : vector<16x32xf32> to vector<2x8x32xf32>
    %587 = vector.shape_cast %585 : vector<16x32xf32> to vector<2x8x32xf32>
    %588 = vector.shape_cast %586 : vector<2x8x32xf32> to vector<16x32xf32>
    %589 = vector.shape_cast %586 : vector<2x8x32xf32> to vector<16x32xf32>
    %c16 = arith.constant 16 : index
    %c0_247 = arith.constant 0 : index
    %c0_248 = arith.constant 0 : index
    %590 = vector.load %arg2[%c16, %c0_247, %c0_248] : memref<40x32x32xf32, #tpu.memory_space<vmem>>, vector<1x32x32xf32>
    %591 = vector.shape_cast %590 : vector<1x32x32xf32> to vector<32x32xf32>
    %cst_249 = arith.constant dense<0.000000e+00> : vector<16x32xf32>
    %592 = tpu.matmul %588, %591, %cst_249 {dimension_numbers = #tpu.dot_dimension_numbers<[1], [0], [0], [1], [0, 0, 1, 1], [], []>} : vector<16x32xf32>, vector<32x32xf32>, vector<16x32xf32> -> vector<16x32xf32>
    %c16_250 = arith.constant 16 : index
    %c0_251 = arith.constant 0 : index
    %593 = vector.load %arg3[%c16_250, %c0_251] : memref<40x32xf32, #tpu.memory_space<vmem>>, vector<1x32xf32>
    %594 = vector.broadcast %593 : vector<1x32xf32> to vector<16x32xf32>
    %595 = arith.addf %592, %594 : vector<16x32xf32>
    %c17 = arith.constant 17 : index
    %c0_252 = arith.constant 0 : index
    %c0_253 = arith.constant 0 : index
    %596 = vector.load %arg2[%c17, %c0_252, %c0_253] : memref<40x32x32xf32, #tpu.memory_space<vmem>>, vector<1x32x32xf32>
    %597 = vector.shape_cast %596 : vector<1x32x32xf32> to vector<32x32xf32>
    %cst_254 = arith.constant dense<0.000000e+00> : vector<16x32xf32>
    %598 = tpu.matmul %589, %597, %cst_254 {dimension_numbers = #tpu.dot_dimension_numbers<[1], [0], [0], [1], [0, 0, 1, 1], [], []>} : vector<16x32xf32>, vector<32x32xf32>, vector<16x32xf32> -> vector<16x32xf32>
    %c17_255 = arith.constant 17 : index
    %c0_256 = arith.constant 0 : index
    %599 = vector.load %arg3[%c17_255, %c0_256] : memref<40x32xf32, #tpu.memory_space<vmem>>, vector<1x32xf32>
    %600 = vector.broadcast %599 : vector<1x32xf32> to vector<16x32xf32>
    %601 = arith.addf %598, %600 : vector<16x32xf32>
    %c18 = arith.constant 18 : index
    %c0_257 = arith.constant 0 : index
    %c0_258 = arith.constant 0 : index
    %602 = vector.load %arg2[%c18, %c0_257, %c0_258] : memref<40x32x32xf32, #tpu.memory_space<vmem>>, vector<1x32x32xf32>
    %603 = vector.shape_cast %602 : vector<1x32x32xf32> to vector<32x32xf32>
    %cst_259 = arith.constant dense<0.000000e+00> : vector<16x32xf32>
    %604 = tpu.matmul %589, %603, %cst_259 {dimension_numbers = #tpu.dot_dimension_numbers<[1], [0], [0], [1], [0, 0, 1, 1], [], []>} : vector<16x32xf32>, vector<32x32xf32>, vector<16x32xf32> -> vector<16x32xf32>
    %c18_260 = arith.constant 18 : index
    %c0_261 = arith.constant 0 : index
    %605 = vector.load %arg3[%c18_260, %c0_261] : memref<40x32xf32, #tpu.memory_space<vmem>>, vector<1x32xf32>
    %606 = vector.broadcast %605 : vector<1x32xf32> to vector<16x32xf32>
    %607 = arith.addf %604, %606 : vector<16x32xf32>
    %c19 = arith.constant 19 : index
    %c0_262 = arith.constant 0 : index
    %c0_263 = arith.constant 0 : index
    %608 = vector.load %arg2[%c19, %c0_262, %c0_263] : memref<40x32x32xf32, #tpu.memory_space<vmem>>, vector<1x32x32xf32>
    %609 = vector.shape_cast %608 : vector<1x32x32xf32> to vector<32x32xf32>
    %cst_264 = arith.constant 0.000000e+00 : f32
    %610 = vector.broadcast %cst_264 : f32 to vector<16x32xf32>
    %611 = vector.extract_strided_slice %595 {offsets = [0, 0], sizes = [16, 8], strides = [1, 1]} : vector<16x32xf32> to vector<16x8xf32>
    %612 = vector.shape_cast %611 : vector<16x8xf32> to vector<2x8x8xf32>
    %613 = vector.extract_strided_slice %601 {offsets = [0, 0], sizes = [16, 8], strides = [1, 1]} : vector<16x32xf32> to vector<16x8xf32>
    %614 = vector.shape_cast %613 : vector<16x8xf32> to vector<2x8x8xf32>
    %615 = vector.extract_strided_slice %607 {offsets = [0, 0], sizes = [16, 8], strides = [1, 1]} : vector<16x32xf32> to vector<16x8xf32>
    %616 = vector.shape_cast %615 : vector<16x8xf32> to vector<2x8x8xf32>
    "tpu.trace_start"() <{level = 10 : i32, message = "bqd,bkd->bqk"}> : () -> ()
    %cst_265 = arith.constant dense<0.000000e+00> : vector<2x8x8xf32>
    %617 = tpu.matmul %612, %614, %cst_265 {dimension_numbers = #tpu.dot_dimension_numbers<[2], [2], [1], [1], [0, 0, 0, 1, 1, 1], [0], [0]>} : vector<2x8x8xf32>, vector<2x8x8xf32>, vector<2x8x8xf32> -> vector<2x8x8xf32>
    "tpu.trace_stop"() : () -> ()
    %cst_266 = arith.constant 0.176776692 : f32
    %618 = vector.broadcast %cst_266 : f32 to vector<2x8x8xf32>
    %619 = arith.mulf %617, %618 : vector<2x8x8xf32>
    %cst_267 = arith.constant dense<0xFF800000> : vector<2x8xf32>
    %620 = vector.multi_reduction <maximumf>, %619, %cst_267 [2] : vector<2x8x8xf32> to vector<2x8xf32>
    %621 = vector.shape_cast %620 : vector<2x8xf32> to vector<2x8x1xf32>
    %622 = vector.broadcast %621 : vector<2x8x1xf32> to vector<2x8x8xf32>
    %623 = arith.subf %619, %622 : vector<2x8x8xf32>
    %624 = math.exp %623 : vector<2x8x8xf32>
    %cst_268 = arith.constant dense<0.000000e+00> : vector<2x8xf32>
    %625 = vector.multi_reduction <add>, %624, %cst_268 [2] : vector<2x8x8xf32> to vector<2x8xf32>
    %626 = vector.shape_cast %625 : vector<2x8xf32> to vector<2x8x1xf32>
    %627 = tpu.reciprocal %626 {approx = true} : vector<2x8x1xf32> -> vector<2x8x1xf32>
    %628 = vector.broadcast %627 : vector<2x8x1xf32> to vector<2x8x8xf32>
    %629 = arith.mulf %624, %628 : vector<2x8x8xf32>
    "tpu.trace_start"() <{level = 10 : i32, message = "bqk,bkd->bqd"}> : () -> ()
    %cst_269 = arith.constant dense<0.000000e+00> : vector<2x8x8xf32>
    %630 = tpu.matmul %629, %616, %cst_269 {dimension_numbers = #tpu.dot_dimension_numbers<[2], [1], [1], [2], [0, 0, 0, 1, 1, 2], [0], [0]>} : vector<2x8x8xf32>, vector<2x8x8xf32>, vector<2x8x8xf32> -> vector<2x8x8xf32>
    "tpu.trace_stop"() : () -> ()
    %631 = vector.shape_cast %630 : vector<2x8x8xf32> to vector<16x8xf32>
    %632 = vector.extract_strided_slice %609 {offsets = [0, 0], sizes = [8, 32], strides = [1, 1]} : vector<32x32xf32> to vector<8x32xf32>
    %cst_270 = arith.constant dense<0.000000e+00> : vector<16x32xf32>
    %633 = tpu.matmul %631, %632, %cst_270 {dimension_numbers = #tpu.dot_dimension_numbers<[1], [0], [0], [1], [0, 0, 1, 1], [], []>} : vector<16x8xf32>, vector<8x32xf32>, vector<16x32xf32> -> vector<16x32xf32>
    %634 = arith.addf %610, %633 : vector<16x32xf32>
    %635 = vector.extract_strided_slice %595 {offsets = [0, 8], sizes = [16, 8], strides = [1, 1]} : vector<16x32xf32> to vector<16x8xf32>
    %636 = vector.shape_cast %635 : vector<16x8xf32> to vector<2x8x8xf32>
    %637 = vector.extract_strided_slice %601 {offsets = [0, 8], sizes = [16, 8], strides = [1, 1]} : vector<16x32xf32> to vector<16x8xf32>
    %638 = vector.shape_cast %637 : vector<16x8xf32> to vector<2x8x8xf32>
    %639 = vector.extract_strided_slice %607 {offsets = [0, 8], sizes = [16, 8], strides = [1, 1]} : vector<16x32xf32> to vector<16x8xf32>
    %640 = vector.shape_cast %639 : vector<16x8xf32> to vector<2x8x8xf32>
    "tpu.trace_start"() <{level = 10 : i32, message = "bqd,bkd->bqk"}> : () -> ()
    %cst_271 = arith.constant dense<0.000000e+00> : vector<2x8x8xf32>
    %641 = tpu.matmul %636, %638, %cst_271 {dimension_numbers = #tpu.dot_dimension_numbers<[2], [2], [1], [1], [0, 0, 0, 1, 1, 1], [0], [0]>} : vector<2x8x8xf32>, vector<2x8x8xf32>, vector<2x8x8xf32> -> vector<2x8x8xf32>
    "tpu.trace_stop"() : () -> ()
    %cst_272 = arith.constant 0.176776692 : f32
    %642 = vector.broadcast %cst_272 : f32 to vector<2x8x8xf32>
    %643 = arith.mulf %641, %642 : vector<2x8x8xf32>
    %cst_273 = arith.constant dense<0xFF800000> : vector<2x8xf32>
    %644 = vector.multi_reduction <maximumf>, %643, %cst_273 [2] : vector<2x8x8xf32> to vector<2x8xf32>
    %645 = vector.shape_cast %644 : vector<2x8xf32> to vector<2x8x1xf32>
    %646 = vector.broadcast %645 : vector<2x8x1xf32> to vector<2x8x8xf32>
    %647 = arith.subf %643, %646 : vector<2x8x8xf32>
    %648 = math.exp %647 : vector<2x8x8xf32>
    %cst_274 = arith.constant dense<0.000000e+00> : vector<2x8xf32>
    %649 = vector.multi_reduction <add>, %648, %cst_274 [2] : vector<2x8x8xf32> to vector<2x8xf32>
    %650 = vector.shape_cast %649 : vector<2x8xf32> to vector<2x8x1xf32>
    %651 = tpu.reciprocal %650 {approx = true} : vector<2x8x1xf32> -> vector<2x8x1xf32>
    %652 = vector.broadcast %651 : vector<2x8x1xf32> to vector<2x8x8xf32>
    %653 = arith.mulf %648, %652 : vector<2x8x8xf32>
    "tpu.trace_start"() <{level = 10 : i32, message = "bqk,bkd->bqd"}> : () -> ()
    %cst_275 = arith.constant dense<0.000000e+00> : vector<2x8x8xf32>
    %654 = tpu.matmul %653, %640, %cst_275 {dimension_numbers = #tpu.dot_dimension_numbers<[2], [1], [1], [2], [0, 0, 0, 1, 1, 2], [0], [0]>} : vector<2x8x8xf32>, vector<2x8x8xf32>, vector<2x8x8xf32> -> vector<2x8x8xf32>
    "tpu.trace_stop"() : () -> ()
    %655 = vector.shape_cast %654 : vector<2x8x8xf32> to vector<16x8xf32>
    %656 = vector.extract_strided_slice %609 {offsets = [8, 0], sizes = [8, 32], strides = [1, 1]} : vector<32x32xf32> to vector<8x32xf32>
    %cst_276 = arith.constant dense<0.000000e+00> : vector<16x32xf32>
    %657 = tpu.matmul %655, %656, %cst_276 {dimension_numbers = #tpu.dot_dimension_numbers<[1], [0], [0], [1], [0, 0, 1, 1], [], []>} : vector<16x8xf32>, vector<8x32xf32>, vector<16x32xf32> -> vector<16x32xf32>
    %658 = arith.addf %634, %657 : vector<16x32xf32>
    %659 = vector.extract_strided_slice %595 {offsets = [0, 16], sizes = [16, 8], strides = [1, 1]} : vector<16x32xf32> to vector<16x8xf32>
    %660 = vector.shape_cast %659 : vector<16x8xf32> to vector<2x8x8xf32>
    %661 = vector.extract_strided_slice %601 {offsets = [0, 16], sizes = [16, 8], strides = [1, 1]} : vector<16x32xf32> to vector<16x8xf32>
    %662 = vector.shape_cast %661 : vector<16x8xf32> to vector<2x8x8xf32>
    %663 = vector.extract_strided_slice %607 {offsets = [0, 16], sizes = [16, 8], strides = [1, 1]} : vector<16x32xf32> to vector<16x8xf32>
    %664 = vector.shape_cast %663 : vector<16x8xf32> to vector<2x8x8xf32>
    "tpu.trace_start"() <{level = 10 : i32, message = "bqd,bkd->bqk"}> : () -> ()
    %cst_277 = arith.constant dense<0.000000e+00> : vector<2x8x8xf32>
    %665 = tpu.matmul %660, %662, %cst_277 {dimension_numbers = #tpu.dot_dimension_numbers<[2], [2], [1], [1], [0, 0, 0, 1, 1, 1], [0], [0]>} : vector<2x8x8xf32>, vector<2x8x8xf32>, vector<2x8x8xf32> -> vector<2x8x8xf32>
    "tpu.trace_stop"() : () -> ()
    %cst_278 = arith.constant 0.176776692 : f32
    %666 = vector.broadcast %cst_278 : f32 to vector<2x8x8xf32>
    %667 = arith.mulf %665, %666 : vector<2x8x8xf32>
    %cst_279 = arith.constant dense<0xFF800000> : vector<2x8xf32>
    %668 = vector.multi_reduction <maximumf>, %667, %cst_279 [2] : vector<2x8x8xf32> to vector<2x8xf32>
    %669 = vector.shape_cast %668 : vector<2x8xf32> to vector<2x8x1xf32>
    %670 = vector.broadcast %669 : vector<2x8x1xf32> to vector<2x8x8xf32>
    %671 = arith.subf %667, %670 : vector<2x8x8xf32>
    %672 = math.exp %671 : vector<2x8x8xf32>
    %cst_280 = arith.constant dense<0.000000e+00> : vector<2x8xf32>
    %673 = vector.multi_reduction <add>, %672, %cst_280 [2] : vector<2x8x8xf32> to vector<2x8xf32>
    %674 = vector.shape_cast %673 : vector<2x8xf32> to vector<2x8x1xf32>
    %675 = tpu.reciprocal %674 {approx = true} : vector<2x8x1xf32> -> vector<2x8x1xf32>
    %676 = vector.broadcast %675 : vector<2x8x1xf32> to vector<2x8x8xf32>
    %677 = arith.mulf %672, %676 : vector<2x8x8xf32>
    "tpu.trace_start"() <{level = 10 : i32, message = "bqk,bkd->bqd"}> : () -> ()
    %cst_281 = arith.constant dense<0.000000e+00> : vector<2x8x8xf32>
    %678 = tpu.matmul %677, %664, %cst_281 {dimension_numbers = #tpu.dot_dimension_numbers<[2], [1], [1], [2], [0, 0, 0, 1, 1, 2], [0], [0]>} : vector<2x8x8xf32>, vector<2x8x8xf32>, vector<2x8x8xf32> -> vector<2x8x8xf32>
    "tpu.trace_stop"() : () -> ()
    %679 = vector.shape_cast %678 : vector<2x8x8xf32> to vector<16x8xf32>
    %680 = vector.extract_strided_slice %609 {offsets = [16, 0], sizes = [8, 32], strides = [1, 1]} : vector<32x32xf32> to vector<8x32xf32>
    %cst_282 = arith.constant dense<0.000000e+00> : vector<16x32xf32>
    %681 = tpu.matmul %679, %680, %cst_282 {dimension_numbers = #tpu.dot_dimension_numbers<[1], [0], [0], [1], [0, 0, 1, 1], [], []>} : vector<16x8xf32>, vector<8x32xf32>, vector<16x32xf32> -> vector<16x32xf32>
    %682 = arith.addf %658, %681 : vector<16x32xf32>
    %683 = vector.extract_strided_slice %595 {offsets = [0, 24], sizes = [16, 8], strides = [1, 1]} : vector<16x32xf32> to vector<16x8xf32>
    %684 = vector.shape_cast %683 : vector<16x8xf32> to vector<2x8x8xf32>
    %685 = vector.extract_strided_slice %601 {offsets = [0, 24], sizes = [16, 8], strides = [1, 1]} : vector<16x32xf32> to vector<16x8xf32>
    %686 = vector.shape_cast %685 : vector<16x8xf32> to vector<2x8x8xf32>
    %687 = vector.extract_strided_slice %607 {offsets = [0, 24], sizes = [16, 8], strides = [1, 1]} : vector<16x32xf32> to vector<16x8xf32>
    %688 = vector.shape_cast %687 : vector<16x8xf32> to vector<2x8x8xf32>
    "tpu.trace_start"() <{level = 10 : i32, message = "bqd,bkd->bqk"}> : () -> ()
    %cst_283 = arith.constant dense<0.000000e+00> : vector<2x8x8xf32>
    %689 = tpu.matmul %684, %686, %cst_283 {dimension_numbers = #tpu.dot_dimension_numbers<[2], [2], [1], [1], [0, 0, 0, 1, 1, 1], [0], [0]>} : vector<2x8x8xf32>, vector<2x8x8xf32>, vector<2x8x8xf32> -> vector<2x8x8xf32>
    "tpu.trace_stop"() : () -> ()
    %cst_284 = arith.constant 0.176776692 : f32
    %690 = vector.broadcast %cst_284 : f32 to vector<2x8x8xf32>
    %691 = arith.mulf %689, %690 : vector<2x8x8xf32>
    %cst_285 = arith.constant dense<0xFF800000> : vector<2x8xf32>
    %692 = vector.multi_reduction <maximumf>, %691, %cst_285 [2] : vector<2x8x8xf32> to vector<2x8xf32>
    %693 = vector.shape_cast %692 : vector<2x8xf32> to vector<2x8x1xf32>
    %694 = vector.broadcast %693 : vector<2x8x1xf32> to vector<2x8x8xf32>
    %695 = arith.subf %691, %694 : vector<2x8x8xf32>
    %696 = math.exp %695 : vector<2x8x8xf32>
    %cst_286 = arith.constant dense<0.000000e+00> : vector<2x8xf32>
    %697 = vector.multi_reduction <add>, %696, %cst_286 [2] : vector<2x8x8xf32> to vector<2x8xf32>
    %698 = vector.shape_cast %697 : vector<2x8xf32> to vector<2x8x1xf32>
    %699 = tpu.reciprocal %698 {approx = true} : vector<2x8x1xf32> -> vector<2x8x1xf32>
    %700 = vector.broadcast %699 : vector<2x8x1xf32> to vector<2x8x8xf32>
    %701 = arith.mulf %696, %700 : vector<2x8x8xf32>
    "tpu.trace_start"() <{level = 10 : i32, message = "bqk,bkd->bqd"}> : () -> ()
    %cst_287 = arith.constant dense<0.000000e+00> : vector<2x8x8xf32>
    %702 = tpu.matmul %701, %688, %cst_287 {dimension_numbers = #tpu.dot_dimension_numbers<[2], [1], [1], [2], [0, 0, 0, 1, 1, 2], [0], [0]>} : vector<2x8x8xf32>, vector<2x8x8xf32>, vector<2x8x8xf32> -> vector<2x8x8xf32>
    "tpu.trace_stop"() : () -> ()
    %703 = vector.shape_cast %702 : vector<2x8x8xf32> to vector<16x8xf32>
    %704 = vector.extract_strided_slice %609 {offsets = [24, 0], sizes = [8, 32], strides = [1, 1]} : vector<32x32xf32> to vector<8x32xf32>
    %cst_288 = arith.constant dense<0.000000e+00> : vector<16x32xf32>
    %705 = tpu.matmul %703, %704, %cst_288 {dimension_numbers = #tpu.dot_dimension_numbers<[1], [0], [0], [1], [0, 0, 1, 1], [], []>} : vector<16x8xf32>, vector<8x32xf32>, vector<16x32xf32> -> vector<16x32xf32>
    %706 = arith.addf %682, %705 : vector<16x32xf32>
    %707 = arith.addf %588, %706 : vector<16x32xf32>
    %c19_289 = arith.constant 19 : index
    %c0_290 = arith.constant 0 : index
    %708 = vector.load %arg3[%c19_289, %c0_290] : memref<40x32xf32, #tpu.memory_space<vmem>>, vector<1x32xf32>
    %709 = vector.broadcast %708 : vector<1x32xf32> to vector<16x32xf32>
    %710 = arith.addf %707, %709 : vector<16x32xf32>
    %c4_291 = arith.constant 4 : index
    %c0_292 = arith.constant 0 : index
    %c0_293 = arith.constant 0 : index
    %711 = vector.load %arg4[%c4_291, %c0_292, %c0_293] : memref<10x32x32xf32, #tpu.memory_space<vmem>>, vector<1x32x32xf32>
    %712 = vector.shape_cast %711 : vector<1x32x32xf32> to vector<32x32xf32>
    %cst_294 = arith.constant dense<0.000000e+00> : vector<16x32xf32>
    %713 = tpu.matmul %710, %712, %cst_294 {dimension_numbers = #tpu.dot_dimension_numbers<[1], [0], [0], [1], [0, 0, 1, 1], [], []>} : vector<16x32xf32>, vector<32x32xf32>, vector<16x32xf32> -> vector<16x32xf32>
    %c4_295 = arith.constant 4 : index
    %c0_296 = arith.constant 0 : index
    %714 = vector.load %arg5[%c4_295, %c0_296] : memref<10x32xf32, #tpu.memory_space<vmem>>, vector<1x32xf32>
    %715 = vector.broadcast %714 : vector<1x32xf32> to vector<16x32xf32>
    %716 = arith.addf %713, %715 : vector<16x32xf32>
    %cst_297 = arith.constant 0.000000e+00 : f32
    %717 = vector.broadcast %cst_297 : f32 to vector<16x32xf32>
    %718 = arith.maximumf %716, %717 : vector<16x32xf32>
    %c4_298 = arith.constant 4 : index
    %c0_299 = arith.constant 0 : index
    %c0_300 = arith.constant 0 : index
    %719 = vector.load %arg6[%c4_298, %c0_299, %c0_300] : memref<10x32x32xf32, #tpu.memory_space<vmem>>, vector<1x32x32xf32>
    %720 = vector.shape_cast %719 : vector<1x32x32xf32> to vector<32x32xf32>
    %cst_301 = arith.constant dense<0.000000e+00> : vector<16x32xf32>
    %721 = tpu.matmul %718, %720, %cst_301 {dimension_numbers = #tpu.dot_dimension_numbers<[1], [0], [0], [1], [0, 0, 1, 1], [], []>} : vector<16x32xf32>, vector<32x32xf32>, vector<16x32xf32> -> vector<16x32xf32>
    %722 = arith.addf %710, %721 : vector<16x32xf32>
    %c4_302 = arith.constant 4 : index
    %c0_303 = arith.constant 0 : index
    %723 = vector.load %arg7[%c4_302, %c0_303] : memref<10x32xf32, #tpu.memory_space<vmem>>, vector<1x32xf32>
    %724 = vector.broadcast %723 : vector<1x32xf32> to vector<16x32xf32>
    %725 = arith.addf %722, %724 : vector<16x32xf32>
    %726 = vector.shape_cast %725 : vector<16x32xf32> to vector<2x8x32xf32>
    %727 = vector.shape_cast %586 : vector<2x8x32xf32> to vector<16x32xf32>
    %728 = vector.shape_cast %587 : vector<2x8x32xf32> to vector<16x32xf32>
    %c20 = arith.constant 20 : index
    %c0_304 = arith.constant 0 : index
    %c0_305 = arith.constant 0 : index
    %729 = vector.load %arg2[%c20, %c0_304, %c0_305] : memref<40x32x32xf32, #tpu.memory_space<vmem>>, vector<1x32x32xf32>
    %730 = vector.shape_cast %729 : vector<1x32x32xf32> to vector<32x32xf32>
    %cst_306 = arith.constant dense<0.000000e+00> : vector<16x32xf32>
    %731 = tpu.matmul %727, %730, %cst_306 {dimension_numbers = #tpu.dot_dimension_numbers<[1], [0], [0], [1], [0, 0, 1, 1], [], []>} : vector<16x32xf32>, vector<32x32xf32>, vector<16x32xf32> -> vector<16x32xf32>
    %c20_307 = arith.constant 20 : index
    %c0_308 = arith.constant 0 : index
    %732 = vector.load %arg3[%c20_307, %c0_308] : memref<40x32xf32, #tpu.memory_space<vmem>>, vector<1x32xf32>
    %733 = vector.broadcast %732 : vector<1x32xf32> to vector<16x32xf32>
    %734 = arith.addf %731, %733 : vector<16x32xf32>
    %c21 = arith.constant 21 : index
    %c0_309 = arith.constant 0 : index
    %c0_310 = arith.constant 0 : index
    %735 = vector.load %arg2[%c21, %c0_309, %c0_310] : memref<40x32x32xf32, #tpu.memory_space<vmem>>, vector<1x32x32xf32>
    %736 = vector.shape_cast %735 : vector<1x32x32xf32> to vector<32x32xf32>
    %cst_311 = arith.constant dense<0.000000e+00> : vector<16x32xf32>
    %737 = tpu.matmul %728, %736, %cst_311 {dimension_numbers = #tpu.dot_dimension_numbers<[1], [0], [0], [1], [0, 0, 1, 1], [], []>} : vector<16x32xf32>, vector<32x32xf32>, vector<16x32xf32> -> vector<16x32xf32>
    %c21_312 = arith.constant 21 : index
    %c0_313 = arith.constant 0 : index
    %738 = vector.load %arg3[%c21_312, %c0_313] : memref<40x32xf32, #tpu.memory_space<vmem>>, vector<1x32xf32>
    %739 = vector.broadcast %738 : vector<1x32xf32> to vector<16x32xf32>
    %740 = arith.addf %737, %739 : vector<16x32xf32>
    %c22 = arith.constant 22 : index
    %c0_314 = arith.constant 0 : index
    %c0_315 = arith.constant 0 : index
    %741 = vector.load %arg2[%c22, %c0_314, %c0_315] : memref<40x32x32xf32, #tpu.memory_space<vmem>>, vector<1x32x32xf32>
    %742 = vector.shape_cast %741 : vector<1x32x32xf32> to vector<32x32xf32>
    %cst_316 = arith.constant dense<0.000000e+00> : vector<16x32xf32>
    %743 = tpu.matmul %728, %742, %cst_316 {dimension_numbers = #tpu.dot_dimension_numbers<[1], [0], [0], [1], [0, 0, 1, 1], [], []>} : vector<16x32xf32>, vector<32x32xf32>, vector<16x32xf32> -> vector<16x32xf32>
    %c22_317 = arith.constant 22 : index
    %c0_318 = arith.constant 0 : index
    %744 = vector.load %arg3[%c22_317, %c0_318] : memref<40x32xf32, #tpu.memory_space<vmem>>, vector<1x32xf32>
    %745 = vector.broadcast %744 : vector<1x32xf32> to vector<16x32xf32>
    %746 = arith.addf %743, %745 : vector<16x32xf32>
    %c23 = arith.constant 23 : index
    %c0_319 = arith.constant 0 : index
    %c0_320 = arith.constant 0 : index
    %747 = vector.load %arg2[%c23, %c0_319, %c0_320] : memref<40x32x32xf32, #tpu.memory_space<vmem>>, vector<1x32x32xf32>
    %748 = vector.shape_cast %747 : vector<1x32x32xf32> to vector<32x32xf32>
    %cst_321 = arith.constant 0.000000e+00 : f32
    %749 = vector.broadcast %cst_321 : f32 to vector<16x32xf32>
    %750 = vector.extract_strided_slice %734 {offsets = [0, 0], sizes = [16, 8], strides = [1, 1]} : vector<16x32xf32> to vector<16x8xf32>
    %751 = vector.shape_cast %750 : vector<16x8xf32> to vector<2x8x8xf32>
    %752 = vector.extract_strided_slice %740 {offsets = [0, 0], sizes = [16, 8], strides = [1, 1]} : vector<16x32xf32> to vector<16x8xf32>
    %753 = vector.shape_cast %752 : vector<16x8xf32> to vector<2x8x8xf32>
    %754 = vector.extract_strided_slice %746 {offsets = [0, 0], sizes = [16, 8], strides = [1, 1]} : vector<16x32xf32> to vector<16x8xf32>
    %755 = vector.shape_cast %754 : vector<16x8xf32> to vector<2x8x8xf32>
    "tpu.trace_start"() <{level = 10 : i32, message = "bqd,bkd->bqk"}> : () -> ()
    %cst_322 = arith.constant dense<0.000000e+00> : vector<2x8x8xf32>
    %756 = tpu.matmul %751, %753, %cst_322 {dimension_numbers = #tpu.dot_dimension_numbers<[2], [2], [1], [1], [0, 0, 0, 1, 1, 1], [0], [0]>} : vector<2x8x8xf32>, vector<2x8x8xf32>, vector<2x8x8xf32> -> vector<2x8x8xf32>
    "tpu.trace_stop"() : () -> ()
    %cst_323 = arith.constant 0.176776692 : f32
    %757 = vector.broadcast %cst_323 : f32 to vector<2x8x8xf32>
    %758 = arith.mulf %756, %757 : vector<2x8x8xf32>
    %cst_324 = arith.constant dense<0xFF800000> : vector<2x8xf32>
    %759 = vector.multi_reduction <maximumf>, %758, %cst_324 [2] : vector<2x8x8xf32> to vector<2x8xf32>
    %760 = vector.shape_cast %759 : vector<2x8xf32> to vector<2x8x1xf32>
    %761 = vector.broadcast %760 : vector<2x8x1xf32> to vector<2x8x8xf32>
    %762 = arith.subf %758, %761 : vector<2x8x8xf32>
    %763 = math.exp %762 : vector<2x8x8xf32>
    %cst_325 = arith.constant dense<0.000000e+00> : vector<2x8xf32>
    %764 = vector.multi_reduction <add>, %763, %cst_325 [2] : vector<2x8x8xf32> to vector<2x8xf32>
    %765 = vector.shape_cast %764 : vector<2x8xf32> to vector<2x8x1xf32>
    %766 = tpu.reciprocal %765 {approx = true} : vector<2x8x1xf32> -> vector<2x8x1xf32>
    %767 = vector.broadcast %766 : vector<2x8x1xf32> to vector<2x8x8xf32>
    %768 = arith.mulf %763, %767 : vector<2x8x8xf32>
    "tpu.trace_start"() <{level = 10 : i32, message = "bqk,bkd->bqd"}> : () -> ()
    %cst_326 = arith.constant dense<0.000000e+00> : vector<2x8x8xf32>
    %769 = tpu.matmul %768, %755, %cst_326 {dimension_numbers = #tpu.dot_dimension_numbers<[2], [1], [1], [2], [0, 0, 0, 1, 1, 2], [0], [0]>} : vector<2x8x8xf32>, vector<2x8x8xf32>, vector<2x8x8xf32> -> vector<2x8x8xf32>
    "tpu.trace_stop"() : () -> ()
    %770 = vector.shape_cast %769 : vector<2x8x8xf32> to vector<16x8xf32>
    %771 = vector.extract_strided_slice %748 {offsets = [0, 0], sizes = [8, 32], strides = [1, 1]} : vector<32x32xf32> to vector<8x32xf32>
    %cst_327 = arith.constant dense<0.000000e+00> : vector<16x32xf32>
    %772 = tpu.matmul %770, %771, %cst_327 {dimension_numbers = #tpu.dot_dimension_numbers<[1], [0], [0], [1], [0, 0, 1, 1], [], []>} : vector<16x8xf32>, vector<8x32xf32>, vector<16x32xf32> -> vector<16x32xf32>
    %773 = arith.addf %749, %772 : vector<16x32xf32>
    %774 = vector.extract_strided_slice %734 {offsets = [0, 8], sizes = [16, 8], strides = [1, 1]} : vector<16x32xf32> to vector<16x8xf32>
    %775 = vector.shape_cast %774 : vector<16x8xf32> to vector<2x8x8xf32>
    %776 = vector.extract_strided_slice %740 {offsets = [0, 8], sizes = [16, 8], strides = [1, 1]} : vector<16x32xf32> to vector<16x8xf32>
    %777 = vector.shape_cast %776 : vector<16x8xf32> to vector<2x8x8xf32>
    %778 = vector.extract_strided_slice %746 {offsets = [0, 8], sizes = [16, 8], strides = [1, 1]} : vector<16x32xf32> to vector<16x8xf32>
    %779 = vector.shape_cast %778 : vector<16x8xf32> to vector<2x8x8xf32>
    "tpu.trace_start"() <{level = 10 : i32, message = "bqd,bkd->bqk"}> : () -> ()
    %cst_328 = arith.constant dense<0.000000e+00> : vector<2x8x8xf32>
    %780 = tpu.matmul %775, %777, %cst_328 {dimension_numbers = #tpu.dot_dimension_numbers<[2], [2], [1], [1], [0, 0, 0, 1, 1, 1], [0], [0]>} : vector<2x8x8xf32>, vector<2x8x8xf32>, vector<2x8x8xf32> -> vector<2x8x8xf32>
    "tpu.trace_stop"() : () -> ()
    %cst_329 = arith.constant 0.176776692 : f32
    %781 = vector.broadcast %cst_329 : f32 to vector<2x8x8xf32>
    %782 = arith.mulf %780, %781 : vector<2x8x8xf32>
    %cst_330 = arith.constant dense<0xFF800000> : vector<2x8xf32>
    %783 = vector.multi_reduction <maximumf>, %782, %cst_330 [2] : vector<2x8x8xf32> to vector<2x8xf32>
    %784 = vector.shape_cast %783 : vector<2x8xf32> to vector<2x8x1xf32>
    %785 = vector.broadcast %784 : vector<2x8x1xf32> to vector<2x8x8xf32>
    %786 = arith.subf %782, %785 : vector<2x8x8xf32>
    %787 = math.exp %786 : vector<2x8x8xf32>
    %cst_331 = arith.constant dense<0.000000e+00> : vector<2x8xf32>
    %788 = vector.multi_reduction <add>, %787, %cst_331 [2] : vector<2x8x8xf32> to vector<2x8xf32>
    %789 = vector.shape_cast %788 : vector<2x8xf32> to vector<2x8x1xf32>
    %790 = tpu.reciprocal %789 {approx = true} : vector<2x8x1xf32> -> vector<2x8x1xf32>
    %791 = vector.broadcast %790 : vector<2x8x1xf32> to vector<2x8x8xf32>
    %792 = arith.mulf %787, %791 : vector<2x8x8xf32>
    "tpu.trace_start"() <{level = 10 : i32, message = "bqk,bkd->bqd"}> : () -> ()
    %cst_332 = arith.constant dense<0.000000e+00> : vector<2x8x8xf32>
    %793 = tpu.matmul %792, %779, %cst_332 {dimension_numbers = #tpu.dot_dimension_numbers<[2], [1], [1], [2], [0, 0, 0, 1, 1, 2], [0], [0]>} : vector<2x8x8xf32>, vector<2x8x8xf32>, vector<2x8x8xf32> -> vector<2x8x8xf32>
    "tpu.trace_stop"() : () -> ()
    %794 = vector.shape_cast %793 : vector<2x8x8xf32> to vector<16x8xf32>
    %795 = vector.extract_strided_slice %748 {offsets = [8, 0], sizes = [8, 32], strides = [1, 1]} : vector<32x32xf32> to vector<8x32xf32>
    %cst_333 = arith.constant dense<0.000000e+00> : vector<16x32xf32>
    %796 = tpu.matmul %794, %795, %cst_333 {dimension_numbers = #tpu.dot_dimension_numbers<[1], [0], [0], [1], [0, 0, 1, 1], [], []>} : vector<16x8xf32>, vector<8x32xf32>, vector<16x32xf32> -> vector<16x32xf32>
    %797 = arith.addf %773, %796 : vector<16x32xf32>
    %798 = vector.extract_strided_slice %734 {offsets = [0, 16], sizes = [16, 8], strides = [1, 1]} : vector<16x32xf32> to vector<16x8xf32>
    %799 = vector.shape_cast %798 : vector<16x8xf32> to vector<2x8x8xf32>
    %800 = vector.extract_strided_slice %740 {offsets = [0, 16], sizes = [16, 8], strides = [1, 1]} : vector<16x32xf32> to vector<16x8xf32>
    %801 = vector.shape_cast %800 : vector<16x8xf32> to vector<2x8x8xf32>
    %802 = vector.extract_strided_slice %746 {offsets = [0, 16], sizes = [16, 8], strides = [1, 1]} : vector<16x32xf32> to vector<16x8xf32>
    %803 = vector.shape_cast %802 : vector<16x8xf32> to vector<2x8x8xf32>
    "tpu.trace_start"() <{level = 10 : i32, message = "bqd,bkd->bqk"}> : () -> ()
    %cst_334 = arith.constant dense<0.000000e+00> : vector<2x8x8xf32>
    %804 = tpu.matmul %799, %801, %cst_334 {dimension_numbers = #tpu.dot_dimension_numbers<[2], [2], [1], [1], [0, 0, 0, 1, 1, 1], [0], [0]>} : vector<2x8x8xf32>, vector<2x8x8xf32>, vector<2x8x8xf32> -> vector<2x8x8xf32>
    "tpu.trace_stop"() : () -> ()
    %cst_335 = arith.constant 0.176776692 : f32
    %805 = vector.broadcast %cst_335 : f32 to vector<2x8x8xf32>
    %806 = arith.mulf %804, %805 : vector<2x8x8xf32>
    %cst_336 = arith.constant dense<0xFF800000> : vector<2x8xf32>
    %807 = vector.multi_reduction <maximumf>, %806, %cst_336 [2] : vector<2x8x8xf32> to vector<2x8xf32>
    %808 = vector.shape_cast %807 : vector<2x8xf32> to vector<2x8x1xf32>
    %809 = vector.broadcast %808 : vector<2x8x1xf32> to vector<2x8x8xf32>
    %810 = arith.subf %806, %809 : vector<2x8x8xf32>
    %811 = math.exp %810 : vector<2x8x8xf32>
    %cst_337 = arith.constant dense<0.000000e+00> : vector<2x8xf32>
    %812 = vector.multi_reduction <add>, %811, %cst_337 [2] : vector<2x8x8xf32> to vector<2x8xf32>
    %813 = vector.shape_cast %812 : vector<2x8xf32> to vector<2x8x1xf32>
    %814 = tpu.reciprocal %813 {approx = true} : vector<2x8x1xf32> -> vector<2x8x1xf32>
    %815 = vector.broadcast %814 : vector<2x8x1xf32> to vector<2x8x8xf32>
    %816 = arith.mulf %811, %815 : vector<2x8x8xf32>
    "tpu.trace_start"() <{level = 10 : i32, message = "bqk,bkd->bqd"}> : () -> ()
    %cst_338 = arith.constant dense<0.000000e+00> : vector<2x8x8xf32>
    %817 = tpu.matmul %816, %803, %cst_338 {dimension_numbers = #tpu.dot_dimension_numbers<[2], [1], [1], [2], [0, 0, 0, 1, 1, 2], [0], [0]>} : vector<2x8x8xf32>, vector<2x8x8xf32>, vector<2x8x8xf32> -> vector<2x8x8xf32>
    "tpu.trace_stop"() : () -> ()
    %818 = vector.shape_cast %817 : vector<2x8x8xf32> to vector<16x8xf32>
    %819 = vector.extract_strided_slice %748 {offsets = [16, 0], sizes = [8, 32], strides = [1, 1]} : vector<32x32xf32> to vector<8x32xf32>
    %cst_339 = arith.constant dense<0.000000e+00> : vector<16x32xf32>
    %820 = tpu.matmul %818, %819, %cst_339 {dimension_numbers = #tpu.dot_dimension_numbers<[1], [0], [0], [1], [0, 0, 1, 1], [], []>} : vector<16x8xf32>, vector<8x32xf32>, vector<16x32xf32> -> vector<16x32xf32>
    %821 = arith.addf %797, %820 : vector<16x32xf32>
    %822 = vector.extract_strided_slice %734 {offsets = [0, 24], sizes = [16, 8], strides = [1, 1]} : vector<16x32xf32> to vector<16x8xf32>
    %823 = vector.shape_cast %822 : vector<16x8xf32> to vector<2x8x8xf32>
    %824 = vector.extract_strided_slice %740 {offsets = [0, 24], sizes = [16, 8], strides = [1, 1]} : vector<16x32xf32> to vector<16x8xf32>
    %825 = vector.shape_cast %824 : vector<16x8xf32> to vector<2x8x8xf32>
    %826 = vector.extract_strided_slice %746 {offsets = [0, 24], sizes = [16, 8], strides = [1, 1]} : vector<16x32xf32> to vector<16x8xf32>
    %827 = vector.shape_cast %826 : vector<16x8xf32> to vector<2x8x8xf32>
    "tpu.trace_start"() <{level = 10 : i32, message = "bqd,bkd->bqk"}> : () -> ()
    %cst_340 = arith.constant dense<0.000000e+00> : vector<2x8x8xf32>
    %828 = tpu.matmul %823, %825, %cst_340 {dimension_numbers = #tpu.dot_dimension_numbers<[2], [2], [1], [1], [0, 0, 0, 1, 1, 1], [0], [0]>} : vector<2x8x8xf32>, vector<2x8x8xf32>, vector<2x8x8xf32> -> vector<2x8x8xf32>
    "tpu.trace_stop"() : () -> ()
    %cst_341 = arith.constant 0.176776692 : f32
    %829 = vector.broadcast %cst_341 : f32 to vector<2x8x8xf32>
    %830 = arith.mulf %828, %829 : vector<2x8x8xf32>
    %cst_342 = arith.constant dense<0xFF800000> : vector<2x8xf32>
    %831 = vector.multi_reduction <maximumf>, %830, %cst_342 [2] : vector<2x8x8xf32> to vector<2x8xf32>
    %832 = vector.shape_cast %831 : vector<2x8xf32> to vector<2x8x1xf32>
    %833 = vector.broadcast %832 : vector<2x8x1xf32> to vector<2x8x8xf32>
    %834 = arith.subf %830, %833 : vector<2x8x8xf32>
    %835 = math.exp %834 : vector<2x8x8xf32>
    %cst_343 = arith.constant dense<0.000000e+00> : vector<2x8xf32>
    %836 = vector.multi_reduction <add>, %835, %cst_343 [2] : vector<2x8x8xf32> to vector<2x8xf32>
    %837 = vector.shape_cast %836 : vector<2x8xf32> to vector<2x8x1xf32>
    %838 = tpu.reciprocal %837 {approx = true} : vector<2x8x1xf32> -> vector<2x8x1xf32>
    %839 = vector.broadcast %838 : vector<2x8x1xf32> to vector<2x8x8xf32>
    %840 = arith.mulf %835, %839 : vector<2x8x8xf32>
    "tpu.trace_start"() <{level = 10 : i32, message = "bqk,bkd->bqd"}> : () -> ()
    %cst_344 = arith.constant dense<0.000000e+00> : vector<2x8x8xf32>
    %841 = tpu.matmul %840, %827, %cst_344 {dimension_numbers = #tpu.dot_dimension_numbers<[2], [1], [1], [2], [0, 0, 0, 1, 1, 2], [0], [0]>} : vector<2x8x8xf32>, vector<2x8x8xf32>, vector<2x8x8xf32> -> vector<2x8x8xf32>
    "tpu.trace_stop"() : () -> ()
    %842 = vector.shape_cast %841 : vector<2x8x8xf32> to vector<16x8xf32>
    %843 = vector.extract_strided_slice %748 {offsets = [24, 0], sizes = [8, 32], strides = [1, 1]} : vector<32x32xf32> to vector<8x32xf32>
    %cst_345 = arith.constant dense<0.000000e+00> : vector<16x32xf32>
    %844 = tpu.matmul %842, %843, %cst_345 {dimension_numbers = #tpu.dot_dimension_numbers<[1], [0], [0], [1], [0, 0, 1, 1], [], []>} : vector<16x8xf32>, vector<8x32xf32>, vector<16x32xf32> -> vector<16x32xf32>
    %845 = arith.addf %821, %844 : vector<16x32xf32>
    %846 = arith.addf %727, %845 : vector<16x32xf32>
    %c23_346 = arith.constant 23 : index
    %c0_347 = arith.constant 0 : index
    %847 = vector.load %arg3[%c23_346, %c0_347] : memref<40x32xf32, #tpu.memory_space<vmem>>, vector<1x32xf32>
    %848 = vector.broadcast %847 : vector<1x32xf32> to vector<16x32xf32>
    %849 = arith.addf %846, %848 : vector<16x32xf32>
    %c5_348 = arith.constant 5 : index
    %c0_349 = arith.constant 0 : index
    %c0_350 = arith.constant 0 : index
    %850 = vector.load %arg4[%c5_348, %c0_349, %c0_350] : memref<10x32x32xf32, #tpu.memory_space<vmem>>, vector<1x32x32xf32>
    %851 = vector.shape_cast %850 : vector<1x32x32xf32> to vector<32x32xf32>
    %cst_351 = arith.constant dense<0.000000e+00> : vector<16x32xf32>
    %852 = tpu.matmul %849, %851, %cst_351 {dimension_numbers = #tpu.dot_dimension_numbers<[1], [0], [0], [1], [0, 0, 1, 1], [], []>} : vector<16x32xf32>, vector<32x32xf32>, vector<16x32xf32> -> vector<16x32xf32>
    %c5_352 = arith.constant 5 : index
    %c0_353 = arith.constant 0 : index
    %853 = vector.load %arg5[%c5_352, %c0_353] : memref<10x32xf32, #tpu.memory_space<vmem>>, vector<1x32xf32>
    %854 = vector.broadcast %853 : vector<1x32xf32> to vector<16x32xf32>
    %855 = arith.addf %852, %854 : vector<16x32xf32>
    %cst_354 = arith.constant 0.000000e+00 : f32
    %856 = vector.broadcast %cst_354 : f32 to vector<16x32xf32>
    %857 = arith.maximumf %855, %856 : vector<16x32xf32>
    %c5_355 = arith.constant 5 : index
    %c0_356 = arith.constant 0 : index
    %c0_357 = arith.constant 0 : index
    %858 = vector.load %arg6[%c5_355, %c0_356, %c0_357] : memref<10x32x32xf32, #tpu.memory_space<vmem>>, vector<1x32x32xf32>
    %859 = vector.shape_cast %858 : vector<1x32x32xf32> to vector<32x32xf32>
    %cst_358 = arith.constant dense<0.000000e+00> : vector<16x32xf32>
    %860 = tpu.matmul %857, %859, %cst_358 {dimension_numbers = #tpu.dot_dimension_numbers<[1], [0], [0], [1], [0, 0, 1, 1], [], []>} : vector<16x32xf32>, vector<32x32xf32>, vector<16x32xf32> -> vector<16x32xf32>
    %861 = arith.addf %849, %860 : vector<16x32xf32>
    %c5_359 = arith.constant 5 : index
    %c0_360 = arith.constant 0 : index
    %862 = vector.load %arg7[%c5_359, %c0_360] : memref<10x32xf32, #tpu.memory_space<vmem>>, vector<1x32xf32>
    %863 = vector.broadcast %862 : vector<1x32xf32> to vector<16x32xf32>
    %864 = arith.addf %861, %863 : vector<16x32xf32>
    %865 = vector.shape_cast %864 : vector<16x32xf32> to vector<2x8x32xf32>
    %866 = vector.shape_cast %587 : vector<2x8x32xf32> to vector<16x32xf32>
    %867 = vector.shape_cast %586 : vector<2x8x32xf32> to vector<16x32xf32>
    %c24 = arith.constant 24 : index
    %c0_361 = arith.constant 0 : index
    %c0_362 = arith.constant 0 : index
    %868 = vector.load %arg2[%c24, %c0_361, %c0_362] : memref<40x32x32xf32, #tpu.memory_space<vmem>>, vector<1x32x32xf32>
    %869 = vector.shape_cast %868 : vector<1x32x32xf32> to vector<32x32xf32>
    %cst_363 = arith.constant dense<0.000000e+00> : vector<16x32xf32>
    %870 = tpu.matmul %866, %869, %cst_363 {dimension_numbers = #tpu.dot_dimension_numbers<[1], [0], [0], [1], [0, 0, 1, 1], [], []>} : vector<16x32xf32>, vector<32x32xf32>, vector<16x32xf32> -> vector<16x32xf32>
    %c24_364 = arith.constant 24 : index
    %c0_365 = arith.constant 0 : index
    %871 = vector.load %arg3[%c24_364, %c0_365] : memref<40x32xf32, #tpu.memory_space<vmem>>, vector<1x32xf32>
    %872 = vector.broadcast %871 : vector<1x32xf32> to vector<16x32xf32>
    %873 = arith.addf %870, %872 : vector<16x32xf32>
    %c25 = arith.constant 25 : index
    %c0_366 = arith.constant 0 : index
    %c0_367 = arith.constant 0 : index
    %874 = vector.load %arg2[%c25, %c0_366, %c0_367] : memref<40x32x32xf32, #tpu.memory_space<vmem>>, vector<1x32x32xf32>
    %875 = vector.shape_cast %874 : vector<1x32x32xf32> to vector<32x32xf32>
    %cst_368 = arith.constant dense<0.000000e+00> : vector<16x32xf32>
    %876 = tpu.matmul %867, %875, %cst_368 {dimension_numbers = #tpu.dot_dimension_numbers<[1], [0], [0], [1], [0, 0, 1, 1], [], []>} : vector<16x32xf32>, vector<32x32xf32>, vector<16x32xf32> -> vector<16x32xf32>
    %c25_369 = arith.constant 25 : index
    %c0_370 = arith.constant 0 : index
    %877 = vector.load %arg3[%c25_369, %c0_370] : memref<40x32xf32, #tpu.memory_space<vmem>>, vector<1x32xf32>
    %878 = vector.broadcast %877 : vector<1x32xf32> to vector<16x32xf32>
    %879 = arith.addf %876, %878 : vector<16x32xf32>
    %c26 = arith.constant 26 : index
    %c0_371 = arith.constant 0 : index
    %c0_372 = arith.constant 0 : index
    %880 = vector.load %arg2[%c26, %c0_371, %c0_372] : memref<40x32x32xf32, #tpu.memory_space<vmem>>, vector<1x32x32xf32>
    %881 = vector.shape_cast %880 : vector<1x32x32xf32> to vector<32x32xf32>
    %cst_373 = arith.constant dense<0.000000e+00> : vector<16x32xf32>
    %882 = tpu.matmul %867, %881, %cst_373 {dimension_numbers = #tpu.dot_dimension_numbers<[1], [0], [0], [1], [0, 0, 1, 1], [], []>} : vector<16x32xf32>, vector<32x32xf32>, vector<16x32xf32> -> vector<16x32xf32>
    %c26_374 = arith.constant 26 : index
    %c0_375 = arith.constant 0 : index
    %883 = vector.load %arg3[%c26_374, %c0_375] : memref<40x32xf32, #tpu.memory_space<vmem>>, vector<1x32xf32>
    %884 = vector.broadcast %883 : vector<1x32xf32> to vector<16x32xf32>
    %885 = arith.addf %882, %884 : vector<16x32xf32>
    %c27 = arith.constant 27 : index
    %c0_376 = arith.constant 0 : index
    %c0_377 = arith.constant 0 : index
    %886 = vector.load %arg2[%c27, %c0_376, %c0_377] : memref<40x32x32xf32, #tpu.memory_space<vmem>>, vector<1x32x32xf32>
    %887 = vector.shape_cast %886 : vector<1x32x32xf32> to vector<32x32xf32>
    %cst_378 = arith.constant 0.000000e+00 : f32
    %888 = vector.broadcast %cst_378 : f32 to vector<16x32xf32>
    %889 = vector.extract_strided_slice %873 {offsets = [0, 0], sizes = [16, 8], strides = [1, 1]} : vector<16x32xf32> to vector<16x8xf32>
    %890 = vector.shape_cast %889 : vector<16x8xf32> to vector<2x8x8xf32>
    %891 = vector.extract_strided_slice %879 {offsets = [0, 0], sizes = [16, 8], strides = [1, 1]} : vector<16x32xf32> to vector<16x8xf32>
    %892 = vector.shape_cast %891 : vector<16x8xf32> to vector<2x8x8xf32>
    %893 = vector.extract_strided_slice %885 {offsets = [0, 0], sizes = [16, 8], strides = [1, 1]} : vector<16x32xf32> to vector<16x8xf32>
    %894 = vector.shape_cast %893 : vector<16x8xf32> to vector<2x8x8xf32>
    "tpu.trace_start"() <{level = 10 : i32, message = "bqd,bkd->bqk"}> : () -> ()
    %cst_379 = arith.constant dense<0.000000e+00> : vector<2x8x8xf32>
    %895 = tpu.matmul %890, %892, %cst_379 {dimension_numbers = #tpu.dot_dimension_numbers<[2], [2], [1], [1], [0, 0, 0, 1, 1, 1], [0], [0]>} : vector<2x8x8xf32>, vector<2x8x8xf32>, vector<2x8x8xf32> -> vector<2x8x8xf32>
    "tpu.trace_stop"() : () -> ()
    %cst_380 = arith.constant 0.176776692 : f32
    %896 = vector.broadcast %cst_380 : f32 to vector<2x8x8xf32>
    %897 = arith.mulf %895, %896 : vector<2x8x8xf32>
    %cst_381 = arith.constant dense<0xFF800000> : vector<2x8xf32>
    %898 = vector.multi_reduction <maximumf>, %897, %cst_381 [2] : vector<2x8x8xf32> to vector<2x8xf32>
    %899 = vector.shape_cast %898 : vector<2x8xf32> to vector<2x8x1xf32>
    %900 = vector.broadcast %899 : vector<2x8x1xf32> to vector<2x8x8xf32>
    %901 = arith.subf %897, %900 : vector<2x8x8xf32>
    %902 = math.exp %901 : vector<2x8x8xf32>
    %cst_382 = arith.constant dense<0.000000e+00> : vector<2x8xf32>
    %903 = vector.multi_reduction <add>, %902, %cst_382 [2] : vector<2x8x8xf32> to vector<2x8xf32>
    %904 = vector.shape_cast %903 : vector<2x8xf32> to vector<2x8x1xf32>
    %905 = tpu.reciprocal %904 {approx = true} : vector<2x8x1xf32> -> vector<2x8x1xf32>
    %906 = vector.broadcast %905 : vector<2x8x1xf32> to vector<2x8x8xf32>
    %907 = arith.mulf %902, %906 : vector<2x8x8xf32>
    "tpu.trace_start"() <{level = 10 : i32, message = "bqk,bkd->bqd"}> : () -> ()
    %cst_383 = arith.constant dense<0.000000e+00> : vector<2x8x8xf32>
    %908 = tpu.matmul %907, %894, %cst_383 {dimension_numbers = #tpu.dot_dimension_numbers<[2], [1], [1], [2], [0, 0, 0, 1, 1, 2], [0], [0]>} : vector<2x8x8xf32>, vector<2x8x8xf32>, vector<2x8x8xf32> -> vector<2x8x8xf32>
    "tpu.trace_stop"() : () -> ()
    %909 = vector.shape_cast %908 : vector<2x8x8xf32> to vector<16x8xf32>
    %910 = vector.extract_strided_slice %887 {offsets = [0, 0], sizes = [8, 32], strides = [1, 1]} : vector<32x32xf32> to vector<8x32xf32>
    %cst_384 = arith.constant dense<0.000000e+00> : vector<16x32xf32>
    %911 = tpu.matmul %909, %910, %cst_384 {dimension_numbers = #tpu.dot_dimension_numbers<[1], [0], [0], [1], [0, 0, 1, 1], [], []>} : vector<16x8xf32>, vector<8x32xf32>, vector<16x32xf32> -> vector<16x32xf32>
    %912 = arith.addf %888, %911 : vector<16x32xf32>
    %913 = vector.extract_strided_slice %873 {offsets = [0, 8], sizes = [16, 8], strides = [1, 1]} : vector<16x32xf32> to vector<16x8xf32>
    %914 = vector.shape_cast %913 : vector<16x8xf32> to vector<2x8x8xf32>
    %915 = vector.extract_strided_slice %879 {offsets = [0, 8], sizes = [16, 8], strides = [1, 1]} : vector<16x32xf32> to vector<16x8xf32>
    %916 = vector.shape_cast %915 : vector<16x8xf32> to vector<2x8x8xf32>
    %917 = vector.extract_strided_slice %885 {offsets = [0, 8], sizes = [16, 8], strides = [1, 1]} : vector<16x32xf32> to vector<16x8xf32>
    %918 = vector.shape_cast %917 : vector<16x8xf32> to vector<2x8x8xf32>
    "tpu.trace_start"() <{level = 10 : i32, message = "bqd,bkd->bqk"}> : () -> ()
    %cst_385 = arith.constant dense<0.000000e+00> : vector<2x8x8xf32>
    %919 = tpu.matmul %914, %916, %cst_385 {dimension_numbers = #tpu.dot_dimension_numbers<[2], [2], [1], [1], [0, 0, 0, 1, 1, 1], [0], [0]>} : vector<2x8x8xf32>, vector<2x8x8xf32>, vector<2x8x8xf32> -> vector<2x8x8xf32>
    "tpu.trace_stop"() : () -> ()
    %cst_386 = arith.constant 0.176776692 : f32
    %920 = vector.broadcast %cst_386 : f32 to vector<2x8x8xf32>
    %921 = arith.mulf %919, %920 : vector<2x8x8xf32>
    %cst_387 = arith.constant dense<0xFF800000> : vector<2x8xf32>
    %922 = vector.multi_reduction <maximumf>, %921, %cst_387 [2] : vector<2x8x8xf32> to vector<2x8xf32>
    %923 = vector.shape_cast %922 : vector<2x8xf32> to vector<2x8x1xf32>
    %924 = vector.broadcast %923 : vector<2x8x1xf32> to vector<2x8x8xf32>
    %925 = arith.subf %921, %924 : vector<2x8x8xf32>
    %926 = math.exp %925 : vector<2x8x8xf32>
    %cst_388 = arith.constant dense<0.000000e+00> : vector<2x8xf32>
    %927 = vector.multi_reduction <add>, %926, %cst_388 [2] : vector<2x8x8xf32> to vector<2x8xf32>
    %928 = vector.shape_cast %927 : vector<2x8xf32> to vector<2x8x1xf32>
    %929 = tpu.reciprocal %928 {approx = true} : vector<2x8x1xf32> -> vector<2x8x1xf32>
    %930 = vector.broadcast %929 : vector<2x8x1xf32> to vector<2x8x8xf32>
    %931 = arith.mulf %926, %930 : vector<2x8x8xf32>
    "tpu.trace_start"() <{level = 10 : i32, message = "bqk,bkd->bqd"}> : () -> ()
    %cst_389 = arith.constant dense<0.000000e+00> : vector<2x8x8xf32>
    %932 = tpu.matmul %931, %918, %cst_389 {dimension_numbers = #tpu.dot_dimension_numbers<[2], [1], [1], [2], [0, 0, 0, 1, 1, 2], [0], [0]>} : vector<2x8x8xf32>, vector<2x8x8xf32>, vector<2x8x8xf32> -> vector<2x8x8xf32>
    "tpu.trace_stop"() : () -> ()
    %933 = vector.shape_cast %932 : vector<2x8x8xf32> to vector<16x8xf32>
    %934 = vector.extract_strided_slice %887 {offsets = [8, 0], sizes = [8, 32], strides = [1, 1]} : vector<32x32xf32> to vector<8x32xf32>
    %cst_390 = arith.constant dense<0.000000e+00> : vector<16x32xf32>
    %935 = tpu.matmul %933, %934, %cst_390 {dimension_numbers = #tpu.dot_dimension_numbers<[1], [0], [0], [1], [0, 0, 1, 1], [], []>} : vector<16x8xf32>, vector<8x32xf32>, vector<16x32xf32> -> vector<16x32xf32>
    %936 = arith.addf %912, %935 : vector<16x32xf32>
    %937 = vector.extract_strided_slice %873 {offsets = [0, 16], sizes = [16, 8], strides = [1, 1]} : vector<16x32xf32> to vector<16x8xf32>
    %938 = vector.shape_cast %937 : vector<16x8xf32> to vector<2x8x8xf32>
    %939 = vector.extract_strided_slice %879 {offsets = [0, 16], sizes = [16, 8], strides = [1, 1]} : vector<16x32xf32> to vector<16x8xf32>
    %940 = vector.shape_cast %939 : vector<16x8xf32> to vector<2x8x8xf32>
    %941 = vector.extract_strided_slice %885 {offsets = [0, 16], sizes = [16, 8], strides = [1, 1]} : vector<16x32xf32> to vector<16x8xf32>
    %942 = vector.shape_cast %941 : vector<16x8xf32> to vector<2x8x8xf32>
    "tpu.trace_start"() <{level = 10 : i32, message = "bqd,bkd->bqk"}> : () -> ()
    %cst_391 = arith.constant dense<0.000000e+00> : vector<2x8x8xf32>
    %943 = tpu.matmul %938, %940, %cst_391 {dimension_numbers = #tpu.dot_dimension_numbers<[2], [2], [1], [1], [0, 0, 0, 1, 1, 1], [0], [0]>} : vector<2x8x8xf32>, vector<2x8x8xf32>, vector<2x8x8xf32> -> vector<2x8x8xf32>
    "tpu.trace_stop"() : () -> ()
    %cst_392 = arith.constant 0.176776692 : f32
    %944 = vector.broadcast %cst_392 : f32 to vector<2x8x8xf32>
    %945 = arith.mulf %943, %944 : vector<2x8x8xf32>
    %cst_393 = arith.constant dense<0xFF800000> : vector<2x8xf32>
    %946 = vector.multi_reduction <maximumf>, %945, %cst_393 [2] : vector<2x8x8xf32> to vector<2x8xf32>
    %947 = vector.shape_cast %946 : vector<2x8xf32> to vector<2x8x1xf32>
    %948 = vector.broadcast %947 : vector<2x8x1xf32> to vector<2x8x8xf32>
    %949 = arith.subf %945, %948 : vector<2x8x8xf32>
    %950 = math.exp %949 : vector<2x8x8xf32>
    %cst_394 = arith.constant dense<0.000000e+00> : vector<2x8xf32>
    %951 = vector.multi_reduction <add>, %950, %cst_394 [2] : vector<2x8x8xf32> to vector<2x8xf32>
    %952 = vector.shape_cast %951 : vector<2x8xf32> to vector<2x8x1xf32>
    %953 = tpu.reciprocal %952 {approx = true} : vector<2x8x1xf32> -> vector<2x8x1xf32>
    %954 = vector.broadcast %953 : vector<2x8x1xf32> to vector<2x8x8xf32>
    %955 = arith.mulf %950, %954 : vector<2x8x8xf32>
    "tpu.trace_start"() <{level = 10 : i32, message = "bqk,bkd->bqd"}> : () -> ()
    %cst_395 = arith.constant dense<0.000000e+00> : vector<2x8x8xf32>
    %956 = tpu.matmul %955, %942, %cst_395 {dimension_numbers = #tpu.dot_dimension_numbers<[2], [1], [1], [2], [0, 0, 0, 1, 1, 2], [0], [0]>} : vector<2x8x8xf32>, vector<2x8x8xf32>, vector<2x8x8xf32> -> vector<2x8x8xf32>
    "tpu.trace_stop"() : () -> ()
    %957 = vector.shape_cast %956 : vector<2x8x8xf32> to vector<16x8xf32>
    %958 = vector.extract_strided_slice %887 {offsets = [16, 0], sizes = [8, 32], strides = [1, 1]} : vector<32x32xf32> to vector<8x32xf32>
    %cst_396 = arith.constant dense<0.000000e+00> : vector<16x32xf32>
    %959 = tpu.matmul %957, %958, %cst_396 {dimension_numbers = #tpu.dot_dimension_numbers<[1], [0], [0], [1], [0, 0, 1, 1], [], []>} : vector<16x8xf32>, vector<8x32xf32>, vector<16x32xf32> -> vector<16x32xf32>
    %960 = arith.addf %936, %959 : vector<16x32xf32>
    %961 = vector.extract_strided_slice %873 {offsets = [0, 24], sizes = [16, 8], strides = [1, 1]} : vector<16x32xf32> to vector<16x8xf32>
    %962 = vector.shape_cast %961 : vector<16x8xf32> to vector<2x8x8xf32>
    %963 = vector.extract_strided_slice %879 {offsets = [0, 24], sizes = [16, 8], strides = [1, 1]} : vector<16x32xf32> to vector<16x8xf32>
    %964 = vector.shape_cast %963 : vector<16x8xf32> to vector<2x8x8xf32>
    %965 = vector.extract_strided_slice %885 {offsets = [0, 24], sizes = [16, 8], strides = [1, 1]} : vector<16x32xf32> to vector<16x8xf32>
    %966 = vector.shape_cast %965 : vector<16x8xf32> to vector<2x8x8xf32>
    "tpu.trace_start"() <{level = 10 : i32, message = "bqd,bkd->bqk"}> : () -> ()
    %cst_397 = arith.constant dense<0.000000e+00> : vector<2x8x8xf32>
    %967 = tpu.matmul %962, %964, %cst_397 {dimension_numbers = #tpu.dot_dimension_numbers<[2], [2], [1], [1], [0, 0, 0, 1, 1, 1], [0], [0]>} : vector<2x8x8xf32>, vector<2x8x8xf32>, vector<2x8x8xf32> -> vector<2x8x8xf32>
    "tpu.trace_stop"() : () -> ()
    %cst_398 = arith.constant 0.176776692 : f32
    %968 = vector.broadcast %cst_398 : f32 to vector<2x8x8xf32>
    %969 = arith.mulf %967, %968 : vector<2x8x8xf32>
    %cst_399 = arith.constant dense<0xFF800000> : vector<2x8xf32>
    %970 = vector.multi_reduction <maximumf>, %969, %cst_399 [2] : vector<2x8x8xf32> to vector<2x8xf32>
    %971 = vector.shape_cast %970 : vector<2x8xf32> to vector<2x8x1xf32>
    %972 = vector.broadcast %971 : vector<2x8x1xf32> to vector<2x8x8xf32>
    %973 = arith.subf %969, %972 : vector<2x8x8xf32>
    %974 = math.exp %973 : vector<2x8x8xf32>
    %cst_400 = arith.constant dense<0.000000e+00> : vector<2x8xf32>
    %975 = vector.multi_reduction <add>, %974, %cst_400 [2] : vector<2x8x8xf32> to vector<2x8xf32>
    %976 = vector.shape_cast %975 : vector<2x8xf32> to vector<2x8x1xf32>
    %977 = tpu.reciprocal %976 {approx = true} : vector<2x8x1xf32> -> vector<2x8x1xf32>
    %978 = vector.broadcast %977 : vector<2x8x1xf32> to vector<2x8x8xf32>
    %979 = arith.mulf %974, %978 : vector<2x8x8xf32>
    "tpu.trace_start"() <{level = 10 : i32, message = "bqk,bkd->bqd"}> : () -> ()
    %cst_401 = arith.constant dense<0.000000e+00> : vector<2x8x8xf32>
    %980 = tpu.matmul %979, %966, %cst_401 {dimension_numbers = #tpu.dot_dimension_numbers<[2], [1], [1], [2], [0, 0, 0, 1, 1, 2], [0], [0]>} : vector<2x8x8xf32>, vector<2x8x8xf32>, vector<2x8x8xf32> -> vector<2x8x8xf32>
    "tpu.trace_stop"() : () -> ()
    %981 = vector.shape_cast %980 : vector<2x8x8xf32> to vector<16x8xf32>
    %982 = vector.extract_strided_slice %887 {offsets = [24, 0], sizes = [8, 32], strides = [1, 1]} : vector<32x32xf32> to vector<8x32xf32>
    %cst_402 = arith.constant dense<0.000000e+00> : vector<16x32xf32>
    %983 = tpu.matmul %981, %982, %cst_402 {dimension_numbers = #tpu.dot_dimension_numbers<[1], [0], [0], [1], [0, 0, 1, 1], [], []>} : vector<16x8xf32>, vector<8x32xf32>, vector<16x32xf32> -> vector<16x32xf32>
    %984 = arith.addf %960, %983 : vector<16x32xf32>
    %985 = arith.addf %866, %984 : vector<16x32xf32>
    %c27_403 = arith.constant 27 : index
    %c0_404 = arith.constant 0 : index
    %986 = vector.load %arg3[%c27_403, %c0_404] : memref<40x32xf32, #tpu.memory_space<vmem>>, vector<1x32xf32>
    %987 = vector.broadcast %986 : vector<1x32xf32> to vector<16x32xf32>
    %988 = arith.addf %985, %987 : vector<16x32xf32>
    %c6_405 = arith.constant 6 : index
    %c0_406 = arith.constant 0 : index
    %c0_407 = arith.constant 0 : index
    %989 = vector.load %arg4[%c6_405, %c0_406, %c0_407] : memref<10x32x32xf32, #tpu.memory_space<vmem>>, vector<1x32x32xf32>
    %990 = vector.shape_cast %989 : vector<1x32x32xf32> to vector<32x32xf32>
    %cst_408 = arith.constant dense<0.000000e+00> : vector<16x32xf32>
    %991 = tpu.matmul %988, %990, %cst_408 {dimension_numbers = #tpu.dot_dimension_numbers<[1], [0], [0], [1], [0, 0, 1, 1], [], []>} : vector<16x32xf32>, vector<32x32xf32>, vector<16x32xf32> -> vector<16x32xf32>
    %c6_409 = arith.constant 6 : index
    %c0_410 = arith.constant 0 : index
    %992 = vector.load %arg5[%c6_409, %c0_410] : memref<10x32xf32, #tpu.memory_space<vmem>>, vector<1x32xf32>
    %993 = vector.broadcast %992 : vector<1x32xf32> to vector<16x32xf32>
    %994 = arith.addf %991, %993 : vector<16x32xf32>
    %cst_411 = arith.constant 0.000000e+00 : f32
    %995 = vector.broadcast %cst_411 : f32 to vector<16x32xf32>
    %996 = arith.maximumf %994, %995 : vector<16x32xf32>
    %c6_412 = arith.constant 6 : index
    %c0_413 = arith.constant 0 : index
    %c0_414 = arith.constant 0 : index
    %997 = vector.load %arg6[%c6_412, %c0_413, %c0_414] : memref<10x32x32xf32, #tpu.memory_space<vmem>>, vector<1x32x32xf32>
    %998 = vector.shape_cast %997 : vector<1x32x32xf32> to vector<32x32xf32>
    %cst_415 = arith.constant dense<0.000000e+00> : vector<16x32xf32>
    %999 = tpu.matmul %996, %998, %cst_415 {dimension_numbers = #tpu.dot_dimension_numbers<[1], [0], [0], [1], [0, 0, 1, 1], [], []>} : vector<16x32xf32>, vector<32x32xf32>, vector<16x32xf32> -> vector<16x32xf32>
    %1000 = arith.addf %988, %999 : vector<16x32xf32>
    %c6_416 = arith.constant 6 : index
    %c0_417 = arith.constant 0 : index
    %1001 = vector.load %arg7[%c6_416, %c0_417] : memref<10x32xf32, #tpu.memory_space<vmem>>, vector<1x32xf32>
    %1002 = vector.broadcast %1001 : vector<1x32xf32> to vector<16x32xf32>
    %1003 = arith.addf %1000, %1002 : vector<16x32xf32>
    %1004 = vector.shape_cast %1003 : vector<16x32xf32> to vector<2x8x32xf32>
    %1005 = vector.shape_cast %587 : vector<2x8x32xf32> to vector<16x32xf32>
    %1006 = vector.shape_cast %587 : vector<2x8x32xf32> to vector<16x32xf32>
    %c28 = arith.constant 28 : index
    %c0_418 = arith.constant 0 : index
    %c0_419 = arith.constant 0 : index
    %1007 = vector.load %arg2[%c28, %c0_418, %c0_419] : memref<40x32x32xf32, #tpu.memory_space<vmem>>, vector<1x32x32xf32>
    %1008 = vector.shape_cast %1007 : vector<1x32x32xf32> to vector<32x32xf32>
    %cst_420 = arith.constant dense<0.000000e+00> : vector<16x32xf32>
    %1009 = tpu.matmul %1005, %1008, %cst_420 {dimension_numbers = #tpu.dot_dimension_numbers<[1], [0], [0], [1], [0, 0, 1, 1], [], []>} : vector<16x32xf32>, vector<32x32xf32>, vector<16x32xf32> -> vector<16x32xf32>
    %c28_421 = arith.constant 28 : index
    %c0_422 = arith.constant 0 : index
    %1010 = vector.load %arg3[%c28_421, %c0_422] : memref<40x32xf32, #tpu.memory_space<vmem>>, vector<1x32xf32>
    %1011 = vector.broadcast %1010 : vector<1x32xf32> to vector<16x32xf32>
    %1012 = arith.addf %1009, %1011 : vector<16x32xf32>
    %c29 = arith.constant 29 : index
    %c0_423 = arith.constant 0 : index
    %c0_424 = arith.constant 0 : index
    %1013 = vector.load %arg2[%c29, %c0_423, %c0_424] : memref<40x32x32xf32, #tpu.memory_space<vmem>>, vector<1x32x32xf32>
    %1014 = vector.shape_cast %1013 : vector<1x32x32xf32> to vector<32x32xf32>
    %cst_425 = arith.constant dense<0.000000e+00> : vector<16x32xf32>
    %1015 = tpu.matmul %1006, %1014, %cst_425 {dimension_numbers = #tpu.dot_dimension_numbers<[1], [0], [0], [1], [0, 0, 1, 1], [], []>} : vector<16x32xf32>, vector<32x32xf32>, vector<16x32xf32> -> vector<16x32xf32>
    %c29_426 = arith.constant 29 : index
    %c0_427 = arith.constant 0 : index
    %1016 = vector.load %arg3[%c29_426, %c0_427] : memref<40x32xf32, #tpu.memory_space<vmem>>, vector<1x32xf32>
    %1017 = vector.broadcast %1016 : vector<1x32xf32> to vector<16x32xf32>
    %1018 = arith.addf %1015, %1017 : vector<16x32xf32>
    %c30 = arith.constant 30 : index
    %c0_428 = arith.constant 0 : index
    %c0_429 = arith.constant 0 : index
    %1019 = vector.load %arg2[%c30, %c0_428, %c0_429] : memref<40x32x32xf32, #tpu.memory_space<vmem>>, vector<1x32x32xf32>
    %1020 = vector.shape_cast %1019 : vector<1x32x32xf32> to vector<32x32xf32>
    %cst_430 = arith.constant dense<0.000000e+00> : vector<16x32xf32>
    %1021 = tpu.matmul %1006, %1020, %cst_430 {dimension_numbers = #tpu.dot_dimension_numbers<[1], [0], [0], [1], [0, 0, 1, 1], [], []>} : vector<16x32xf32>, vector<32x32xf32>, vector<16x32xf32> -> vector<16x32xf32>
    %c30_431 = arith.constant 30 : index
    %c0_432 = arith.constant 0 : index
    %1022 = vector.load %arg3[%c30_431, %c0_432] : memref<40x32xf32, #tpu.memory_space<vmem>>, vector<1x32xf32>
    %1023 = vector.broadcast %1022 : vector<1x32xf32> to vector<16x32xf32>
    %1024 = arith.addf %1021, %1023 : vector<16x32xf32>
    %c31 = arith.constant 31 : index
    %c0_433 = arith.constant 0 : index
    %c0_434 = arith.constant 0 : index
    %1025 = vector.load %arg2[%c31, %c0_433, %c0_434] : memref<40x32x32xf32, #tpu.memory_space<vmem>>, vector<1x32x32xf32>
    %1026 = vector.shape_cast %1025 : vector<1x32x32xf32> to vector<32x32xf32>
    %cst_435 = arith.constant 0.000000e+00 : f32
    %1027 = vector.broadcast %cst_435 : f32 to vector<16x32xf32>
    %1028 = vector.extract_strided_slice %1012 {offsets = [0, 0], sizes = [16, 8], strides = [1, 1]} : vector<16x32xf32> to vector<16x8xf32>
    %1029 = vector.shape_cast %1028 : vector<16x8xf32> to vector<2x8x8xf32>
    %1030 = vector.extract_strided_slice %1018 {offsets = [0, 0], sizes = [16, 8], strides = [1, 1]} : vector<16x32xf32> to vector<16x8xf32>
    %1031 = vector.shape_cast %1030 : vector<16x8xf32> to vector<2x8x8xf32>
    %1032 = vector.extract_strided_slice %1024 {offsets = [0, 0], sizes = [16, 8], strides = [1, 1]} : vector<16x32xf32> to vector<16x8xf32>
    %1033 = vector.shape_cast %1032 : vector<16x8xf32> to vector<2x8x8xf32>
    "tpu.trace_start"() <{level = 10 : i32, message = "bqd,bkd->bqk"}> : () -> ()
    %cst_436 = arith.constant dense<0.000000e+00> : vector<2x8x8xf32>
    %1034 = tpu.matmul %1029, %1031, %cst_436 {dimension_numbers = #tpu.dot_dimension_numbers<[2], [2], [1], [1], [0, 0, 0, 1, 1, 1], [0], [0]>} : vector<2x8x8xf32>, vector<2x8x8xf32>, vector<2x8x8xf32> -> vector<2x8x8xf32>
    "tpu.trace_stop"() : () -> ()
    %cst_437 = arith.constant 0.176776692 : f32
    %1035 = vector.broadcast %cst_437 : f32 to vector<2x8x8xf32>
    %1036 = arith.mulf %1034, %1035 : vector<2x8x8xf32>
    %cst_438 = arith.constant dense<0xFF800000> : vector<2x8xf32>
    %1037 = vector.multi_reduction <maximumf>, %1036, %cst_438 [2] : vector<2x8x8xf32> to vector<2x8xf32>
    %1038 = vector.shape_cast %1037 : vector<2x8xf32> to vector<2x8x1xf32>
    %1039 = vector.broadcast %1038 : vector<2x8x1xf32> to vector<2x8x8xf32>
    %1040 = arith.subf %1036, %1039 : vector<2x8x8xf32>
    %1041 = math.exp %1040 : vector<2x8x8xf32>
    %cst_439 = arith.constant dense<0.000000e+00> : vector<2x8xf32>
    %1042 = vector.multi_reduction <add>, %1041, %cst_439 [2] : vector<2x8x8xf32> to vector<2x8xf32>
    %1043 = vector.shape_cast %1042 : vector<2x8xf32> to vector<2x8x1xf32>
    %1044 = tpu.reciprocal %1043 {approx = true} : vector<2x8x1xf32> -> vector<2x8x1xf32>
    %1045 = vector.broadcast %1044 : vector<2x8x1xf32> to vector<2x8x8xf32>
    %1046 = arith.mulf %1041, %1045 : vector<2x8x8xf32>
    "tpu.trace_start"() <{level = 10 : i32, message = "bqk,bkd->bqd"}> : () -> ()
    %cst_440 = arith.constant dense<0.000000e+00> : vector<2x8x8xf32>
    %1047 = tpu.matmul %1046, %1033, %cst_440 {dimension_numbers = #tpu.dot_dimension_numbers<[2], [1], [1], [2], [0, 0, 0, 1, 1, 2], [0], [0]>} : vector<2x8x8xf32>, vector<2x8x8xf32>, vector<2x8x8xf32> -> vector<2x8x8xf32>
    "tpu.trace_stop"() : () -> ()
    %1048 = vector.shape_cast %1047 : vector<2x8x8xf32> to vector<16x8xf32>
    %1049 = vector.extract_strided_slice %1026 {offsets = [0, 0], sizes = [8, 32], strides = [1, 1]} : vector<32x32xf32> to vector<8x32xf32>
    %cst_441 = arith.constant dense<0.000000e+00> : vector<16x32xf32>
    %1050 = tpu.matmul %1048, %1049, %cst_441 {dimension_numbers = #tpu.dot_dimension_numbers<[1], [0], [0], [1], [0, 0, 1, 1], [], []>} : vector<16x8xf32>, vector<8x32xf32>, vector<16x32xf32> -> vector<16x32xf32>
    %1051 = arith.addf %1027, %1050 : vector<16x32xf32>
    %1052 = vector.extract_strided_slice %1012 {offsets = [0, 8], sizes = [16, 8], strides = [1, 1]} : vector<16x32xf32> to vector<16x8xf32>
    %1053 = vector.shape_cast %1052 : vector<16x8xf32> to vector<2x8x8xf32>
    %1054 = vector.extract_strided_slice %1018 {offsets = [0, 8], sizes = [16, 8], strides = [1, 1]} : vector<16x32xf32> to vector<16x8xf32>
    %1055 = vector.shape_cast %1054 : vector<16x8xf32> to vector<2x8x8xf32>
    %1056 = vector.extract_strided_slice %1024 {offsets = [0, 8], sizes = [16, 8], strides = [1, 1]} : vector<16x32xf32> to vector<16x8xf32>
    %1057 = vector.shape_cast %1056 : vector<16x8xf32> to vector<2x8x8xf32>
    "tpu.trace_start"() <{level = 10 : i32, message = "bqd,bkd->bqk"}> : () -> ()
    %cst_442 = arith.constant dense<0.000000e+00> : vector<2x8x8xf32>
    %1058 = tpu.matmul %1053, %1055, %cst_442 {dimension_numbers = #tpu.dot_dimension_numbers<[2], [2], [1], [1], [0, 0, 0, 1, 1, 1], [0], [0]>} : vector<2x8x8xf32>, vector<2x8x8xf32>, vector<2x8x8xf32> -> vector<2x8x8xf32>
    "tpu.trace_stop"() : () -> ()
    %cst_443 = arith.constant 0.176776692 : f32
    %1059 = vector.broadcast %cst_443 : f32 to vector<2x8x8xf32>
    %1060 = arith.mulf %1058, %1059 : vector<2x8x8xf32>
    %cst_444 = arith.constant dense<0xFF800000> : vector<2x8xf32>
    %1061 = vector.multi_reduction <maximumf>, %1060, %cst_444 [2] : vector<2x8x8xf32> to vector<2x8xf32>
    %1062 = vector.shape_cast %1061 : vector<2x8xf32> to vector<2x8x1xf32>
    %1063 = vector.broadcast %1062 : vector<2x8x1xf32> to vector<2x8x8xf32>
    %1064 = arith.subf %1060, %1063 : vector<2x8x8xf32>
    %1065 = math.exp %1064 : vector<2x8x8xf32>
    %cst_445 = arith.constant dense<0.000000e+00> : vector<2x8xf32>
    %1066 = vector.multi_reduction <add>, %1065, %cst_445 [2] : vector<2x8x8xf32> to vector<2x8xf32>
    %1067 = vector.shape_cast %1066 : vector<2x8xf32> to vector<2x8x1xf32>
    %1068 = tpu.reciprocal %1067 {approx = true} : vector<2x8x1xf32> -> vector<2x8x1xf32>
    %1069 = vector.broadcast %1068 : vector<2x8x1xf32> to vector<2x8x8xf32>
    %1070 = arith.mulf %1065, %1069 : vector<2x8x8xf32>
    "tpu.trace_start"() <{level = 10 : i32, message = "bqk,bkd->bqd"}> : () -> ()
    %cst_446 = arith.constant dense<0.000000e+00> : vector<2x8x8xf32>
    %1071 = tpu.matmul %1070, %1057, %cst_446 {dimension_numbers = #tpu.dot_dimension_numbers<[2], [1], [1], [2], [0, 0, 0, 1, 1, 2], [0], [0]>} : vector<2x8x8xf32>, vector<2x8x8xf32>, vector<2x8x8xf32> -> vector<2x8x8xf32>
    "tpu.trace_stop"() : () -> ()
    %1072 = vector.shape_cast %1071 : vector<2x8x8xf32> to vector<16x8xf32>
    %1073 = vector.extract_strided_slice %1026 {offsets = [8, 0], sizes = [8, 32], strides = [1, 1]} : vector<32x32xf32> to vector<8x32xf32>
    %cst_447 = arith.constant dense<0.000000e+00> : vector<16x32xf32>
    %1074 = tpu.matmul %1072, %1073, %cst_447 {dimension_numbers = #tpu.dot_dimension_numbers<[1], [0], [0], [1], [0, 0, 1, 1], [], []>} : vector<16x8xf32>, vector<8x32xf32>, vector<16x32xf32> -> vector<16x32xf32>
    %1075 = arith.addf %1051, %1074 : vector<16x32xf32>
    %1076 = vector.extract_strided_slice %1012 {offsets = [0, 16], sizes = [16, 8], strides = [1, 1]} : vector<16x32xf32> to vector<16x8xf32>
    %1077 = vector.shape_cast %1076 : vector<16x8xf32> to vector<2x8x8xf32>
    %1078 = vector.extract_strided_slice %1018 {offsets = [0, 16], sizes = [16, 8], strides = [1, 1]} : vector<16x32xf32> to vector<16x8xf32>
    %1079 = vector.shape_cast %1078 : vector<16x8xf32> to vector<2x8x8xf32>
    %1080 = vector.extract_strided_slice %1024 {offsets = [0, 16], sizes = [16, 8], strides = [1, 1]} : vector<16x32xf32> to vector<16x8xf32>
    %1081 = vector.shape_cast %1080 : vector<16x8xf32> to vector<2x8x8xf32>
    "tpu.trace_start"() <{level = 10 : i32, message = "bqd,bkd->bqk"}> : () -> ()
    %cst_448 = arith.constant dense<0.000000e+00> : vector<2x8x8xf32>
    %1082 = tpu.matmul %1077, %1079, %cst_448 {dimension_numbers = #tpu.dot_dimension_numbers<[2], [2], [1], [1], [0, 0, 0, 1, 1, 1], [0], [0]>} : vector<2x8x8xf32>, vector<2x8x8xf32>, vector<2x8x8xf32> -> vector<2x8x8xf32>
    "tpu.trace_stop"() : () -> ()
    %cst_449 = arith.constant 0.176776692 : f32
    %1083 = vector.broadcast %cst_449 : f32 to vector<2x8x8xf32>
    %1084 = arith.mulf %1082, %1083 : vector<2x8x8xf32>
    %cst_450 = arith.constant dense<0xFF800000> : vector<2x8xf32>
    %1085 = vector.multi_reduction <maximumf>, %1084, %cst_450 [2] : vector<2x8x8xf32> to vector<2x8xf32>
    %1086 = vector.shape_cast %1085 : vector<2x8xf32> to vector<2x8x1xf32>
    %1087 = vector.broadcast %1086 : vector<2x8x1xf32> to vector<2x8x8xf32>
    %1088 = arith.subf %1084, %1087 : vector<2x8x8xf32>
    %1089 = math.exp %1088 : vector<2x8x8xf32>
    %cst_451 = arith.constant dense<0.000000e+00> : vector<2x8xf32>
    %1090 = vector.multi_reduction <add>, %1089, %cst_451 [2] : vector<2x8x8xf32> to vector<2x8xf32>
    %1091 = vector.shape_cast %1090 : vector<2x8xf32> to vector<2x8x1xf32>
    %1092 = tpu.reciprocal %1091 {approx = true} : vector<2x8x1xf32> -> vector<2x8x1xf32>
    %1093 = vector.broadcast %1092 : vector<2x8x1xf32> to vector<2x8x8xf32>
    %1094 = arith.mulf %1089, %1093 : vector<2x8x8xf32>
    "tpu.trace_start"() <{level = 10 : i32, message = "bqk,bkd->bqd"}> : () -> ()
    %cst_452 = arith.constant dense<0.000000e+00> : vector<2x8x8xf32>
    %1095 = tpu.matmul %1094, %1081, %cst_452 {dimension_numbers = #tpu.dot_dimension_numbers<[2], [1], [1], [2], [0, 0, 0, 1, 1, 2], [0], [0]>} : vector<2x8x8xf32>, vector<2x8x8xf32>, vector<2x8x8xf32> -> vector<2x8x8xf32>
    "tpu.trace_stop"() : () -> ()
    %1096 = vector.shape_cast %1095 : vector<2x8x8xf32> to vector<16x8xf32>
    %1097 = vector.extract_strided_slice %1026 {offsets = [16, 0], sizes = [8, 32], strides = [1, 1]} : vector<32x32xf32> to vector<8x32xf32>
    %cst_453 = arith.constant dense<0.000000e+00> : vector<16x32xf32>
    %1098 = tpu.matmul %1096, %1097, %cst_453 {dimension_numbers = #tpu.dot_dimension_numbers<[1], [0], [0], [1], [0, 0, 1, 1], [], []>} : vector<16x8xf32>, vector<8x32xf32>, vector<16x32xf32> -> vector<16x32xf32>
    %1099 = arith.addf %1075, %1098 : vector<16x32xf32>
    %1100 = vector.extract_strided_slice %1012 {offsets = [0, 24], sizes = [16, 8], strides = [1, 1]} : vector<16x32xf32> to vector<16x8xf32>
    %1101 = vector.shape_cast %1100 : vector<16x8xf32> to vector<2x8x8xf32>
    %1102 = vector.extract_strided_slice %1018 {offsets = [0, 24], sizes = [16, 8], strides = [1, 1]} : vector<16x32xf32> to vector<16x8xf32>
    %1103 = vector.shape_cast %1102 : vector<16x8xf32> to vector<2x8x8xf32>
    %1104 = vector.extract_strided_slice %1024 {offsets = [0, 24], sizes = [16, 8], strides = [1, 1]} : vector<16x32xf32> to vector<16x8xf32>
    %1105 = vector.shape_cast %1104 : vector<16x8xf32> to vector<2x8x8xf32>
    "tpu.trace_start"() <{level = 10 : i32, message = "bqd,bkd->bqk"}> : () -> ()
    %cst_454 = arith.constant dense<0.000000e+00> : vector<2x8x8xf32>
    %1106 = tpu.matmul %1101, %1103, %cst_454 {dimension_numbers = #tpu.dot_dimension_numbers<[2], [2], [1], [1], [0, 0, 0, 1, 1, 1], [0], [0]>} : vector<2x8x8xf32>, vector<2x8x8xf32>, vector<2x8x8xf32> -> vector<2x8x8xf32>
    "tpu.trace_stop"() : () -> ()
    %cst_455 = arith.constant 0.176776692 : f32
    %1107 = vector.broadcast %cst_455 : f32 to vector<2x8x8xf32>
    %1108 = arith.mulf %1106, %1107 : vector<2x8x8xf32>
    %cst_456 = arith.constant dense<0xFF800000> : vector<2x8xf32>
    %1109 = vector.multi_reduction <maximumf>, %1108, %cst_456 [2] : vector<2x8x8xf32> to vector<2x8xf32>
    %1110 = vector.shape_cast %1109 : vector<2x8xf32> to vector<2x8x1xf32>
    %1111 = vector.broadcast %1110 : vector<2x8x1xf32> to vector<2x8x8xf32>
    %1112 = arith.subf %1108, %1111 : vector<2x8x8xf32>
    %1113 = math.exp %1112 : vector<2x8x8xf32>
    %cst_457 = arith.constant dense<0.000000e+00> : vector<2x8xf32>
    %1114 = vector.multi_reduction <add>, %1113, %cst_457 [2] : vector<2x8x8xf32> to vector<2x8xf32>
    %1115 = vector.shape_cast %1114 : vector<2x8xf32> to vector<2x8x1xf32>
    %1116 = tpu.reciprocal %1115 {approx = true} : vector<2x8x1xf32> -> vector<2x8x1xf32>
    %1117 = vector.broadcast %1116 : vector<2x8x1xf32> to vector<2x8x8xf32>
    %1118 = arith.mulf %1113, %1117 : vector<2x8x8xf32>
    "tpu.trace_start"() <{level = 10 : i32, message = "bqk,bkd->bqd"}> : () -> ()
    %cst_458 = arith.constant dense<0.000000e+00> : vector<2x8x8xf32>
    %1119 = tpu.matmul %1118, %1105, %cst_458 {dimension_numbers = #tpu.dot_dimension_numbers<[2], [1], [1], [2], [0, 0, 0, 1, 1, 2], [0], [0]>} : vector<2x8x8xf32>, vector<2x8x8xf32>, vector<2x8x8xf32> -> vector<2x8x8xf32>
    "tpu.trace_stop"() : () -> ()
    %1120 = vector.shape_cast %1119 : vector<2x8x8xf32> to vector<16x8xf32>
    %1121 = vector.extract_strided_slice %1026 {offsets = [24, 0], sizes = [8, 32], strides = [1, 1]} : vector<32x32xf32> to vector<8x32xf32>
    %cst_459 = arith.constant dense<0.000000e+00> : vector<16x32xf32>
    %1122 = tpu.matmul %1120, %1121, %cst_459 {dimension_numbers = #tpu.dot_dimension_numbers<[1], [0], [0], [1], [0, 0, 1, 1], [], []>} : vector<16x8xf32>, vector<8x32xf32>, vector<16x32xf32> -> vector<16x32xf32>
    %1123 = arith.addf %1099, %1122 : vector<16x32xf32>
    %1124 = arith.addf %1005, %1123 : vector<16x32xf32>
    %c31_460 = arith.constant 31 : index
    %c0_461 = arith.constant 0 : index
    %1125 = vector.load %arg3[%c31_460, %c0_461] : memref<40x32xf32, #tpu.memory_space<vmem>>, vector<1x32xf32>
    %1126 = vector.broadcast %1125 : vector<1x32xf32> to vector<16x32xf32>
    %1127 = arith.addf %1124, %1126 : vector<16x32xf32>
    %c7_462 = arith.constant 7 : index
    %c0_463 = arith.constant 0 : index
    %c0_464 = arith.constant 0 : index
    %1128 = vector.load %arg4[%c7_462, %c0_463, %c0_464] : memref<10x32x32xf32, #tpu.memory_space<vmem>>, vector<1x32x32xf32>
    %1129 = vector.shape_cast %1128 : vector<1x32x32xf32> to vector<32x32xf32>
    %cst_465 = arith.constant dense<0.000000e+00> : vector<16x32xf32>
    %1130 = tpu.matmul %1127, %1129, %cst_465 {dimension_numbers = #tpu.dot_dimension_numbers<[1], [0], [0], [1], [0, 0, 1, 1], [], []>} : vector<16x32xf32>, vector<32x32xf32>, vector<16x32xf32> -> vector<16x32xf32>
    %c7_466 = arith.constant 7 : index
    %c0_467 = arith.constant 0 : index
    %1131 = vector.load %arg5[%c7_466, %c0_467] : memref<10x32xf32, #tpu.memory_space<vmem>>, vector<1x32xf32>
    %1132 = vector.broadcast %1131 : vector<1x32xf32> to vector<16x32xf32>
    %1133 = arith.addf %1130, %1132 : vector<16x32xf32>
    %cst_468 = arith.constant 0.000000e+00 : f32
    %1134 = vector.broadcast %cst_468 : f32 to vector<16x32xf32>
    %1135 = arith.maximumf %1133, %1134 : vector<16x32xf32>
    %c7_469 = arith.constant 7 : index
    %c0_470 = arith.constant 0 : index
    %c0_471 = arith.constant 0 : index
    %1136 = vector.load %arg6[%c7_469, %c0_470, %c0_471] : memref<10x32x32xf32, #tpu.memory_space<vmem>>, vector<1x32x32xf32>
    %1137 = vector.shape_cast %1136 : vector<1x32x32xf32> to vector<32x32xf32>
    %cst_472 = arith.constant dense<0.000000e+00> : vector<16x32xf32>
    %1138 = tpu.matmul %1135, %1137, %cst_472 {dimension_numbers = #tpu.dot_dimension_numbers<[1], [0], [0], [1], [0, 0, 1, 1], [], []>} : vector<16x32xf32>, vector<32x32xf32>, vector<16x32xf32> -> vector<16x32xf32>
    %1139 = arith.addf %1127, %1138 : vector<16x32xf32>
    %c7_473 = arith.constant 7 : index
    %c0_474 = arith.constant 0 : index
    %1140 = vector.load %arg7[%c7_473, %c0_474] : memref<10x32xf32, #tpu.memory_space<vmem>>, vector<1x32xf32>
    %1141 = vector.broadcast %1140 : vector<1x32xf32> to vector<16x32xf32>
    %1142 = arith.addf %1139, %1141 : vector<16x32xf32>
    %1143 = vector.shape_cast %1142 : vector<16x32xf32> to vector<2x8x32xf32>
    %c2_475 = arith.constant 2 : index
    %c0_476 = arith.constant 0 : index
    %c0_477 = arith.constant 0 : index
    %1144 = vector.load %arg8[%c2_475, %c0_476, %c0_477] : memref<4x64x32xf32, #tpu.memory_space<vmem>>, vector<1x64x32xf32>
    %1145 = vector.shape_cast %1144 : vector<1x64x32xf32> to vector<64x32xf32>
    %c3_478 = arith.constant 3 : index
    %c0_479 = arith.constant 0 : index
    %c0_480 = arith.constant 0 : index
    %1146 = vector.load %arg8[%c3_478, %c0_479, %c0_480] : memref<4x64x32xf32, #tpu.memory_space<vmem>>, vector<1x64x32xf32>
    %1147 = vector.shape_cast %1146 : vector<1x64x32xf32> to vector<64x32xf32>
    %c2_481 = arith.constant 2 : index
    %c0_482 = arith.constant 0 : index
    %1148 = vector.load %arg9[%c2_481, %c0_482] : memref<4x32xf32, #tpu.memory_space<vmem>>, vector<1x32xf32>
    %c3_483 = arith.constant 3 : index
    %c0_484 = arith.constant 0 : index
    %1149 = vector.load %arg9[%c3_483, %c0_484] : memref<4x32xf32, #tpu.memory_space<vmem>>, vector<1x32xf32>
    %1150 = vector.shape_cast %586 : vector<2x8x32xf32> to vector<16x32xf32>
    %1151 = vector.shape_cast %726 : vector<2x8x32xf32> to vector<16x32xf32>
    %1152 = vector.extract_strided_slice %1145 {offsets = [0, 0], sizes = [32, 32], strides = [1, 1]} : vector<64x32xf32> to vector<32x32xf32>
    %cst_485 = arith.constant dense<0.000000e+00> : vector<16x32xf32>
    %1153 = tpu.matmul %1151, %1152, %cst_485 {dimension_numbers = #tpu.dot_dimension_numbers<[1], [0], [0], [1], [0, 0, 1, 1], [], []>} : vector<16x32xf32>, vector<32x32xf32>, vector<16x32xf32> -> vector<16x32xf32>
    %1154 = vector.shape_cast %865 : vector<2x8x32xf32> to vector<16x32xf32>
    %1155 = vector.extract_strided_slice %1145 {offsets = [32, 0], sizes = [32, 32], strides = [1, 1]} : vector<64x32xf32> to vector<32x32xf32>
    %cst_486 = arith.constant dense<0.000000e+00> : vector<16x32xf32>
    %1156 = tpu.matmul %1154, %1155, %cst_486 {dimension_numbers = #tpu.dot_dimension_numbers<[1], [0], [0], [1], [0, 0, 1, 1], [], []>} : vector<16x32xf32>, vector<32x32xf32>, vector<16x32xf32> -> vector<16x32xf32>
    %1157 = arith.addf %1153, %1156 : vector<16x32xf32>
    %1158 = vector.broadcast %1148 : vector<1x32xf32> to vector<16x32xf32>
    %1159 = arith.addf %1157, %1158 : vector<16x32xf32>
    %1160 = arith.addf %1150, %1159 : vector<16x32xf32>
    %1161 = vector.shape_cast %587 : vector<2x8x32xf32> to vector<16x32xf32>
    %1162 = vector.shape_cast %1143 : vector<2x8x32xf32> to vector<16x32xf32>
    %1163 = vector.extract_strided_slice %1147 {offsets = [0, 0], sizes = [32, 32], strides = [1, 1]} : vector<64x32xf32> to vector<32x32xf32>
    %cst_487 = arith.constant dense<0.000000e+00> : vector<16x32xf32>
    %1164 = tpu.matmul %1162, %1163, %cst_487 {dimension_numbers = #tpu.dot_dimension_numbers<[1], [0], [0], [1], [0, 0, 1, 1], [], []>} : vector<16x32xf32>, vector<32x32xf32>, vector<16x32xf32> -> vector<16x32xf32>
    %1165 = vector.shape_cast %1004 : vector<2x8x32xf32> to vector<16x32xf32>
    %1166 = vector.extract_strided_slice %1147 {offsets = [32, 0], sizes = [32, 32], strides = [1, 1]} : vector<64x32xf32> to vector<32x32xf32>
    %cst_488 = arith.constant dense<0.000000e+00> : vector<16x32xf32>
    %1167 = tpu.matmul %1165, %1166, %cst_488 {dimension_numbers = #tpu.dot_dimension_numbers<[1], [0], [0], [1], [0, 0, 1, 1], [], []>} : vector<16x32xf32>, vector<32x32xf32>, vector<16x32xf32> -> vector<16x32xf32>
    %1168 = arith.addf %1164, %1167 : vector<16x32xf32>
    %1169 = vector.broadcast %1149 : vector<1x32xf32> to vector<16x32xf32>
    %1170 = arith.addf %1168, %1169 : vector<16x32xf32>
    %1171 = arith.addf %1161, %1170 : vector<16x32xf32>
    %1172 = vector.shape_cast %1160 : vector<16x32xf32> to vector<2x8x32xf32>
    %1173 = vector.shape_cast %1171 : vector<16x32xf32> to vector<2x8x32xf32>
    %c0_489 = arith.constant 0 : index
    %c0_490 = arith.constant 0 : index
    %c0_491 = arith.constant 0 : index
    %1174 = vector.load %arg14[%c0_489, %c0_490, %c0_491] : memref<2x8x32xf32, #tpu.memory_space<vmem>>, vector<2x8x32xf32>
    tpu.vector_store %arg14[%c0_489, %c0_490, %c0_491], %1172 {strides = array<i32>} : memref<2x8x32xf32, #tpu.memory_space<vmem>>, vector<2x8x32xf32>,
    %c0_492 = arith.constant 0 : index
    %c0_493 = arith.constant 0 : index
    %c0_494 = arith.constant 0 : index
    %1175 = vector.load %arg15[%c0_492, %c0_493, %c0_494] : memref<2x8x32xf32, #tpu.memory_space<vmem>>, vector<2x8x32xf32>
    tpu.vector_store %arg15[%c0_492, %c0_493, %c0_494], %1173 {strides = array<i32>} : memref<2x8x32xf32, #tpu.memory_space<vmem>>, vector<2x8x32xf32>,
    %c0_495 = arith.constant 0 : index
    %c0_496 = arith.constant 0 : index
    %1176 = vector.load %arg10[%c0_495, %c0_496] : memref<2x32xf32, #tpu.memory_space<vmem>>, vector<1x32xf32>
    %1177 = vector.shape_cast %1176 : vector<1x32xf32> to vector<1x1x32xf32>
    %1178 = vector.shape_cast %1177 : vector<1x1x32xf32> to vector<1x1x32xf32>
    %1179 = vector.broadcast %1178 : vector<1x1x32xf32> to vector<2x1x32xf32>
    %c1_497 = arith.constant 1 : index
    %c0_498 = arith.constant 0 : index
    %1180 = vector.load %arg10[%c1_497, %c0_498] : memref<2x32xf32, #tpu.memory_space<vmem>>, vector<1x32xf32>
    %1181 = vector.shape_cast %1180 : vector<1x32xf32> to vector<1x1x32xf32>
    %1182 = vector.shape_cast %1181 : vector<1x1x32xf32> to vector<1x1x32xf32>
    %1183 = vector.broadcast %1182 : vector<1x1x32xf32> to vector<2x1x32xf32>
    %1184 = vector.shape_cast %1179 : vector<2x1x32xf32> to vector<2x32xf32>
    %1185 = vector.shape_cast %1172 : vector<2x8x32xf32> to vector<16x32xf32>
    %c32 = arith.constant 32 : index
    %c0_499 = arith.constant 0 : index
    %c0_500 = arith.constant 0 : index
    %1186 = vector.load %arg2[%c32, %c0_499, %c0_500] : memref<40x32x32xf32, #tpu.memory_space<vmem>>, vector<1x32x32xf32>
    %1187 = vector.shape_cast %1186 : vector<1x32x32xf32> to vector<32x32xf32>
    %cst_501 = arith.constant dense<0.000000e+00> : vector<2x32xf32>
    %1188 = tpu.matmul %1184, %1187, %cst_501 {dimension_numbers = #tpu.dot_dimension_numbers<[1], [0], [0], [1], [0, 0, 1, 1], [], []>} : vector<2x32xf32>, vector<32x32xf32>, vector<2x32xf32> -> vector<2x32xf32>
    %c32_502 = arith.constant 32 : index
    %c0_503 = arith.constant 0 : index
    %1189 = vector.load %arg3[%c32_502, %c0_503] : memref<40x32xf32, #tpu.memory_space<vmem>>, vector<1x32xf32>
    %1190 = vector.broadcast %1189 : vector<1x32xf32> to vector<2x32xf32>
    %1191 = arith.addf %1188, %1190 : vector<2x32xf32>
    %c33 = arith.constant 33 : index
    %c0_504 = arith.constant 0 : index
    %c0_505 = arith.constant 0 : index
    %1192 = vector.load %arg2[%c33, %c0_504, %c0_505] : memref<40x32x32xf32, #tpu.memory_space<vmem>>, vector<1x32x32xf32>
    %1193 = vector.shape_cast %1192 : vector<1x32x32xf32> to vector<32x32xf32>
    %cst_506 = arith.constant dense<0.000000e+00> : vector<16x32xf32>
    %1194 = tpu.matmul %1185, %1193, %cst_506 {dimension_numbers = #tpu.dot_dimension_numbers<[1], [0], [0], [1], [0, 0, 1, 1], [], []>} : vector<16x32xf32>, vector<32x32xf32>, vector<16x32xf32> -> vector<16x32xf32>
    %c33_507 = arith.constant 33 : index
    %c0_508 = arith.constant 0 : index
    %1195 = vector.load %arg3[%c33_507, %c0_508] : memref<40x32xf32, #tpu.memory_space<vmem>>, vector<1x32xf32>
    %1196 = vector.broadcast %1195 : vector<1x32xf32> to vector<16x32xf32>
    %1197 = arith.addf %1194, %1196 : vector<16x32xf32>
    %c34 = arith.constant 34 : index
    %c0_509 = arith.constant 0 : index
    %c0_510 = arith.constant 0 : index
    %1198 = vector.load %arg2[%c34, %c0_509, %c0_510] : memref<40x32x32xf32, #tpu.memory_space<vmem>>, vector<1x32x32xf32>
    %1199 = vector.shape_cast %1198 : vector<1x32x32xf32> to vector<32x32xf32>
    %cst_511 = arith.constant dense<0.000000e+00> : vector<16x32xf32>
    %1200 = tpu.matmul %1185, %1199, %cst_511 {dimension_numbers = #tpu.dot_dimension_numbers<[1], [0], [0], [1], [0, 0, 1, 1], [], []>} : vector<16x32xf32>, vector<32x32xf32>, vector<16x32xf32> -> vector<16x32xf32>
    %c34_512 = arith.constant 34 : index
    %c0_513 = arith.constant 0 : index
    %1201 = vector.load %arg3[%c34_512, %c0_513] : memref<40x32xf32, #tpu.memory_space<vmem>>, vector<1x32xf32>
    %1202 = vector.broadcast %1201 : vector<1x32xf32> to vector<16x32xf32>
    %1203 = arith.addf %1200, %1202 : vector<16x32xf32>
    %c35 = arith.constant 35 : index
    %c0_514 = arith.constant 0 : index
    %c0_515 = arith.constant 0 : index
    %1204 = vector.load %arg2[%c35, %c0_514, %c0_515] : memref<40x32x32xf32, #tpu.memory_space<vmem>>, vector<1x32x32xf32>
    %1205 = vector.shape_cast %1204 : vector<1x32x32xf32> to vector<32x32xf32>
    %cst_516 = arith.constant 0.000000e+00 : f32
    %1206 = vector.broadcast %cst_516 : f32 to vector<2x32xf32>
    %1207 = vector.extract_strided_slice %1191 {offsets = [0, 0], sizes = [2, 8], strides = [1, 1]} : vector<2x32xf32> to vector<2x8xf32>
    %1208 = vector.shape_cast %1207 : vector<2x8xf32> to vector<2x1x8xf32>
    %1209 = vector.extract_strided_slice %1197 {offsets = [0, 0], sizes = [16, 8], strides = [1, 1]} : vector<16x32xf32> to vector<16x8xf32>
    %1210 = vector.shape_cast %1209 : vector<16x8xf32> to vector<2x8x8xf32>
    %1211 = vector.extract_strided_slice %1203 {offsets = [0, 0], sizes = [16, 8], strides = [1, 1]} : vector<16x32xf32> to vector<16x8xf32>
    %1212 = vector.shape_cast %1211 : vector<16x8xf32> to vector<2x8x8xf32>
    "tpu.trace_start"() <{level = 10 : i32, message = "bqd,bkd->bqk"}> : () -> ()
    %cst_517 = arith.constant dense<0.000000e+00> : vector<2x1x8xf32>
    %1213 = tpu.matmul %1208, %1210, %cst_517 {dimension_numbers = #tpu.dot_dimension_numbers<[2], [2], [1], [1], [0, 0, 0, 1, 1, 1], [0], [0]>} : vector<2x1x8xf32>, vector<2x8x8xf32>, vector<2x1x8xf32> -> vector<2x1x8xf32>
    "tpu.trace_stop"() : () -> ()
    %cst_518 = arith.constant 0.176776692 : f32
    %1214 = vector.broadcast %cst_518 : f32 to vector<2x1x8xf32>
    %1215 = arith.mulf %1213, %1214 : vector<2x1x8xf32>
    %cst_519 = arith.constant dense<0xFF800000> : vector<2x1xf32>
    %1216 = vector.multi_reduction <maximumf>, %1215, %cst_519 [2] : vector<2x1x8xf32> to vector<2x1xf32>
    %1217 = vector.shape_cast %1216 : vector<2x1xf32> to vector<2x1x1xf32>
    %1218 = vector.broadcast %1217 : vector<2x1x1xf32> to vector<2x1x8xf32>
    %1219 = arith.subf %1215, %1218 : vector<2x1x8xf32>
    %1220 = math.exp %1219 : vector<2x1x8xf32>
    %cst_520 = arith.constant dense<0.000000e+00> : vector<2x1xf32>
    %1221 = vector.multi_reduction <add>, %1220, %cst_520 [2] : vector<2x1x8xf32> to vector<2x1xf32>
    %1222 = vector.shape_cast %1221 : vector<2x1xf32> to vector<2x1x1xf32>
    %1223 = tpu.reciprocal %1222 {approx = true} : vector<2x1x1xf32> -> vector<2x1x1xf32>
    %1224 = vector.broadcast %1223 : vector<2x1x1xf32> to vector<2x1x8xf32>
    %1225 = arith.mulf %1220, %1224 : vector<2x1x8xf32>
    "tpu.trace_start"() <{level = 10 : i32, message = "bqk,bkd->bqd"}> : () -> ()
    %cst_521 = arith.constant dense<0.000000e+00> : vector<2x1x8xf32>
    %1226 = tpu.matmul %1225, %1212, %cst_521 {dimension_numbers = #tpu.dot_dimension_numbers<[2], [1], [1], [2], [0, 0, 0, 1, 1, 2], [0], [0]>} : vector<2x1x8xf32>, vector<2x8x8xf32>, vector<2x1x8xf32> -> vector<2x1x8xf32>
    "tpu.trace_stop"() : () -> ()
    %1227 = vector.shape_cast %1226 : vector<2x1x8xf32> to vector<2x8xf32>
    %1228 = vector.extract_strided_slice %1205 {offsets = [0, 0], sizes = [8, 32], strides = [1, 1]} : vector<32x32xf32> to vector<8x32xf32>
    %cst_522 = arith.constant dense<0.000000e+00> : vector<2x32xf32>
    %1229 = tpu.matmul %1227, %1228, %cst_522 {dimension_numbers = #tpu.dot_dimension_numbers<[1], [0], [0], [1], [0, 0, 1, 1], [], []>} : vector<2x8xf32>, vector<8x32xf32>, vector<2x32xf32> -> vector<2x32xf32>
    %1230 = arith.addf %1206, %1229 : vector<2x32xf32>
    %1231 = vector.extract_strided_slice %1191 {offsets = [0, 8], sizes = [2, 8], strides = [1, 1]} : vector<2x32xf32> to vector<2x8xf32>
    %1232 = vector.shape_cast %1231 : vector<2x8xf32> to vector<2x1x8xf32>
    %1233 = vector.extract_strided_slice %1197 {offsets = [0, 8], sizes = [16, 8], strides = [1, 1]} : vector<16x32xf32> to vector<16x8xf32>
    %1234 = vector.shape_cast %1233 : vector<16x8xf32> to vector<2x8x8xf32>
    %1235 = vector.extract_strided_slice %1203 {offsets = [0, 8], sizes = [16, 8], strides = [1, 1]} : vector<16x32xf32> to vector<16x8xf32>
    %1236 = vector.shape_cast %1235 : vector<16x8xf32> to vector<2x8x8xf32>
    "tpu.trace_start"() <{level = 10 : i32, message = "bqd,bkd->bqk"}> : () -> ()
    %cst_523 = arith.constant dense<0.000000e+00> : vector<2x1x8xf32>
    %1237 = tpu.matmul %1232, %1234, %cst_523 {dimension_numbers = #tpu.dot_dimension_numbers<[2], [2], [1], [1], [0, 0, 0, 1, 1, 1], [0], [0]>} : vector<2x1x8xf32>, vector<2x8x8xf32>, vector<2x1x8xf32> -> vector<2x1x8xf32>
    "tpu.trace_stop"() : () -> ()
    %cst_524 = arith.constant 0.176776692 : f32
    %1238 = vector.broadcast %cst_524 : f32 to vector<2x1x8xf32>
    %1239 = arith.mulf %1237, %1238 : vector<2x1x8xf32>
    %cst_525 = arith.constant dense<0xFF800000> : vector<2x1xf32>
    %1240 = vector.multi_reduction <maximumf>, %1239, %cst_525 [2] : vector<2x1x8xf32> to vector<2x1xf32>
    %1241 = vector.shape_cast %1240 : vector<2x1xf32> to vector<2x1x1xf32>
    %1242 = vector.broadcast %1241 : vector<2x1x1xf32> to vector<2x1x8xf32>
    %1243 = arith.subf %1239, %1242 : vector<2x1x8xf32>
    %1244 = math.exp %1243 : vector<2x1x8xf32>
    %cst_526 = arith.constant dense<0.000000e+00> : vector<2x1xf32>
    %1245 = vector.multi_reduction <add>, %1244, %cst_526 [2] : vector<2x1x8xf32> to vector<2x1xf32>
    %1246 = vector.shape_cast %1245 : vector<2x1xf32> to vector<2x1x1xf32>
    %1247 = tpu.reciprocal %1246 {approx = true} : vector<2x1x1xf32> -> vector<2x1x1xf32>
    %1248 = vector.broadcast %1247 : vector<2x1x1xf32> to vector<2x1x8xf32>
    %1249 = arith.mulf %1244, %1248 : vector<2x1x8xf32>
    "tpu.trace_start"() <{level = 10 : i32, message = "bqk,bkd->bqd"}> : () -> ()
    %cst_527 = arith.constant dense<0.000000e+00> : vector<2x1x8xf32>
    %1250 = tpu.matmul %1249, %1236, %cst_527 {dimension_numbers = #tpu.dot_dimension_numbers<[2], [1], [1], [2], [0, 0, 0, 1, 1, 2], [0], [0]>} : vector<2x1x8xf32>, vector<2x8x8xf32>, vector<2x1x8xf32> -> vector<2x1x8xf32>
    "tpu.trace_stop"() : () -> ()
    %1251 = vector.shape_cast %1250 : vector<2x1x8xf32> to vector<2x8xf32>
    %1252 = vector.extract_strided_slice %1205 {offsets = [8, 0], sizes = [8, 32], strides = [1, 1]} : vector<32x32xf32> to vector<8x32xf32>
    %cst_528 = arith.constant dense<0.000000e+00> : vector<2x32xf32>
    %1253 = tpu.matmul %1251, %1252, %cst_528 {dimension_numbers = #tpu.dot_dimension_numbers<[1], [0], [0], [1], [0, 0, 1, 1], [], []>} : vector<2x8xf32>, vector<8x32xf32>, vector<2x32xf32> -> vector<2x32xf32>
    %1254 = arith.addf %1230, %1253 : vector<2x32xf32>
    %1255 = vector.extract_strided_slice %1191 {offsets = [0, 16], sizes = [2, 8], strides = [1, 1]} : vector<2x32xf32> to vector<2x8xf32>
    %1256 = vector.shape_cast %1255 : vector<2x8xf32> to vector<2x1x8xf32>
    %1257 = vector.extract_strided_slice %1197 {offsets = [0, 16], sizes = [16, 8], strides = [1, 1]} : vector<16x32xf32> to vector<16x8xf32>
    %1258 = vector.shape_cast %1257 : vector<16x8xf32> to vector<2x8x8xf32>
    %1259 = vector.extract_strided_slice %1203 {offsets = [0, 16], sizes = [16, 8], strides = [1, 1]} : vector<16x32xf32> to vector<16x8xf32>
    %1260 = vector.shape_cast %1259 : vector<16x8xf32> to vector<2x8x8xf32>
    "tpu.trace_start"() <{level = 10 : i32, message = "bqd,bkd->bqk"}> : () -> ()
    %cst_529 = arith.constant dense<0.000000e+00> : vector<2x1x8xf32>
    %1261 = tpu.matmul %1256, %1258, %cst_529 {dimension_numbers = #tpu.dot_dimension_numbers<[2], [2], [1], [1], [0, 0, 0, 1, 1, 1], [0], [0]>} : vector<2x1x8xf32>, vector<2x8x8xf32>, vector<2x1x8xf32> -> vector<2x1x8xf32>
    "tpu.trace_stop"() : () -> ()
    %cst_530 = arith.constant 0.176776692 : f32
    %1262 = vector.broadcast %cst_530 : f32 to vector<2x1x8xf32>
    %1263 = arith.mulf %1261, %1262 : vector<2x1x8xf32>
    %cst_531 = arith.constant dense<0xFF800000> : vector<2x1xf32>
    %1264 = vector.multi_reduction <maximumf>, %1263, %cst_531 [2] : vector<2x1x8xf32> to vector<2x1xf32>
    %1265 = vector.shape_cast %1264 : vector<2x1xf32> to vector<2x1x1xf32>
    %1266 = vector.broadcast %1265 : vector<2x1x1xf32> to vector<2x1x8xf32>
    %1267 = arith.subf %1263, %1266 : vector<2x1x8xf32>
    %1268 = math.exp %1267 : vector<2x1x8xf32>
    %cst_532 = arith.constant dense<0.000000e+00> : vector<2x1xf32>
    %1269 = vector.multi_reduction <add>, %1268, %cst_532 [2] : vector<2x1x8xf32> to vector<2x1xf32>
    %1270 = vector.shape_cast %1269 : vector<2x1xf32> to vector<2x1x1xf32>
    %1271 = tpu.reciprocal %1270 {approx = true} : vector<2x1x1xf32> -> vector<2x1x1xf32>
    %1272 = vector.broadcast %1271 : vector<2x1x1xf32> to vector<2x1x8xf32>
    %1273 = arith.mulf %1268, %1272 : vector<2x1x8xf32>
    "tpu.trace_start"() <{level = 10 : i32, message = "bqk,bkd->bqd"}> : () -> ()
    %cst_533 = arith.constant dense<0.000000e+00> : vector<2x1x8xf32>
    %1274 = tpu.matmul %1273, %1260, %cst_533 {dimension_numbers = #tpu.dot_dimension_numbers<[2], [1], [1], [2], [0, 0, 0, 1, 1, 2], [0], [0]>} : vector<2x1x8xf32>, vector<2x8x8xf32>, vector<2x1x8xf32> -> vector<2x1x8xf32>
    "tpu.trace_stop"() : () -> ()
    %1275 = vector.shape_cast %1274 : vector<2x1x8xf32> to vector<2x8xf32>
    %1276 = vector.extract_strided_slice %1205 {offsets = [16, 0], sizes = [8, 32], strides = [1, 1]} : vector<32x32xf32> to vector<8x32xf32>
    %cst_534 = arith.constant dense<0.000000e+00> : vector<2x32xf32>
    %1277 = tpu.matmul %1275, %1276, %cst_534 {dimension_numbers = #tpu.dot_dimension_numbers<[1], [0], [0], [1], [0, 0, 1, 1], [], []>} : vector<2x8xf32>, vector<8x32xf32>, vector<2x32xf32> -> vector<2x32xf32>
    %1278 = arith.addf %1254, %1277 : vector<2x32xf32>
    %1279 = vector.extract_strided_slice %1191 {offsets = [0, 24], sizes = [2, 8], strides = [1, 1]} : vector<2x32xf32> to vector<2x8xf32>
    %1280 = vector.shape_cast %1279 : vector<2x8xf32> to vector<2x1x8xf32>
    %1281 = vector.extract_strided_slice %1197 {offsets = [0, 24], sizes = [16, 8], strides = [1, 1]} : vector<16x32xf32> to vector<16x8xf32>
    %1282 = vector.shape_cast %1281 : vector<16x8xf32> to vector<2x8x8xf32>
    %1283 = vector.extract_strided_slice %1203 {offsets = [0, 24], sizes = [16, 8], strides = [1, 1]} : vector<16x32xf32> to vector<16x8xf32>
    %1284 = vector.shape_cast %1283 : vector<16x8xf32> to vector<2x8x8xf32>
    "tpu.trace_start"() <{level = 10 : i32, message = "bqd,bkd->bqk"}> : () -> ()
    %cst_535 = arith.constant dense<0.000000e+00> : vector<2x1x8xf32>
    %1285 = tpu.matmul %1280, %1282, %cst_535 {dimension_numbers = #tpu.dot_dimension_numbers<[2], [2], [1], [1], [0, 0, 0, 1, 1, 1], [0], [0]>} : vector<2x1x8xf32>, vector<2x8x8xf32>, vector<2x1x8xf32> -> vector<2x1x8xf32>
    "tpu.trace_stop"() : () -> ()
    %cst_536 = arith.constant 0.176776692 : f32
    %1286 = vector.broadcast %cst_536 : f32 to vector<2x1x8xf32>
    %1287 = arith.mulf %1285, %1286 : vector<2x1x8xf32>
    %cst_537 = arith.constant dense<0xFF800000> : vector<2x1xf32>
    %1288 = vector.multi_reduction <maximumf>, %1287, %cst_537 [2] : vector<2x1x8xf32> to vector<2x1xf32>
    %1289 = vector.shape_cast %1288 : vector<2x1xf32> to vector<2x1x1xf32>
    %1290 = vector.broadcast %1289 : vector<2x1x1xf32> to vector<2x1x8xf32>
    %1291 = arith.subf %1287, %1290 : vector<2x1x8xf32>
    %1292 = math.exp %1291 : vector<2x1x8xf32>
    %cst_538 = arith.constant dense<0.000000e+00> : vector<2x1xf32>
    %1293 = vector.multi_reduction <add>, %1292, %cst_538 [2] : vector<2x1x8xf32> to vector<2x1xf32>
    %1294 = vector.shape_cast %1293 : vector<2x1xf32> to vector<2x1x1xf32>
    %1295 = tpu.reciprocal %1294 {approx = true} : vector<2x1x1xf32> -> vector<2x1x1xf32>
    %1296 = vector.broadcast %1295 : vector<2x1x1xf32> to vector<2x1x8xf32>
    %1297 = arith.mulf %1292, %1296 : vector<2x1x8xf32>
    "tpu.trace_start"() <{level = 10 : i32, message = "bqk,bkd->bqd"}> : () -> ()
    %cst_539 = arith.constant dense<0.000000e+00> : vector<2x1x8xf32>
    %1298 = tpu.matmul %1297, %1284, %cst_539 {dimension_numbers = #tpu.dot_dimension_numbers<[2], [1], [1], [2], [0, 0, 0, 1, 1, 2], [0], [0]>} : vector<2x1x8xf32>, vector<2x8x8xf32>, vector<2x1x8xf32> -> vector<2x1x8xf32>
    "tpu.trace_stop"() : () -> ()
    %1299 = vector.shape_cast %1298 : vector<2x1x8xf32> to vector<2x8xf32>
    %1300 = vector.extract_strided_slice %1205 {offsets = [24, 0], sizes = [8, 32], strides = [1, 1]} : vector<32x32xf32> to vector<8x32xf32>
    %cst_540 = arith.constant dense<0.000000e+00> : vector<2x32xf32>
    %1301 = tpu.matmul %1299, %1300, %cst_540 {dimension_numbers = #tpu.dot_dimension_numbers<[1], [0], [0], [1], [0, 0, 1, 1], [], []>} : vector<2x8xf32>, vector<8x32xf32>, vector<2x32xf32> -> vector<2x32xf32>
    %1302 = arith.addf %1278, %1301 : vector<2x32xf32>
    %1303 = arith.addf %1184, %1302 : vector<2x32xf32>
    %c35_541 = arith.constant 35 : index
    %c0_542 = arith.constant 0 : index
    %1304 = vector.load %arg3[%c35_541, %c0_542] : memref<40x32xf32, #tpu.memory_space<vmem>>, vector<1x32xf32>
    %1305 = vector.broadcast %1304 : vector<1x32xf32> to vector<2x32xf32>
    %1306 = arith.addf %1303, %1305 : vector<2x32xf32>
    %c8_543 = arith.constant 8 : index
    %c0_544 = arith.constant 0 : index
    %c0_545 = arith.constant 0 : index
    %1307 = vector.load %arg4[%c8_543, %c0_544, %c0_545] : memref<10x32x32xf32, #tpu.memory_space<vmem>>, vector<1x32x32xf32>
    %1308 = vector.shape_cast %1307 : vector<1x32x32xf32> to vector<32x32xf32>
    %cst_546 = arith.constant dense<0.000000e+00> : vector<2x32xf32>
    %1309 = tpu.matmul %1306, %1308, %cst_546 {dimension_numbers = #tpu.dot_dimension_numbers<[1], [0], [0], [1], [0, 0, 1, 1], [], []>} : vector<2x32xf32>, vector<32x32xf32>, vector<2x32xf32> -> vector<2x32xf32>
    %c8_547 = arith.constant 8 : index
    %c0_548 = arith.constant 0 : index
    %1310 = vector.load %arg5[%c8_547, %c0_548] : memref<10x32xf32, #tpu.memory_space<vmem>>, vector<1x32xf32>
    %1311 = vector.broadcast %1310 : vector<1x32xf32> to vector<2x32xf32>
    %1312 = arith.addf %1309, %1311 : vector<2x32xf32>
    %cst_549 = arith.constant 0.000000e+00 : f32
    %1313 = vector.broadcast %cst_549 : f32 to vector<2x32xf32>
    %1314 = arith.maximumf %1312, %1313 : vector<2x32xf32>
    %c8_550 = arith.constant 8 : index
    %c0_551 = arith.constant 0 : index
    %c0_552 = arith.constant 0 : index
    %1315 = vector.load %arg6[%c8_550, %c0_551, %c0_552] : memref<10x32x32xf32, #tpu.memory_space<vmem>>, vector<1x32x32xf32>
    %1316 = vector.shape_cast %1315 : vector<1x32x32xf32> to vector<32x32xf32>
    %cst_553 = arith.constant dense<0.000000e+00> : vector<2x32xf32>
    %1317 = tpu.matmul %1314, %1316, %cst_553 {dimension_numbers = #tpu.dot_dimension_numbers<[1], [0], [0], [1], [0, 0, 1, 1], [], []>} : vector<2x32xf32>, vector<32x32xf32>, vector<2x32xf32> -> vector<2x32xf32>
    %1318 = arith.addf %1306, %1317 : vector<2x32xf32>
    %c8_554 = arith.constant 8 : index
    %c0_555 = arith.constant 0 : index
    %1319 = vector.load %arg7[%c8_554, %c0_555] : memref<10x32xf32, #tpu.memory_space<vmem>>, vector<1x32xf32>
    %1320 = vector.broadcast %1319 : vector<1x32xf32> to vector<2x32xf32>
    %1321 = arith.addf %1318, %1320 : vector<2x32xf32>
    %1322 = vector.shape_cast %1321 : vector<2x32xf32> to vector<2x1x32xf32>
    %1323 = vector.shape_cast %1322 : vector<2x1x32xf32> to vector<2x32xf32>
    %1324 = vector.shape_cast %1183 : vector<2x1x32xf32> to vector<2x32xf32>
    %1325 = vector.shape_cast %1173 : vector<2x8x32xf32> to vector<16x32xf32>
    %c36 = arith.constant 36 : index
    %c0_556 = arith.constant 0 : index
    %c0_557 = arith.constant 0 : index
    %1326 = vector.load %arg2[%c36, %c0_556, %c0_557] : memref<40x32x32xf32, #tpu.memory_space<vmem>>, vector<1x32x32xf32>
    %1327 = vector.shape_cast %1326 : vector<1x32x32xf32> to vector<32x32xf32>
    %cst_558 = arith.constant dense<0.000000e+00> : vector<2x32xf32>
    %1328 = tpu.matmul %1324, %1327, %cst_558 {dimension_numbers = #tpu.dot_dimension_numbers<[1], [0], [0], [1], [0, 0, 1, 1], [], []>} : vector<2x32xf32>, vector<32x32xf32>, vector<2x32xf32> -> vector<2x32xf32>
    %c36_559 = arith.constant 36 : index
    %c0_560 = arith.constant 0 : index
    %1329 = vector.load %arg3[%c36_559, %c0_560] : memref<40x32xf32, #tpu.memory_space<vmem>>, vector<1x32xf32>
    %1330 = vector.broadcast %1329 : vector<1x32xf32> to vector<2x32xf32>
    %1331 = arith.addf %1328, %1330 : vector<2x32xf32>
    %c37 = arith.constant 37 : index
    %c0_561 = arith.constant 0 : index
    %c0_562 = arith.constant 0 : index
    %1332 = vector.load %arg2[%c37, %c0_561, %c0_562] : memref<40x32x32xf32, #tpu.memory_space<vmem>>, vector<1x32x32xf32>
    %1333 = vector.shape_cast %1332 : vector<1x32x32xf32> to vector<32x32xf32>
    %cst_563 = arith.constant dense<0.000000e+00> : vector<16x32xf32>
    %1334 = tpu.matmul %1325, %1333, %cst_563 {dimension_numbers = #tpu.dot_dimension_numbers<[1], [0], [0], [1], [0, 0, 1, 1], [], []>} : vector<16x32xf32>, vector<32x32xf32>, vector<16x32xf32> -> vector<16x32xf32>
    %c37_564 = arith.constant 37 : index
    %c0_565 = arith.constant 0 : index
    %1335 = vector.load %arg3[%c37_564, %c0_565] : memref<40x32xf32, #tpu.memory_space<vmem>>, vector<1x32xf32>
    %1336 = vector.broadcast %1335 : vector<1x32xf32> to vector<16x32xf32>
    %1337 = arith.addf %1334, %1336 : vector<16x32xf32>
    %c38 = arith.constant 38 : index
    %c0_566 = arith.constant 0 : index
    %c0_567 = arith.constant 0 : index
    %1338 = vector.load %arg2[%c38, %c0_566, %c0_567] : memref<40x32x32xf32, #tpu.memory_space<vmem>>, vector<1x32x32xf32>
    %1339 = vector.shape_cast %1338 : vector<1x32x32xf32> to vector<32x32xf32>
    %cst_568 = arith.constant dense<0.000000e+00> : vector<16x32xf32>
    %1340 = tpu.matmul %1325, %1339, %cst_568 {dimension_numbers = #tpu.dot_dimension_numbers<[1], [0], [0], [1], [0, 0, 1, 1], [], []>} : vector<16x32xf32>, vector<32x32xf32>, vector<16x32xf32> -> vector<16x32xf32>
    %c38_569 = arith.constant 38 : index
    %c0_570 = arith.constant 0 : index
    %1341 = vector.load %arg3[%c38_569, %c0_570] : memref<40x32xf32, #tpu.memory_space<vmem>>, vector<1x32xf32>
    %1342 = vector.broadcast %1341 : vector<1x32xf32> to vector<16x32xf32>
    %1343 = arith.addf %1340, %1342 : vector<16x32xf32>
    %c39 = arith.constant 39 : index
    %c0_571 = arith.constant 0 : index
    %c0_572 = arith.constant 0 : index
    %1344 = vector.load %arg2[%c39, %c0_571, %c0_572] : memref<40x32x32xf32, #tpu.memory_space<vmem>>, vector<1x32x32xf32>
    %1345 = vector.shape_cast %1344 : vector<1x32x32xf32> to vector<32x32xf32>
    %cst_573 = arith.constant 0.000000e+00 : f32
    %1346 = vector.broadcast %cst_573 : f32 to vector<2x32xf32>
    %1347 = vector.extract_strided_slice %1331 {offsets = [0, 0], sizes = [2, 8], strides = [1, 1]} : vector<2x32xf32> to vector<2x8xf32>
    %1348 = vector.shape_cast %1347 : vector<2x8xf32> to vector<2x1x8xf32>
    %1349 = vector.extract_strided_slice %1337 {offsets = [0, 0], sizes = [16, 8], strides = [1, 1]} : vector<16x32xf32> to vector<16x8xf32>
    %1350 = vector.shape_cast %1349 : vector<16x8xf32> to vector<2x8x8xf32>
    %1351 = vector.extract_strided_slice %1343 {offsets = [0, 0], sizes = [16, 8], strides = [1, 1]} : vector<16x32xf32> to vector<16x8xf32>
    %1352 = vector.shape_cast %1351 : vector<16x8xf32> to vector<2x8x8xf32>
    "tpu.trace_start"() <{level = 10 : i32, message = "bqd,bkd->bqk"}> : () -> ()
    %cst_574 = arith.constant dense<0.000000e+00> : vector<2x1x8xf32>
    %1353 = tpu.matmul %1348, %1350, %cst_574 {dimension_numbers = #tpu.dot_dimension_numbers<[2], [2], [1], [1], [0, 0, 0, 1, 1, 1], [0], [0]>} : vector<2x1x8xf32>, vector<2x8x8xf32>, vector<2x1x8xf32> -> vector<2x1x8xf32>
    "tpu.trace_stop"() : () -> ()
    %cst_575 = arith.constant 0.176776692 : f32
    %1354 = vector.broadcast %cst_575 : f32 to vector<2x1x8xf32>
    %1355 = arith.mulf %1353, %1354 : vector<2x1x8xf32>
    %cst_576 = arith.constant dense<0xFF800000> : vector<2x1xf32>
    %1356 = vector.multi_reduction <maximumf>, %1355, %cst_576 [2] : vector<2x1x8xf32> to vector<2x1xf32>
    %1357 = vector.shape_cast %1356 : vector<2x1xf32> to vector<2x1x1xf32>
    %1358 = vector.broadcast %1357 : vector<2x1x1xf32> to vector<2x1x8xf32>
    %1359 = arith.subf %1355, %1358 : vector<2x1x8xf32>
    %1360 = math.exp %1359 : vector<2x1x8xf32>
    %cst_577 = arith.constant dense<0.000000e+00> : vector<2x1xf32>
    %1361 = vector.multi_reduction <add>, %1360, %cst_577 [2] : vector<2x1x8xf32> to vector<2x1xf32>
    %1362 = vector.shape_cast %1361 : vector<2x1xf32> to vector<2x1x1xf32>
    %1363 = tpu.reciprocal %1362 {approx = true} : vector<2x1x1xf32> -> vector<2x1x1xf32>
    %1364 = vector.broadcast %1363 : vector<2x1x1xf32> to vector<2x1x8xf32>
    %1365 = arith.mulf %1360, %1364 : vector<2x1x8xf32>
    "tpu.trace_start"() <{level = 10 : i32, message = "bqk,bkd->bqd"}> : () -> ()
    %cst_578 = arith.constant dense<0.000000e+00> : vector<2x1x8xf32>
    %1366 = tpu.matmul %1365, %1352, %cst_578 {dimension_numbers = #tpu.dot_dimension_numbers<[2], [1], [1], [2], [0, 0, 0, 1, 1, 2], [0], [0]>} : vector<2x1x8xf32>, vector<2x8x8xf32>, vector<2x1x8xf32> -> vector<2x1x8xf32>
    "tpu.trace_stop"() : () -> ()
    %1367 = vector.shape_cast %1366 : vector<2x1x8xf32> to vector<2x8xf32>
    %1368 = vector.extract_strided_slice %1345 {offsets = [0, 0], sizes = [8, 32], strides = [1, 1]} : vector<32x32xf32> to vector<8x32xf32>
    %cst_579 = arith.constant dense<0.000000e+00> : vector<2x32xf32>
    %1369 = tpu.matmul %1367, %1368, %cst_579 {dimension_numbers = #tpu.dot_dimension_numbers<[1], [0], [0], [1], [0, 0, 1, 1], [], []>} : vector<2x8xf32>, vector<8x32xf32>, vector<2x32xf32> -> vector<2x32xf32>
    %1370 = arith.addf %1346, %1369 : vector<2x32xf32>
    %1371 = vector.extract_strided_slice %1331 {offsets = [0, 8], sizes = [2, 8], strides = [1, 1]} : vector<2x32xf32> to vector<2x8xf32>
    %1372 = vector.shape_cast %1371 : vector<2x8xf32> to vector<2x1x8xf32>
    %1373 = vector.extract_strided_slice %1337 {offsets = [0, 8], sizes = [16, 8], strides = [1, 1]} : vector<16x32xf32> to vector<16x8xf32>
    %1374 = vector.shape_cast %1373 : vector<16x8xf32> to vector<2x8x8xf32>
    %1375 = vector.extract_strided_slice %1343 {offsets = [0, 8], sizes = [16, 8], strides = [1, 1]} : vector<16x32xf32> to vector<16x8xf32>
    %1376 = vector.shape_cast %1375 : vector<16x8xf32> to vector<2x8x8xf32>
    "tpu.trace_start"() <{level = 10 : i32, message = "bqd,bkd->bqk"}> : () -> ()
    %cst_580 = arith.constant dense<0.000000e+00> : vector<2x1x8xf32>
    %1377 = tpu.matmul %1372, %1374, %cst_580 {dimension_numbers = #tpu.dot_dimension_numbers<[2], [2], [1], [1], [0, 0, 0, 1, 1, 1], [0], [0]>} : vector<2x1x8xf32>, vector<2x8x8xf32>, vector<2x1x8xf32> -> vector<2x1x8xf32>
    "tpu.trace_stop"() : () -> ()
    %cst_581 = arith.constant 0.176776692 : f32
    %1378 = vector.broadcast %cst_581 : f32 to vector<2x1x8xf32>
    %1379 = arith.mulf %1377, %1378 : vector<2x1x8xf32>
    %cst_582 = arith.constant dense<0xFF800000> : vector<2x1xf32>
    %1380 = vector.multi_reduction <maximumf>, %1379, %cst_582 [2] : vector<2x1x8xf32> to vector<2x1xf32>
    %1381 = vector.shape_cast %1380 : vector<2x1xf32> to vector<2x1x1xf32>
    %1382 = vector.broadcast %1381 : vector<2x1x1xf32> to vector<2x1x8xf32>
    %1383 = arith.subf %1379, %1382 : vector<2x1x8xf32>
    %1384 = math.exp %1383 : vector<2x1x8xf32>
    %cst_583 = arith.constant dense<0.000000e+00> : vector<2x1xf32>
    %1385 = vector.multi_reduction <add>, %1384, %cst_583 [2] : vector<2x1x8xf32> to vector<2x1xf32>
    %1386 = vector.shape_cast %1385 : vector<2x1xf32> to vector<2x1x1xf32>
    %1387 = tpu.reciprocal %1386 {approx = true} : vector<2x1x1xf32> -> vector<2x1x1xf32>
    %1388 = vector.broadcast %1387 : vector<2x1x1xf32> to vector<2x1x8xf32>
    %1389 = arith.mulf %1384, %1388 : vector<2x1x8xf32>
    "tpu.trace_start"() <{level = 10 : i32, message = "bqk,bkd->bqd"}> : () -> ()
    %cst_584 = arith.constant dense<0.000000e+00> : vector<2x1x8xf32>
    %1390 = tpu.matmul %1389, %1376, %cst_584 {dimension_numbers = #tpu.dot_dimension_numbers<[2], [1], [1], [2], [0, 0, 0, 1, 1, 2], [0], [0]>} : vector<2x1x8xf32>, vector<2x8x8xf32>, vector<2x1x8xf32> -> vector<2x1x8xf32>
    "tpu.trace_stop"() : () -> ()
    %1391 = vector.shape_cast %1390 : vector<2x1x8xf32> to vector<2x8xf32>
    %1392 = vector.extract_strided_slice %1345 {offsets = [8, 0], sizes = [8, 32], strides = [1, 1]} : vector<32x32xf32> to vector<8x32xf32>
    %cst_585 = arith.constant dense<0.000000e+00> : vector<2x32xf32>
    %1393 = tpu.matmul %1391, %1392, %cst_585 {dimension_numbers = #tpu.dot_dimension_numbers<[1], [0], [0], [1], [0, 0, 1, 1], [], []>} : vector<2x8xf32>, vector<8x32xf32>, vector<2x32xf32> -> vector<2x32xf32>
    %1394 = arith.addf %1370, %1393 : vector<2x32xf32>
    %1395 = vector.extract_strided_slice %1331 {offsets = [0, 16], sizes = [2, 8], strides = [1, 1]} : vector<2x32xf32> to vector<2x8xf32>
    %1396 = vector.shape_cast %1395 : vector<2x8xf32> to vector<2x1x8xf32>
    %1397 = vector.extract_strided_slice %1337 {offsets = [0, 16], sizes = [16, 8], strides = [1, 1]} : vector<16x32xf32> to vector<16x8xf32>
    %1398 = vector.shape_cast %1397 : vector<16x8xf32> to vector<2x8x8xf32>
    %1399 = vector.extract_strided_slice %1343 {offsets = [0, 16], sizes = [16, 8], strides = [1, 1]} : vector<16x32xf32> to vector<16x8xf32>
    %1400 = vector.shape_cast %1399 : vector<16x8xf32> to vector<2x8x8xf32>
    "tpu.trace_start"() <{level = 10 : i32, message = "bqd,bkd->bqk"}> : () -> ()
    %cst_586 = arith.constant dense<0.000000e+00> : vector<2x1x8xf32>
    %1401 = tpu.matmul %1396, %1398, %cst_586 {dimension_numbers = #tpu.dot_dimension_numbers<[2], [2], [1], [1], [0, 0, 0, 1, 1, 1], [0], [0]>} : vector<2x1x8xf32>, vector<2x8x8xf32>, vector<2x1x8xf32> -> vector<2x1x8xf32>
    "tpu.trace_stop"() : () -> ()
    %cst_587 = arith.constant 0.176776692 : f32
    %1402 = vector.broadcast %cst_587 : f32 to vector<2x1x8xf32>
    %1403 = arith.mulf %1401, %1402 : vector<2x1x8xf32>
    %cst_588 = arith.constant dense<0xFF800000> : vector<2x1xf32>
    %1404 = vector.multi_reduction <maximumf>, %1403, %cst_588 [2] : vector<2x1x8xf32> to vector<2x1xf32>
    %1405 = vector.shape_cast %1404 : vector<2x1xf32> to vector<2x1x1xf32>
    %1406 = vector.broadcast %1405 : vector<2x1x1xf32> to vector<2x1x8xf32>
    %1407 = arith.subf %1403, %1406 : vector<2x1x8xf32>
    %1408 = math.exp %1407 : vector<2x1x8xf32>
    %cst_589 = arith.constant dense<0.000000e+00> : vector<2x1xf32>
    %1409 = vector.multi_reduction <add>, %1408, %cst_589 [2] : vector<2x1x8xf32> to vector<2x1xf32>
    %1410 = vector.shape_cast %1409 : vector<2x1xf32> to vector<2x1x1xf32>
    %1411 = tpu.reciprocal %1410 {approx = true} : vector<2x1x1xf32> -> vector<2x1x1xf32>
    %1412 = vector.broadcast %1411 : vector<2x1x1xf32> to vector<2x1x8xf32>
    %1413 = arith.mulf %1408, %1412 : vector<2x1x8xf32>
    "tpu.trace_start"() <{level = 10 : i32, message = "bqk,bkd->bqd"}> : () -> ()
    %cst_590 = arith.constant dense<0.000000e+00> : vector<2x1x8xf32>
    %1414 = tpu.matmul %1413, %1400, %cst_590 {dimension_numbers = #tpu.dot_dimension_numbers<[2], [1], [1], [2], [0, 0, 0, 1, 1, 2], [0], [0]>} : vector<2x1x8xf32>, vector<2x8x8xf32>, vector<2x1x8xf32> -> vector<2x1x8xf32>
    "tpu.trace_stop"() : () -> ()
    %1415 = vector.shape_cast %1414 : vector<2x1x8xf32> to vector<2x8xf32>
    %1416 = vector.extract_strided_slice %1345 {offsets = [16, 0], sizes = [8, 32], strides = [1, 1]} : vector<32x32xf32> to vector<8x32xf32>
    %cst_591 = arith.constant dense<0.000000e+00> : vector<2x32xf32>
    %1417 = tpu.matmul %1415, %1416, %cst_591 {dimension_numbers = #tpu.dot_dimension_numbers<[1], [0], [0], [1], [0, 0, 1, 1], [], []>} : vector<2x8xf32>, vector<8x32xf32>, vector<2x32xf32> -> vector<2x32xf32>
    %1418 = arith.addf %1394, %1417 : vector<2x32xf32>
    %1419 = vector.extract_strided_slice %1331 {offsets = [0, 24], sizes = [2, 8], strides = [1, 1]} : vector<2x32xf32> to vector<2x8xf32>
    %1420 = vector.shape_cast %1419 : vector<2x8xf32> to vector<2x1x8xf32>
    %1421 = vector.extract_strided_slice %1337 {offsets = [0, 24], sizes = [16, 8], strides = [1, 1]} : vector<16x32xf32> to vector<16x8xf32>
    %1422 = vector.shape_cast %1421 : vector<16x8xf32> to vector<2x8x8xf32>
    %1423 = vector.extract_strided_slice %1343 {offsets = [0, 24], sizes = [16, 8], strides = [1, 1]} : vector<16x32xf32> to vector<16x8xf32>
    %1424 = vector.shape_cast %1423 : vector<16x8xf32> to vector<2x8x8xf32>
    "tpu.trace_start"() <{level = 10 : i32, message = "bqd,bkd->bqk"}> : () -> ()
    %cst_592 = arith.constant dense<0.000000e+00> : vector<2x1x8xf32>
    %1425 = tpu.matmul %1420, %1422, %cst_592 {dimension_numbers = #tpu.dot_dimension_numbers<[2], [2], [1], [1], [0, 0, 0, 1, 1, 1], [0], [0]>} : vector<2x1x8xf32>, vector<2x8x8xf32>, vector<2x1x8xf32> -> vector<2x1x8xf32>
    "tpu.trace_stop"() : () -> ()
    %cst_593 = arith.constant 0.176776692 : f32
    %1426 = vector.broadcast %cst_593 : f32 to vector<2x1x8xf32>
    %1427 = arith.mulf %1425, %1426 : vector<2x1x8xf32>
    %cst_594 = arith.constant dense<0xFF800000> : vector<2x1xf32>
    %1428 = vector.multi_reduction <maximumf>, %1427, %cst_594 [2] : vector<2x1x8xf32> to vector<2x1xf32>
    %1429 = vector.shape_cast %1428 : vector<2x1xf32> to vector<2x1x1xf32>
    %1430 = vector.broadcast %1429 : vector<2x1x1xf32> to vector<2x1x8xf32>
    %1431 = arith.subf %1427, %1430 : vector<2x1x8xf32>
    %1432 = math.exp %1431 : vector<2x1x8xf32>
    %cst_595 = arith.constant dense<0.000000e+00> : vector<2x1xf32>
    %1433 = vector.multi_reduction <add>, %1432, %cst_595 [2] : vector<2x1x8xf32> to vector<2x1xf32>
    %1434 = vector.shape_cast %1433 : vector<2x1xf32> to vector<2x1x1xf32>
    %1435 = tpu.reciprocal %1434 {approx = true} : vector<2x1x1xf32> -> vector<2x1x1xf32>
    %1436 = vector.broadcast %1435 : vector<2x1x1xf32> to vector<2x1x8xf32>
    %1437 = arith.mulf %1432, %1436 : vector<2x1x8xf32>
    "tpu.trace_start"() <{level = 10 : i32, message = "bqk,bkd->bqd"}> : () -> ()
    %cst_596 = arith.constant dense<0.000000e+00> : vector<2x1x8xf32>
    %1438 = tpu.matmul %1437, %1424, %cst_596 {dimension_numbers = #tpu.dot_dimension_numbers<[2], [1], [1], [2], [0, 0, 0, 1, 1, 2], [0], [0]>} : vector<2x1x8xf32>, vector<2x8x8xf32>, vector<2x1x8xf32> -> vector<2x1x8xf32>
    "tpu.trace_stop"() : () -> ()
    %1439 = vector.shape_cast %1438 : vector<2x1x8xf32> to vector<2x8xf32>
    %1440 = vector.extract_strided_slice %1345 {offsets = [24, 0], sizes = [8, 32], strides = [1, 1]} : vector<32x32xf32> to vector<8x32xf32>
    %cst_597 = arith.constant dense<0.000000e+00> : vector<2x32xf32>
    %1441 = tpu.matmul %1439, %1440, %cst_597 {dimension_numbers = #tpu.dot_dimension_numbers<[1], [0], [0], [1], [0, 0, 1, 1], [], []>} : vector<2x8xf32>, vector<8x32xf32>, vector<2x32xf32> -> vector<2x32xf32>
    %1442 = arith.addf %1418, %1441 : vector<2x32xf32>
    %1443 = arith.addf %1324, %1442 : vector<2x32xf32>
    %c39_598 = arith.constant 39 : index
    %c0_599 = arith.constant 0 : index
    %1444 = vector.load %arg3[%c39_598, %c0_599] : memref<40x32xf32, #tpu.memory_space<vmem>>, vector<1x32xf32>
    %1445 = vector.broadcast %1444 : vector<1x32xf32> to vector<2x32xf32>
    %1446 = arith.addf %1443, %1445 : vector<2x32xf32>
    %c9_600 = arith.constant 9 : index
    %c0_601 = arith.constant 0 : index
    %c0_602 = arith.constant 0 : index
    %1447 = vector.load %arg4[%c9_600, %c0_601, %c0_602] : memref<10x32x32xf32, #tpu.memory_space<vmem>>, vector<1x32x32xf32>
    %1448 = vector.shape_cast %1447 : vector<1x32x32xf32> to vector<32x32xf32>
    %cst_603 = arith.constant dense<0.000000e+00> : vector<2x32xf32>
    %1449 = tpu.matmul %1446, %1448, %cst_603 {dimension_numbers = #tpu.dot_dimension_numbers<[1], [0], [0], [1], [0, 0, 1, 1], [], []>} : vector<2x32xf32>, vector<32x32xf32>, vector<2x32xf32> -> vector<2x32xf32>
    %c9_604 = arith.constant 9 : index
    %c0_605 = arith.constant 0 : index
    %1450 = vector.load %arg5[%c9_604, %c0_605] : memref<10x32xf32, #tpu.memory_space<vmem>>, vector<1x32xf32>
    %1451 = vector.broadcast %1450 : vector<1x32xf32> to vector<2x32xf32>
    %1452 = arith.addf %1449, %1451 : vector<2x32xf32>
    %cst_606 = arith.constant 0.000000e+00 : f32
    %1453 = vector.broadcast %cst_606 : f32 to vector<2x32xf32>
    %1454 = arith.maximumf %1452, %1453 : vector<2x32xf32>
    %c9_607 = arith.constant 9 : index
    %c0_608 = arith.constant 0 : index
    %c0_609 = arith.constant 0 : index
    %1455 = vector.load %arg6[%c9_607, %c0_608, %c0_609] : memref<10x32x32xf32, #tpu.memory_space<vmem>>, vector<1x32x32xf32>
    %1456 = vector.shape_cast %1455 : vector<1x32x32xf32> to vector<32x32xf32>
    %cst_610 = arith.constant dense<0.000000e+00> : vector<2x32xf32>
    %1457 = tpu.matmul %1454, %1456, %cst_610 {dimension_numbers = #tpu.dot_dimension_numbers<[1], [0], [0], [1], [0, 0, 1, 1], [], []>} : vector<2x32xf32>, vector<32x32xf32>, vector<2x32xf32> -> vector<2x32xf32>
    %1458 = arith.addf %1446, %1457 : vector<2x32xf32>
    %c9_611 = arith.constant 9 : index
    %c0_612 = arith.constant 0 : index
    %1459 = vector.load %arg7[%c9_611, %c0_612] : memref<10x32xf32, #tpu.memory_space<vmem>>, vector<1x32xf32>
    %1460 = vector.broadcast %1459 : vector<1x32xf32> to vector<2x32xf32>
    %1461 = arith.addf %1458, %1460 : vector<2x32xf32>
    %1462 = vector.shape_cast %1461 : vector<2x32xf32> to vector<2x1x32xf32>
    %1463 = vector.shape_cast %1462 : vector<2x1x32xf32> to vector<2x32xf32>
    %c0_613 = arith.constant 0 : index
    %c0_614 = arith.constant 0 : index
    %1464 = vector.load %arg11[%c0_613, %c0_614] : memref<64x1xf32, #tpu.memory_space<vmem>>, vector<64x1xf32>
    %1465 = vector.extract_strided_slice %1464 {offsets = [0, 0], sizes = [32, 1], strides = [1, 1]} : vector<64x1xf32> to vector<32x1xf32>
    %cst_615 = arith.constant dense<0.000000e+00> : vector<2x1xf32>
    %1466 = tpu.matmul %1323, %1465, %cst_615 {dimension_numbers = #tpu.dot_dimension_numbers<[1], [0], [0], [1], [0, 0, 1, 1], [], []>} : vector<2x32xf32>, vector<32x1xf32>, vector<2x1xf32> -> vector<2x1xf32>
    %1467 = vector.extract_strided_slice %1464 {offsets = [32, 0], sizes = [32, 1], strides = [1, 1]} : vector<64x1xf32> to vector<32x1xf32>
    %cst_616 = arith.constant dense<0.000000e+00> : vector<2x1xf32>
    %1468 = tpu.matmul %1463, %1467, %cst_616 {dimension_numbers = #tpu.dot_dimension_numbers<[1], [0], [0], [1], [0, 0, 1, 1], [], []>} : vector<2x32xf32>, vector<32x1xf32>, vector<2x1xf32> -> vector<2x1xf32>
    %1469 = arith.addf %1466, %1468 : vector<2x1xf32>
    %c0_617 = arith.constant 0 : index
    %c0_618 = arith.constant 0 : index
    %1470 = vector.load %arg12[%c0_617, %c0_618] : memref<1x1xf32, #tpu.memory_space<vmem>>, vector<1x1xf32>
    %1471 = vector.broadcast %1470 : vector<1x1xf32> to vector<2x1xf32>
    %1472 = arith.addf %1469, %1471 : vector<2x1xf32>
    %c0_619 = arith.constant 0 : index
    %c0_620 = arith.constant 0 : index
    %1473 = vector.load %arg13[%c0_619, %c0_620] : memref<2x1xf32, #tpu.memory_space<vmem>>, vector<2x1xf32>
    tpu.vector_store %arg13[%c0_619, %c0_620], %1472 {strides = array<i32>} : memref<2x1xf32, #tpu.memory_space<vmem>>, vector<2x1xf32>,
    return
  }
}

</mosaic_0001>

<bundles_post_ra>
// kernel: multiset_transformer_forward.1
= control target key start
LH: loop header
LB: loop body
LE: loop exit
PB: predicated region body
PF: predicated region fallthrough
CT: control target
= control target key end

     0   :  { %s12419_s0 = inlined_call_operand.vmem [shape: f32[2,8,32], index: 0, kind: input, shape index: {}]   ;;  %s12420_s1 = inlined_call_operand.vmem [shape: f32[2,8,32], index: 1, kind: input, shape index: {}]   ;;  %s12421_s2 = inlined_call_operand.vmem [shape: f32[40,32,32], index: 2, kind: input, shape index: {}]   ;;  %s12422_s3 = inlined_call_operand.vmem [shape: f32[40,32], index: 3, kind: input, shape index: {}]   ;;  %s12423_s4 = inlined_call_operand.vmem [shape: f32[10,32,32], index: 4, kind: input, shape index: {}]   ;;  %s12424_s5 = inlined_call_operand.vmem [shape: f32[10,32], index: 5, kind: input, shape index: {}]   ;;  %s12425_s6 = inlined_call_operand.vmem [shape: f32[10,32,32], index: 6, kind: input, shape index: {}]   ;;  %s12426_s7 = inlined_call_operand.vmem [shape: f32[10,32], index: 7, kind: input, shape index: {}]   ;;  %s12427_s8 = inlined_call_operand.vmem [shape: f32[4,64,32], index: 8, kind: input, shape index: {}]   ;;  %s12428_s9 = inlined_call_operand.vmem [shape: f32[4,32], index: 9, kind: input, shape index: {}]   ;;  %s12429_s10 = inlined_call_operand.vmem [shape: f32[2,32], index: 10, kind: input, shape index: {}]   ;;  %s12430_s11 = inlined_call_operand.vmem [shape: f32[64,1], index: 11, kind: input, shape index: {}]   ;;  %s12431_s12 = inlined_call_operand.<no memory space> [shape: f32[1,1], index: 12, kind: input, shape index: {}]   ;;  %s12432_s13 = inlined_call_operand.vmem [shape: f32[2,1], index: 13, kind: output, shape index: {0}]   ;;  %s12433_s14 = inlined_call_operand.hbm [shape: f32[2,8,32], index: 14, kind: output, shape index: {1}]   ;;  %s12434_s15 = inlined_call_operand.hbm [shape: f32[2,8,32], index: 15, kind: output, shape index: {2}]  }
   0x1   :  { %v21_v0 = vstv %s12431_s12 }
   0x2   :  { %22 = vst [vmem:[#allocation2] sm:$0x1] %v21_v0 }
   0x3   :  { %23 = vsyncpa [#allocation4], 0  ;;  %v8667_v1 = vld [vmem:[%s12421_s2 + $0x38] sm:$0xff]  ;;  %v8666_v2 = vld [vmem:[%s12421_s2 + $0x30] sm:$0xff]  ;;  %vm61_vm0 = vcmask 261120  }
   0x4   :  { %v58_v3 = vld [vmem:[%s12421_s2 + $0x18] sm:$0xff]  ;;  %110 = vmatpush.msra.mxu1 %v8667_v1  ;;  %v57_v4 = vld [vmem:[%s12421_s2 + $0x10] sm:$0xff]  ;;  %v8665_v5 = vld [vmem:[%s12421_s2 + $0x28] sm:$0xff] }
   0x5   :  { %80 = vmatpush.msra.mxu0 %v58_v3  ;;  %v8664_v6 = vld [vmem:[%s12421_s2 + $0x20] sm:$0xff]  ;;  %v56_v7 = vld [vmem:[%s12421_s2 + $0x8] sm:$0xff]  ;;  %v8673_v9 = vld [vmem:[%s12421_s2 + $0x58] sm:$0xff] }
   0x6   :  { %111 = vmatpush.msra.mxu1 %v8666_v2  ;;  %v9929_v8 = vld [vmem:[%s12419_s0] sm:$0xff]  ;;  %v8672_v10 = vld [vmem:[%s12421_s2 + $0x50] sm:$0xff]  ;;  %140 = vmatpush.msra.mxu2 %v8673_v9  ;;  %v8671_v12 = vld [vmem:[%s12421_s2 + $0x48] sm:$0xff] }
   0x7   :  { %81 = vmatpush.msra.mxu0 %v57_v4  ;;  %v55_v11 = vld [vmem:[%s12421_s2] sm:$0xff] }
   0x8   :  { %112 = vmatpush.msra.mxu1 %v8665_v5  ;;  %141 = vmatpush.msra.mxu2 %v8672_v10  ;;  %v8670_v13 = vld [vmem:[%s12421_s2 + $0x40] sm:$0xff] }
   0x9   :  { %82 = vmatpush.msra.mxu0 %v56_v7 }
   0xa   :  { %113 = vmatpush.msra.mxu1 %v8664_v6  ;;  %142 = vmatpush.msra.mxu2 %v8671_v12 }
   0xb   :  { %83 = vmatpush.msra.mxu0 %v55_v11  ;;  %8668 = vmatmul.msk.f32.vlgmr.msra.gmra.mxu1 %vm61_vm0, %v9929_v8 }
   0xc   :  { %8662 = vmatmul.msk.f32.vlgmr.msra.gmra.mxu0 %vm61_vm0, %v9929_v8  ;;  %143 = vmatpush.msra.mxu2 %v8670_v13 }
   0xd   :  { %8674 = vmatmul.msk.f32.vlgmr.msra.gmra.mxu2 %vm61_vm0, %v9929_v8 }
   0xe   :  { %24 = vsyncpa [#allocation6], 0  ;;  %v9370_v14 = vld [vmem:[%s12422_s3 + $0x1] ss:$0 sm:$0xff]  ;;  %v9371_v15 = vld [vmem:[%s12422_s3] ss:$0 sm:$0xff] }
   0xf   :  { %vm156_vm1 = vcmask 64512   ;;  %s9815_s18 = smov 120   ;;  %v9969_v20 = vld [vmem:[%s12419_s0 + $0x8] sm:$0xff]  ;;  %v9372_v21 = vld [vmem:[%s12422_s3 + $0x2] ss:$0 sm:$0xff]  ;;  %s9816_s23 = smov 112  }
  0x10   :  { %v8676_v63 = vld [vmem:[%s12421_s2 + $0x60] sm:$0xff]  ;;  %v8677_v9 = vld [vmem:[%s12421_s2 + $0x68] sm:$0xff]  ;;  %s9817_s12 = smov 104   ;;  %vm6936_vm2 = vcmask 1041409   ;;  %vm7085_vm3 = vcmask 57344   ;;  %s9818_s17 = smov [#allocation3]  }
  0x11   :  { %s8628_s19 = sshll.u32 %s9818_s17, 4  ;;  %s8630_s20 = sshll.u32 %s12433_s14, 4  ;;  %vm8620_vm4 = vcmask 1024   ;;  %s8629_s19 = int_to_ptr.vmem [resolvable:$true] %s8628_s19  ;;  %s8631_s20 = int_to_ptr.hbm [resolvable:$true] %s8630_s20 }
  0x13   :  { %8669 = vmatmul.msk.f32.gmra.mxu1 %vm61_vm0, %v9969_v20 }
  0x14   :  { %8663 = vmatmul.msk.f32.gmra.mxu0 %vm61_vm0, %v9969_v20 }
  0x15   :  { %8675 = vmatmul.msk.f32.gmra.mxu2 %vm61_vm0, %v9969_v20 }
  0x88   :  { %v115_v16 = vpop.f32.mrf.mxu1 }
  0x89   :  { %v85_v17 = vpop.f32.mrf.mxu0  ;;  %v9958_v18 = vadd.f32 %v9370_v14, %v115_v16 }
  0x8a   :  { %v9960_v19 = vadd.f32 %v9371_v15, %v85_v17 }
  0x8b   :  { %281 = vrot.lane.b32.xlu0 %v9958_v18, %s9815_s18  ;;  %8680 = vmatpush.xpose.msk.msra.mxu3 %vm156_vm1, %v9958_v18 }
  0x8e   :  { %8681 = vmatmul.msk.f32.vlgmr.msra.gmra.mxu3 %vm156_vm1, %v9960_v19 }
  0x90   :  { %v145_v22 = vpop.f32.mrf.mxu2  ;;  %v118_v26 = vpop.f32.mrf.mxu1 }
  0x91   :  { %v9984_v23 = vadd.f32 %v9372_v21, %v145_v22  ;;  %v88_v27 = vpop.f32.mrf.mxu0  ;;  %v9994_v28 = vadd.f32 %v9370_v14, %v118_v26 }
  0x92   :  { %v9996_v29 = vadd.f32 %v9371_v15, %v88_v27 }
  0x93   :  { %279 = vrot.lane.b32.xlu0 %v9960_v19, %s9815_s18  ;;  %8682 = vmatpush.xpose.msk.msrb.mxu3 %vm156_vm1, %v9994_v28 }
  0x96   :  { %8683 = vmatmul.msk.f32.vlgmr.msrb.gmra.mxu3 %vm156_vm1, %v9996_v29 }
  0x97   :  { %251 = vmatpush.msra.mxu3 %v9984_v23 }
  0x98   :  { %v148_v45 = vpop.f32.mrf.mxu2 }
  0x99   :  { %v10009_v46 = vadd.f32 %v9372_v21, %v148_v45 }
  0x9b   :  { %360 = vrot.lane.b32.xlu0 %v9984_v23, %s9815_s18  ;;  %274 = vmatpush.msrb.mxu0 %v10009_v46 }
  0xa3   :  { %473 = vrot.lane.b32.xlu0 %v9958_v18, %s9816_s23 }
  0xab   :  { %471 = vrot.lane.b32.xlu0 %v9960_v19, %s9816_s23 }
  0xfd   :  { %v282_v24 = vpop.permute.xlu0 %281 }
  0xfe   :  { %8686 = vmatpush.xpose.msk.msrb.mxu1 %vm156_vm1, %v282_v24 }
 0x102   :  { %434 = vmatpush.msra.mxu1 %v8677_v9 }
 0x105   :  { %v280_v25 = vpop.permute.xlu0 %279 }
 0x106   :  { %8687 = vmatmul.msk.f32.vlgmr.msrb.gmra.mxu1 %vm156_vm1, %v280_v25 }
 0x10d   :  { %v361_v30 = vpop.permute.xlu0 %360 }
 0x10e   :  { %381 = vmatpush.msrb.mxu3 %v361_v30 }
 0x111   :  { %v180_v31 = vpop.f32.mrf.mxu3 }
 0x112   :  { %v209_v32 = vmul.f32 0.17677669, %v180_v31 }
 0x114   :  { %v211_v33 = vsel %vm156_vm1, %v209_v32, -inf }
 0x115   :  { %212 = vmax.xlane.f32.xlu1 %v211_v33  ;;  %v474_v55 = vpop.permute.xlu0 %473 }
 0x119   :  { %v206_v40 = vpop.f32.mrf.mxu3 }
 0x11a   :  { %v210_v42 = vmul.f32 0.17677669, %v206_v40 }
 0x11c   :  { %v214_v44 = vsel %vm156_vm1, %v210_v42, -inf }
 0x11d   :  { %215 = vmax.xlane.f32.xlu0 %v214_v44  ;;  %v472_v57 = vpop.permute.xlu0 %471  ;;  %v8678_v44 = vld [vmem:[%s12421_s2 + $0x70] sm:$0xff] }
 0x11e   :  { %624 = vmatpush.msrb.mxu1 %v8678_v44 }
 0x183   :  { %v304_v34 = vpop.f32.mrf.mxu1 }
 0x184   :  { %v335_v35 = vmul.f32 0.17677669, %v304_v34 }
 0x186   :  { %v337_v36 = vsel %vm156_vm1, %v335_v35, -inf }
 0x187   :  { %338 = vmax.xlane.f32.xlu1 %v337_v36 }
 0x188   :  { %v213_v37 = vpop.xlane.xlu1 %212 }
 0x189   :  { %v217_v38 = vsub.f32 %v209_v32, %v213_v37 }
 0x18b   :  { %v219_v39 = vmul.f32 1.442695, %v217_v38 }
 0x18d   :  { %9435 = vpow2.f32 %v219_v39 }
 0x190   :  { %v216_v58 = vpop.xlane.xlu0 %215 }
 0x191   :  { %v218_v59 = vsub.f32 %v210_v42, %v216_v58 }
 0x193   :  { %v9436_v41 = vpop.eup %9435  ;;  %v221_v60 = vmul.f32 1.442695, %v218_v59 }
 0x194   :  { %v223_v43 = vsel %vm156_vm1, %v9436_v41, 0.0 }
 0x195   :  { %224 = vadd.xlane.f32.xlu2 %v223_v43 }
 0x1a0   :  { %309 = vrot.lane.b32.xlu1 %v9994_v28, %s9815_s18 }
 0x1fa   :  { %v339_v47 = vpop.xlane.xlu1 %338 }
 0x1fb   :  { %v343_v48 = vsub.f32 %v335_v35, %v339_v47 }
 0x1fd   :  { %v345_v49 = vmul.f32 1.442695, %v343_v48 }
 0x1ff   :  { %9437 = vpow2.f32 %v345_v49 }
 0x205   :  { %v9438_v50 = vpop.eup %9437 }
 0x206   :  { %v349_v51 = vsel %vm156_vm1, %v9438_v50, 0.0 }
 0x207   :  { %350 = vadd.xlane.f32.xlu2 %v349_v51 }
 0x208   :  { %v225_v52 = vpop.xlane.xlu2 %224 }
 0x209   :  { %9439 = vrcp.f32 %v225_v52 }
 0x20a   :  { %9441 = vpow2.f32 %v221_v60 }
 0x20f   :  { %v9440_v53 = vpop.eup %9439 }
 0x210   :  { %v231_v54 = vmul.f32 %v9440_v53, %v9436_v41  ;;  %v9442_v61 = vpop.eup %9441 }
 0x211   :  { %v226_v62 = vsel %vm156_vm1, %v9442_v61, 0.0 }
 0x212   :  { %8684 = vmatmul.msk.f32.vlgmr.msra.gmra.mxu3 %vm156_vm1, %v231_v54  ;;  %v310_v56 = vpop.permute.xlu1 %309 }
 0x213   :  { %8696 = vmatpush.xpose.msk.msra.mxu3 %vm156_vm1, %v474_v55  ;;  %8688 = vmatpush.xpose.msk.msrb.mxu2 %vm156_vm1, %v310_v56 }
 0x217   :  { %463 = vmatpush.msra.mxu2 %v8676_v63 }
 0x21f   :  { %307 = vrot.lane.b32.xlu2 %v9996_v29, %s9815_s18 }
 0x248   :  { %227 = vadd.xlane.f32.xlu2 %v226_v62 }
 0x27a   :  { %v351_v0 = vpop.xlane.xlu2 %350 }
 0x27b   :  { %9443 = vrcp.f32 %v351_v0 }
 0x281   :  { %v9444_v1 = vpop.eup %9443 }
 0x282   :  { %v357_v2 = vmul.f32 %v9444_v1, %v9438_v50  ;;  %v308_v3 = vpop.permute.xlu2 %307 }
 0x283   :  { %8689 = vmatmul.msk.f32.vlgmr.msrb.gmra.mxu2 %vm156_vm1, %v308_v3 }
 0x284   :  { %8690 = vmatmul.msk.f32.vlgmr.msrb.gmra.mxu3 %vm156_vm1, %v357_v2 }
 0x28c   :  { %8697 = vmatmul.msk.f32.vlgmr.msra.gmra.mxu3 %vm156_vm1, %v472_v57 }
 0x295   :  { %v253_v4 = vpop.f32.mrf.mxu3 }
 0x296   :  { %8694 = vmatmul.msk.f32.vlgmr.msra.gmra.mxu2 %vm156_vm1, %v253_v4 }
 0x2bb   :  { %v228_v5 = vpop.xlane.xlu2 %227 }
 0x2bc   :  { %9445 = vrcp.f32 %v228_v5 }
 0x2c2   :  { %v9446_v6 = vpop.eup %9445 }
 0x2c3   :  { %v232_v7 = vmul.f32 %v9446_v6, %v9442_v61 }
 0x2c5   :  { %8685 = vmatmul.msk.f32.vlgmr.msrb.gmra.mxu0 %vm156_vm1, %v232_v7 }
 0x306   :  { %v332_v10 = vpop.f32.mrf.mxu2 }
 0x307   :  { %v336_v11 = vmul.f32 0.17677669, %v332_v10  ;;  %v383_v12 = vpop.f32.mrf.mxu3 }
 0x308   :  { %8692 = vmatmul.msk.f32.vlgmr.msra.gmra.mxu1 %vm156_vm1, %v383_v12  ;;  %v9345_v12 = vpack.i.bf16 %v10009_v46, %v9984_v23 }
 0x309   :  { %v340_v13 = vsel %vm156_vm1, %v336_v11, -inf }
 0x30a   :  { %341 = vmax.xlane.f32.xlu1 %v340_v13 }
 0x30f   :  { %v496_v14 = vpop.f32.mrf.mxu3 }
 0x310   :  { %v527_v15 = vmul.f32 0.17677669, %v496_v14 }
 0x312   :  { %v529_v16 = vsel %vm156_vm1, %v527_v15, -inf }
 0x313   :  { %530 = vmax.xlane.f32.xlu2 %v529_v16 }
 0x319   :  { %v10065_v50 = vpop.f32.mrf.mxu2 }
 0x323   :  { %501 = vrot.lane.b32.xlu1 %v9994_v28, %s9816_s23 }
 0x32b   :  { %387 = vrot.lane.b32.xlu2 %v10009_v46, %s9815_s18 }
 0x333   :  { %499 = vrot.lane.b32.xlu2 %v9996_v29, %s9816_s23 }
 0x33b   :  { %662 = vrot.lane.b32.xlu2 %v9996_v29, %s9817_s12 }
 0x342   :  { %v276_v17 = vpop.f32.mrf.mxu0 }
 0x343   :  { %8695 = vmatmul.msk.f32.gmra.mxu2 %vm156_vm1, %v276_v17 }
 0x37d   :  { %v342_v21 = vpop.xlane.xlu1 %341 }
 0x37e   :  { %v344_v22 = vsub.f32 %v336_v11, %v342_v21 }
 0x380   :  { %v347_v24 = vmul.f32 1.442695, %v344_v22 }
 0x382   :  { %9447 = vpow2.f32 %v347_v24 }
 0x385   :  { %v436_v44 = vpop.f32.mrf.mxu1 }
 0x386   :  { %v531_v25 = vpop.xlane.xlu2 %530 }
 0x387   :  { %v535_v26 = vsub.f32 %v527_v15, %v531_v25 }
 0x388   :  { %v9448_v27 = vpop.eup %9447 }
 0x389   :  { %v537_v30 = vmul.f32 1.442695, %v535_v26  ;;  %v352_v31 = vsel %vm156_vm1, %v9448_v27, 0.0 }
 0x38a   :  { %353 = vadd.xlane.f32.xlu0 %v352_v31  ;;  %v8725_v31 = vld [vmem:[%s12421_s2 + $0xb8] sm:$0xff] }
 0x38b   :  { %9449 = vpow2.f32 %v537_v30 }
 0x38e   :  { %v388_v32 = vpop.permute.xlu2 %387 }
 0x38f   :  { %408 = vmatpush.msra.mxu0 %v388_v32  ;;  %v8724_v32 = vld [vmem:[%s12421_s2 + $0xb0] sm:$0xff] }
 0x391   :  { %v9450_v33 = vpop.eup %9449 }
 0x392   :  { %v541_v29 = vsel %vm156_vm1, %v9450_v33, 0.0 }
 0x393   :  { %542 = vadd.xlane.f32.xlu1 %v541_v29  ;;  %v8722_v29 = vld [vmem:[%s12421_s2 + $0xa0] sm:$0xff] }
 0x395   :  { %v502_v34 = vpop.permute.xlu1 %501 }
 0x396   :  { %8698 = vmatpush.xpose.msk.msrb.mxu0 %vm156_vm1, %v502_v34  ;;  %v500_v40 = vpop.permute.xlu2 %499  ;;  %v8719_v34 = vld [vmem:[%s12421_s2 + $0x98] sm:$0xff] }
 0x39e   :  { %551 = vrot.lane.b32.xlu0 %v9984_v23, %s9816_s23  ;;  %v663_v43 = vpop.permute.xlu2 %662 }
 0x3a6   :  { %636 = vrot.lane.b32.xlu0 %v9958_v18, %s9817_s12 }
 0x3ac   :  { %664 = vrot.lane.b32.xlu1 %v9994_v28, %s9817_s12 }
 0x3ae   :  { %634 = vrot.lane.b32.xlu0 %v9960_v19, %s9817_s12 }
 0x3c6   :  { %v10068_v52 = vpop.f32.mrf.mxu2 }
 0x3fd   :  { %v354_v35 = vpop.xlane.xlu0 %353 }
 0x3fe   :  { %9451 = vrcp.f32 %v354_v35  ;;  %v8718_v35 = vld [vmem:[%s12421_s2 + $0x90] sm:$0xff] }
 0x404   :  { %v9452_v36 = vpop.eup %9451 }
 0x405   :  { %v358_v37 = vmul.f32 %v9452_v36, %v9448_v27  ;;  %v8717_v36 = vld [vmem:[%s12421_s2 + $0x88] sm:$0xff] }
 0x406   :  { %v543_v38 = vpop.xlane.xlu1 %542 }
 0x407   :  { %9453 = vrcp.f32 %v543_v38  ;;  %8691 = vmatmul.msk.f32.vlgmr.msra.gmra.mxu0 %vm156_vm1, %v358_v37  ;;  %v8716_v37 = vld [vmem:[%s12421_s2 + $0x80] sm:$0xff] }
 0x40d   :  { %v9454_v39 = vpop.eup %9453 }
 0x40e   :  { %v549_v41 = vmul.f32 %v9454_v39, %v9450_v33  ;;  %v8723_v33 = vld [vmem:[%s12421_s2 + $0xa8] sm:$0xff] }
 0x40f   :  { %8699 = vmatmul.msk.f32.vlgmr.msrb.gmra.mxu0 %vm156_vm1, %v500_v40  ;;  %v10120_v40 = vld [vmem:[%s12420_s1] sm:$0xff] }
 0x410   :  { %v552_v18 = vpop.permute.xlu0 %551 }
 0x411   :  { %572 = vmatpush.msrb.mxu3 %v552_v18  ;;  %v805_v18 = vld [vmem:[%s12423_s4 + $0x10] sm:$0xff] }
 0x412   :  { %8700 = vmatmul.msk.f32.vlgmr.msrb.gmra.mxu3 %vm156_vm1, %v549_v41  ;;  %v806_v41 = vld [vmem:[%s12423_s4 + $0x18] sm:$0xff] }
 0x418   :  { %v637_v28 = vpop.permute.xlu0 %636 }
 0x419   :  { %8704 = vmatpush.xpose.msk.msrb.mxu2 %vm156_vm1, %v637_v28  ;;  %v804_v28 = vld [vmem:[%s12423_s4 + $0x8] sm:$0xff] }
 0x41e   :  { %v665_v19 = vpop.permute.xlu1 %664 }
 0x41f   :  { %8706 = vmatpush.xpose.msk.msra.mxu3 %vm156_vm1, %v665_v19  ;;  %v803_v19 = vld [vmem:[%s12423_s4] sm:$0xff] }
 0x420   :  { %v635_v42 = vpop.permute.xlu0 %634 }
 0x421   :  { %8705 = vmatmul.msk.f32.vlgmr.msrb.gmra.mxu2 %vm156_vm1, %v635_v42  ;;  %v843_v42 = vld [vmem:[%s12425_s6 + $0x18] sm:$0xff] }
 0x422   :  { %8707 = vmatmul.msk.f32.vlgmr.msra.gmra.mxu3 %vm156_vm1, %v663_v43  ;;  %v842_v43 = vld [vmem:[%s12425_s6 + $0x10] sm:$0xff]  ;;  %862 = vmatpush.msra.mxu1 %v843_v42  ;;  %v9378_v42 = vld [vmem:[%s12422_s3 + $0x6] ss:$0 sm:$0xff] }
 0x424   :  { %863 = vmatpush.msra.mxu1 %v842_v43 }
 0x484   :  { %v410_v45 = vpop.f32.mrf.mxu0 }
 0x485   :  { %8693 = vmatmul.msk.f32.gmra.mxu1 %vm156_vm1, %v410_v45  ;;  %v841_v45 = vld [vmem:[%s12425_s6 + $0x8] sm:$0xff] }
 0x486   :  { %864 = vmatpush.msra.mxu1 %v841_v45 }
 0x48c   :  { %v524_v47 = vpop.f32.mrf.mxu0 }
 0x48d   :  { %v528_v48 = vmul.f32 0.17677669, %v524_v47  ;;  %v840_v47 = vld [vmem:[%s12425_s6] sm:$0xff] }
 0x48e   :  { %865 = vmatpush.msra.mxu1 %v840_v47 }
 0x48f   :  { %v532_v49 = vsel %vm156_vm1, %v528_v48, -inf }
 0x490   :  { %533 = vmax.xlane.f32.xlu1 %v532_v49 }
 0x495   :  { %v574_v51 = vpop.f32.mrf.mxu3 }
 0x496   :  { %8702 = vmatmul.msk.f32.vlgmr.msrb.gmra.mxu1 %vm156_vm1, %v574_v51  ;;  %v9375_v51 = vld [vmem:[%s12422_s3 + $0x4] ss:$0 sm:$0xff] }
 0x4a4   :  { %v659_v53 = vpop.f32.mrf.mxu2 }
 0x4a5   :  { %v690_v54 = vmul.f32 0.17677669, %v659_v53  ;;  %v687_v55 = vpop.f32.mrf.mxu3 }
 0x4a6   :  { %v691_v56 = vmul.f32 0.17677669, %v687_v55 }
 0x4a7   :  { %v692_v57 = vsel %vm156_vm1, %v690_v54, -inf }
 0x4a8   :  { %693 = vmax.xlane.f32.xlu0 %v692_v57  ;;  %v695_v58 = vsel %vm156_vm1, %v691_v56, -inf }
 0x4a9   :  { %696 = vmax.xlane.f32.xlu2 %v695_v58 }
 0x4c1   :  { %577 = vrot.lane.b32.xlu2 %v10009_v46, %s9816_s23  ;;  %v8679_v46 = vld [vmem:[%s12421_s2 + $0x78] sm:$0xff] }
 0x4c2   :  { %787 = vmatpush.msrb.mxu3 %v8679_v46 }
 0x4c4   :  { %934 = vmatpush.msra.mxu3 %v8725_v31 }
 0x4c6   :  { %935 = vmatpush.msra.mxu3 %v8724_v32 }
 0x4c8   :  { %936 = vmatpush.msra.mxu3 %v8723_v33 }
 0x4ca   :  { %937 = vmatpush.msra.mxu3 %v8722_v29 }
 0x502   :  { %v439_v49 = vpop.f32.mrf.mxu1 }
 0x503   :  { %v534_v59 = vpop.xlane.xlu1 %533 }
 0x504   :  { %v536_v60 = vsub.f32 %v528_v48, %v534_v59  ;;  %v10151_v48 = vld [vmem:[%s12420_s1 + $0x8] sm:$0xff] }
 0x506   :  { %v539_v61 = vmul.f32 1.442695, %v536_v60  ;;  %v9373_v60 = vld [vmem:[%s12422_s3 + $0x3] ss:$0 sm:$0xff] }
 0x508   :  { %9455 = vpow2.f32 %v539_v61 }
 0x50e   :  { %v9456_v62 = vpop.eup %9455 }
 0x50f   :  { %v544_v63 = vsel %vm156_vm1, %v9456_v62, 0.0 }
 0x510   :  { %545 = vadd.xlane.f32.xlu1 %v544_v63  ;;  %v469_v63 = vadd.f32 %v10068_v52, %v439_v49 }
 0x513   :  { %v626_v55 = vpop.f32.mrf.mxu1 }
 0x51b   :  { %v694_v0 = vpop.xlane.xlu0 %693 }
 0x51c   :  { %v698_v1 = vsub.f32 %v690_v54, %v694_v0  ;;  %v697_v2 = vpop.xlane.xlu2 %696 }
 0x51d   :  { %v699_v3 = vsub.f32 %v691_v56, %v697_v2  ;;  %v466_v56 = vadd.f32 %v10065_v50, %v436_v44 }
 0x51e   :  { %v700_v4 = vmul.f32 1.442695, %v698_v1 }
 0x51f   :  { %v702_v5 = vmul.f32 1.442695, %v699_v3  ;;  %v632_v57 = vadd.f32 %v626_v55, %v466_v56 }
 0x520   :  { %9457 = vpow2.f32 %v700_v4 }
 0x521   :  { %9459 = vpow2.f32 %v702_v5  ;;  %v9374_v5 = vld [vmem:[%s12422_s3 + $0x5] ss:$0 sm:$0xff] }
 0x524   :  { %v578_v6 = vpop.permute.xlu2 %577 }
 0x525   :  { %598 = vmatpush.msra.mxu0 %v578_v6 }
 0x526   :  { %v9458_v7 = vpop.eup %9457 }
 0x527   :  { %v9460_v9 = vpop.eup %9459  ;;  %v704_v10 = vsel %vm156_vm1, %v9458_v7, 0.0 }
 0x528   :  { %705 = vadd.xlane.f32.xlu0 %v704_v10  ;;  %v707_v11 = vsel %vm156_vm1, %v9460_v9, 0.0  ;;  %v9376_v10 = vld [vmem:[%s12424_s5] ss:$0 sm:$0xff] }
 0x529   :  { %708 = vadd.xlane.f32.xlu1 %v707_v11 }
 0x53c   :  { %9346 = vrot.lane.b32.xlu0 %v9345_v12, %s9817_s12 }
 0x583   :  { %v546_v13 = vpop.xlane.xlu1 %545 }
 0x584   :  { %9461 = vrcp.f32 %v546_v13 }
 0x58a   :  { %v9462_v14 = vpop.eup %9461 }
 0x58b   :  { %v550_v15 = vmul.f32 %v9462_v14, %v9456_v62 }
 0x58d   :  { %8701 = vmatmul.msk.f32.vlgmr.msra.gmra.mxu0 %vm156_vm1, %v550_v15 }
 0x59b   :  { %v706_v16 = vpop.xlane.xlu0 %705 }
 0x59c   :  { %v709_v17 = vpop.xlane.xlu1 %708  ;;  %9463 = vrcp.f32 %v706_v16 }
 0x59d   :  { %9465 = vrcp.f32 %v709_v17 }
 0x5a2   :  { %v9464_v21 = vpop.eup %9463 }
 0x5a3   :  { %v9466_v22 = vpop.eup %9465  ;;  %v712_v27 = vmul.f32 %v9464_v21, %v9458_v7 }
 0x5a4   :  { %v713_v30 = vmul.f32 %v9466_v22, %v9460_v9  ;;  %v8731_v22 = vld [vmem:[%s12421_s2 + $0xd8] sm:$0xff] }
 0x5ae   :  { %v9347_v24 = vpop.permute.xlu0 %9346 }
 0x5af   :  { %v9349_v25 = vunpack.i.h.bf16 %v9347_v24  ;;  %v9348_v26 = vunpack.i.l.bf16 %v9347_v24  ;;  %v8730_v24 = vld [vmem:[%s12421_s2 + $0xd0] sm:$0xff] }
 0x5b1   :  { %735 = vmatpush.msrb.mxu0 %v9348_v26  ;;  %761 = vmatpush.msra.mxu2 %v9349_v25  ;;  %v8729_v25 = vld [vmem:[%s12421_s2 + $0xc8] sm:$0xff]  ;;  %v8728_v26 = vld [vmem:[%s12421_s2 + $0xc0] sm:$0xff] }
 0x5b2   :  { %8708 = vmatmul.msk.f32.vlgmr.msrb.gmra.mxu0 %vm156_vm1, %v712_v27  ;;  %8709 = vmatmul.msk.f32.vlgmr.msra.gmra.mxu2 %vm156_vm1, %v713_v30 }
 0x5b3   :  { %898 = vmatpush.msrb.mxu2 %v8719_v34  ;;  %827 = vmatpush.msra.mxu0 %v806_v41 }
 0x5b5   :  { %899 = vmatpush.msrb.mxu2 %v8718_v35  ;;  %828 = vmatpush.msra.mxu0 %v805_v18 }
 0x5b7   :  { %900 = vmatpush.msrb.mxu2 %v8717_v36  ;;  %829 = vmatpush.msra.mxu0 %v804_v28 }
 0x5b9   :  { %901 = vmatpush.msrb.mxu2 %v8716_v37  ;;  %830 = vmatpush.msra.mxu0 %v803_v19 }
 0x5ba   :  { %8720 = vmatmul.msk.f32.vlgmr.msrb.gmra.mxu2 %vm61_vm0, %v9929_v8 }
 0x5bb   :  { %964 = vmatpush.msrb.mxu0 %v8731_v22 }
 0x5bd   :  { %965 = vmatpush.msrb.mxu0 %v8730_v24 }
 0x5bf   :  { %966 = vmatpush.msrb.mxu0 %v8729_v25 }
 0x5c1   :  { %967 = vmatpush.msrb.mxu0 %v8728_v26 }
 0x5c2   :  { %8721 = vmatmul.msk.f32.gmra.mxu2 %vm61_vm0, %v9969_v20 }
 0x60a   :  { %v600_v23 = vpop.f32.mrf.mxu0 }
 0x60b   :  { %8703 = vmatmul.msk.f32.gmra.mxu1 %vm156_vm1, %v600_v23 }
 0x62f   :  { %v737_v38 = vpop.f32.mrf.mxu0 }
 0x630   :  { %8710 = vmatmul.msk.f32.vlgmr.msrb.gmra.mxu3 %vm156_vm1, %v737_v38 }
 0x635   :  { %v763_v39 = vpop.f32.mrf.mxu2 }
 0x638   :  { %8711 = vmatmul.msk.f32.gmra.mxu3 %vm156_vm1, %v763_v39 }
 0x63d   :  { %v903_v53 = vpop.f32.mrf.mxu2 }
 0x63e   :  { %v10158_v54 = vadd.f32 %v9375_v51, %v903_v53 }
 0x640   :  { %8726 = vmatmul.msk.f32.vlgmr.msra.gmra.mxu3 %vm61_vm0, %v10120_v40  ;;  %1102 = vrot.lane.b32.xlu2 %v10158_v54, %s9815_s18 }
 0x645   :  { %v906_v7 = vpop.f32.mrf.mxu2 }
 0x646   :  { %v10192_v9 = vadd.f32 %v9375_v51, %v906_v7 }
 0x648   :  { %8727 = vmatmul.msk.f32.gmra.mxu3 %vm61_vm0, %v10151_v48 }
 0x688   :  { %v629_v62 = vpop.f32.mrf.mxu1 }
 0x689   :  { %v633_v1 = vadd.f32 %v629_v62, %v469_v63 }
 0x69a   :  { %v1103_v14 = vpop.permute.xlu2 %1102 }
 0x6b3   :  { %v789_v58 = vpop.f32.mrf.mxu3 }
 0x6b4   :  { %v795_v59 = vadd.f32 %v789_v58, %v632_v57 }
 0x6b6   :  { %v797_v61 = vadd.f32 %v795_v59, %v9929_v8 }
 0x6b8   :  { %v10168_v0 = vadd.f32 %v9373_v60, %v797_v61 }
 0x6ba   :  { %8712 = vmatmul.msk.f32.vlgmr.msra.gmra.mxu0 %vm61_vm0, %v10168_v0 }
 0x6bb   :  { %v792_v2 = vpop.f32.mrf.mxu3 }
 0x6bc   :  { %v796_v50 = vadd.f32 %v792_v2, %v633_v1 }
 0x6be   :  { %v798_v3 = vadd.f32 %v796_v50, %v9969_v20 }
 0x6c0   :  { %v10173_v4 = vadd.f32 %v9373_v60, %v798_v3 }
 0x6c2   :  { %8713 = vmatmul.msk.f32.gmra.mxu0 %vm61_vm0, %v10173_v4 }
 0x6c3   :  { %v939_v8 = vpop.f32.mrf.mxu3 }
 0x6c4   :  { %v10180_v52 = vadd.f32 %v9374_v5, %v939_v8 }
 0x6c6   :  { %1104 = vrot.lane.b32.xlu1 %v10180_v52, %s9815_s18  ;;  %8738 = vmatpush.xpose.msk.msrb.mxu1 %vm156_vm1, %v10180_v52 }
 0x6ca   :  { %8732 = vmatmul.msk.f32.vlgmr.msrb.gmra.mxu0 %vm61_vm0, %v10120_v40 }
 0x6cb   :  { %v942_v6 = vpop.f32.mrf.mxu3 }
 0x6cc   :  { %v10186_v20 = vadd.f32 %v9374_v5, %v942_v6 }
 0x6ce   :  { %1132 = vrot.lane.b32.xlu1 %v10186_v20, %s9815_s18  ;;  %8740 = vmatpush.xpose.msk.msra.mxu2 %vm156_vm1, %v10186_v20 }
 0x6d1   :  { %8741 = vmatmul.msk.f32.vlgmr.msra.gmra.mxu2 %vm156_vm1, %v10192_v9 }
 0x6d2   :  { %8733 = vmatmul.msk.f32.gmra.mxu0 %vm61_vm0, %v10151_v48 }
 0x6d6   :  { %1130 = vrot.lane.b32.xlu1 %v10192_v9, %s9815_s18 }
 0x737   :  { %v832_v11 = vpop.f32.mrf.mxu0 }
 0x738   :  { %v833_v12 = vadd.f32 %v9376_v10, %v832_v11  ;;  %v1105_v13 = vpop.permute.xlu1 %1104 }
 0x739   :  { %8744 = vmatpush.xpose.msk.msrb.mxu3 %vm156_vm1, %v1105_v13 }
 0x73a   :  { %v838_v15 = vmax.f32 %v833_v12, 0.0 }
 0x73c   :  { %8714 = vmatmul.msk.f32.vlgmr.msra.gmra.mxu1 %vm61_vm0, %v838_v15  ;;  %8745 = vmatmul.msk.f32.vlgmr.msrb.gmra.mxu3 %vm156_vm1, %v1103_v14 }
 0x73f   :  { %v835_v16 = vpop.f32.mrf.mxu0 }
 0x740   :  { %v836_v17 = vadd.f32 %v9376_v10, %v835_v16  ;;  %v1133_v27 = vpop.permute.xlu1 %1132 }
 0x741   :  { %8746 = vmatpush.xpose.msk.msra.mxu0 %vm156_vm1, %v1133_v27 }
 0x742   :  { %v839_v21 = vmax.f32 %v836_v17, 0.0  ;;  %v8734_v17 = vld [vmem:[%s12421_s2 + $0xe0] sm:$0xff] }
 0x744   :  { %8715 = vmatmul.msk.f32.gmra.mxu1 %vm61_vm0, %v839_v21  ;;  %v8735_v21 = vld [vmem:[%s12421_s2 + $0xe8] sm:$0xff] }
 0x745   :  { %1286 = vmatpush.msrb.mxu0 %v8734_v17  ;;  %1257 = vmatpush.msra.mxu3 %v8735_v21 }
 0x747   :  { %v969_v43 = vpop.f32.mrf.mxu0 }
 0x748   :  { %v1131_v33 = vpop.permute.xlu1 %1130  ;;  %v10235_v44 = vadd.f32 %v9378_v42, %v969_v43 }
 0x749   :  { %8747 = vmatmul.msk.f32.vlgmr.msra.gmra.mxu0 %vm156_vm1, %v1131_v33 }
 0x74a   :  { %1074 = vmatpush.msra.mxu1 %v10235_v44 }
 0x74c   :  { %8739 = vmatmul.msk.f32.vlgmr.msrb.gmra.mxu1 %vm156_vm1, %v10158_v54 }
 0x74f   :  { %v972_v49 = vpop.f32.mrf.mxu0 }
 0x750   :  { %v10243_v51 = vadd.f32 %v9378_v42, %v972_v49 }
 0x752   :  { %1097 = vmatpush.msrb.mxu2 %v10243_v51 }
 0x754   :  { %v1029_v53 = vpop.f32.mrf.mxu2 }
 0x755   :  { %v1033_v55 = vmul.f32 0.17677669, %v1029_v53 }
 0x757   :  { %v1037_v56 = vsel %vm156_vm1, %v1033_v55, -inf }
 0x7b9   :  { %v10222_v30 = vpop.f32.mrf.mxu1 }
 0x7bf   :  { %v1127_v23 = vpop.f32.mrf.mxu3 }
 0x7c0   :  { %v1158_v46 = vmul.f32 0.17677669, %v1127_v23 }
 0x7c1   :  { %v10226_v31 = vpop.f32.mrf.mxu1 }
 0x7c2   :  { %v1160_v32 = vsel %vm156_vm1, %v1158_v46, -inf }
 0x7c3   :  { %1161 = vmax.xlane.f32.xlu2 %v1160_v32 }
 0x7c6   :  { %v1155_v57 = vpop.f32.mrf.mxu0 }
 0x7c7   :  { %v1159_v58 = vmul.f32 0.17677669, %v1155_v57 }
 0x7c9   :  { %v1003_v29 = vpop.f32.mrf.mxu1  ;;  %v1163_v59 = vsel %vm156_vm1, %v1159_v58, -inf }
 0x7ca   :  { %v1032_v34 = vmul.f32 0.17677669, %v1003_v29 }
 0x7cc   :  { %v1034_v35 = vsel %vm156_vm1, %v1032_v34, -inf }
 0x7cd   :  { %1035 = vmax.xlane.f32.xlu0 %v1034_v35 }
 0x7db   :  { %1183 = vrot.lane.b32.xlu2 %v10235_v44, %s9815_s18 }
 0x836   :  { %v1162_v36 = vpop.xlane.xlu2 %1161 }
 0x837   :  { %v1166_v37 = vsub.f32 %v1158_v46, %v1162_v36 }
 0x839   :  { %v1168_v38 = vmul.f32 1.442695, %v1166_v37 }
 0x83b   :  { %9467 = vpow2.f32 %v1168_v38 }
 0x83e   :  { %v1184_v60 = vpop.permute.xlu2 %1183 }
 0x83f   :  { %1204 = vmatpush.msrb.mxu1 %v1184_v60 }
 0x840   :  { %v1036_v39 = vpop.xlane.xlu0 %1035 }
 0x841   :  { %v9468_v41 = vpop.eup %9467  ;;  %v1040_v18 = vsub.f32 %v1032_v34, %v1036_v39 }
 0x842   :  { %v1172_v28 = vsel %vm156_vm1, %v9468_v41, 0.0 }
 0x843   :  { %v1042_v19 = vmul.f32 1.442695, %v1040_v18  ;;  %1173 = vadd.xlane.f32.xlu0 %v1172_v28 }
 0x845   :  { %9469 = vpow2.f32 %v1042_v19 }
 0x84b   :  { %v9470_v45 = vpop.eup %9469 }
 0x84c   :  { %v1046_v47 = vsel %vm156_vm1, %v9470_v45, 0.0 }
 0x84d   :  { %1047 = vadd.xlane.f32.xlu1 %v1046_v47 }
 0x857   :  { %1296 = vrot.lane.b32.xlu0 %v10180_v52, %s9816_s23 }
 0x866   :  { %1294 = vrot.lane.b32.xlu1 %v10158_v54, %s9816_s23 }
 0x881   :  { %1038 = vmax.xlane.f32.xlu0 %v1037_v56 }
 0x890   :  { %1164 = vmax.xlane.f32.xlu1 %v1163_v59 }
 0x8a9   :  { %1322 = vrot.lane.b32.xlu1 %v10192_v9, %s9816_s23 }
 0x8b1   :  { %1487 = vrot.lane.b32.xlu1 %v10186_v20, %s9817_s12 }
 0x8b6   :  { %v1174_v62 = vpop.xlane.xlu0 %1173 }
 0x8c0   :  { %v1048_v61 = vpop.xlane.xlu1 %1047 }
 0x8c1   :  { %9471 = vrcp.f32 %v1048_v61 }
 0x8c2   :  { %9473 = vrcp.f32 %v1174_v62  ;;  %v8736_v62 = vld [vmem:[%s12421_s2 + $0xf0] sm:$0xff] }
 0x8c3   :  { %1447 = vmatpush.msrb.mxu3 %v8736_v62 }
 0x8c7   :  { %v9472_v63 = vpop.eup %9471 }
 0x8c8   :  { %v1054_v1 = vmul.f32 %v9472_v63, %v9470_v45  ;;  %v9474_v50 = vpop.eup %9473 }
 0x8c9   :  { %v1297_v2 = vpop.permute.xlu0 %1296  ;;  %v1180_v3 = vmul.f32 %v9474_v50, %v9468_v41 }
 0x8ca   :  { %8742 = vmatmul.msk.f32.vlgmr.msra.gmra.mxu1 %vm156_vm1, %v1054_v1 }
 0x8cb   :  { %8754 = vmatpush.xpose.msk.msra.mxu1 %vm156_vm1, %v1297_v2 }
 0x8d2   :  { %8748 = vmatmul.msk.f32.vlgmr.msrb.gmra.mxu1 %vm156_vm1, %v1180_v3 }
 0x8d8   :  { %v1295_v5 = vpop.permute.xlu1 %1294 }
 0x8da   :  { %8755 = vmatmul.msk.f32.vlgmr.msra.gmra.mxu1 %vm156_vm1, %v1295_v5 }
 0x8f4   :  { %v1039_v8 = vpop.xlane.xlu0 %1038 }
 0x8f5   :  { %v1041_v6 = vsub.f32 %v1033_v55, %v1039_v8 }
 0x8f7   :  { %v1044_v7 = vmul.f32 1.442695, %v1041_v6 }
 0x8f9   :  { %9475 = vpow2.f32 %v1044_v7 }
 0x8ff   :  { %v9476_v10 = vpop.eup %9475 }
 0x900   :  { %v1049_v11 = vsel %vm156_vm1, %v9476_v10, 0.0 }
 0x901   :  { %1050 = vadd.xlane.f32.xlu2 %v1049_v11 }
 0x903   :  { %v1165_v12 = vpop.xlane.xlu1 %1164 }
 0x904   :  { %v1167_v13 = vsub.f32 %v1159_v58, %v1165_v12 }
 0x906   :  { %v1170_v14 = vmul.f32 1.442695, %v1167_v13 }
 0x908   :  { %9477 = vpow2.f32 %v1170_v14 }
 0x90e   :  { %v9478_v15 = vpop.eup %9477 }
 0x90f   :  { %v1175_v16 = vsel %vm156_vm1, %v9478_v15, 0.0 }
 0x910   :  { %1176 = vadd.xlane.f32.xlu2 %v1175_v16 }
 0x91b   :  { %v1323_v32 = vpop.permute.xlu1 %1322 }
 0x923   :  { %v1488_v34 = vpop.permute.xlu1 %1487 }
 0x928   :  { %1324 = vrot.lane.b32.xlu2 %v10186_v20, %s9816_s23 }
 0x930   :  { %1459 = vrot.lane.b32.xlu2 %v10180_v52, %s9817_s12 }
 0x938   :  { %1457 = vrot.lane.b32.xlu2 %v10158_v54, %s9817_s12 }
 0x940   :  { %1374 = vrot.lane.b32.xlu2 %v10235_v44, %s9816_s23 }
 0x947   :  { %v1076_v22 = vpop.f32.mrf.mxu1 }
 0x948   :  { %8752 = vmatmul.msk.f32.vlgmr.msrb.gmra.mxu0 %vm156_vm1, %v1076_v22  ;;  %1485 = vrot.lane.b32.xlu2 %v10192_v9, %s9817_s12 }
 0x94f   :  { %v1206_v20 = vpop.f32.mrf.mxu1 }
 0x950   :  { %8750 = vmatmul.msk.f32.vlgmr.msra.gmra.mxu3 %vm156_vm1, %v1206_v20 }
 0x957   :  { %v1319_v24 = vpop.f32.mrf.mxu1 }
 0x958   :  { %v1350_v25 = vmul.f32 0.17677669, %v1319_v24 }
 0x95a   :  { %v1352_v52 = vsel %vm156_vm1, %v1350_v25, -inf }
 0x95b   :  { %1353 = vmax.xlane.f32.xlu0 %v1352_v52 }
 0x96f   :  { %1210 = vrot.lane.b32.xlu0 %v10243_v51, %s9815_s18 }
 0x974   :  { %v1051_v54 = vpop.xlane.xlu2 %1050 }
 0x975   :  { %9479 = vrcp.f32 %v1051_v54 }
 0x97b   :  { %v9480_v26 = vpop.eup %9479 }
 0x97c   :  { %v1055_v27 = vmul.f32 %v9480_v26, %v9476_v10 }
 0x97e   :  { %8743 = vmatmul.msk.f32.vlgmr.msrb.gmra.mxu2 %vm156_vm1, %v1055_v27 }
 0x983   :  { %v1177_v23 = vpop.xlane.xlu2 %1176 }
 0x98b   :  { %v1325_v46 = vpop.permute.xlu2 %1324 }
 0x993   :  { %v1460_v9 = vpop.permute.xlu2 %1459 }
 0x994   :  { %8762 = vmatpush.xpose.msk.msra.mxu0 %vm156_vm1, %v1460_v9 }
 0x99b   :  { %v1458_v33 = vpop.permute.xlu2 %1457 }
 0x9a3   :  { %v1375_v29 = vpop.permute.xlu2 %1374 }
 0x9a4   :  { %1395 = vmatpush.msrb.mxu1 %v1375_v29 }
 0x9a6   :  { %8764 = vmatpush.xpose.msk.msra.mxu1 %vm156_vm1, %v1488_v34 }
 0x9ab   :  { %v1486_v47 = vpop.permute.xlu2 %1485 }
 0x9c5   :  { %v10294_v57 = vpop.f32.mrf.mxu0 }
 0x9ce   :  { %v1354_v35 = vpop.xlane.xlu0 %1353 }
 0x9cf   :  { %v1358_v36 = vsub.f32 %v1350_v25, %v1354_v35  ;;  %v8790_v35 = vld [vmem:[%s12421_s2 + $0x130] sm:$0xff] }
 0x9d1   :  { %v1360_v37 = vmul.f32 1.442695, %v1358_v36  ;;  %v8789_v36 = vld [vmem:[%s12421_s2 + $0x128] sm:$0xff] }
 0x9d3   :  { %9481 = vpow2.f32 %v1360_v37  ;;  %v8788_v37 = vld [vmem:[%s12421_s2 + $0x120] sm:$0xff] }
 0x9d4   :  { %9483 = vrcp.f32 %v1177_v23 }
 0x9d9   :  { %v9482_v38 = vpop.eup %9481 }
 0x9da   :  { %v1364_v39 = vsel %vm156_vm1, %v9482_v38, 0.0  ;;  %v9484_v41 = vpop.eup %9483 }
 0x9db   :  { %1365 = vadd.xlane.f32.xlu0 %v1364_v39  ;;  %v1181_v18 = vmul.f32 %v9484_v41, %v9478_v15  ;;  %v8784_v39 = vld [vmem:[%s12421_s2 + $0x110] sm:$0xff]  ;;  %v8783_v41 = vld [vmem:[%s12421_s2 + $0x108] sm:$0xff] }
 0x9e1   :  { %v1211_v28 = vpop.permute.xlu0 %1210 }
 0x9e2   :  { %1231 = vmatpush.msra.mxu2 %v1211_v28  ;;  %v8773_v28 = vld [vmem:[%s12423_s4 + $0x38] sm:$0xff] }
 0x9e3   :  { %8749 = vmatmul.msk.f32.vlgmr.msra.gmra.mxu2 %vm156_vm1, %v1181_v18  ;;  %v8782_v18 = vld [vmem:[%s12421_s2 + $0x100] sm:$0xff] }
 0x9e4   :  { %8756 = vmatpush.xpose.msk.msrb.mxu2 %vm156_vm1, %v1325_v46  ;;  %v8737_v46 = vld [vmem:[%s12421_s2 + $0xf8] sm:$0xff] }
 0x9eb   :  { %8757 = vmatmul.msk.f32.vlgmr.msrb.gmra.mxu2 %vm156_vm1, %v1323_v32 }
 0xa01   :  { %v1099_v19 = vpop.f32.mrf.mxu2 }
 0xa02   :  { %8753 = vmatmul.msk.f32.gmra.mxu0 %vm156_vm1, %v1099_v19  ;;  %v8772_v19 = vld [vmem:[%s12423_s4 + $0x30] sm:$0xff] }
 0xa0a   :  { %8763 = vmatmul.msk.f32.vlgmr.msra.gmra.mxu0 %vm156_vm1, %v1458_v33 }
 0xa4e   :  { %v1366_v42 = vpop.xlane.xlu0 %1365 }
 0xa4f   :  { %9485 = vrcp.f32 %v1366_v42  ;;  %v8771_v42 = vld [vmem:[%s12423_s4 + $0x28] sm:$0xff] }
 0xa55   :  { %v9486_v43 = vpop.eup %9485 }
 0xa56   :  { %v1372_v45 = vmul.f32 %v9486_v43, %v9482_v38  ;;  %v8785_v38 = vld [vmem:[%s12421_s2 + $0x118] sm:$0xff] }
 0xa58   :  { %8758 = vmatmul.msk.f32.vlgmr.msrb.gmra.mxu1 %vm156_vm1, %v1372_v45  ;;  %v1259_v45 = vpop.f32.mrf.mxu3 }
 0xa59   :  { %1610 = vmatpush.msrb.mxu1 %v8737_v46 }
 0xa60   :  { %8765 = vmatmul.msk.f32.vlgmr.msra.gmra.mxu1 %vm156_vm1, %v1486_v47  ;;  %v9755_v47 = vld [vmem:[%s12419_s0] sm:$0xff] }
 0xa66   :  { %v1233_v49 = vpop.f32.mrf.mxu2 }
 0xa67   :  { %8751 = vmatmul.msk.f32.gmra.mxu3 %vm156_vm1, %v1233_v49  ;;  %v9756_v49 = vld [vmem:[%s12419_s0 + $0x8] sm:$0xff] }
 0xa6e   :  { %v1347_v53 = vpop.f32.mrf.mxu2 }
 0xa6f   :  { %v1351_v55 = vmul.f32 0.17677669, %v1347_v53 }
 0xa71   :  { %v1355_v56 = vsel %vm156_vm1, %v1351_v55, -inf }
 0xa72   :  { %1356 = vmax.xlane.f32.xlu1 %v1355_v56 }
 0xa7f   :  { %v10296_v58 = vpop.f32.mrf.mxu0 }
 0xa87   :  { %v1482_v59 = vpop.f32.mrf.mxu0 }
 0xa88   :  { %v1513_v60 = vmul.f32 0.17677669, %v1482_v59 }
 0xa8a   :  { %v1515_v61 = vsel %vm156_vm1, %v1513_v60, -inf }
 0xa8b   :  { %1516 = vmax.xlane.f32.xlu2 %v1515_v61  ;;  %1537 = vrot.lane.b32.xlu1 %v10235_v44, %s9817_s12  ;;  %v9379_v61 = vld [vmem:[%s12422_s3 + $0x7] ss:$0 sm:$0xff] }
 0xad5   :  { %v1397_v63 = vpop.f32.mrf.mxu1 }
 0xad6   :  { %8760 = vmatmul.msk.f32.vlgmr.msrb.gmra.mxu3 %vm156_vm1, %v1397_v63 }
 0xadd   :  { %v1510_v11 = vpop.f32.mrf.mxu1 }
 0xade   :  { %v1514_v12 = vmul.f32 0.17677669, %v1510_v11  ;;  %v9380_v11 = vld [vmem:[%s12422_s3 + $0x9] ss:$0 sm:$0xff] }
 0xae0   :  { %v1518_v13 = vsel %vm156_vm1, %v1514_v12, -inf }
 0xae5   :  { %v1357_v1 = vpop.xlane.xlu1 %1356 }
 0xae6   :  { %v1359_v2 = vsub.f32 %v1351_v55, %v1357_v1  ;;  %v1289_v55 = vadd.f32 %v10294_v57, %v1259_v45  ;;  %v8779_v1 = vld [vmem:[%s12425_s6 + $0x38] sm:$0xff]  ;;  %v8778_v57 = vld [vmem:[%s12425_s6 + $0x30] sm:$0xff] }
 0xae7   :  { %1687 = vmatpush.msra.mxu3 %v8779_v1 }
 0xae8   :  { %v1362_v50 = vmul.f32 1.442695, %v1359_v2  ;;  %v8777_v2 = vld [vmem:[%s12425_s6 + $0x28] sm:$0xff] }
 0xae9   :  { %1688 = vmatpush.msra.mxu3 %v8778_v57 }
 0xaea   :  { %9487 = vpow2.f32 %v1362_v50  ;;  %v8776_v50 = vld [vmem:[%s12425_s6 + $0x20] sm:$0xff] }
 0xaeb   :  { %1689 = vmatpush.msra.mxu3 %v8777_v2 }
 0xaed   :  { %1690 = vmatpush.msra.mxu3 %v8776_v50 }
 0xaf0   :  { %v9488_v3 = vpop.eup %9487 }
 0xaf1   :  { %v1367_v5 = vsel %vm156_vm1, %v9488_v3, 0.0 }
 0xaf2   :  { %1368 = vadd.xlane.f32.xlu0 %v1367_v5 }
 0xafd   :  { %v1538_v54 = vpop.permute.xlu1 %1537 }
 0xafe   :  { %v1517_v8 = vpop.xlane.xlu2 %1516 }
 0xaff   :  { %v1521_v6 = vsub.f32 %v1513_v60, %v1517_v8 }
 0xb01   :  { %v1523_v7 = vmul.f32 1.442695, %v1521_v6 }
 0xb03   :  { %9489 = vpow2.f32 %v1523_v7 }
 0xb09   :  { %v9490_v44 = vpop.eup %9489 }
 0xb0a   :  { %v1527_v10 = vsel %vm156_vm1, %v9490_v44, 0.0 }
 0xb0b   :  { %1528 = vadd.xlane.f32.xlu0 %v1527_v10 }
 0xb13   :  { %1519 = vmax.xlane.f32.xlu0 %v1518_v13 }
 0xb27   :  { %1400 = vrot.lane.b32.xlu0 %v10243_v51, %s9816_s23 }
 0xb65   :  { %v1369_v14 = vpop.xlane.xlu0 %1368 }
 0xb7e   :  { %v1529_v15 = vpop.xlane.xlu0 %1528 }
 0xb86   :  { %v1520_v16 = vpop.xlane.xlu0 %1519 }
 0xb87   :  { %v1522_v17 = vsub.f32 %v1514_v12, %v1520_v16  ;;  %v9382_v16 = vld [vmem:[%s12424_s5 + $0x1] ss:$0 sm:$0xff] }
 0xb89   :  { %v1525_v21 = vmul.f32 1.442695, %v1522_v17 }
 0xb8b   :  { %9491 = vpow2.f32 %v1525_v21 }
 0xb8c   :  { %9493 = vrcp.f32 %v1369_v14 }
 0xb8d   :  { %9495 = vrcp.f32 %v1529_v15 }
 0xb91   :  { %v9492_v22 = vpop.eup %9491 }
 0xb92   :  { %v1530_v20 = vsel %vm156_vm1, %v9492_v22, 0.0  ;;  %v9494_v24 = vpop.eup %9493 }
 0xb93   :  { %1531 = vadd.xlane.f32.xlu2 %v1530_v20  ;;  %v1373_v25 = vmul.f32 %v9494_v24, %v9488_v3  ;;  %v9496_v26 = vpop.eup %9495  ;;  %v8797_v20 = vld [vmem:[%s12421_s2 + $0x158] sm:$0xff]  ;;  %v8796_v24 = vld [vmem:[%s12421_s2 + $0x150] sm:$0xff] }
 0xb94   :  { %v1535_v27 = vmul.f32 %v9496_v26, %v9490_v44 }
 0xb99   :  { %v1401_v52 = vpop.permute.xlu0 %1400 }
 0xb9a   :  { %1421 = vmatpush.msra.mxu2 %v1401_v52  ;;  %v8794_v52 = vld [vmem:[%s12421_s2 + $0x140] sm:$0xff] }
 0xb9b   :  { %8759 = vmatmul.msk.f32.vlgmr.msra.gmra.mxu2 %vm156_vm1, %v1373_v25  ;;  %v8795_v25 = vld [vmem:[%s12421_s2 + $0x148] sm:$0xff] }
 0xb9c   :  { %1558 = vmatpush.msrb.mxu2 %v1538_v54 }
 0xb9e   :  { %1651 = vmatpush.msra.mxu2 %v8773_v28 }
 0xba0   :  { %1652 = vmatpush.msra.mxu2 %v8772_v19 }
 0xba2   :  { %1653 = vmatpush.msra.mxu2 %v8771_v42 }
 0xba3   :  { %8766 = vmatmul.msk.f32.vlgmr.msrb.gmra.mxu2 %vm156_vm1, %v1535_v27 }
 0xbab   :  { %1563 = vrot.lane.b32.xlu2 %v10243_v51, %s9817_s12  ;;  %v8791_v51 = vld [vmem:[%s12421_s2 + $0x138] sm:$0xff] }
 0xbac   :  { %1753 = vmatpush.msra.mxu1 %v8791_v51 }
 0xbae   :  { %1754 = vmatpush.msra.mxu1 %v8790_v35 }
 0xbb0   :  { %1755 = vmatpush.msra.mxu1 %v8789_v36 }
 0xbb2   :  { %1756 = vmatpush.msra.mxu1 %v8788_v37 }
 0xc06   :  { %v1532_v23 = vpop.xlane.xlu2 %1531 }
 0xc07   :  { %9497 = vrcp.f32 %v1532_v23 }
 0xc0d   :  { %v9498_v9 = vpop.eup %9497 }
 0xc0e   :  { %v1536_v32 = vmul.f32 %v9498_v9, %v9492_v22  ;;  %v1564_v33 = vpop.permute.xlu2 %1563 }
 0xc0f   :  { %1584 = vmatpush.msrb.mxu0 %v1564_v33 }
 0xc10   :  { %8767 = vmatmul.msk.f32.vlgmr.msrb.gmra.mxu0 %vm156_vm1, %v1536_v32 }
 0xc11   :  { %1723 = vmatpush.msra.mxu0 %v8785_v38 }
 0xc13   :  { %1724 = vmatpush.msra.mxu0 %v8784_v39 }
 0xc15   :  { %1725 = vmatpush.msra.mxu0 %v8783_v41 }
 0xc17   :  { %1726 = vmatpush.msra.mxu0 %v8782_v18 }
 0xc18   :  { %8786 = vmatmul.msk.f32.vlgmr.msra.gmra.mxu0 %vm61_vm0, %v10120_v40  ;;  %v8770_v40 = vld [vmem:[%s12423_s4 + $0x20] sm:$0xff] }
 0xc19   :  { %1654 = vmatpush.msra.mxu2 %v8770_v40 }
 0xc1b   :  { %1783 = vmatpush.msrb.mxu2 %v8797_v20 }
 0xc1d   :  { %1784 = vmatpush.msrb.mxu2 %v8796_v24 }
 0xc1e   :  { %v1423_v29 = vpop.f32.mrf.mxu2 }
 0xc1f   :  { %8761 = vmatmul.msk.f32.gmra.mxu3 %vm156_vm1, %v1423_v29  ;;  %1785 = vmatpush.msrb.mxu2 %v8795_v25  ;;  %v8800_v25 = vld [vmem:[%s12421_s2 + $0x160] sm:$0xff] }
 0xc20   :  { %8787 = vmatmul.msk.f32.gmra.mxu0 %vm61_vm0, %v10151_v48  ;;  %v1262_v48 = vpop.f32.mrf.mxu3 }
 0xc21   :  { %v1292_v5 = vadd.f32 %v10296_v58, %v1262_v48  ;;  %v9381_v58 = vld [vmem:[%s12422_s3 + $0x8] ss:$0 sm:$0xff]  ;;  %1786 = vmatpush.msrb.mxu2 %v8794_v52 }
 0xc22   :  { %v8801_v52 = vld [vmem:[%s12421_s2 + $0x168] sm:$0xff] }
 0xc26   :  { %v1560_v34 = vpop.f32.mrf.mxu2 }
 0xc27   :  { %8768 = vmatmul.msk.f32.vlgmr.msrb.gmra.mxu1 %vm156_vm1, %v1560_v34  ;;  %v9384_v34 = vld [vmem:[%s12422_s3 + $0xa] ss:$0 sm:$0xff] }
 0xc28   :  { %v1449_v53 = vpop.f32.mrf.mxu3 }
 0xc29   :  { %v1455_v56 = vadd.f32 %v1449_v53, %v1289_v55 }
 0xc8d   :  { %v1586_v43 = vpop.f32.mrf.mxu0 }
 0xc8e   :  { %8769 = vmatmul.msk.f32.gmra.mxu1 %vm156_vm1, %v1586_v43 }
 0xc95   :  { %v1728_v14 = vpop.f32.mrf.mxu0 }
 0xc96   :  { %8792 = vmatmul.msk.f32.vlgmr.msra.gmra.mxu1 %vm61_vm0, %v9755_v47  ;;  %v10407_v15 = vadd.f32 %v9381_v58, %v1728_v14 }
 0xc9d   :  { %v1731_v32 = vpop.f32.mrf.mxu0 }
 0xc9e   :  { %8793 = vmatmul.msk.f32.gmra.mxu1 %vm61_vm0, %v9756_v49  ;;  %v10434_v29 = vadd.f32 %v9381_v58, %v1731_v32 }
 0xca2   :  { %v1452_v3 = vpop.f32.mrf.mxu3 }
 0xca3   :  { %v1456_v8 = vadd.f32 %v1452_v3, %v1292_v5 }
 0xca4   :  { %v1612_v59 = vpop.f32.mrf.mxu1 }
 0xca5   :  { %v1618_v60 = vadd.f32 %v1612_v59, %v1455_v56 }
 0xca7   :  { %v1620_v62 = vadd.f32 %v9755_v47, %v1618_v60 }
 0xca9   :  { %v10374_v63 = vadd.f32 %v9379_v61, %v1620_v62 }
 0xcab   :  { %8774 = vmatmul.msk.f32.vlgmr.msra.gmra.mxu2 %vm61_vm0, %v10374_v63 }
 0xd0b   :  { %v1615_v6 = vpop.f32.mrf.mxu1 }
 0xd0c   :  { %v1619_v7 = vadd.f32 %v1615_v6, %v1456_v8 }
 0xd0e   :  { %v1621_v44 = vadd.f32 %v9756_v49, %v1619_v7 }
 0xd10   :  { %v10391_v10 = vadd.f32 %v9379_v61, %v1621_v44 }
 0xd12   :  { %8775 = vmatmul.msk.f32.gmra.mxu2 %vm61_vm0, %v10391_v10 }
 0xd13   :  { %v1758_v12 = vpop.f32.mrf.mxu1 }
 0xd14   :  { %v10398_v13 = vadd.f32 %v9380_v11, %v1758_v12 }
 0xd16   :  { %1923 = vrot.lane.b32.xlu0 %v10398_v13, %s9815_s18  ;;  %8804 = vmatpush.xpose.msk.msrb.mxu3 %vm156_vm1, %v10398_v13 }
 0xd1a   :  { %8798 = vmatmul.msk.f32.vlgmr.msrb.gmra.mxu2 %vm61_vm0, %v9755_v47 }
 0xd1b   :  { %v1761_v9 = vpop.f32.mrf.mxu1 }
 0xd1c   :  { %v10432_v33 = vadd.f32 %v9380_v11, %v1761_v9 }
 0xd1e   :  { %1921 = vrot.lane.b32.xlu0 %v10407_v15, %s9815_s18  ;;  %8806 = vmatpush.xpose.msk.msrb.mxu0 %vm156_vm1, %v10432_v33 }
 0xd21   :  { %8807 = vmatmul.msk.f32.vlgmr.msrb.gmra.mxu0 %vm156_vm1, %v10434_v29 }
 0xd22   :  { %8799 = vmatmul.msk.f32.gmra.mxu2 %vm61_vm0, %v9756_v49 }
 0xd2e   :  { %v1656_v17 = vpop.f32.mrf.mxu2 }
 0xd2f   :  { %v1657_v21 = vadd.f32 %v9382_v16, %v1656_v17 }
 0xd31   :  { %v1662_v22 = vmax.f32 %v1657_v21, 0.0 }
 0xd33   :  { %8780 = vmatmul.msk.f32.vlgmr.msra.gmra.mxu3 %vm61_vm0, %v1662_v22 }
 0xd88   :  { %v1924_v54 = vpop.permute.xlu0 %1923 }
 0xd89   :  { %8810 = vmatpush.xpose.msk.msrb.mxu1 %vm156_vm1, %v1924_v54 }
 0xd8d   :  { %2076 = vmatpush.msra.mxu1 %v8801_v52 }
 0xd90   :  { %v1922_v26 = vpop.permute.xlu0 %1921 }
 0xd91   :  { %8811 = vmatmul.msk.f32.vlgmr.msrb.gmra.mxu1 %vm156_vm1, %v1922_v26 }
 0xd95   :  { %v1659_v27 = vpop.f32.mrf.mxu2 }
 0xd96   :  { %v1660_v23 = vadd.f32 %v9382_v16, %v1659_v27 }
 0xd98   :  { %v1663_v46 = vmax.f32 %v1660_v23, 0.0 }
 0xd9a   :  { %8781 = vmatmul.msk.f32.gmra.mxu3 %vm61_vm0, %v1663_v46 }
 0xd9d   :  { %v1788_v51 = vpop.f32.mrf.mxu2 }
 0xd9e   :  { %v10445_v35 = vadd.f32 %v9384_v34, %v1788_v51  ;;  %v1848_v42 = vpop.f32.mrf.mxu0 }
 0xd9f   :  { %v1852_v40 = vmul.f32 0.17677669, %v1848_v42 }
 0xda0   :  { %1893 = vmatpush.msra.mxu3 %v10445_v35 }
 0xda1   :  { %v1856_v43 = vsel %vm156_vm1, %v1852_v40, -inf }
 0xda2   :  { %8805 = vmatmul.msk.f32.vlgmr.msrb.gmra.mxu3 %vm156_vm1, %v10407_v15 }
 0xda5   :  { %v1791_v55 = vpop.f32.mrf.mxu2 }
 0xda6   :  { %v10462_v56 = vadd.f32 %v9384_v34, %v1791_v55 }
 0xda8   :  { %1916 = vmatpush.msra.mxu0 %v10462_v56 }
 0xdb6   :  { %v10449_v39 = vpop.f32.mrf.mxu3 }
 0xe0e   :  { %v1946_v36 = vpop.f32.mrf.mxu1 }
 0xe0f   :  { %v1977_v37 = vmul.f32 0.17677669, %v1946_v36 }
 0xe11   :  { %v1979_v38 = vsel %vm156_vm1, %v1977_v37, -inf }
 0xe12   :  { %1980 = vmax.xlane.f32.xlu0 %v1979_v38 }
 0xe1d   :  { %v10451_v41 = vpop.f32.mrf.mxu3 }
 0xe25   :  { %v1822_v18 = vpop.f32.mrf.mxu3 }
 0xe26   :  { %v1851_v28 = vmul.f32 0.17677669, %v1822_v18  ;;  %2002 = vrot.lane.b32.xlu0 %v10445_v35, %s9815_s18 }
 0xe28   :  { %v1853_v19 = vsel %vm156_vm1, %v1851_v28, -inf }
 0xe29   :  { %1854 = vmax.xlane.f32.xlu1 %v1853_v19 }
 0xe2e   :  { %2115 = vrot.lane.b32.xlu0 %v10398_v13, %s9816_s23 }
 0xe42   :  { %1951 = vrot.lane.b32.xlu1 %v10432_v33, %s9815_s18 }
 0xe58   :  { %1857 = vmax.xlane.f32.xlu0 %v1856_v43 }
 0xe85   :  { %v1981_v45 = vpop.xlane.xlu0 %1980 }
 0xe86   :  { %v1985_v47 = vsub.f32 %v1977_v37, %v1981_v45 }
 0xe88   :  { %v1987_v48 = vmul.f32 1.442695, %v1985_v47 }
 0xe8a   :  { %9499 = vpow2.f32 %v1987_v48 }
 0xe90   :  { %v9500_v49 = vpop.eup %9499 }
 0xe91   :  { %v1991_v53 = vsel %vm156_vm1, %v9500_v49, 0.0 }
 0xe92   :  { %1992 = vadd.xlane.f32.xlu1 %v1991_v53 }
 0xe98   :  { %v2003_v59 = vpop.permute.xlu0 %2002 }
 0xe99   :  { %2023 = vmatpush.msrb.mxu3 %v2003_v59 }
 0xe9c   :  { %v1855_v60 = vpop.xlane.xlu1 %1854 }
 0xe9d   :  { %v1859_v61 = vsub.f32 %v1851_v28, %v1855_v60 }
 0xe9f   :  { %v1861_v62 = vmul.f32 1.442695, %v1859_v61 }
 0xea0   :  { %v2116_v50 = vpop.permute.xlu0 %2115 }
 0xea1   :  { %9501 = vpow2.f32 %v1861_v62 }
 0xea7   :  { %v9502_v1 = vpop.eup %9501 }
 0xea8   :  { %v1865_v57 = vsel %vm156_vm1, %v9502_v1, 0.0 }
 0xea9   :  { %1866 = vadd.xlane.f32.xlu2 %v1865_v57  ;;  %v8802_v57 = vld [vmem:[%s12421_s2 + $0x170] sm:$0xff] }
 0xeaa   :  { %2266 = vmatpush.msrb.mxu1 %v8802_v57 }
 0xeab   :  { %2113 = vrot.lane.b32.xlu1 %v10407_v15, %s9816_s23 }
 0xeb4   :  { %v1952_v2 = vpop.permute.xlu1 %1951 }
 0xeb5   :  { %8812 = vmatpush.xpose.msk.msra.mxu2 %vm156_vm1, %v1952_v2 }
 0xeb9   :  { %2105 = vmatpush.msrb.mxu2 %v8800_v25 }
 0xec1   :  { %1949 = vrot.lane.b32.xlu2 %v10434_v29, %s9815_s18 }
 0xecb   :  { %v1858_v3 = vpop.xlane.xlu0 %1857 }
 0xecc   :  { %v1860_v5 = vsub.f32 %v1852_v40, %v1858_v3 }
 0xece   :  { %v1863_v8 = vmul.f32 1.442695, %v1860_v5 }
 0xed0   :  { %9503 = vpow2.f32 %v1863_v8 }
 0xed6   :  { %v9504_v6 = vpop.eup %9503 }
 0xed7   :  { %v1868_v7 = vsel %vm156_vm1, %v9504_v6, 0.0 }
 0xeea   :  { %1869 = vadd.xlane.f32.xlu2 %v1868_v7 }
 0xf05   :  { %v1993_v11 = vpop.xlane.xlu1 %1992 }
 0xf1c   :  { %v1867_v44 = vpop.xlane.xlu2 %1866 }
 0xf1d   :  { %9505 = vrcp.f32 %v1867_v44  ;;  %v2114_v21 = vpop.permute.xlu1 %2113 }
 0xf1e   :  { %9507 = vrcp.f32 %v1993_v11 }
 0xf23   :  { %v9506_v12 = vpop.eup %9505 }
 0xf24   :  { %v1873_v58 = vmul.f32 %v9506_v12, %v9502_v1  ;;  %v1950_v14 = vpop.permute.xlu2 %1949  ;;  %v9508_v16 = vpop.eup %9507 }
 0xf25   :  { %8813 = vmatmul.msk.f32.vlgmr.msra.gmra.mxu2 %vm156_vm1, %v1950_v14  ;;  %v1999_v17 = vmul.f32 %v9508_v16, %v9500_v49 }
 0xf26   :  { %8808 = vmatmul.msk.f32.vlgmr.msra.gmra.mxu3 %vm156_vm1, %v1873_v58 }
 0xf27   :  { %8820 = vmatpush.xpose.msk.msra.mxu3 %vm156_vm1, %v2116_v50 }
 0xf2e   :  { %8814 = vmatmul.msk.f32.vlgmr.msrb.gmra.mxu3 %vm156_vm1, %v1999_v17 }
 0xf36   :  { %8821 = vmatmul.msk.f32.vlgmr.msra.gmra.mxu3 %vm156_vm1, %v2114_v21 }
 0xf5d   :  { %v1870_v22 = vpop.xlane.xlu2 %1869 }
 0xf5e   :  { %9509 = vrcp.f32 %v1870_v22 }
 0xf64   :  { %v9510_v20 = vpop.eup %9509 }
 0xf65   :  { %v1874_v24 = vmul.f32 %v9510_v20, %v9504_v6 }
 0xf67   :  { %8809 = vmatmul.msk.f32.vlgmr.msra.gmra.mxu0 %vm156_vm1, %v1874_v24 }
 0xfa8   :  { %v1974_v54 = vpop.f32.mrf.mxu2 }
 0xfa9   :  { %v1978_v26 = vmul.f32 0.17677669, %v1974_v54  ;;  %v1895_v27 = vpop.f32.mrf.mxu3 }
 0xfaa   :  { %8818 = vmatmul.msk.f32.vlgmr.msrb.gmra.mxu2 %vm156_vm1, %v1895_v27 }
 0xfab   :  { %v1982_v23 = vsel %vm156_vm1, %v1978_v26, -inf }
 0xfac   :  { %1983 = vmax.xlane.f32.xlu1 %v1982_v23 }
 0xfb1   :  { %v2025_v46 = vpop.f32.mrf.mxu3 }
 0xfb2   :  { %8816 = vmatmul.msk.f32.vlgmr.msra.gmra.mxu1 %vm156_vm1, %v2025_v46 }
 0xfb9   :  { %v2138_v9 = vpop.f32.mrf.mxu3 }
 0xfba   :  { %v2169_v32 = vmul.f32 0.17677669, %v2138_v9 }
 0xfbc   :  { %v2171_v34 = vsel %vm156_vm1, %v2169_v32, -inf }
 0xfbd   :  { %2172 = vmax.xlane.f32.xlu0 %v2171_v34 }
 0xfc5   :  { %2143 = vrot.lane.b32.xlu1 %v10432_v33, %s9816_s23 }
 0xfd1   :  { %2029 = vrot.lane.b32.xlu0 %v10462_v56, %s9815_s18 }
 0xfd9   :  { %2278 = vrot.lane.b32.xlu0 %v10398_v13, %s9817_s12 }
 0xfe1   :  { %2306 = vrot.lane.b32.xlu0 %v10432_v33, %s9817_s12 }
 0xfe4   :  { %v1918_v51 = vpop.f32.mrf.mxu0 }
 0xfe5   :  { %8819 = vmatmul.msk.f32.gmra.mxu2 %vm156_vm1, %v1918_v51 }
0x101f   :  { %v1984_v36 = vpop.xlane.xlu1 %1983 }
0x1020   :  { %v1986_v37 = vsub.f32 %v1978_v26, %v1984_v36  ;;  %v9350_v36 = vpack.i.bf16 %v10462_v56, %v10445_v35 }
0x1022   :  { %v1989_v38 = vmul.f32 1.442695, %v1986_v37 }
0x1024   :  { %9511 = vpow2.f32 %v1989_v38 }
0x102a   :  { %v9512_v18 = vpop.eup %9511 }
0x102b   :  { %v1994_v28 = vsel %vm156_vm1, %v9512_v18, 0.0 }
0x102c   :  { %1995 = vadd.xlane.f32.xlu2 %v1994_v28 }
0x102d   :  { %v10520_v8 = vpop.f32.mrf.mxu2 }
0x1030   :  { %v2173_v19 = vpop.xlane.xlu0 %2172 }
0x1031   :  { %v2177_v42 = vsub.f32 %v2169_v32, %v2173_v19 }
0x1033   :  { %v2179_v40 = vmul.f32 1.442695, %v2177_v42 }
0x1035   :  { %9513 = vpow2.f32 %v2179_v40 }
0x1037   :  { %v2144_v45 = vpop.permute.xlu1 %2143 }
0x103b   :  { %v9514_v43 = vpop.eup %9513 }
0x103c   :  { %v2183_v13 = vsel %vm156_vm1, %v9514_v43, 0.0 }
0x103d   :  { %2184 = vadd.xlane.f32.xlu1 %v2183_v13 }
0x1043   :  { %v2030_v33 = vpop.permute.xlu0 %2029 }
0x1044   :  { %2050 = vmatpush.msrb.mxu0 %v2030_v33  ;;  %2193 = vrot.lane.b32.xlu2 %v10445_v35, %s9816_s23 }
0x1046   :  { %8822 = vmatpush.xpose.msk.msra.mxu0 %vm156_vm1, %v2144_v45 }
0x104b   :  { %v2279_v47 = vpop.permute.xlu0 %2278 }
0x104c   :  { %8828 = vmatpush.xpose.msk.msra.mxu2 %vm156_vm1, %v2279_v47  ;;  %2141 = vrot.lane.b32.xlu2 %v10434_v29, %s9816_s23 }
0x1053   :  { %v2307_v59 = vpop.permute.xlu0 %2306 }
0x1054   :  { %2304 = vrot.lane.b32.xlu2 %v10434_v29, %s9817_s12 }
0x1056   :  { %2276 = vrot.lane.b32.xlu1 %v10407_v15, %s9817_s12 }
0x1068   :  { %v10523_v7 = vpop.f32.mrf.mxu2 }
0x109f   :  { %v1996_v48 = vpop.xlane.xlu2 %1995 }
0x10a0   :  { %9515 = vrcp.f32 %v1996_v48  ;;  %v8857_v48 = vld [vmem:[%s12421_s2 + $0x1b8] sm:$0xff] }
0x10a6   :  { %v9516_v49 = vpop.eup %9515 }
0x10a7   :  { %v2000_v53 = vmul.f32 %v9516_v49, %v9512_v18  ;;  %v2194_v55 = vpop.permute.xlu2 %2193  ;;  %v8856_v49 = vld [vmem:[%s12421_s2 + $0x1b0] sm:$0xff] }
0x10a8   :  { %2214 = vmatpush.msrb.mxu3 %v2194_v55  ;;  %v8854_v55 = vld [vmem:[%s12421_s2 + $0x1a0] sm:$0xff] }
0x10a9   :  { %8815 = vmatmul.msk.f32.vlgmr.msrb.gmra.mxu0 %vm156_vm1, %v2000_v53  ;;  %v8855_v53 = vld [vmem:[%s12421_s2 + $0x1a8] sm:$0xff] }
0x10aa   :  { %8830 = vmatpush.xpose.msk.msra.mxu3 %vm156_vm1, %v2307_v59  ;;  %v8851_v59 = vld [vmem:[%s12421_s2 + $0x198] sm:$0xff] }
0x10af   :  { %v2142_v60 = vpop.permute.xlu2 %2141 }
0x10b0   :  { %v2185_v61 = vpop.xlane.xlu1 %2184 }
0x10b1   :  { %9517 = vrcp.f32 %v2185_v61  ;;  %8823 = vmatmul.msk.f32.vlgmr.msra.gmra.mxu0 %vm156_vm1, %v2142_v60  ;;  %v8850_v60 = vld [vmem:[%s12421_s2 + $0x190] sm:$0xff]  ;;  %v8849_v61 = vld [vmem:[%s12421_s2 + $0x188] sm:$0xff] }
0x10b7   :  { %v9518_v29 = vpop.eup %9517  ;;  %v2305_v15 = vpop.permute.xlu2 %2304 }
0x10b8   :  { %v2191_v62 = vmul.f32 %v9518_v29, %v9514_v43  ;;  %v8848_v29 = vld [vmem:[%s12421_s2 + $0x180] sm:$0xff] }
0x10ba   :  { %8824 = vmatmul.msk.f32.vlgmr.msrb.gmra.mxu3 %vm156_vm1, %v2191_v62  ;;  %v10569_v62 = vld [vmem:[%s12420_s1] sm:$0xff] }
0x10c2   :  { %8831 = vmatmul.msk.f32.vlgmr.msra.gmra.mxu3 %vm156_vm1, %v2305_v15 }
0x10c8   :  { %v2277_v1 = vpop.permute.xlu1 %2276 }
0x10c9   :  { %8829 = vmatmul.msk.f32.vlgmr.msra.gmra.mxu2 %vm156_vm1, %v2277_v1  ;;  %v10577_v1 = vld [vmem:[%s12420_s1 + $0x8] sm:$0xff] }
0x1126   :  { %v2052_v2 = vpop.f32.mrf.mxu0 }
0x1127   :  { %8817 = vmatmul.msk.f32.gmra.mxu1 %vm156_vm1, %v2052_v2  ;;  %v8839_v2 = vld [vmem:[%s12423_s4 + $0x58] sm:$0xff] }
0x112e   :  { %v2166_v50 = vpop.f32.mrf.mxu0 }
0x112f   :  { %v2170_v3 = vmul.f32 0.17677669, %v2166_v50  ;;  %v8838_v50 = vld [vmem:[%s12423_s4 + $0x50] sm:$0xff] }
0x1131   :  { %v2174_v5 = vsel %vm156_vm1, %v2170_v3, -inf }
0x1132   :  { %2175 = vmax.xlane.f32.xlu0 %v2174_v5  ;;  %v8836_v5 = vld [vmem:[%s12423_s4 + $0x40] sm:$0xff] }
0x113d   :  { %v2216_v6 = vpop.f32.mrf.mxu3 }
0x113e   :  { %8826 = vmatmul.msk.f32.vlgmr.msrb.gmra.mxu1 %vm156_vm1, %v2216_v6  ;;  %v2078_v6 = vpop.f32.mrf.mxu1 }
0x1145   :  { %v2329_v44 = vpop.f32.mrf.mxu3 }
0x1146   :  { %v2333_v11 = vmul.f32 0.17677669, %v2329_v44  ;;  %v8845_v44 = vld [vmem:[%s12425_s6 + $0x58] sm:$0xff] }
0x1147   :  { %2506 = vmatpush.msra.mxu1 %v8845_v44 }
0x1148   :  { %v2337_v12 = vsel %vm156_vm1, %v2333_v11, -inf }
0x1149   :  { %2338 = vmax.xlane.f32.xlu2 %v2337_v12 }
0x114c   :  { %v2301_v58 = vpop.f32.mrf.mxu2 }
0x114d   :  { %v2332_v14 = vmul.f32 0.17677669, %v2301_v58  ;;  %v8843_v58 = vld [vmem:[%s12425_s6 + $0x48] sm:$0xff] }
0x114f   :  { %v2334_v16 = vsel %vm156_vm1, %v2332_v14, -inf }
0x1150   :  { %2335 = vmax.xlane.f32.xlu1 %v2334_v16  ;;  %v8842_v16 = vld [vmem:[%s12425_s6 + $0x40] sm:$0xff] }
0x1161   :  { %2219 = vrot.lane.b32.xlu2 %v10462_v56, %s9816_s23  ;;  %v8803_v56 = vld [vmem:[%s12421_s2 + $0x178] sm:$0xff] }
0x1162   :  { %2429 = vmatpush.msrb.mxu3 %v8803_v56 }
0x1164   :  { %2572 = vmatpush.msra.mxu3 %v8857_v48 }
0x1166   :  { %2573 = vmatpush.msra.mxu3 %v8856_v49 }
0x1168   :  { %2574 = vmatpush.msra.mxu3 %v8855_v53 }
0x116a   :  { %2575 = vmatpush.msra.mxu3 %v8854_v55 }
0x11a4   :  { %v2081_v12 = vpop.f32.mrf.mxu1 }
0x11a5   :  { %v2176_v17 = vpop.xlane.xlu0 %2175 }
0x11a6   :  { %v2178_v21 = vsub.f32 %v2170_v3, %v2176_v17  ;;  %v8837_v3 = vld [vmem:[%s12423_s4 + $0x48] sm:$0xff] }
0x11a8   :  { %v2181_v22 = vmul.f32 1.442695, %v2178_v21 }
0x11aa   :  { %9519 = vpow2.f32 %v2181_v22 }
0x11b0   :  { %v9520_v20 = vpop.eup %9519 }
0x11b1   :  { %v2186_v24 = vsel %vm156_vm1, %v9520_v20, 0.0 }
0x11b2   :  { %2187 = vadd.xlane.f32.xlu0 %v2186_v24 }
0x11bb   :  { %v2268_v22 = vpop.f32.mrf.mxu1 }
0x11bc   :  { %v2339_v25 = vpop.xlane.xlu2 %2338 }
0x11bd   :  { %v2341_v52 = vsub.f32 %v2333_v11, %v2339_v25  ;;  %v8844_v11 = vld [vmem:[%s12425_s6 + $0x50] sm:$0xff] }
0x11be   :  { %2507 = vmatpush.msra.mxu1 %v8844_v11 }
0x11bf   :  { %v2344_v54 = vmul.f32 1.442695, %v2341_v52 }
0x11c0   :  { %2508 = vmatpush.msra.mxu1 %v8843_v58 }
0x11c1   :  { %9521 = vpow2.f32 %v2344_v54  ;;  %v9385_v54 = vld [vmem:[%s12422_s3 + $0xb] ss:$0 sm:$0xff] }
0x11c2   :  { %2509 = vmatpush.msra.mxu1 %v8842_v16 }
0x11c3   :  { %v2336_v26 = vpop.xlane.xlu1 %2335 }
0x11c4   :  { %v2340_v27 = vsub.f32 %v2332_v14, %v2336_v26  ;;  %v2220_v23 = vpop.permute.xlu2 %2219  ;;  %v9387_v14 = vld [vmem:[%s12422_s3 + $0xc] ss:$0 sm:$0xff] }
0x11c5   :  { %2240 = vmatpush.msrb.mxu0 %v2220_v23  ;;  %v2111_v23 = vadd.f32 %v10523_v7, %v2081_v12 }
0x11c6   :  { %v2342_v46 = vmul.f32 1.442695, %v2340_v27 }
0x11c7   :  { %v9522_v9 = vpop.eup %9521 }
0x11c8   :  { %9523 = vpow2.f32 %v2342_v46  ;;  %v2349_v32 = vsel %vm156_vm1, %v9522_v9, 0.0 }
0x11c9   :  { %2350 = vadd.xlane.f32.xlu0 %v2349_v32 }
0x11ce   :  { %v9524_v34 = vpop.eup %9523 }
0x11cf   :  { %v2346_v51 = vsel %vm156_vm1, %v9524_v34, 0.0 }
0x11d0   :  { %2347 = vadd.xlane.f32.xlu1 %v2346_v51 }
0x11e9   :  { %9351 = vrot.lane.b32.xlu1 %v9350_v36, %s9817_s12  ;;  %v9386_v36 = vld [vmem:[%s12422_s3 + $0xd] ss:$0 sm:$0xff] }
0x1225   :  { %v2188_v37 = vpop.xlane.xlu0 %2187 }
0x1226   :  { %9525 = vrcp.f32 %v2188_v37 }
0x122c   :  { %v9526_v38 = vpop.eup %9525 }
0x122d   :  { %v2192_v18 = vmul.f32 %v9526_v38, %v9520_v20  ;;  %v2108_v20 = vadd.f32 %v10520_v8, %v2078_v6  ;;  %v8863_v38 = vld [vmem:[%s12421_s2 + $0x1d8] sm:$0xff] }
0x122f   :  { %8825 = vmatmul.msk.f32.vlgmr.msrb.gmra.mxu0 %vm156_vm1, %v2192_v18  ;;  %v2274_v24 = vadd.f32 %v2268_v22, %v2108_v20  ;;  %v8862_v18 = vld [vmem:[%s12421_s2 + $0x1d0] sm:$0xff] }
0x123c   :  { %v2351_v28 = vpop.xlane.xlu0 %2350 }
0x123d   :  { %9527 = vrcp.f32 %v2351_v28 }
0x1243   :  { %v2348_v19 = vpop.xlane.xlu1 %2347  ;;  %v9528_v42 = vpop.eup %9527 }
0x1244   :  { %9529 = vrcp.f32 %v2348_v19  ;;  %v2355_v45 = vmul.f32 %v9528_v42, %v9522_v9 }
0x124a   :  { %v9530_v40 = vpop.eup %9529 }
0x124b   :  { %v2354_v47 = vmul.f32 %v9530_v40, %v9524_v34  ;;  %v8861_v40 = vld [vmem:[%s12421_s2 + $0x1c8] sm:$0xff] }
0x125b   :  { %v9352_v43 = vpop.permute.xlu1 %9351 }
0x125c   :  { %v9354_v13 = vunpack.i.h.bf16 %v9352_v43  ;;  %v9353_v33 = vunpack.i.l.bf16 %v9352_v43 }
0x125e   :  { %2377 = vmatpush.msra.mxu0 %v9353_v33  ;;  %2403 = vmatpush.msrb.mxu2 %v9354_v13  ;;  %v8860_v13 = vld [vmem:[%s12421_s2 + $0x1c0] sm:$0xff] }
0x125f   :  { %8832 = vmatmul.msk.f32.vlgmr.msra.gmra.mxu0 %vm156_vm1, %v2354_v47  ;;  %8833 = vmatmul.msk.f32.vlgmr.msrb.gmra.mxu2 %vm156_vm1, %v2355_v45  ;;  %v9388_v33 = vld [vmem:[%s12424_s5 + $0x2] ss:$0 sm:$0xff] }
0x1260   :  { %2542 = vmatpush.msra.mxu2 %v8851_v59  ;;  %2470 = vmatpush.msrb.mxu0 %v8839_v2  ;;  %v9390_v59 = vld [vmem:[%s12422_s3 + $0xe] ss:$0 sm:$0xff] }
0x1262   :  { %2543 = vmatpush.msra.mxu2 %v8850_v60  ;;  %2471 = vmatpush.msrb.mxu0 %v8838_v50 }
0x1264   :  { %2544 = vmatpush.msra.mxu2 %v8849_v61  ;;  %2472 = vmatpush.msrb.mxu0 %v8837_v3 }
0x1266   :  { %2545 = vmatpush.msra.mxu2 %v8848_v29  ;;  %2473 = vmatpush.msrb.mxu0 %v8836_v5 }
0x1267   :  { %8852 = vmatmul.msk.f32.vlgmr.msra.gmra.mxu2 %vm61_vm0, %v10569_v62 }
0x1268   :  { %2602 = vmatpush.msra.mxu0 %v8863_v38 }
0x126a   :  { %2603 = vmatpush.msra.mxu0 %v8862_v18 }
0x126c   :  { %2604 = vmatpush.msra.mxu0 %v8861_v40 }
0x126e   :  { %2605 = vmatpush.msra.mxu0 %v8860_v13 }
0x126f   :  { %8853 = vmatmul.msk.f32.gmra.mxu2 %vm61_vm0, %v10577_v1 }
0x12ac   :  { %v2242_v35 = vpop.f32.mrf.mxu0 }
0x12ad   :  { %8827 = vmatmul.msk.f32.gmra.mxu1 %vm156_vm1, %v2242_v35 }
0x12dc   :  { %v2379_v15 = vpop.f32.mrf.mxu0 }
0x12dd   :  { %8834 = vmatmul.msk.f32.vlgmr.msrb.gmra.mxu3 %vm156_vm1, %v2379_v15 }
0x12e2   :  { %v2405_v57 = vpop.f32.mrf.mxu2 }
0x12e5   :  { %8835 = vmatmul.msk.f32.gmra.mxu3 %vm156_vm1, %v2405_v57 }
0x12ea   :  { %v2547_v17 = vpop.f32.mrf.mxu2 }
0x12eb   :  { %v10613_v21 = vadd.f32 %v9387_v14, %v2547_v17 }
0x12ed   :  { %8858 = vmatmul.msk.f32.vlgmr.msra.gmra.mxu3 %vm61_vm0, %v10569_v62  ;;  %2740 = vrot.lane.b32.xlu2 %v10613_v21, %s9815_s18 }
0x12f2   :  { %v2550_v19 = vpop.f32.mrf.mxu2 }
0x12f3   :  { %v10652_v43 = vadd.f32 %v9387_v14, %v2550_v19 }
0x12f5   :  { %8859 = vmatmul.msk.f32.gmra.mxu3 %vm61_vm0, %v10577_v1 }
0x132a   :  { %v2271_v27 = vpop.f32.mrf.mxu1 }
0x132b   :  { %v2275_v9 = vadd.f32 %v2271_v27, %v2111_v23 }
0x1347   :  { %v2741_v56 = vpop.permute.xlu2 %2740 }
0x1360   :  { %v2431_v25 = vpop.f32.mrf.mxu3 }
0x1361   :  { %v2437_v52 = vadd.f32 %v2431_v25, %v2274_v24 }
0x1363   :  { %v2439_v26 = vadd.f32 %v10569_v62, %v2437_v52 }
0x1365   :  { %v10623_v46 = vadd.f32 %v9385_v54, %v2439_v26 }
0x1367   :  { %8840 = vmatmul.msk.f32.vlgmr.msrb.gmra.mxu0 %vm61_vm0, %v10623_v46 }
0x1368   :  { %v2434_v32 = vpop.f32.mrf.mxu3 }
0x1369   :  { %v2438_v8 = vadd.f32 %v2434_v32, %v2275_v9 }
0x136b   :  { %v2440_v34 = vadd.f32 %v10577_v1, %v2438_v8 }
0x136d   :  { %v10628_v51 = vadd.f32 %v9385_v54, %v2440_v34 }
0x136f   :  { %8841 = vmatmul.msk.f32.gmra.mxu0 %vm61_vm0, %v10628_v51 }
0x1370   :  { %v2577_v7 = vpop.f32.mrf.mxu3 }
0x1371   :  { %v10635_v37 = vadd.f32 %v9386_v36, %v2577_v7 }
0x1373   :  { %2742 = vrot.lane.b32.xlu0 %v10635_v37, %s9815_s18  ;;  %8870 = vmatpush.xpose.msk.msrb.mxu1 %vm156_vm1, %v10635_v37 }
0x1377   :  { %8864 = vmatmul.msk.f32.vlgmr.msra.gmra.mxu0 %vm61_vm0, %v10569_v62 }
0x1378   :  { %v2580_v28 = vpop.f32.mrf.mxu3 }
0x1379   :  { %v10647_v42 = vadd.f32 %v9386_v36, %v2580_v28 }
0x137b   :  { %8872 = vmatpush.xpose.msk.msrb.mxu2 %vm156_vm1, %v10647_v42  ;;  %2770 = vrot.lane.b32.xlu1 %v10647_v42, %s9815_s18 }
0x137e   :  { %8873 = vmatmul.msk.f32.vlgmr.msrb.gmra.mxu2 %vm156_vm1, %v10652_v43 }
0x137f   :  { %8865 = vmatmul.msk.f32.gmra.mxu0 %vm61_vm0, %v10577_v1 }
0x1383   :  { %2768 = vrot.lane.b32.xlu1 %v10652_v43, %s9815_s18 }
0x13e4   :  { %v2475_v45 = vpop.f32.mrf.mxu0 }
0x13e5   :  { %v2476_v47 = vadd.f32 %v9388_v33, %v2475_v45  ;;  %v2743_v35 = vpop.permute.xlu0 %2742 }
0x13e6   :  { %8876 = vmatpush.xpose.msk.msrb.mxu3 %vm156_vm1, %v2743_v35 }
0x13e7   :  { %v2481_v48 = vmax.f32 %v2476_v47, 0.0 }
0x13e9   :  { %8846 = vmatmul.msk.f32.vlgmr.msra.gmra.mxu1 %vm61_vm0, %v2481_v48  ;;  %8877 = vmatmul.msk.f32.vlgmr.msrb.gmra.mxu3 %vm156_vm1, %v2741_v56 }
0x13ec   :  { %v2478_v49 = vpop.f32.mrf.mxu0 }
0x13ed   :  { %v2479_v53 = vadd.f32 %v9388_v33, %v2478_v49  ;;  %v2771_v50 = vpop.permute.xlu1 %2770 }
0x13ee   :  { %8878 = vmatpush.xpose.msk.msrb.mxu0 %vm156_vm1, %v2771_v50 }
0x13ef   :  { %v2482_v55 = vmax.f32 %v2479_v53, 0.0 }
0x13f1   :  { %8847 = vmatmul.msk.f32.gmra.mxu1 %vm61_vm0, %v2482_v55 }
0x13f4   :  { %v2607_v60 = vpop.f32.mrf.mxu0 }
0x13f5   :  { %v10681_v61 = vadd.f32 %v9390_v59, %v2607_v60  ;;  %v2769_v11 = vpop.permute.xlu1 %2768 }
0x13f6   :  { %8879 = vmatmul.msk.f32.vlgmr.msrb.gmra.mxu0 %vm156_vm1, %v2769_v11 }
0x13f7   :  { %2712 = vmatpush.msra.mxu1 %v10681_v61 }
0x13f9   :  { %8871 = vmatmul.msk.f32.vlgmr.msrb.gmra.mxu1 %vm156_vm1, %v10613_v21 }
0x13fc   :  { %v2610_v9 = vpop.f32.mrf.mxu0 }
0x13fd   :  { %v10699_v32 = vadd.f32 %v9390_v59, %v2610_v9 }
0x13ff   :  { %2735 = vmatpush.msra.mxu2 %v10699_v32 }
0x1401   :  { %v2667_v12 = vpop.f32.mrf.mxu2 }
0x1402   :  { %v2671_v58 = vmul.f32 0.17677669, %v2667_v12 }
0x1404   :  { %v2675_v14 = vsel %vm156_vm1, %v2671_v58, -inf }
0x1466   :  { %v10684_v29 = vpop.f32.mrf.mxu1 }
0x146c   :  { %v2765_v15 = vpop.f32.mrf.mxu3 }
0x146d   :  { %v2796_v57 = vmul.f32 0.17677669, %v2765_v15 }
0x146e   :  { %v10686_v2 = vpop.f32.mrf.mxu1 }
0x146f   :  { %v2798_v3 = vsel %vm156_vm1, %v2796_v57, -inf }
0x1470   :  { %2799 = vmax.xlane.f32.xlu2 %v2798_v3 }
0x1473   :  { %v2793_v7 = vpop.f32.mrf.mxu0 }
0x1474   :  { %v2797_v18 = vmul.f32 0.17677669, %v2793_v7 }
0x1476   :  { %v2641_v5 = vpop.f32.mrf.mxu1  ;;  %v2801_v19 = vsel %vm156_vm1, %v2797_v18, -inf }
0x1477   :  { %v2670_v6 = vmul.f32 0.17677669, %v2641_v5 }
0x1479   :  { %v2672_v44 = vsel %vm156_vm1, %v2670_v6, -inf }
0x147a   :  { %2673 = vmax.xlane.f32.xlu0 %v2672_v44  ;;  %v8867_v44 = vld [vmem:[%s12421_s2 + $0x1e8] sm:$0xff] }
0x147b   :  { %2895 = vmatpush.msra.mxu3 %v8867_v44 }
0x148e   :  { %2821 = vrot.lane.b32.xlu0 %v10681_v61, %s9815_s18 }
0x14b8   :  { %2676 = vmax.xlane.f32.xlu0 %v2675_v14 }
0x14e3   :  { %v2800_v16 = vpop.xlane.xlu2 %2799 }
0x14e4   :  { %v2804_v17 = vsub.f32 %v2796_v57, %v2800_v16 }
0x14e6   :  { %v2806_v22 = vmul.f32 1.442695, %v2804_v17 }
0x14e8   :  { %9531 = vpow2.f32 %v2806_v22 }
0x14ed   :  { %v2674_v20 = vpop.xlane.xlu0 %2673 }
0x14ee   :  { %v9532_v24 = vpop.eup %9531  ;;  %v2678_v25 = vsub.f32 %v2670_v6, %v2674_v20  ;;  %v8866_v6 = vld [vmem:[%s12421_s2 + $0x1e0] sm:$0xff] }
0x14ef   :  { %v2810_v52 = vsel %vm156_vm1, %v9532_v24, 0.0  ;;  %2924 = vmatpush.msra.mxu0 %v8866_v6 }
0x14f0   :  { %v2680_v54 = vmul.f32 1.442695, %v2678_v25  ;;  %2811 = vadd.xlane.f32.xlu2 %v2810_v52 }
0x14f2   :  { %9533 = vpow2.f32 %v2680_v54 }
0x14f8   :  { %v9534_v26 = vpop.eup %9533 }
0x14f9   :  { %v2684_v27 = vsel %vm156_vm1, %v9534_v26, 0.0 }
0x14fa   :  { %2685 = vadd.xlane.f32.xlu1 %v2684_v27 }
0x1500   :  { %v2822_v23 = vpop.permute.xlu0 %2821 }
0x1501   :  { %2842 = vmatpush.msrb.mxu1 %v2822_v23 }
0x1508   :  { %2934 = vrot.lane.b32.xlu2 %v10635_v37, %s9816_s23 }
0x1513   :  { %2932 = vrot.lane.b32.xlu1 %v10613_v21, %s9816_s23 }
0x152b   :  { %v2677_v8 = vpop.xlane.xlu0 %2676 }
0x152c   :  { %v2679_v34 = vsub.f32 %v2671_v58, %v2677_v8 }
0x152e   :  { %v2682_v36 = vmul.f32 1.442695, %v2679_v34 }
0x1530   :  { %9535 = vpow2.f32 %v2682_v36 }
0x1536   :  { %v9536_v38 = vpop.eup %9535 }
0x1537   :  { %v2687_v28 = vsel %vm156_vm1, %v9536_v38, 0.0 }
0x1538   :  { %2688 = vadd.xlane.f32.xlu2 %v2687_v28 }
0x153d   :  { %2802 = vmax.xlane.f32.xlu1 %v2801_v19 }
0x1550   :  { %2848 = vrot.lane.b32.xlu2 %v10699_v32, %s9815_s18 }
0x1556   :  { %2960 = vrot.lane.b32.xlu1 %v10652_v43, %s9816_s23 }
0x155e   :  { %3012 = vrot.lane.b32.xlu1 %v10681_v61, %s9816_s23 }
0x1563   :  { %v2812_v40 = vpop.xlane.xlu2 %2811 }
0x1566   :  { %3123 = vrot.lane.b32.xlu1 %v10652_v43, %s9817_s12 }
0x156b   :  { %v2935_v47 = vpop.permute.xlu2 %2934 }
0x156d   :  { %v2686_v13 = vpop.xlane.xlu1 %2685 }
0x156e   :  { %9537 = vrcp.f32 %v2686_v13 }
0x156f   :  { %9539 = vrcp.f32 %v2812_v40 }
0x1574   :  { %v9538_v33 = vpop.eup %9537 }
0x1575   :  { %v2692_v45 = vmul.f32 %v9538_v33, %v9534_v26  ;;  %v9540_v35 = vpop.eup %9539 }
0x1576   :  { %v2818_v56 = vmul.f32 %v9540_v35, %v9532_v24 }
0x1577   :  { %8874 = vmatmul.msk.f32.vlgmr.msra.gmra.mxu1 %vm156_vm1, %v2692_v45 }
0x1578   :  { %8886 = vmatpush.xpose.msk.msra.mxu1 %vm156_vm1, %v2935_v47  ;;  %v8868_v47 = vld [vmem:[%s12421_s2 + $0x1f0] sm:$0xff] }
0x1579   :  { %3085 = vmatpush.msrb.mxu3 %v8868_v47  ;;  %v3342_v47 = vld [vmem:[%s12427_s8] sm:$0xff] }
0x157f   :  { %8880 = vmatmul.msk.f32.vlgmr.msrb.gmra.mxu1 %vm156_vm1, %v2818_v56 }
0x1585   :  { %v2933_v48 = vpop.permute.xlu1 %2932 }
0x1587   :  { %8887 = vmatmul.msk.f32.vlgmr.msra.gmra.mxu1 %vm156_vm1, %v2933_v48 }
0x15ab   :  { %v2689_v49 = vpop.xlane.xlu2 %2688 }
0x15ac   :  { %9541 = vrcp.f32 %v2689_v49 }
0x15b0   :  { %v2803_v43 = vpop.xlane.xlu1 %2802 }
0x15b1   :  { %v2805_v53 = vsub.f32 %v2797_v18, %v2803_v43 }
0x15b2   :  { %v9542_v55 = vpop.eup %9541 }
0x15b3   :  { %v2693_v59 = vmul.f32 %v9542_v55, %v9536_v38  ;;  %v2808_v60 = vmul.f32 1.442695, %v2805_v53  ;;  %v2849_v15 = vpop.permute.xlu2 %2848 }
0x15b4   :  { %2869 = vmatpush.msrb.mxu2 %v2849_v15 }
0x15b5   :  { %9543 = vpow2.f32 %v2808_v60  ;;  %8875 = vmatmul.msk.f32.vlgmr.msra.gmra.mxu2 %vm156_vm1, %v2693_v59 }
0x15bb   :  { %v9544_v57 = vpop.eup %9543 }
0x15bc   :  { %v2813_v50 = vsel %vm156_vm1, %v9544_v57, 0.0 }
0x15bd   :  { %2814 = vadd.xlane.f32.xlu0 %v2813_v50 }
0x15c8   :  { %v2961_v3 = vpop.permute.xlu1 %2960 }
0x15d0   :  { %v3013_v5 = vpop.permute.xlu1 %3012 }
0x15d1   :  { %3033 = vmatpush.msrb.mxu1 %v3013_v5 }
0x15d8   :  { %v3124_v7 = vpop.permute.xlu1 %3123 }
0x15f4   :  { %v2714_v11 = vpop.f32.mrf.mxu1 }
0x15f5   :  { %8884 = vmatmul.msk.f32.vlgmr.msra.gmra.mxu0 %vm156_vm1, %v2714_v11 }
0x15fc   :  { %v2844_v12 = vpop.f32.mrf.mxu1 }
0x15fd   :  { %8882 = vmatmul.msk.f32.vlgmr.msra.gmra.mxu3 %vm156_vm1, %v2844_v12 }
0x1604   :  { %v2957_v58 = vpop.f32.mrf.mxu1 }
0x1605   :  { %v2988_v14 = vmul.f32 0.17677669, %v2957_v58 }
0x1607   :  { %v2990_v16 = vsel %vm156_vm1, %v2988_v14, -inf }
0x1608   :  { %2991 = vmax.xlane.f32.xlu0 %v2990_v16 }
0x161c   :  { %2962 = vrot.lane.b32.xlu0 %v10647_v42, %s9816_s23 }
0x1624   :  { %3097 = vrot.lane.b32.xlu0 %v10635_v37, %s9817_s12 }
0x162c   :  { %3095 = vrot.lane.b32.xlu0 %v10613_v21, %s9817_s12 }
0x1630   :  { %v2815_v17 = vpop.xlane.xlu0 %2814 }
0x1631   :  { %9545 = vrcp.f32 %v2815_v17 }
0x1634   :  { %3125 = vrot.lane.b32.xlu0 %v10647_v42, %s9817_s12 }
0x1637   :  { %v9546_v22 = vpop.eup %9545 }
0x1638   :  { %v2819_v20 = vmul.f32 %v9546_v22, %v9544_v57  ;;  %v2737_v24 = vpop.f32.mrf.mxu2 }
0x1639   :  { %8885 = vmatmul.msk.f32.gmra.mxu0 %vm156_vm1, %v2737_v24 }
0x163a   :  { %8881 = vmatmul.msk.f32.vlgmr.msrb.gmra.mxu2 %vm156_vm1, %v2819_v20 }
0x1672   :  { %v10747_v38 = vpop.f32.mrf.mxu0 }
0x167b   :  { %v2992_v25 = vpop.xlane.xlu0 %2991 }
0x167c   :  { %v2996_v52 = vsub.f32 %v2988_v14, %v2992_v25 }
0x167e   :  { %v2998_v54 = vmul.f32 1.442695, %v2996_v52  ;;  %v8869_v52 = vld [vmem:[%s12421_s2 + $0x1f8] sm:$0xff] }
0x1680   :  { %9547 = vpow2.f32 %v2998_v54 }
0x1686   :  { %v9548_v37 = vpop.eup %9547 }
0x1687   :  { %v3002_v26 = vsel %vm156_vm1, %v9548_v37, 0.0 }
0x1688   :  { %3003 = vadd.xlane.f32.xlu2 %v3002_v26 }
0x168e   :  { %v2963_v21 = vpop.permute.xlu0 %2962 }
0x168f   :  { %8888 = vmatpush.xpose.msk.msra.mxu2 %vm156_vm1, %v2963_v21 }
0x1692   :  { %8889 = vmatmul.msk.f32.vlgmr.msra.gmra.mxu2 %vm156_vm1, %v2961_v3 }
0x1696   :  { %v3098_v42 = vpop.permute.xlu0 %3097 }
0x1697   :  { %8894 = vmatpush.xpose.msk.msrb.mxu0 %vm156_vm1, %v3098_v42 }
0x169e   :  { %v3096_v27 = vpop.permute.xlu0 %3095 }
0x169f   :  { %8895 = vmatmul.msk.f32.vlgmr.msrb.gmra.mxu0 %vm156_vm1, %v3096_v27 }
0x16a6   :  { %v3126_v23 = vpop.permute.xlu0 %3125 }
0x16a7   :  { %8896 = vmatpush.xpose.msk.msra.mxu1 %vm156_vm1, %v3126_v23  ;;  %v3348_v23 = vld [vmem:[%s12427_s8 + $0x30] sm:$0xff] }
0x16b6   :  { %v10750_v18 = vpop.f32.mrf.mxu0 }
0x16bd   :  { %v2871_v9 = vpop.f32.mrf.mxu2 }
0x16be   :  { %8883 = vmatmul.msk.f32.gmra.mxu3 %vm156_vm1, %v2871_v9  ;;  %v1698_v9 = vadd.f32 %v10449_v39, %v10374_v63  ;;  %v1699_v63 = vadd.f32 %v10451_v41, %v10391_v10  ;;  %v8902_v10 = vld [vmem:[%s12423_s4 + $0x60] sm:$0xff]  ;;  %v3345_v41 = vld [vmem:[%s12427_s8 + $0x18] sm:$0xff] }
0x16fb   :  { %v3004_v8 = vpop.xlane.xlu2 %3003 }
0x16fc   :  { %9549 = vrcp.f32 %v3004_v8  ;;  %v9383_v8 = vld [vmem:[%s12426_s7 + $0x1] ss:$0 sm:$0xff] }
0x16fd   :  { %v1703_v39 = vadd.f32 %v9383_v8, %v1699_v63  ;;  %v9389_v63 = vld [vmem:[%s12426_s7 + $0x2] ss:$0 sm:$0xff] }
0x1702   :  { %v9550_v34 = vpop.eup %9549 }
0x1703   :  { %v3010_v36 = vmul.f32 %v9550_v34, %v9548_v37  ;;  %v3347_v34 = vld [vmem:[%s12427_s8 + $0x28] sm:$0xff] }
0x1705   :  { %8890 = vmatmul.msk.f32.vlgmr.msrb.gmra.mxu1 %vm156_vm1, %v3010_v36  ;;  %v3346_v36 = vld [vmem:[%s12427_s8 + $0x20] sm:$0xff] }
0x1706   :  { %3248 = vmatpush.msrb.mxu1 %v8869_v52  ;;  %v8943_v52 = vld [vmem:[%s12421_s2 + $0x248] sm:$0xff] }
0x170d   :  { %8897 = vmatmul.msk.f32.vlgmr.msra.gmra.mxu1 %vm156_vm1, %v3124_v7  ;;  %v1702_v7 = vadd.f32 %v9383_v8, %v1698_v9  ;;  %v9392_v9 = vld [vmem:[%s12424_s5 + $0x3] ss:$0 sm:$0xff] }
0x170e   :  { %3408 = vmatpush.msra.mxu1 %v3345_v41  ;;  %v9759_v41 = vld [vmem:[%s12419_s0] sm:$0xff] }
0x1715   :  { %v2985_v28 = vpop.f32.mrf.mxu2 }
0x1716   :  { %v2989_v19 = vmul.f32 0.17677669, %v2985_v28  ;;  %v8905_v28 = vld [vmem:[%s12423_s4 + $0x78] sm:$0xff] }
0x1718   :  { %v2993_v40 = vsel %vm156_vm1, %v2989_v19, -inf }
0x1719   :  { %2994 = vmax.xlane.f32.xlu0 %v2993_v40  ;;  %v8903_v40 = vld [vmem:[%s12423_s4 + $0x68] sm:$0xff] }
0x171c   :  { %v3120_v13 = vpop.f32.mrf.mxu0 }
0x171d   :  { %v3151_v33 = vmul.f32 0.17677669, %v3120_v13  ;;  %v3344_v13 = vld [vmem:[%s12427_s8 + $0x10] sm:$0xff] }
0x171e   :  { %3409 = vmatpush.msra.mxu1 %v3344_v13 }
0x171f   :  { %v3153_v45 = vsel %vm156_vm1, %v3151_v33, -inf }
0x1720   :  { %3154 = vmax.xlane.f32.xlu1 %v3153_v45  ;;  %v2897_v45 = vpop.f32.mrf.mxu3 }
0x172d   :  { %3175 = vrot.lane.b32.xlu0 %v10681_v61, %s9817_s12 }
0x1782   :  { %v3035_v35 = vpop.f32.mrf.mxu1 }
0x1783   :  { %8892 = vmatmul.msk.f32.vlgmr.msrb.gmra.mxu3 %vm156_vm1, %v3035_v35  ;;  %v2900_v35 = vpop.f32.mrf.mxu3 }
0x178a   :  { %v3148_v57 = vpop.f32.mrf.mxu1 }
0x178b   :  { %v3152_v50 = vmul.f32 0.17677669, %v3148_v57 }
0x178c   :  { %v2995_v56 = vpop.xlane.xlu0 %2994 }
0x178d   :  { %v2997_v48 = vsub.f32 %v2989_v19, %v2995_v56  ;;  %v3156_v3 = vsel %vm156_vm1, %v3152_v50, -inf  ;;  %v8904_v19 = vld [vmem:[%s12423_s4 + $0x70] sm:$0xff] }
0x178f   :  { %v3000_v49 = vmul.f32 1.442695, %v2997_v48  ;;  %v2927_v48 = vadd.f32 %v10747_v38, %v2897_v45  ;;  %v9377_v38 = vld [vmem:[%s12426_s7] ss:$0 sm:$0xff] }
0x1791   :  { %9551 = vpow2.f32 %v3000_v49 }
0x1793   :  { %v3155_v43 = vpop.xlane.xlu1 %3154 }
0x1794   :  { %v3159_v53 = vsub.f32 %v3151_v33, %v3155_v43  ;;  %v3343_v33 = vld [vmem:[%s12427_s8 + $0x8] sm:$0xff] }
0x1795   :  { %3410 = vmatpush.msra.mxu1 %v3343_v33  ;;  %v2518_v33 = vadd.f32 %v10686_v2, %v10628_v51  ;;  %v8916_v51 = vld [vmem:[%s12427_s8 + $0x50] sm:$0xff]  ;;  %v8915_v2 = vld [vmem:[%s12427_s8 + $0x48] sm:$0xff] }
0x1796   :  { %v3161_v55 = vmul.f32 1.442695, %v3159_v53 }
0x1797   :  { %v9552_v59 = vpop.eup %9551  ;;  %3411 = vmatpush.msra.mxu1 %v3342_v47 }
0x1798   :  { %9553 = vpow2.f32 %v3161_v55  ;;  %v3005_v60 = vsel %vm156_vm1, %v9552_v59, 0.0  ;;  %v9391_v55 = vld [vmem:[%s12422_s3 + $0xf] ss:$0 sm:$0xff] }
0x1799   :  { %3006 = vadd.xlane.f32.xlu2 %v3005_v60 }
0x179e   :  { %v9554_v61 = vpop.eup %9553 }
0x179f   :  { %v3165_v15 = vsel %vm156_vm1, %v9554_v61, 0.0  ;;  %v3176_v17 = vpop.permute.xlu0 %3175 }
0x17a1   :  { %3166 = vadd.xlane.f32.xlu2 %v3165_v15  ;;  %v873_v15 = vadd.f32 %v10222_v30, %v10168_v0  ;;  %v8911_v0 = vld [vmem:[%s12425_s6 + $0x78] sm:$0xff]  ;;  %v8910_v30 = vld [vmem:[%s12425_s6 + $0x70] sm:$0xff] }
0x17a2   :  { %3325 = vmatpush.msra.mxu3 %v8911_v0 }
0x17a3   :  { %v877_v57 = vadd.f32 %v9377_v38, %v873_v15 }
0x17a4   :  { %3326 = vmatpush.msra.mxu3 %v8910_v30  ;;  %v9396_v30 = vld [vmem:[%s12426_s7 + $0x3] ss:$0 sm:$0xff] }
0x17a9   :  { %3157 = vmax.xlane.f32.xlu2 %v3156_v3  ;;  %v8921_v3 = vld [vmem:[%s12427_s8 + $0x78] sm:$0xff] }
0x17c1   :  { %3038 = vrot.lane.b32.xlu2 %v10699_v32, %s9816_s23 }
0x1806   :  { %v3087_v56 = vpop.f32.mrf.mxu3 }
0x1807   :  { %v3093_v49 = vadd.f32 %v3087_v56, %v2927_v48  ;;  %v9760_v56 = vld [vmem:[%s12419_s0 + $0x8] sm:$0xff] }
0x180c   :  { %v3007_v5 = vpop.xlane.xlu2 %3006 }
0x180d   :  { %9555 = vrcp.f32 %v3007_v5  ;;  %v8909_v5 = vld [vmem:[%s12425_s6 + $0x68] sm:$0xff] }
0x180e   :  { %3327 = vmatpush.msra.mxu3 %v8909_v5 }
0x1813   :  { %v9556_v58 = vpop.eup %9555 }
0x1814   :  { %v3167_v6 = vpop.xlane.xlu2 %3166  ;;  %v3011_v14 = vmul.f32 %v9556_v58, %v9552_v59  ;;  %v8919_v58 = vld [vmem:[%s12427_s8 + $0x68] sm:$0xff] }
0x181c   :  { %v3158_v44 = vpop.xlane.xlu2 %3157 }
0x181d   :  { %v3160_v11 = vsub.f32 %v3152_v50, %v3158_v44  ;;  %v8932_v44 = vld [vmem:[%s12421_s2 + $0x210] sm:$0xff] }
0x181f   :  { %v3163_v12 = vmul.f32 1.442695, %v3160_v11  ;;  %v8938_v11 = vld [vmem:[%s12421_s2 + $0x230] sm:$0xff] }
0x1821   :  { %9557 = vpow2.f32 %v3163_v12  ;;  %v8908_v12 = vld [vmem:[%s12425_s6 + $0x60] sm:$0xff] }
0x1822   :  { %9559 = vrcp.f32 %v3167_v6  ;;  %v8920_v6 = vld [vmem:[%s12427_s8 + $0x70] sm:$0xff]  ;;  %3328 = vmatpush.msra.mxu3 %v8908_v12 }
0x1824   :  { %v3039_v16 = vpop.permute.xlu2 %3038 }
0x1825   :  { %3059 = vmatpush.msrb.mxu2 %v3039_v16  ;;  %v8937_v16 = vld [vmem:[%s12421_s2 + $0x228] sm:$0xff] }
0x1826   :  { %8891 = vmatmul.msk.f32.vlgmr.msrb.gmra.mxu2 %vm156_vm1, %v3011_v14  ;;  %v8931_v14 = vld [vmem:[%s12421_s2 + $0x208] sm:$0xff] }
0x1827   :  { %v9558_v22 = vpop.eup %9557  ;;  %3196 = vmatpush.msra.mxu2 %v3176_v17  ;;  %v8918_v17 = vld [vmem:[%s12427_s8 + $0x60] sm:$0xff] }
0x1828   :  { %v3168_v20 = vsel %vm156_vm1, %v9558_v22, 0.0  ;;  %v9560_v24 = vpop.eup %9559 }
0x1829   :  { %3169 = vadd.xlane.f32.xlu1 %v3168_v20  ;;  %v3173_v25 = vmul.f32 %v9560_v24, %v9554_v61  ;;  %3289 = vmatpush.msrb.mxu2 %v8905_v28  ;;  %v8936_v20 = vld [vmem:[%s12421_s2 + $0x220] sm:$0xff]  ;;  %v8945_v24 = vld [vmem:[%s12421_s2 + $0x258] sm:$0xff] }
0x182b   :  { %3290 = vmatpush.msrb.mxu2 %v8904_v19 }
0x182d   :  { %3291 = vmatpush.msrb.mxu2 %v8903_v40 }
0x182e   :  { %8898 = vmatmul.msk.f32.vlgmr.msra.gmra.mxu2 %vm156_vm1, %v3173_v25  ;;  %v8944_v25 = vld [vmem:[%s12421_s2 + $0x250] sm:$0xff] }
0x182f   :  { %3292 = vmatpush.msrb.mxu2 %v8902_v10 }
0x1831   :  { %3442 = vmatpush.msra.mxu2 %v8921_v3 }
0x1833   :  { %3443 = vmatpush.msra.mxu2 %v8920_v6 }
0x1835   :  { %3444 = vmatpush.msra.mxu2 %v8919_v58 }
0x1837   :  { %3445 = vmatpush.msra.mxu2 %v8918_v17 }
0x1842   :  { %3201 = vrot.lane.b32.xlu1 %v10699_v32, %s9817_s12  ;;  %v3349_v32 = vld [vmem:[%s12427_s8 + $0x38] sm:$0xff] }
0x189c   :  { %v3170_v54 = vpop.xlane.xlu1 %3169 }
0x189d   :  { %9561 = vrcp.f32 %v3170_v54 }
0x18a3   :  { %v9562_v26 = vpop.eup %9561 }
0x18a4   :  { %v3174_v42 = vmul.f32 %v9562_v26, %v9558_v22  ;;  %v8930_v22 = vld [vmem:[%s12421_s2 + $0x200] sm:$0xff]  ;;  %v2930_v26 = vadd.f32 %v10750_v18, %v2900_v35  ;;  %v2522_v35 = vadd.f32 %v9389_v63, %v2518_v33 }
0x18a5   :  { %v9393_v18 = vld [vmem:[%s12428_s9] ss:$0 sm:$0xff] }
0x18a9   :  { %v3061_v37 = vpop.f32.mrf.mxu2 }
0x18aa   :  { %8893 = vmatmul.msk.f32.gmra.mxu3 %vm156_vm1, %v3061_v37  ;;  %v8942_v37 = vld [vmem:[%s12421_s2 + $0x240] sm:$0xff] }
0x18b1   :  { %v3198_v21 = vpop.f32.mrf.mxu2 }
0x18b2   :  { %8900 = vmatmul.msk.f32.vlgmr.msrb.gmra.mxu1 %vm156_vm1, %v3198_v21 }
0x18b4   :  { %v3202_v27 = vpop.permute.xlu1 %3201 }
0x18b5   :  { %3222 = vmatpush.msra.mxu0 %v3202_v27 }
0x18b6   :  { %8899 = vmatmul.msk.f32.vlgmr.msra.gmra.mxu0 %vm156_vm1, %v3174_v42 }
0x18b7   :  { %3379 = vmatpush.msrb.mxu0 %v3349_v32 }
0x18b9   :  { %3380 = vmatpush.msrb.mxu0 %v3348_v23 }
0x18bb   :  { %3381 = vmatpush.msrb.mxu0 %v3347_v34  ;;  %v8917_v34 = vld [vmem:[%s12427_s8 + $0x58] sm:$0xff] }
0x18bc   :  { %3471 = vmatpush.msrb.mxu3 %v8917_v34 }
0x18bd   :  { %3382 = vmatpush.msrb.mxu0 %v3346_v36 }
0x18be   :  { %8922 = vmatmul.msk.f32.vlgmr.msrb.gmra.mxu0 %vm61_vm0, %v1702_v7  ;;  %v2517_v7 = vadd.f32 %v10684_v29, %v10623_v46  ;;  %3472 = vmatpush.msrb.mxu3 %v8916_v51 }
0x18c0   :  { %v2521_v10 = vadd.f32 %v9389_v63, %v2517_v7  ;;  %3473 = vmatpush.msrb.mxu3 %v8915_v2 }
0x18c6   :  { %8923 = vmatmul.msk.f32.gmra.mxu0 %vm61_vm0, %v1703_v39 }
0x192d   :  { %v3090_v54 = vpop.f32.mrf.mxu3 }
0x192e   :  { %v3094_v21 = vadd.f32 %v3090_v54, %v2930_v26 }
0x192f   :  { %v3250_v43 = vpop.f32.mrf.mxu1 }
0x1930   :  { %v3256_v53 = vadd.f32 %v3250_v43, %v3093_v49  ;;  %v8914_v49 = vld [vmem:[%s12427_s8 + $0x40] sm:$0xff]  ;;  %v9394_v43 = vld [vmem:[%s12422_s3 + $0x10] ss:$0 sm:$0xff] }
0x1931   :  { %3474 = vmatpush.msrb.mxu3 %v8914_v49 }
0x1932   :  { %v3258_v59 = vadd.f32 %v10569_v62, %v3256_v53  ;;  %v874_v62 = vadd.f32 %v10226_v31, %v10173_v4  ;;  %v8933_v4 = vld [vmem:[%s12421_s2 + $0x218] sm:$0xff] }
0x1933   :  { %v3224_v60 = vpop.f32.mrf.mxu0  ;;  %v8939_v31 = vld [vmem:[%s12421_s2 + $0x238] sm:$0xff]  ;;  %3512 = vmatpush.msra.mxu0 %v8933_v4 }
0x1934   :  { %v10826_v61 = vadd.f32 %v9391_v55, %v3258_v59  ;;  %8901 = vmatmul.msk.f32.gmra.mxu1 %vm156_vm1, %v3224_v60  ;;  %v878_v50 = vadd.f32 %v9377_v38, %v874_v62 }
0x1935   :  { %3542 = vmatpush.msrb.mxu1 %v8939_v31  ;;  %3513 = vmatpush.msra.mxu0 %v8932_v44 }
0x1936   :  { %8906 = vmatmul.msk.f32.vlgmr.msrb.gmra.mxu2 %vm61_vm0, %v10826_v61 }
0x1937   :  { %3543 = vmatpush.msrb.mxu1 %v8938_v11  ;;  %3514 = vmatpush.msra.mxu0 %v8931_v14 }
0x1938   :  { %3572 = vmatpush.msrb.mxu2 %v8945_v24 }
0x1939   :  { %3544 = vmatpush.msrb.mxu1 %v8937_v16  ;;  %3515 = vmatpush.msra.mxu0 %v8930_v22 }
0x193a   :  { %3573 = vmatpush.msrb.mxu2 %v8944_v25 }
0x193b   :  { %3545 = vmatpush.msrb.mxu1 %v8936_v20  ;;  %v3384_v8 = vpop.f32.mrf.mxu0 }
0x193c   :  { %8924 = vmatmul.msk.f32.vlgmr.msra.gmra.mxu1 %vm61_vm0, %v877_v57  ;;  %3574 = vmatpush.msrb.mxu2 %v8943_v52 }
0x193e   :  { %3575 = vmatpush.msrb.mxu2 %v8942_v37 }
0x1943   :  { %v3387_v46 = vpop.f32.mrf.mxu0 }
0x1944   :  { %8925 = vmatmul.msk.f32.gmra.mxu1 %vm61_vm0, %v878_v50 }
0x19b1   :  { %v3253_v42 = vpop.f32.mrf.mxu1 }
0x19b2   :  { %v3257_v27 = vadd.f32 %v3253_v42, %v3094_v21 }
0x19b4   :  { %v3259_v32 = vadd.f32 %v10577_v1, %v3257_v27 }
0x19b6   :  { %v10902_v23 = vadd.f32 %v9391_v55, %v3259_v32  ;;  %v9395_v55 = vld [vmem:[%s12422_s3 + $0x11] ss:$0 sm:$0xff] }
0x19b8   :  { %8907 = vmatmul.msk.f32.gmra.mxu2 %vm61_vm0, %v10902_v23 }
0x19b9   :  { %v3294_v36 = vpop.f32.mrf.mxu2  ;;  %v3413_v1 = vpop.f32.mrf.mxu1 }
0x19ba   :  { %v3295_v39 = vadd.f32 %v9392_v9, %v3294_v36  ;;  %v3414_v28 = vadd.f32 %v3413_v1, %v3384_v8 }
0x19bc   :  { %v3300_v19 = vmax.f32 %v3295_v39, 0.0  ;;  %v3420_v40 = vadd.f32 %v9393_v18, %v3414_v28 }
0x19be   :  { %v10923_v13 = vadd.f32 %v9759_v41, %v3420_v40  ;;  %8912 = vmatmul.msk.f32.vlgmr.msra.gmra.mxu3 %vm61_vm0, %v3300_v19 }
0x19c0   :  { %8926 = vmatmul.msk.f32.vlgmr.msra.gmra.mxu2 %vm61_vm0, %v2521_v10  ;;  %8934 = vmatmul.msk.f32.vlgmr.msra.gmra.mxu0 %vm61_vm0, %v10923_v13 }
0x19c1   :  { %8940 = vmatmul.msk.f32.vlgmr.msrb.gmra.mxu1 %vm61_vm0, %v10923_v13  ;;  %v3416_v29 = vpop.f32.mrf.mxu1 }
0x19c2   :  { %v3417_v45 = vadd.f32 %v3416_v29, %v3387_v46 }
0x19c4   :  { %v3421_v47 = vadd.f32 %v9393_v18, %v3417_v45 }
0x19c6   :  { %v10936_v48 = vadd.f32 %v9760_v56, %v3421_v47 }
0x19c8   :  { %8927 = vmatmul.msk.f32.gmra.mxu2 %vm61_vm0, %v2522_v35  ;;  %8935 = vmatmul.msk.f32.gmra.mxu0 %vm61_vm0, %v10936_v48 }
0x19c9   :  { %8941 = vmatmul.msk.f32.gmra.mxu1 %vm61_vm0, %v10936_v48 }
0x19d0   :  { %8946 = vmatmul.msk.f32.vlgmr.msrb.gmra.mxu2 %vm61_vm0, %v10923_v13 }
0x19d8   :  { %8947 = vmatmul.msk.f32.gmra.mxu2 %vm61_vm0, %v10936_v48 }
0x1a3b   :  { %v3297_v53 = vpop.f32.mrf.mxu2 }
0x1a3c   :  { %v3298_v59 = vadd.f32 %v9392_v9, %v3297_v53 }
0x1a3d   :  { %v3517_v60 = vpop.f32.mrf.mxu0 }
0x1a3e   :  { %v3301_v15 = vmax.f32 %v3298_v59, 0.0  ;;  %v10962_v38 = vadd.f32 %v9394_v43, %v3517_v60  ;;  %v3547_v57 = vpop.f32.mrf.mxu1 }
0x1a3f   :  { %v10964_v62 = vadd.f32 %v9395_v55, %v3547_v57 }
0x1a40   :  { %8913 = vmatmul.msk.f32.gmra.mxu3 %vm61_vm0, %v3301_v15  ;;  %3710 = vrot.lane.b32.xlu2 %v10962_v38, %s9815_s18 }
0x1a41   :  { %3712 = vrot.lane.b32.xlu0 %v10964_v62, %s9815_s18  ;;  %8952 = vmatpush.xpose.msk.msra.mxu3 %vm156_vm1, %v10964_v62  ;;  %v3330_v50 = vpop.f32.mrf.mxu3 }
0x1a42   :  { %v3336_v0 = vadd.f32 %v3330_v50, %v10826_v61  ;;  %v9397_v61 = vld [vmem:[%s12422_s3 + $0x12] ss:$0 sm:$0xff]  ;;  %v8948_v50 = vld [vmem:[%s12421_s2 + $0x260] sm:$0xff] }
0x1a43   :  { %v10977_v3 = vpop.f32.mrf.mxu2 }
0x1a44   :  { %v3340_v4 = vadd.f32 %v9396_v30, %v3336_v0  ;;  %v8949_v0 = vld [vmem:[%s12421_s2 + $0x268] sm:$0xff] }
0x1a45   :  { %v3520_v5 = vpop.f32.mrf.mxu0 }
0x1a46   :  { %v3550_v31 = vpop.f32.mrf.mxu1  ;;  %v10984_v44 = vadd.f32 %v9394_v43, %v3520_v5 }
0x1a47   :  { %v10979_v6 = vadd.f32 %v9395_v55, %v3550_v31 }
0x1a48   :  { %8928 = vmatmul.msk.f32.vlgmr.msrb.gmra.mxu3 %vm61_vm0, %v3340_v4 }
0x1a49   :  { %8954 = vmatpush.xpose.msk.msrb.mxu0 %vm156_vm1, %v10979_v6 }
0x1a4b   :  { %v10986_v11 = vpop.f32.mrf.mxu2 }
0x1a4c   :  { %8955 = vmatmul.msk.f32.vlgmr.msrb.gmra.mxu0 %vm156_vm1, %v10984_v44 }
0x1a53   :  { %v3577_v12 = vpop.f32.mrf.mxu2 }
0x1a54   :  { %v10993_v58 = vadd.f32 %v9397_v61, %v3577_v12 }
0x1a56   :  { %3682 = vmatpush.msrb.mxu3 %v10993_v58 }
0x1a5b   :  { %v3580_v14 = vpop.f32.mrf.mxu2 }
0x1a5c   :  { %v10996_v16 = vadd.f32 %v9397_v61, %v3580_v14 }
0x1a5e   :  { %3705 = vmatpush.msra.mxu0 %v10996_v16 }
0x1a9a   :  { %v3711_v22 = vpop.permute.xlu2 %3710 }
0x1ab3   :  { %v3713_v17 = vpop.permute.xlu0 %3712 }
0x1ab4   :  { %8958 = vmatpush.xpose.msk.msra.mxu1 %vm156_vm1, %v3713_v17 }
0x1ab7   :  { %8959 = vmatmul.msk.f32.vlgmr.msra.gmra.mxu1 %vm156_vm1, %v3711_v22 }
0x1ab8   :  { %3865 = vmatpush.msrb.mxu1 %v8949_v0 }
0x1ac3   :  { %v3333_v20 = vpop.f32.mrf.mxu3 }
0x1ac4   :  { %v3337_v24 = vadd.f32 %v3333_v20, %v10902_v23 }
0x1ac6   :  { %v3341_v25 = vadd.f32 %v9396_v30, %v3337_v24 }
0x1ac8   :  { %8929 = vmatmul.msk.f32.gmra.mxu3 %vm61_vm0, %v3341_v25 }
0x1ac9   :  { %v3637_v23 = vpop.f32.mrf.mxu0 }
0x1aca   :  { %v3641_v9 = vmul.f32 0.17677669, %v3637_v23 }
0x1acb   :  { %v11006_v26 = vpop.f32.mrf.mxu3 }
0x1acc   :  { %v3645_v8 = vsel %vm156_vm1, %v3641_v9, -inf }
0x1ad0   :  { %8953 = vmatmul.msk.f32.vlgmr.msra.gmra.mxu3 %vm156_vm1, %v10962_v38 }
0x1b34   :  { %v3735_v52 = vpop.f32.mrf.mxu1 }
0x1b35   :  { %v3766_v54 = vmul.f32 0.17677669, %v3735_v52 }
0x1b37   :  { %v3768_v37 = vsel %vm156_vm1, %v3766_v54, -inf }
0x1b38   :  { %3769 = vmax.xlane.f32.xlu2 %v3768_v37 }
0x1b4b   :  { %v11008_v21 = vpop.f32.mrf.mxu3 }
0x1b50   :  { %3791 = vrot.lane.b32.xlu2 %v10993_v58, %s9815_s18 }
0x1b53   :  { %v3611_v42 = vpop.f32.mrf.mxu3 }
0x1b54   :  { %v3640_v27 = vmul.f32 0.17677669, %v3611_v42 }
0x1b56   :  { %v3642_v32 = vsel %vm156_vm1, %v3640_v27, -inf }
0x1b57   :  { %3643 = vmax.xlane.f32.xlu0 %v3642_v32 }
0x1b58   :  { %3904 = vrot.lane.b32.xlu2 %v10964_v62, %s9816_s23 }
0x1b6b   :  { %3740 = vrot.lane.b32.xlu0 %v10979_v6, %s9815_s18 }
0x1b81   :  { %3646 = vmax.xlane.f32.xlu2 %v3645_v8 }
0x1bab   :  { %v3770_v18 = vpop.xlane.xlu2 %3769 }
0x1bac   :  { %v3774_v34 = vsub.f32 %v3766_v54, %v3770_v18 }
0x1bae   :  { %v3776_v36 = vmul.f32 1.442695, %v3774_v34 }
0x1bb0   :  { %9563 = vpow2.f32 %v3776_v36 }
0x1bb3   :  { %v3792_v1 = vpop.permute.xlu2 %3791 }
0x1bb4   :  { %3812 = vmatpush.msra.mxu3 %v3792_v1 }
0x1bb6   :  { %v9564_v7 = vpop.eup %9563 }
0x1bb7   :  { %v3780_v63 = vsel %vm156_vm1, %v9564_v7, 0.0 }
0x1bb8   :  { %3781 = vadd.xlane.f32.xlu0 %v3780_v63 }
0x1bbb   :  { %v3905_v46 = vpop.permute.xlu2 %3904 }
0x1bca   :  { %v3644_v39 = vpop.xlane.xlu0 %3643 }
0x1bcb   :  { %v3648_v28 = vsub.f32 %v3640_v27, %v3644_v39 }
0x1bcc   :  { %3902 = vrot.lane.b32.xlu0 %v10962_v38, %s9816_s23 }
0x1bcd   :  { %v3650_v19 = vmul.f32 1.442695, %v3648_v28 }
0x1bcf   :  { %9565 = vpow2.f32 %v3650_v19 }
0x1bd5   :  { %v9566_v40 = vpop.eup %9565 }
0x1bd6   :  { %v3654_v10 = vsel %vm156_vm1, %v9566_v40, 0.0 }
0x1bd7   :  { %3655 = vadd.xlane.f32.xlu1 %v3654_v10 }
0x1bdd   :  { %v3741_v41 = vpop.permute.xlu0 %3740 }
0x1bde   :  { %8960 = vmatpush.xpose.msk.msra.mxu2 %vm156_vm1, %v3741_v41 }
0x1be2   :  { %3894 = vmatpush.msrb.mxu2 %v8948_v50 }
0x1bf0   :  { %3738 = vrot.lane.b32.xlu1 %v10984_v44, %s9815_s18 }
0x1bf4   :  { %v3647_v29 = vpop.xlane.xlu2 %3646 }
0x1bf5   :  { %v3649_v33 = vsub.f32 %v3641_v9, %v3647_v29  ;;  %v8950_v29 = vld [vmem:[%s12421_s2 + $0x270] sm:$0xff] }
0x1bf6   :  { %4055 = vmatpush.msra.mxu1 %v8950_v29 }
0x1bf7   :  { %v3652_v45 = vmul.f32 1.442695, %v3649_v33 }
0x1bf9   :  { %9567 = vpow2.f32 %v3652_v45 }
0x1bff   :  { %v9568_v47 = vpop.eup %9567 }
0x1c00   :  { %v3657_v35 = vsel %vm156_vm1, %v9568_v47, 0.0 }
0x1c1a   :  { %3658 = vadd.xlane.f32.xlu1 %v3657_v35 }
0x1c2b   :  { %v3782_v51 = vpop.xlane.xlu0 %3781 }
0x1c3e   :  { %v3903_v59 = vpop.permute.xlu0 %3902 }
0x1c4a   :  { %v3656_v56 = vpop.xlane.xlu1 %3655 }
0x1c4b   :  { %9569 = vrcp.f32 %v3656_v56 }
0x1c4c   :  { %9571 = vrcp.f32 %v3782_v51 }
0x1c51   :  { %v9570_v2 = vpop.eup %9569 }
0x1c52   :  { %v3662_v49 = vmul.f32 %v9570_v2, %v9566_v40  ;;  %v9572_v43 = vpop.eup %9571 }
0x1c53   :  { %v3788_v53 = vmul.f32 %v9572_v43, %v9564_v7 }
0x1c54   :  { %8956 = vmatmul.msk.f32.vlgmr.msrb.gmra.mxu3 %vm156_vm1, %v3662_v49 }
0x1c55   :  { %8968 = vmatpush.xpose.msk.msrb.mxu3 %vm156_vm1, %v3905_v46 }
0x1c5c   :  { %8962 = vmatmul.msk.f32.vlgmr.msra.gmra.mxu3 %vm156_vm1, %v3788_v53 }
0x1c62   :  { %v3739_v55 = vpop.permute.xlu1 %3738 }
0x1c63   :  { %8961 = vmatmul.msk.f32.vlgmr.msra.gmra.mxu2 %vm156_vm1, %v3739_v55 }
0x1c64   :  { %8969 = vmatmul.msk.f32.vlgmr.msrb.gmra.mxu3 %vm156_vm1, %v3903_v59 }
0x1c8d   :  { %v3659_v60 = vpop.xlane.xlu1 %3658 }
0x1c8e   :  { %9573 = vrcp.f32 %v3659_v60 }
0x1c94   :  { %v9574_v15 = vpop.eup %9573 }
0x1c95   :  { %v3663_v57 = vmul.f32 %v9574_v15, %v9568_v47  ;;  %v9355_v15 = vpack.i.bf16 %v10996_v16, %v10993_v58 }
0x1c97   :  { %8957 = vmatmul.msk.f32.vlgmr.msra.gmra.mxu0 %vm156_vm1, %v3663_v57 }
0x1cd7   :  { %v3684_v30 = vpop.f32.mrf.mxu3 }
0x1cd8   :  { %8966 = vmatmul.msk.f32.vlgmr.msrb.gmra.mxu2 %vm156_vm1, %v3684_v30 }
0x1cdf   :  { %v3814_v4 = vpop.f32.mrf.mxu3 }
0x1ce0   :  { %8964 = vmatmul.msk.f32.vlgmr.msrb.gmra.mxu1 %vm156_vm1, %v3814_v4 }
0x1ce6   :  { %v3763_v31 = vpop.f32.mrf.mxu2 }
0x1ce7   :  { %v3767_v5 = vmul.f32 0.17677669, %v3763_v31  ;;  %v3927_v61 = vpop.f32.mrf.mxu3 }
0x1ce8   :  { %v3958_v12 = vmul.f32 0.17677669, %v3927_v61 }
0x1ce9   :  { %v3771_v14 = vsel %vm156_vm1, %v3767_v5, -inf }
0x1cea   :  { %3772 = vmax.xlane.f32.xlu0 %v3771_v14  ;;  %v3960_v17 = vsel %vm156_vm1, %v3958_v12, -inf }
0x1ceb   :  { %3961 = vmax.xlane.f32.xlu2 %v3960_v17 }
0x1cfe   :  { %3932 = vrot.lane.b32.xlu0 %v10979_v6, %s9816_s23 }
0x1d03   :  { %3818 = vrot.lane.b32.xlu2 %v10996_v16, %s9815_s18 }
0x1d06   :  { %3930 = vrot.lane.b32.xlu0 %v10984_v44, %s9816_s23 }
0x1d0b   :  { %4067 = vrot.lane.b32.xlu2 %v10964_v62, %s9817_s12 }
0x1d13   :  { %4065 = vrot.lane.b32.xlu2 %v10962_v38, %s9817_s12 }
0x1d14   :  { %v3707_v22 = vpop.f32.mrf.mxu0 }
0x1d15   :  { %8967 = vmatmul.msk.f32.gmra.mxu2 %vm156_vm1, %v3707_v22 }
0x1d5b   :  { %v11065_v63 = vpop.f32.mrf.mxu2 }
0x1d5d   :  { %v3773_v20 = vpop.xlane.xlu0 %3772 }
0x1d5e   :  { %v3775_v24 = vsub.f32 %v3767_v5, %v3773_v20  ;;  %v3962_v25 = vpop.xlane.xlu2 %3961 }
0x1d5f   :  { %v3966_v52 = vsub.f32 %v3958_v12, %v3962_v25  ;;  %v8999_v25 = vld [vmem:[%s12421_s2 + $0x298] sm:$0xff] }
0x1d60   :  { %v3778_v54 = vmul.f32 1.442695, %v3775_v24 }
0x1d61   :  { %v3968_v37 = vmul.f32 1.442695, %v3966_v52  ;;  %v8998_v52 = vld [vmem:[%s12421_s2 + $0x290] sm:$0xff] }
0x1d62   :  { %9575 = vpow2.f32 %v3778_v54  ;;  %v8997_v54 = vld [vmem:[%s12421_s2 + $0x288] sm:$0xff] }
0x1d63   :  { %9577 = vpow2.f32 %v3968_v37  ;;  %v8996_v37 = vld [vmem:[%s12421_s2 + $0x280] sm:$0xff] }
0x1d66   :  { %v3819_v42 = vpop.permute.xlu2 %3818 }
0x1d67   :  { %3839 = vmatpush.msrb.mxu0 %v3819_v42 }
0x1d68   :  { %v9576_v27 = vpop.eup %9575 }
0x1d69   :  { %v9578_v32 = vpop.eup %9577  ;;  %v3783_v62 = vsel %vm156_vm1, %v9576_v27, 0.0 }
0x1d6a   :  { %3784 = vadd.xlane.f32.xlu1 %v3783_v62  ;;  %v3972_v38 = vsel %vm156_vm1, %v9578_v32, 0.0 }
0x1d6b   :  { %3973 = vadd.xlane.f32.xlu0 %v3972_v38 }
0x1d6e   :  { %v4068_v23 = vpop.permute.xlu2 %4067 }
0x1d6f   :  { %8976 = vmatpush.xpose.msk.msra.mxu2 %vm156_vm1, %v4068_v23 }
0x1d70   :  { %v3933_v9 = vpop.permute.xlu0 %3932 }
0x1d71   :  { %8970 = vmatpush.xpose.msk.msra.mxu0 %vm156_vm1, %v3933_v9 }
0x1d76   :  { %v4066_v8 = vpop.permute.xlu2 %4065 }
0x1d77   :  { %8977 = vmatmul.msk.f32.vlgmr.msra.gmra.mxu2 %vm156_vm1, %v4066_v8  ;;  %v8951_v8 = vld [vmem:[%s12421_s2 + $0x278] sm:$0xff] }
0x1d78   :  { %v3931_v34 = vpop.permute.xlu0 %3930 }
0x1d7f   :  { %4093 = vrot.lane.b32.xlu0 %v10984_v44, %s9817_s12 }
0x1d83   :  { %3982 = vrot.lane.b32.xlu1 %v10993_v58, %s9816_s23 }
0x1d8b   :  { %4095 = vrot.lane.b32.xlu1 %v10979_v6, %s9817_s12 }
0x1d98   :  { %v11068_v39 = vpop.f32.mrf.mxu2 }
0x1ddd   :  { %v3785_v18 = vpop.xlane.xlu1 %3784 }
0x1dde   :  { %9579 = vrcp.f32 %v3785_v18  ;;  %v3974_v7 = vpop.xlane.xlu0 %3973  ;;  %v9005_v18 = vld [vmem:[%s12421_s2 + $0x2b8] sm:$0xff] }
0x1ddf   :  { %9581 = vrcp.f32 %v3974_v7  ;;  %v9002_v7 = vld [vmem:[%s12421_s2 + $0x2a0] sm:$0xff] }
0x1de4   :  { %v9580_v36 = vpop.eup %9579 }
0x1de5   :  { %v3789_v1 = vmul.f32 %v9580_v36, %v9576_v27  ;;  %v9582_v44 = vpop.eup %9581 }
0x1de6   :  { %v3980_v28 = vmul.f32 %v9582_v44, %v9578_v32 }
0x1de7   :  { %8963 = vmatmul.msk.f32.vlgmr.msrb.gmra.mxu0 %vm156_vm1, %v3789_v1  ;;  %v9003_v1 = vld [vmem:[%s12421_s2 + $0x2a8] sm:$0xff] }
0x1def   :  { %8971 = vmatmul.msk.f32.vlgmr.msra.gmra.mxu0 %vm156_vm1, %v3931_v34  ;;  %v9004_v34 = vld [vmem:[%s12421_s2 + $0x2b0] sm:$0xff] }
0x1df1   :  { %v4094_v46 = vpop.permute.xlu0 %4093 }
0x1df5   :  { %v3983_v19 = vpop.permute.xlu1 %3982 }
0x1df6   :  { %4003 = vmatpush.msra.mxu3 %v3983_v19  ;;  %v9398_v19 = vld [vmem:[%s12428_s9 + $0x1] ss:$0 sm:$0xff] }
0x1df7   :  { %8972 = vmatmul.msk.f32.vlgmr.msra.gmra.mxu3 %vm156_vm1, %v3980_v28  ;;  %v3477_v28 = vadd.f32 %v11006_v26, %v10977_v3  ;;  %v3480_v3 = vadd.f32 %v11008_v21, %v10986_v11  ;;  %v8987_v11 = vld [vmem:[%s12423_s4 + $0x98] sm:$0xff]  ;;  %v8986_v21 = vld [vmem:[%s12423_s4 + $0x90] sm:$0xff] }
0x1dfa   :  { %v4090_v6 = vpop.f32.mrf.mxu2 }
0x1dfb   :  { %v4121_v40 = vmul.f32 0.17677669, %v4090_v6 }
0x1dfd   :  { %v4096_v10 = vpop.permute.xlu1 %4095  ;;  %v4123_v41 = vsel %vm156_vm1, %v4121_v40, -inf }
0x1dfe   :  { %8978 = vmatpush.xpose.msk.msrb.mxu3 %vm156_vm1, %v4096_v10  ;;  %4124 = vmax.xlane.f32.xlu2 %v4123_v41  ;;  %v11134_v10 = vld [vmem:[%s12422_s3 + $0x14] ss:$0 sm:$0xff]  ;;  %v9761_v41 = vld [vmem:[%s12420_s1] sm:$0xff] }
0x1e01   :  { %8979 = vmatmul.msk.f32.vlgmr.msrb.gmra.mxu3 %vm156_vm1, %v4094_v46 }
0x1e02   :  { %4218 = vmatpush.msra.mxu3 %v8951_v8 }
0x1e04   :  { %4367 = vmatpush.msrb.mxu3 %v9005_v18 }
0x1e06   :  { %4368 = vmatpush.msrb.mxu3 %v9004_v34 }
0x1e08   :  { %4369 = vmatpush.msrb.mxu3 %v9003_v1  ;;  %v9403_v1 = vld [vmem:[%s12422_s3 + $0x16] ss:$0 sm:$0xff] }
0x1e0a   :  { %4370 = vmatpush.msrb.mxu3 %v9002_v7 }
0x1e64   :  { %v3841_v33 = vpop.f32.mrf.mxu0 }
0x1e65   :  { %8965 = vmatmul.msk.f32.gmra.mxu1 %vm156_vm1, %v3841_v33  ;;  %v3484_v33 = vadd.f32 %v9398_v19, %v3480_v3 }
0x1e6c   :  { %v3955_v45 = vpop.f32.mrf.mxu0 }
0x1e6d   :  { %v3959_v47 = vmul.f32 0.17677669, %v3955_v45  ;;  %v9762_v45 = vld [vmem:[%s12420_s1 + $0x8] sm:$0xff]  ;;  %s8643_s1 = sshll.u32 %s12434_s15, 4  ;;  %s8644_s1 = int_to_ptr.hbm [resolvable:$true] %s8643_s1 }
0x1e6f   :  { %v3963_v35 = vsel %vm156_vm1, %v3959_v47, -inf }
0x1e70   :  { %3964 = vmax.xlane.f32.xlu1 %v3963_v35  ;;  %v8985_v35 = vld [vmem:[%s12423_s4 + $0x88] sm:$0xff] }
0x1e71   :  { %v4125_v56 = vpop.xlane.xlu2 %4124 }
0x1e72   :  { %v4129_v51 = vsub.f32 %v4121_v40, %v4125_v56  ;;  %v3483_v40 = vadd.f32 %v9398_v19, %v3477_v28  ;;  %v8984_v56 = vld [vmem:[%s12423_s4 + $0x80] sm:$0xff] }
0x1e74   :  { %v4131_v2 = vmul.f32 1.442695, %v4129_v51  ;;  %v11139_v46 = vadd.f32 %v9761_v41, %v3483_v40  ;;  %v3867_v51 = vpop.f32.mrf.mxu1 }
0x1e76   :  { %9583 = vpow2.f32 %v4131_v2 }
0x1e7a   :  { %v4005_v49 = vpop.f32.mrf.mxu3 }
0x1e7b   :  { %8974 = vmatmul.msk.f32.vlgmr.msra.gmra.mxu1 %vm156_vm1, %v4005_v49  ;;  %v8993_v49 = vld [vmem:[%s12425_s6 + $0x98] sm:$0xff] }
0x1e7c   :  { %v9584_v43 = vpop.eup %9583  ;;  %4295 = vmatpush.msrb.mxu1 %v8993_v49 }
0x1e7d   :  { %v4135_v53 = vsel %vm156_vm1, %v9584_v43, 0.0 }
0x1e7e   :  { %4136 = vadd.xlane.f32.xlu2 %v4135_v53 }
0x1e84   :  { %v4118_v55 = vpop.f32.mrf.mxu3 }
0x1e85   :  { %v4122_v59 = vmul.f32 0.17677669, %v4118_v55  ;;  %v3897_v55 = vadd.f32 %v11065_v63, %v3867_v51  ;;  %v9010_v63 = vld [vmem:[%s12421_s2 + $0x2d0] sm:$0xff] }
0x1e87   :  { %v4126_v60 = vsel %vm156_vm1, %v4122_v59, -inf }
0x1e88   :  { %4127 = vmax.xlane.f32.xlu0 %v4126_v60  ;;  %v9011_v60 = vld [vmem:[%s12421_s2 + $0x2d8] sm:$0xff] }
0x1e96   :  { %9356 = vrot.lane.b32.xlu2 %v9355_v15, %s9817_s12 }
0x1e9c   :  { %4008 = vrot.lane.b32.xlu0 %v10996_v16, %s9816_s23 }
0x1ee2   :  { %v3870_v2 = vpop.f32.mrf.mxu1 }
0x1ee3   :  { %v3965_v57 = vpop.xlane.xlu1 %3964 }
0x1ee4   :  { %v3967_v50 = vsub.f32 %v3959_v47, %v3965_v57  ;;  %v11153_v47 = vadd.f32 %v9762_v45, %v3484_v33  ;;  %v8990_v57 = vld [vmem:[%s12425_s6 + $0x80] sm:$0xff] }
0x1ee6   :  { %v3970_v0 = vmul.f32 1.442695, %v3967_v50 }
0x1ee8   :  { %9585 = vpow2.f32 %v3970_v0 }
0x1eee   :  { %v9586_v30 = vpop.eup %9585 }
0x1eef   :  { %v3975_v4 = vsel %vm156_vm1, %v9586_v30, 0.0 }
0x1ef0   :  { %3976 = vadd.xlane.f32.xlu1 %v3975_v4  ;;  %v9009_v4 = vld [vmem:[%s12421_s2 + $0x2c8] sm:$0xff] }
0x1ef1   :  { %v4137_v31 = vpop.xlane.xlu2 %4136 }
0x1ef8   :  { %v4057_v53 = vpop.f32.mrf.mxu1 }
0x1ef9   :  { %v9357_v5 = vpop.permute.xlu2 %9356  ;;  %v4063_v15 = vadd.f32 %v4057_v53, %v3897_v55 }
0x1efa   :  { %v9359_v61 = vunpack.i.h.bf16 %v9357_v5  ;;  %v9358_v16 = vunpack.i.l.bf16 %v9357_v5 }
0x1efb   :  { %v4128_v12 = vpop.xlane.xlu0 %4127 }
0x1efc   :  { %v4130_v14 = vsub.f32 %v4122_v59, %v4128_v12  ;;  %4192 = vmatpush.msrb.mxu2 %v9359_v61  ;;  %v8991_v59 = vld [vmem:[%s12425_s6 + $0x88] sm:$0xff] }
0x1efe   :  { %v4133_v58 = vmul.f32 1.442695, %v4130_v14  ;;  %4331 = vmatpush.msra.mxu2 %v8999_v25  ;;  %v3900_v14 = vadd.f32 %v11068_v39, %v3870_v2 }
0x1f00   :  { %9587 = vpow2.f32 %v4133_v58  ;;  %4332 = vmatpush.msra.mxu2 %v8998_v52 }
0x1f02   :  { %4333 = vmatpush.msra.mxu2 %v8997_v54 }
0x1f04   :  { %4334 = vmatpush.msra.mxu2 %v8996_v37 }
0x1f06   :  { %v9588_v17 = vpop.eup %9587 }
0x1f07   :  { %v4138_v22 = vsel %vm156_vm1, %v9588_v17, 0.0 }
0x1f08   :  { %4139 = vadd.xlane.f32.xlu1 %v4138_v22 }
0x1f0e   :  { %v4009_v20 = vpop.permute.xlu0 %4008 }
0x1f0f   :  { %4029 = vmatpush.msrb.mxu0 %v4009_v20 }
0x1f11   :  { %4166 = vmatpush.msra.mxu0 %v9358_v16 }
0x1f63   :  { %v3977_v24 = vpop.xlane.xlu1 %3976 }
0x1f64   :  { %9589 = vrcp.f32 %v3977_v24  ;;  %v9401_v24 = vld [vmem:[%s12422_s3 + $0x15] ss:$0 sm:$0xff] }
0x1f65   :  { %9591 = vrcp.f32 %v4137_v31  ;;  %v9008_v31 = vld [vmem:[%s12421_s2 + $0x2c0] sm:$0xff] }
0x1f6a   :  { %v9590_v42 = vpop.eup %9589 }
0x1f6b   :  { %v3981_v27 = vmul.f32 %v9590_v42, %v9586_v30  ;;  %v9592_v32 = vpop.eup %9591  ;;  %v9400_v30 = vld [vmem:[%s12422_s3 + $0x13] ss:$0 sm:$0xff] }
0x1f6c   :  { %v4143_v62 = vmul.f32 %v9592_v32, %v9584_v43  ;;  %v8992_v43 = vld [vmem:[%s12425_s6 + $0x90] sm:$0xff] }
0x1f6d   :  { %8973 = vmatmul.msk.f32.vlgmr.msrb.gmra.mxu0 %vm156_vm1, %v3981_v27  ;;  %4296 = vmatpush.msrb.mxu1 %v8992_v43  ;;  %v9402_v27 = vld [vmem:[%s12424_s5 + $0x4] ss:$0 sm:$0xff] }
0x1f6e   :  { %4259 = vmatpush.msrb.mxu0 %v8987_v11 }
0x1f6f   :  { %4297 = vmatpush.msrb.mxu1 %v8991_v59 }
0x1f70   :  { %4260 = vmatpush.msrb.mxu0 %v8986_v21 }
0x1f71   :  { %4298 = vmatpush.msrb.mxu1 %v8990_v57 }
0x1f72   :  { %4261 = vmatpush.msrb.mxu0 %v8985_v35 }
0x1f74   :  { %4262 = vmatpush.msrb.mxu0 %v8984_v56 }
0x1f75   :  { %8980 = vmatmul.msk.f32.vlgmr.msra.gmra.mxu0 %vm156_vm1, %v4143_v62 }
0x1f76   :  { %4397 = vmatpush.msra.mxu0 %v9011_v60 }
0x1f78   :  { %4398 = vmatpush.msra.mxu0 %v9010_v63 }
0x1f7a   :  { %4399 = vmatpush.msra.mxu0 %v9009_v4 }
0x1f7b   :  { %v4140_v38 = vpop.xlane.xlu1 %4139 }
0x1f7c   :  { %9593 = vrcp.f32 %v4140_v38  ;;  %4400 = vmatpush.msra.mxu0 %v9008_v31 }
0x1f82   :  { %v9594_v23 = vpop.eup %9593 }
0x1f83   :  { %v4144_v9 = vmul.f32 %v9594_v23, %v9588_v17 }
0x1f85   :  { %8981 = vmatmul.msk.f32.vlgmr.msrb.gmra.mxu2 %vm156_vm1, %v4144_v9 }
0x1f8d   :  { %9000 = vmatmul.msk.f32.vlgmr.msra.gmra.mxu2 %vm61_vm0, %v10923_v13 }
0x1f95   :  { %9001 = vmatmul.msk.f32.gmra.mxu2 %vm61_vm0, %v10936_v48 }
0x1fea   :  { %v4031_v36 = vpop.f32.mrf.mxu0 }
0x1feb   :  { %8975 = vmatmul.msk.f32.gmra.mxu1 %vm156_vm1, %v4031_v36 }
0x1ff2   :  { %v4168_v44 = vpop.f32.mrf.mxu0 }
0x1ff3   :  { %8982 = vmatmul.msk.f32.vlgmr.msra.gmra.mxu3 %vm156_vm1, %v4168_v44 }
0x2008   :  { %v4194_v6 = vpop.f32.mrf.mxu2 }
0x2009   :  { %8983 = vmatmul.msk.f32.gmra.mxu3 %vm156_vm1, %v4194_v6 }
0x2010   :  { %v4336_v26 = vpop.f32.mrf.mxu2 }
0x2011   :  { %v11144_v29 = vadd.f32 %v11134_v10, %v4336_v26  ;;  %9006 = vmatmul.msk.f32.vlgmr.msrb.gmra.mxu3 %vm61_vm0, %v11139_v46 }
0x2013   :  { %4535 = vrot.lane.b32.xlu0 %v11144_v29, %s9815_s18 }
0x2018   :  { %v4339_v54 = vpop.f32.mrf.mxu2 }
0x2019   :  { %9007 = vmatmul.msk.f32.gmra.mxu3 %vm61_vm0, %v11153_v47  ;;  %v11226_v42 = vadd.f32 %v11134_v10, %v4339_v54 }
0x2068   :  { %v4060_v12 = vpop.f32.mrf.mxu1 }
0x2069   :  { %v4064_v58 = vadd.f32 %v4060_v12, %v3900_v14 }
0x2076   :  { %v4220_v50 = vpop.f32.mrf.mxu3 }
0x2077   :  { %v4226_v0 = vadd.f32 %v4220_v50, %v4063_v15 }
0x2079   :  { %v4228_v5 = vadd.f32 %v4226_v0, %v10923_v13 }
0x207b   :  { %v11198_v61 = vadd.f32 %v9400_v30, %v4228_v5 }
0x207d   :  { %8988 = vmatmul.msk.f32.vlgmr.msrb.gmra.mxu0 %vm61_vm0, %v11198_v61 }
0x2085   :  { %v4536_v9 = vpop.permute.xlu0 %4535 }
0x208c   :  { %v4223_v17 = vpop.f32.mrf.mxu3 }
0x208d   :  { %v4227_v22 = vadd.f32 %v4223_v17, %v4064_v58 }
0x208f   :  { %v4229_v16 = vadd.f32 %v4227_v22, %v10936_v48 }
0x2091   :  { %v11204_v20 = vadd.f32 %v9400_v30, %v4229_v16 }
0x2093   :  { %8989 = vmatmul.msk.f32.gmra.mxu0 %vm61_vm0, %v11204_v20 }
0x2094   :  { %v4372_v25 = vpop.f32.mrf.mxu3 }
0x2095   :  { %v11211_v52 = vadd.f32 %v9401_v24, %v4372_v25 }
0x2097   :  { %4537 = vrot.lane.b32.xlu1 %v11211_v52, %s9815_s18  ;;  %9018 = vmatpush.xpose.msk.msra.mxu1 %vm156_vm1, %v11211_v52 }
0x209b   :  { %9012 = vmatmul.msk.f32.vlgmr.msra.gmra.mxu0 %vm61_vm0, %v11139_v46 }
0x209c   :  { %v4375_v39 = vpop.f32.mrf.mxu3 }
0x209d   :  { %v11219_v37 = vadd.f32 %v9401_v24, %v4375_v39 }
0x209f   :  { %9020 = vmatpush.xpose.msk.msrb.mxu2 %vm156_vm1, %v11219_v37  ;;  %4565 = vrot.lane.b32.xlu1 %v11219_v37, %s9815_s18 }
0x20a2   :  { %9021 = vmatmul.msk.f32.vlgmr.msrb.gmra.mxu2 %vm156_vm1, %v11226_v42 }
0x20a3   :  { %9013 = vmatmul.msk.f32.gmra.mxu0 %vm61_vm0, %v11153_v47 }
0x20a7   :  { %4563 = vrot.lane.b32.xlu1 %v11226_v42, %s9815_s18 }
0x20fa   :  { %v4264_v32 = vpop.f32.mrf.mxu0 }
0x20fb   :  { %v4265_v62 = vadd.f32 %v9402_v27, %v4264_v32 }
0x20fd   :  { %v4270_v38 = vmax.f32 %v4265_v62, 0.0 }
0x20ff   :  { %8994 = vmatmul.msk.f32.vlgmr.msrb.gmra.mxu1 %vm61_vm0, %v4270_v38 }
0x2109   :  { %v4538_v23 = vpop.permute.xlu1 %4537 }
0x210a   :  { %9024 = vmatpush.xpose.msk.msra.mxu3 %vm156_vm1, %v4538_v23 }
0x210d   :  { %9025 = vmatmul.msk.f32.vlgmr.msra.gmra.mxu3 %vm156_vm1, %v4536_v9 }
0x2110   :  { %v4267_v8 = vpop.f32.mrf.mxu0 }
0x2111   :  { %v4268_v18 = vadd.f32 %v9402_v27, %v4267_v8  ;;  %v4566_v34 = vpop.permute.xlu1 %4565 }
0x2112   :  { %9026 = vmatpush.xpose.msk.msrb.mxu0 %vm156_vm1, %v4566_v34  ;;  %v9014_v34 = vld [vmem:[%s12421_s2 + $0x2e0] sm:$0xff] }
0x2113   :  { %v4271_v36 = vmax.f32 %v4268_v18, 0.0 }
0x2115   :  { %8995 = vmatmul.msk.f32.gmra.mxu1 %vm61_vm0, %v4271_v36  ;;  %v9015_v36 = vld [vmem:[%s12421_s2 + $0x2e8] sm:$0xff] }
0x2116   :  { %4719 = vmatpush.msra.mxu0 %v9014_v34  ;;  %4690 = vmatpush.msrb.mxu3 %v9015_v36 }
0x2118   :  { %v4402_v7 = vpop.f32.mrf.mxu0 }
0x2119   :  { %v11245_v44 = vadd.f32 %v9403_v1, %v4402_v7  ;;  %v4564_v28 = vpop.permute.xlu1 %4563 }
0x211a   :  { %9027 = vmatmul.msk.f32.vlgmr.msrb.gmra.mxu0 %vm156_vm1, %v4564_v28 }
0x211b   :  { %4507 = vmatpush.msrb.mxu1 %v11245_v44 }
0x211d   :  { %9019 = vmatmul.msk.f32.vlgmr.msra.gmra.mxu1 %vm156_vm1, %v11144_v29 }
0x2120   :  { %v4405_v19 = vpop.f32.mrf.mxu0 }
0x2121   :  { %v11251_v6 = vadd.f32 %v9403_v1, %v4405_v19 }
0x2123   :  { %4530 = vmatpush.msra.mxu2 %v11251_v6 }
0x2125   :  { %v4462_v21 = vpop.f32.mrf.mxu2 }
0x2126   :  { %v4466_v35 = vmul.f32 0.17677669, %v4462_v21 }
0x2128   :  { %v4470_v56 = vsel %vm156_vm1, %v4466_v35, -inf }
0x217c   :  { %v11254_v40 = vpop.f32.mrf.mxu1 }
0x2190   :  { %v4560_v10 = vpop.f32.mrf.mxu3 }
0x2191   :  { %v4591_v41 = vmul.f32 0.17677669, %v4560_v10 }
0x2192   :  { %v11256_v3 = vpop.f32.mrf.mxu1 }
0x2193   :  { %v4593_v26 = vsel %vm156_vm1, %v4591_v41, -inf }
0x2194   :  { %4594 = vmax.xlane.f32.xlu2 %v4593_v26 }
0x2197   :  { %v4588_v5 = vpop.f32.mrf.mxu0 }
0x2198   :  { %v4592_v12 = vmul.f32 0.17677669, %v4588_v5 }
0x219a   :  { %v4436_v33 = vpop.f32.mrf.mxu1  ;;  %v4596_v14 = vsel %vm156_vm1, %v4592_v12, -inf }
0x219b   :  { %v4465_v45 = vmul.f32 0.17677669, %v4436_v33 }
0x219d   :  { %v4467_v11 = vsel %vm156_vm1, %v4465_v45, -inf }
0x219e   :  { %4468 = vmax.xlane.f32.xlu0 %v4467_v11 }
0x21ac   :  { %4616 = vrot.lane.b32.xlu2 %v11245_v44, %s9815_s18 }
0x21d5   :  { %4471 = vmax.xlane.f32.xlu2 %v4470_v56 }
0x2207   :  { %v4595_v51 = vpop.xlane.xlu2 %4594 }
0x2208   :  { %v4599_v2 = vsub.f32 %v4591_v41, %v4595_v51 }
0x220a   :  { %v4601_v49 = vmul.f32 1.442695, %v4599_v2 }
0x220c   :  { %9595 = vpow2.f32 %v4601_v49 }
0x220f   :  { %v4617_v43 = vpop.permute.xlu2 %4616 }
0x2210   :  { %4637 = vmatpush.msra.mxu1 %v4617_v43 }
0x2211   :  { %v4469_v53 = vpop.xlane.xlu0 %4468 }
0x2212   :  { %v9596_v55 = vpop.eup %9595  ;;  %v4473_v59 = vsub.f32 %v4465_v45, %v4469_v53 }
0x2213   :  { %v4605_v60 = vsel %vm156_vm1, %v9596_v55, 0.0 }
0x2214   :  { %v4475_v15 = vmul.f32 1.442695, %v4473_v59  ;;  %4606 = vadd.xlane.f32.xlu0 %v4605_v60 }
0x2216   :  { %9597 = vpow2.f32 %v4475_v15 }
0x221c   :  { %v9598_v57 = vpop.eup %9597 }
0x221d   :  { %v4479_v63 = vsel %vm156_vm1, %v9598_v57, 0.0 }
0x221e   :  { %4480 = vadd.xlane.f32.xlu1 %v4479_v63 }
0x2228   :  { %4729 = vrot.lane.b32.xlu0 %v11211_v52, %s9816_s23 }
0x2237   :  { %4727 = vrot.lane.b32.xlu1 %v11144_v29, %s9816_s23 }
0x2248   :  { %v4472_v50 = vpop.xlane.xlu2 %4471 }
0x2249   :  { %v4474_v0 = vsub.f32 %v4466_v35, %v4472_v50 }
0x224b   :  { %v4477_v30 = vmul.f32 1.442695, %v4474_v0 }
0x224d   :  { %9599 = vpow2.f32 %v4477_v30 }
0x2253   :  { %v9600_v4 = vpop.eup %9599 }
0x2254   :  { %v4482_v31 = vsel %vm156_vm1, %v9600_v4, 0.0 }
0x2255   :  { %4483 = vadd.xlane.f32.xlu0 %v4482_v31 }
0x2261   :  { %4597 = vmax.xlane.f32.xlu1 %v4596_v14 }
0x227a   :  { %4755 = vrot.lane.b32.xlu1 %v11226_v42, %s9816_s23 }
0x2282   :  { %4920 = vrot.lane.b32.xlu1 %v11219_v37, %s9817_s12 }
0x2287   :  { %v4607_v17 = vpop.xlane.xlu0 %4606 }
0x2291   :  { %v4481_v58 = vpop.xlane.xlu1 %4480 }
0x2292   :  { %9601 = vrcp.f32 %v4481_v58 }
0x2293   :  { %9603 = vrcp.f32 %v4607_v17 }
0x2298   :  { %v9602_v22 = vpop.eup %9601 }
0x2299   :  { %v4487_v16 = vmul.f32 %v9602_v22, %v9598_v57  ;;  %v9604_v25 = vpop.eup %9603 }
0x229a   :  { %v4730_v24 = vpop.permute.xlu0 %4729  ;;  %v4613_v39 = vmul.f32 %v9604_v25, %v9596_v55 }
0x229b   :  { %9022 = vmatmul.msk.f32.vlgmr.msrb.gmra.mxu1 %vm156_vm1, %v4487_v16 }
0x229c   :  { %9034 = vmatpush.xpose.msk.msrb.mxu1 %vm156_vm1, %v4730_v24 }
0x22a3   :  { %9028 = vmatmul.msk.f32.vlgmr.msra.gmra.mxu1 %vm156_vm1, %v4613_v39 }
0x22a9   :  { %v4728_v54 = vpop.permute.xlu1 %4727 }
0x22ab   :  { %9035 = vmatmul.msk.f32.vlgmr.msrb.gmra.mxu1 %vm156_vm1, %v4728_v54 }
0x22c8   :  { %v4484_v27 = vpop.xlane.xlu0 %4483 }
0x22c9   :  { %9605 = vrcp.f32 %v4484_v27 }
0x22cf   :  { %v9606_v32 = vpop.eup %9605 }
0x22d0   :  { %v4488_v62 = vmul.f32 %v9606_v32, %v9600_v4 }
0x22d2   :  { %9023 = vmatmul.msk.f32.vlgmr.msra.gmra.mxu2 %vm156_vm1, %v4488_v62 }
0x22d4   :  { %v4598_v38 = vpop.xlane.xlu1 %4597 }
0x22d5   :  { %v4600_v23 = vsub.f32 %v4592_v12, %v4598_v38  ;;  %v9016_v12 = vld [vmem:[%s12421_s2 + $0x2f0] sm:$0xff] }
0x22d6   :  { %4880 = vmatpush.msra.mxu3 %v9016_v12 }
0x22d7   :  { %v4603_v9 = vmul.f32 1.442695, %v4600_v23 }
0x22d9   :  { %9607 = vpow2.f32 %v4603_v9 }
0x22df   :  { %v9608_v8 = vpop.eup %9607 }
0x22e0   :  { %v4608_v18 = vsel %vm156_vm1, %v9608_v8, 0.0 }
0x22e1   :  { %4609 = vadd.xlane.f32.xlu0 %v4608_v18 }
0x22ec   :  { %v4756_v51 = vpop.permute.xlu1 %4755 }
0x22f4   :  { %v4921_v43 = vpop.permute.xlu1 %4920 }
0x22f5   :  { %4757 = vrot.lane.b32.xlu0 %v11219_v37, %s9816_s23 }
0x2318   :  { %v4509_v1 = vpop.f32.mrf.mxu1 }
0x2319   :  { %9032 = vmatmul.msk.f32.vlgmr.msra.gmra.mxu0 %vm156_vm1, %v4509_v1 }
0x2320   :  { %v4639_v7 = vpop.f32.mrf.mxu1 }
0x2321   :  { %9030 = vmatmul.msk.f32.vlgmr.msrb.gmra.mxu3 %vm156_vm1, %v4639_v7 }
0x2328   :  { %v4752_v28 = vpop.f32.mrf.mxu1 }
0x2329   :  { %v4783_v19 = vmul.f32 0.17677669, %v4752_v28 }
0x232b   :  { %v4785_v37 = vsel %vm156_vm1, %v4783_v19, -inf }
0x232c   :  { %4786 = vmax.xlane.f32.xlu2 %v4785_v37 }
0x2344   :  { %4643 = vrot.lane.b32.xlu2 %v11251_v6, %s9815_s18 }
0x234c   :  { %4892 = vrot.lane.b32.xlu2 %v11211_v52, %s9817_s12 }
0x2354   :  { %4890 = vrot.lane.b32.xlu2 %v11144_v29, %s9817_s12  ;;  %v4610_v41 = vpop.xlane.xlu0 %4609 }
0x2355   :  { %v4532_v10 = vpop.f32.mrf.mxu2  ;;  %9609 = vrcp.f32 %v4610_v41 }
0x2356   :  { %9033 = vmatmul.msk.f32.gmra.mxu0 %vm156_vm1, %v4532_v10 }
0x235b   :  { %v9610_v11 = vpop.eup %9609 }
0x235c   :  { %4807 = vrot.lane.b32.xlu2 %v11245_v44, %s9816_s23  ;;  %v4614_v52 = vmul.f32 %v9610_v11, %v9608_v8 }
0x2364   :  { %4918 = vrot.lane.b32.xlu2 %v11226_v42, %s9817_s12 }
0x2367   :  { %v4758_v29 = vpop.permute.xlu0 %4757 }
0x2396   :  { %v11310_v55 = vpop.f32.mrf.mxu0 }
0x239f   :  { %v4787_v26 = vpop.xlane.xlu2 %4786 }
0x23a0   :  { %v4791_v33 = vsub.f32 %v4783_v19, %v4787_v26 }
0x23a2   :  { %v4793_v45 = vmul.f32 1.442695, %v4791_v33  ;;  %v9017_v33 = vld [vmem:[%s12421_s2 + $0x2f8] sm:$0xff] }
0x23a4   :  { %9611 = vpow2.f32 %v4793_v45 }
0x23a7   :  { %v4644_v21 = vpop.permute.xlu2 %4643 }
0x23a8   :  { %4664 = vmatpush.msrb.mxu2 %v4644_v21  ;;  %v9065_v21 = vld [vmem:[%s12421_s2 + $0x318] sm:$0xff] }
0x23a9   :  { %9029 = vmatmul.msk.f32.vlgmr.msrb.gmra.mxu2 %vm156_vm1, %v4614_v52 }
0x23aa   :  { %v9612_v35 = vpop.eup %9611  ;;  %9036 = vmatpush.xpose.msk.msra.mxu2 %vm156_vm1, %v4758_v29  ;;  %v9063_v29 = vld [vmem:[%s12421_s2 + $0x308] sm:$0xff] }
0x23ab   :  { %v4797_v56 = vsel %vm156_vm1, %v9612_v35, 0.0 }
0x23ac   :  { %4798 = vadd.xlane.f32.xlu0 %v4797_v56 }
0x23af   :  { %v4893_v42 = vpop.permute.xlu2 %4892 }
0x23b0   :  { %9042 = vmatpush.xpose.msk.msrb.mxu0 %vm156_vm1, %v4893_v42 }
0x23b1   :  { %9037 = vmatmul.msk.f32.vlgmr.msra.gmra.mxu2 %vm156_vm1, %v4756_v51  ;;  %v9071_v51 = vld [vmem:[%s12421_s2 + $0x338] sm:$0xff] }
0x23b7   :  { %v4891_v2 = vpop.permute.xlu2 %4890 }
0x23b8   :  { %9043 = vmatmul.msk.f32.vlgmr.msrb.gmra.mxu0 %vm156_vm1, %v4891_v2  ;;  %v9070_v2 = vld [vmem:[%s12421_s2 + $0x330] sm:$0xff] }
0x23bf   :  { %v4808_v49 = vpop.permute.xlu2 %4807 }
0x23c0   :  { %4828 = vmatpush.msra.mxu1 %v4808_v49  ;;  %v9069_v49 = vld [vmem:[%s12421_s2 + $0x328] sm:$0xff] }
0x23c2   :  { %9044 = vmatpush.xpose.msk.msrb.mxu1 %vm156_vm1, %v4921_v43  ;;  %v9068_v43 = vld [vmem:[%s12421_s2 + $0x320] sm:$0xff] }
0x23c7   :  { %v4919_v63 = vpop.permute.xlu2 %4918 }
0x23d3   :  { %v11313_v57 = vpop.f32.mrf.mxu0 }
0x241f   :  { %v4799_v53 = vpop.xlane.xlu0 %4798 }
0x2420   :  { %9613 = vrcp.f32 %v4799_v53  ;;  %v9053_v53 = vld [vmem:[%s12423_s4 + $0xb8] sm:$0xff] }
0x2426   :  { %v9614_v59 = vpop.eup %9613 }
0x2427   :  { %v4805_v60 = vmul.f32 %v9614_v59, %v9612_v35  ;;  %v9062_v35 = vld [vmem:[%s12421_s2 + $0x300] sm:$0xff]  ;;  %v9052_v59 = vld [vmem:[%s12423_s4 + $0xb0] sm:$0xff] }
0x2429   :  { %9038 = vmatmul.msk.f32.vlgmr.msra.gmra.mxu1 %vm156_vm1, %v4805_v60  ;;  %v9051_v60 = vld [vmem:[%s12423_s4 + $0xa8] sm:$0xff] }
0x242a   :  { %5043 = vmatpush.msra.mxu1 %v9017_v33 }
0x242c   :  { %v4666_v15 = vpop.f32.mrf.mxu2 }
0x242d   :  { %9031 = vmatmul.msk.f32.gmra.mxu3 %vm156_vm1, %v4666_v15  ;;  %v9050_v15 = vld [vmem:[%s12423_s4 + $0xa0] sm:$0xff] }
0x2431   :  { %9045 = vmatmul.msk.f32.vlgmr.msrb.gmra.mxu1 %vm156_vm1, %v4919_v63 }
0x2432   :  { %5186 = vmatpush.msrb.mxu1 %v9071_v51 }
0x2434   :  { %v4780_v50 = vpop.f32.mrf.mxu2  ;;  %5187 = vmatpush.msrb.mxu1 %v9070_v2 }
0x2435   :  { %v4784_v0 = vmul.f32 0.17677669, %v4780_v50  ;;  %v4915_v30 = vpop.f32.mrf.mxu0  ;;  %v4692_v50 = vpop.f32.mrf.mxu3 }
0x2436   :  { %v4946_v4 = vmul.f32 0.17677669, %v4915_v30  ;;  %5188 = vmatpush.msrb.mxu1 %v9069_v49  ;;  %v4722_v12 = vadd.f32 %v11310_v55, %v4692_v50  ;;  %v9058_v55 = vld [vmem:[%s12425_s6 + $0xb0] sm:$0xff] }
0x2437   :  { %v4788_v31 = vsel %vm156_vm1, %v4784_v0, -inf }
0x2438   :  { %4789 = vmax.xlane.f32.xlu1 %v4788_v31  ;;  %v4948_v5 = vsel %vm156_vm1, %v4946_v4, -inf  ;;  %5189 = vmatpush.msrb.mxu1 %v9068_v43 }
0x2439   :  { %4949 = vmax.xlane.f32.xlu2 %v4948_v5 }
0x2451   :  { %4970 = vrot.lane.b32.xlu1 %v11245_v44, %s9817_s12 }
0x24a6   :  { %v4830_v14 = vpop.f32.mrf.mxu1 }
0x24a7   :  { %9040 = vmatmul.msk.f32.vlgmr.msra.gmra.mxu3 %vm156_vm1, %v4830_v14 }
0x24ab   :  { %v4790_v58 = vpop.xlane.xlu1 %4789 }
0x24ac   :  { %v4792_v17 = vsub.f32 %v4784_v0, %v4790_v58  ;;  %v4950_v22 = vpop.xlane.xlu2 %4949  ;;  %v9405_v0 = vld [vmem:[%s12422_s3 + $0x18] ss:$0 sm:$0xff] }
0x24ad   :  { %v4954_v24 = vsub.f32 %v4946_v4, %v4950_v22  ;;  %v9406_v22 = vld [vmem:[%s12422_s3 + $0x17] ss:$0 sm:$0xff] }
0x24ae   :  { %v4795_v16 = vmul.f32 1.442695, %v4792_v17  ;;  %v4943_v32 = vpop.f32.mrf.mxu1 }
0x24af   :  { %v4956_v25 = vmul.f32 1.442695, %v4954_v24  ;;  %v4947_v62 = vmul.f32 0.17677669, %v4943_v32  ;;  %v9075_v32 = vld [vmem:[%s12421_s2 + $0x348] sm:$0xff] }
0x24b0   :  { %9615 = vpow2.f32 %v4795_v16  ;;  %v4695_v31 = vpop.f32.mrf.mxu3 }
0x24b1   :  { %9617 = vpow2.f32 %v4956_v25  ;;  %v4951_v38 = vsel %vm156_vm1, %v4947_v62, -inf  ;;  %v9059_v25 = vld [vmem:[%s12425_s6 + $0xb8] sm:$0xff] }
0x24b2   :  { %5120 = vmatpush.msrb.mxu3 %v9059_v25 }
0x24b4   :  { %5121 = vmatpush.msrb.mxu3 %v9058_v55 }
0x24b6   :  { %v9616_v39 = vpop.eup %9615 }
0x24b7   :  { %v4800_v54 = vsel %vm156_vm1, %v9616_v39, 0.0  ;;  %v9618_v44 = vpop.eup %9617 }
0x24b8   :  { %4801 = vadd.xlane.f32.xlu0 %v4800_v54  ;;  %v4960_v27 = vsel %vm156_vm1, %v9618_v44, 0.0  ;;  %v9077_v54 = vld [vmem:[%s12421_s2 + $0x358] sm:$0xff] }
0x24c0   :  { %4961 = vadd.xlane.f32.xlu0 %v4960_v27  ;;  %v9076_v27 = vld [vmem:[%s12421_s2 + $0x350] sm:$0xff] }
0x24c3   :  { %v4971_v37 = vpop.permute.xlu1 %4970 }
0x24c8   :  { %4952 = vmax.xlane.f32.xlu0 %v4951_v38 }
0x24dc   :  { %4833 = vrot.lane.b32.xlu0 %v11251_v6, %s9816_s23 }
0x252a   :  { %v4882_v5 = vpop.f32.mrf.mxu3 }
0x252b   :  { %v4802_v23 = vpop.xlane.xlu0 %4801  ;;  %v4888_v14 = vadd.f32 %v4882_v5, %v4722_v12 }
0x2533   :  { %v4962_v9 = vpop.xlane.xlu0 %4961 }
0x253b   :  { %v4953_v8 = vpop.xlane.xlu0 %4952 }
0x253c   :  { %v4955_v18 = vsub.f32 %v4947_v62, %v4953_v8  ;;  %v9074_v62 = vld [vmem:[%s12421_s2 + $0x340] sm:$0xff] }
0x253e   :  { %v4958_v34 = vmul.f32 1.442695, %v4955_v18 }
0x2540   :  { %9619 = vpow2.f32 %v4958_v34 }
0x2541   :  { %9621 = vrcp.f32 %v4802_v23  ;;  %v4725_v23 = vadd.f32 %v11313_v57, %v4695_v31 }
0x2542   :  { %9623 = vrcp.f32 %v4962_v9 }
0x2546   :  { %v9620_v36 = vpop.eup %9619 }
0x2547   :  { %v4963_v1 = vsel %vm156_vm1, %v9620_v36, 0.0  ;;  %v9622_v7 = vpop.eup %9621 }
0x2548   :  { %4964 = vadd.xlane.f32.xlu2 %v4963_v1  ;;  %v4806_v28 = vmul.f32 %v9622_v7, %v9616_v39  ;;  %v9624_v10 = vpop.eup %9623  ;;  %v9057_v39 = vld [vmem:[%s12425_s6 + $0xa8] sm:$0xff]  ;;  %v9407_v1 = vld [vmem:[%s12422_s3 + $0x19] ss:$0 sm:$0xff] }
0x2549   :  { %v4968_v41 = vmul.f32 %v9624_v10, %v9618_v44  ;;  %5122 = vmatpush.msrb.mxu3 %v9057_v39  ;;  %v9056_v44 = vld [vmem:[%s12425_s6 + $0xa0] sm:$0xff] }
0x254b   :  { %5123 = vmatpush.msrb.mxu3 %v9056_v44 }
0x254e   :  { %v4834_v19 = vpop.permute.xlu0 %4833 }
0x254f   :  { %4854 = vmatpush.msrb.mxu2 %v4834_v19 }
0x2550   :  { %9039 = vmatmul.msk.f32.vlgmr.msrb.gmra.mxu2 %vm156_vm1, %v4806_v28 }
0x2551   :  { %4991 = vmatpush.msra.mxu2 %v4971_v37 }
0x2553   :  { %5084 = vmatpush.msrb.mxu2 %v9053_v53 }
0x2555   :  { %5085 = vmatpush.msrb.mxu2 %v9052_v59 }
0x2557   :  { %5086 = vmatpush.msrb.mxu2 %v9051_v60 }
0x2558   :  { %9046 = vmatmul.msk.f32.vlgmr.msra.gmra.mxu2 %vm156_vm1, %v4968_v41  ;;  %v9408_v41 = vld [vmem:[%s12424_s5 + $0x5] ss:$0 sm:$0xff] }
0x2559   :  { %5087 = vmatpush.msrb.mxu2 %v9050_v15 }
0x255b   :  { %5216 = vmatpush.msra.mxu2 %v9077_v54 }
0x255d   :  { %5217 = vmatpush.msra.mxu2 %v9076_v27 }
0x255f   :  { %5218 = vmatpush.msra.mxu2 %v9075_v32 }
0x2560   :  { %4996 = vrot.lane.b32.xlu2 %v11251_v6, %s9817_s12  ;;  %v9064_v6 = vld [vmem:[%s12421_s2 + $0x310] sm:$0xff] }
0x2561   :  { %5219 = vmatpush.msra.mxu2 %v9074_v62 }
0x25bb   :  { %v4965_v26 = vpop.xlane.xlu2 %4964 }
0x25bc   :  { %9625 = vrcp.f32 %v4965_v26 }
0x25c2   :  { %v9626_v45 = vpop.eup %9625 }
0x25c3   :  { %v4969_v11 = vmul.f32 %v9626_v45, %v9620_v36  ;;  %v4997_v52 = vpop.permute.xlu2 %4996 }
0x25c4   :  { %5017 = vmatpush.msra.mxu0 %v4997_v52 }
0x25c5   :  { %9047 = vmatmul.msk.f32.vlgmr.msra.gmra.mxu0 %vm156_vm1, %v4969_v11 }
0x25c6   :  { %5156 = vmatpush.msrb.mxu0 %v9065_v21 }
0x25c8   :  { %5157 = vmatpush.msrb.mxu0 %v9064_v6 }
0x25ca   :  { %5158 = vmatpush.msrb.mxu0 %v9063_v29 }
0x25cc   :  { %5159 = vmatpush.msrb.mxu0 %v9062_v35  ;;  %v9409_v35 = vld [vmem:[%s12422_s3 + $0x1a] ss:$0 sm:$0xff] }
0x25cd   :  { %9066 = vmatmul.msk.f32.vlgmr.msrb.gmra.mxu0 %vm61_vm0, %v11139_v46 }
0x25d3   :  { %v4856_v56 = vpop.f32.mrf.mxu2 }
0x25d4   :  { %9041 = vmatmul.msk.f32.gmra.mxu3 %vm156_vm1, %v4856_v56 }
0x25d5   :  { %9067 = vmatmul.msk.f32.gmra.mxu0 %vm61_vm0, %v11153_v47 }
0x25db   :  { %v4993_v42 = vpop.f32.mrf.mxu2 }
0x25dc   :  { %9048 = vmatmul.msk.f32.vlgmr.msra.gmra.mxu1 %vm156_vm1, %v4993_v42 }
0x2642   :  { %v5019_v63 = vpop.f32.mrf.mxu0 }
0x2643   :  { %9049 = vmatmul.msk.f32.gmra.mxu1 %vm156_vm1, %v5019_v63 }
0x264a   :  { %v5161_v30 = vpop.f32.mrf.mxu0 }
0x264b   :  { %v11385_v4 = vadd.f32 %v9405_v0, %v5161_v30  ;;  %9072 = vmatmul.msk.f32.vlgmr.msrb.gmra.mxu1 %vm61_vm0, %v10923_v13 }
0x264d   :  { %5354 = vrot.lane.b32.xlu1 %v11385_v4, %s9815_s18 }
0x2652   :  { %v5164_v19 = vpop.f32.mrf.mxu0 }
0x2653   :  { %9073 = vmatmul.msk.f32.gmra.mxu1 %vm61_vm0, %v10936_v48  ;;  %v11447_v10 = vadd.f32 %v9405_v0, %v5164_v19 }
0x2657   :  { %v4885_v38 = vpop.f32.mrf.mxu3 }
0x2658   :  { %v4889_v9 = vadd.f32 %v4885_v38, %v4725_v23 }
0x2659   :  { %v5045_v58 = vpop.f32.mrf.mxu1 }
0x265a   :  { %v5051_v17 = vadd.f32 %v5045_v58, %v4888_v14 }
0x265c   :  { %v5053_v16 = vadd.f32 %v5051_v17, %v10923_v13 }
0x265e   :  { %v11398_v24 = vadd.f32 %v9406_v22, %v5053_v16 }
0x2660   :  { %9054 = vmatmul.msk.f32.vlgmr.msrb.gmra.mxu2 %vm61_vm0, %v11398_v24 }
0x26bf   :  { %v5355_v52 = vpop.permute.xlu1 %5354 }
0x26c0   :  { %v5048_v8 = vpop.f32.mrf.mxu1 }
0x26c1   :  { %v5052_v18 = vadd.f32 %v5048_v8, %v4889_v9 }
0x26c3   :  { %v5054_v34 = vadd.f32 %v5052_v18, %v10936_v48 }
0x26c5   :  { %v11428_v36 = vadd.f32 %v9406_v22, %v5054_v34 }
0x26c7   :  { %9055 = vmatmul.msk.f32.gmra.mxu2 %vm61_vm0, %v11428_v36 }
0x26c8   :  { %v5191_v7 = vpop.f32.mrf.mxu1 }
0x26c9   :  { %v11435_v28 = vadd.f32 %v9407_v1, %v5191_v7 }
0x26cb   :  { %5356 = vrot.lane.b32.xlu0 %v11435_v28, %s9815_s18  ;;  %9084 = vmatpush.xpose.msk.msra.mxu3 %vm156_vm1, %v11435_v28 }
0x26cf   :  { %9078 = vmatmul.msk.f32.vlgmr.msra.gmra.mxu2 %vm61_vm0, %v10923_v13 }
0x26d0   :  { %v5194_v57 = vpop.f32.mrf.mxu1 }
0x26d1   :  { %v11443_v37 = vadd.f32 %v9407_v1, %v5194_v57 }
0x26d3   :  { %9086 = vmatpush.xpose.msk.msra.mxu0 %vm156_vm1, %v11443_v37 }
0x26d6   :  { %9087 = vmatmul.msk.f32.vlgmr.msra.gmra.mxu0 %vm156_vm1, %v11447_v10 }
0x26d7   :  { %9079 = vmatmul.msk.f32.gmra.mxu2 %vm61_vm0, %v10936_v48 }
0x26e3   :  { %v5089_v26 = vpop.f32.mrf.mxu2 }
0x26e4   :  { %v5090_v33 = vadd.f32 %v9408_v41, %v5089_v26  ;;  %v9080_v26 = vld [vmem:[%s12421_s2 + $0x360] sm:$0xff] }
0x26e6   :  { %v5095_v45 = vmax.f32 %v5090_v33, 0.0  ;;  %v9081_v33 = vld [vmem:[%s12421_s2 + $0x368] sm:$0xff] }
0x26e8   :  { %9060 = vmatmul.msk.f32.vlgmr.msrb.gmra.mxu3 %vm61_vm0, %v5095_v45 }
0x273d   :  { %v5357_v11 = vpop.permute.xlu0 %5356 }
0x273e   :  { %9090 = vmatpush.xpose.msk.msra.mxu1 %vm156_vm1, %v5357_v11 }
0x2741   :  { %9091 = vmatmul.msk.f32.vlgmr.msra.gmra.mxu1 %vm156_vm1, %v5355_v52 }
0x2742   :  { %5509 = vmatpush.msrb.mxu1 %v9081_v33 }
0x274a   :  { %v5092_v21 = vpop.f32.mrf.mxu2 }
0x274b   :  { %v5093_v6 = vadd.f32 %v9408_v41, %v5092_v21 }
0x274d   :  { %v5096_v29 = vmax.f32 %v5093_v6, 0.0 }
0x274f   :  { %9061 = vmatmul.msk.f32.gmra.mxu3 %vm61_vm0, %v5096_v29 }
0x2752   :  { %v5221_v56 = vpop.f32.mrf.mxu2 }
0x2753   :  { %v11463_v42 = vadd.f32 %v9409_v35, %v5221_v56  ;;  %v5281_v39 = vpop.f32.mrf.mxu0 }
0x2754   :  { %v5285_v54 = vmul.f32 0.17677669, %v5281_v39 }
0x2755   :  { %5326 = vmatpush.msrb.mxu3 %v11463_v42 }
0x2756   :  { %v5289_v44 = vsel %vm156_vm1, %v5285_v54, -inf }
0x2757   :  { %9085 = vmatmul.msk.f32.vlgmr.msra.gmra.mxu3 %vm156_vm1, %v11385_v4 }
0x275a   :  { %v5224_v51 = vpop.f32.mrf.mxu2 }
0x275b   :  { %v11468_v2 = vadd.f32 %v9409_v35, %v5224_v51 }
0x275d   :  { %5349 = vmatpush.msrb.mxu0 %v11468_v2 }
0x276b   :  { %v11472_v59 = vpop.f32.mrf.mxu3 }
0x27be   :  { %v5379_v49 = vpop.f32.mrf.mxu1 }
0x27bf   :  { %v5410_v43 = vmul.f32 0.17677669, %v5379_v49 }
0x27c1   :  { %v5412_v53 = vsel %vm156_vm1, %v5410_v43, -inf }
0x27c2   :  { %5413 = vmax.xlane.f32.xlu1 %v5412_v53 }
0x27d2   :  { %v11474_v60 = vpop.f32.mrf.mxu3 }
0x27da   :  { %v5255_v15 = vpop.f32.mrf.mxu3 }
0x27db   :  { %v5284_v63 = vmul.f32 0.17677669, %v5255_v15  ;;  %5435 = vrot.lane.b32.xlu1 %v11463_v42, %s9815_s18 }
0x27dd   :  { %v5286_v50 = vsel %vm156_vm1, %v5284_v63, -inf }
0x27de   :  { %5287 = vmax.xlane.f32.xlu0 %v5286_v50 }
0x27e3   :  { %5546 = vrot.lane.b32.xlu1 %v11385_v4, %s9816_s23 }
0x27f2   :  { %5384 = vrot.lane.b32.xlu0 %v11443_v37, %s9815_s18 }
0x2835   :  { %v5414_v0 = vpop.xlane.xlu1 %5413 }
0x2836   :  { %v5418_v30 = vsub.f32 %v5410_v43, %v5414_v0 }
0x2838   :  { %v5420_v31 = vmul.f32 1.442695, %v5418_v30 }
0x283a   :  { %9627 = vpow2.f32 %v5420_v31 }
0x2840   :  { %v9628_v5 = vpop.eup %9627 }
0x2841   :  { %v5424_v12 = vsel %vm156_vm1, %v9628_v5, 0.0 }
0x2842   :  { %5425 = vadd.xlane.f32.xlu0 %v5424_v12 }
0x284d   :  { %v5436_v14 = vpop.permute.xlu1 %5435 }
0x284e   :  { %5456 = vmatpush.msra.mxu3 %v5436_v14 }
0x2851   :  { %v5288_v58 = vpop.xlane.xlu0 %5287 }
0x2852   :  { %v5292_v17 = vsub.f32 %v5284_v63, %v5288_v58 }
0x2854   :  { %v5294_v22 = vmul.f32 1.442695, %v5292_v17 }
0x2855   :  { %v5547_v34 = vpop.permute.xlu1 %5546 }
0x2856   :  { %9629 = vpow2.f32 %v5294_v22  ;;  %5548 = vrot.lane.b32.xlu0 %v11435_v28, %s9816_s23 }
0x285c   :  { %v9630_v16 = vpop.eup %9629 }
0x285d   :  { %v5298_v25 = vsel %vm156_vm1, %v9630_v16, 0.0 }
0x285e   :  { %5299 = vadd.xlane.f32.xlu2 %v5298_v25 }
0x2864   :  { %v5385_v55 = vpop.permute.xlu0 %5384 }
0x2865   :  { %9092 = vmatpush.xpose.msk.msrb.mxu2 %vm156_vm1, %v5385_v55 }
0x2869   :  { %5538 = vmatpush.msra.mxu2 %v9080_v26 }
0x2876   :  { %5382 = vrot.lane.b32.xlu2 %v11447_v10, %s9815_s18 }
0x289f   :  { %5290 = vmax.xlane.f32.xlu2 %v5289_v44 }
0x28b5   :  { %v5426_v32 = vpop.xlane.xlu0 %5425 }
0x28c8   :  { %v5549_v9 = vpop.permute.xlu0 %5548 }
0x28d1   :  { %v5300_v27 = vpop.xlane.xlu2 %5299 }
0x28d2   :  { %9631 = vrcp.f32 %v5300_v27 }
0x28d3   :  { %9633 = vrcp.f32 %v5426_v32 }
0x28d8   :  { %v9632_v62 = vpop.eup %9631 }
0x28d9   :  { %v5306_v38 = vmul.f32 %v9632_v62, %v9630_v16  ;;  %v5383_v23 = vpop.permute.xlu2 %5382  ;;  %v9634_v8 = vpop.eup %9633  ;;  %v9082_v62 = vld [vmem:[%s12421_s2 + $0x370] sm:$0xff] }
0x28da   :  { %9093 = vmatmul.msk.f32.vlgmr.msrb.gmra.mxu2 %vm156_vm1, %v5383_v23  ;;  %v5432_v18 = vmul.f32 %v9634_v8, %v9628_v5  ;;  %5699 = vmatpush.msra.mxu1 %v9082_v62  ;;  %v9134_v62 = vld [vmem:[%s12421_s2 + $0x3a0] sm:$0xff] }
0x28db   :  { %9088 = vmatmul.msk.f32.vlgmr.msrb.gmra.mxu3 %vm156_vm1, %v5306_v38 }
0x28dc   :  { %9100 = vmatpush.xpose.msk.msrb.mxu3 %vm156_vm1, %v5549_v9 }
0x28e3   :  { %9094 = vmatmul.msk.f32.vlgmr.msra.gmra.mxu3 %vm156_vm1, %v5432_v18 }
0x28eb   :  { %9101 = vmatmul.msk.f32.vlgmr.msrb.gmra.mxu3 %vm156_vm1, %v5547_v34 }
0x2912   :  { %v5291_v1 = vpop.xlane.xlu2 %5290 }
0x2913   :  { %v5293_v7 = vsub.f32 %v5285_v54, %v5291_v1 }
0x2915   :  { %v5296_v57 = vmul.f32 1.442695, %v5293_v7 }
0x2917   :  { %9635 = vpow2.f32 %v5296_v57 }
0x291d   :  { %v9636_v19 = vpop.eup %9635 }
0x291e   :  { %v5301_v41 = vsel %vm156_vm1, %v9636_v19, 0.0 }
0x291f   :  { %5302 = vadd.xlane.f32.xlu0 %v5301_v41 }
0x295d   :  { %v5407_v45 = vpop.f32.mrf.mxu2 }
0x295e   :  { %v5411_v11 = vmul.f32 0.17677669, %v5407_v45  ;;  %v5328_v52 = vpop.f32.mrf.mxu3 }
0x295f   :  { %9098 = vmatmul.msk.f32.vlgmr.msra.gmra.mxu2 %vm156_vm1, %v5328_v52 }
0x2960   :  { %v5415_v21 = vsel %vm156_vm1, %v5411_v11, -inf }
0x2961   :  { %5416 = vmax.xlane.f32.xlu1 %v5415_v21 }
0x2966   :  { %v5458_v6 = vpop.f32.mrf.mxu3 }
0x2967   :  { %9096 = vmatmul.msk.f32.vlgmr.msrb.gmra.mxu1 %vm156_vm1, %v5458_v6 }
0x296e   :  { %v5571_v29 = vpop.f32.mrf.mxu3 }
0x296f   :  { %v5602_v35 = vmul.f32 0.17677669, %v5571_v29 }
0x2971   :  { %v5604_v56 = vsel %vm156_vm1, %v5602_v35, -inf }
0x2972   :  { %5605 = vmax.xlane.f32.xlu2 %v5604_v56 }
0x297a   :  { %5576 = vrot.lane.b32.xlu1 %v11443_v37, %s9816_s23 }
0x298a   :  { %5462 = vrot.lane.b32.xlu2 %v11468_v2, %s9815_s18 }
0x2992   :  { %5574 = vrot.lane.b32.xlu2 %v11447_v10, %s9816_s23  ;;  %v5303_v51 = vpop.xlane.xlu0 %5302 }
0x2993   :  { %9637 = vrcp.f32 %v5303_v51 }
0x2999   :  { %v9638_v49 = vpop.eup %9637 }
0x299a   :  { %v5307_v43 = vmul.f32 %v9638_v49, %v9636_v19  ;;  %5737 = vrot.lane.b32.xlu2 %v11447_v10, %s9817_s12 }
0x299c   :  { %9089 = vmatmul.msk.f32.vlgmr.msrb.gmra.mxu0 %vm156_vm1, %v5307_v43 }
0x29d4   :  { %v5417_v53 = vpop.xlane.xlu1 %5416 }
0x29d5   :  { %v5419_v15 = vsub.f32 %v5411_v11, %v5417_v53 }
0x29d7   :  { %v5422_v63 = vmul.f32 1.442695, %v5419_v15 }
0x29d9   :  { %9639 = vpow2.f32 %v5422_v63 }
0x29df   :  { %v9640_v50 = vpop.eup %9639 }
0x29e0   :  { %v5427_v0 = vsel %vm156_vm1, %v9640_v50, 0.0 }
0x29e1   :  { %5428 = vadd.xlane.f32.xlu0 %v5427_v0 }
0x29e2   :  { %v11540_v18 = vpop.f32.mrf.mxu2 }
0x29e5   :  { %v5606_v30 = vpop.xlane.xlu2 %5605 }
0x29e6   :  { %v5610_v31 = vsub.f32 %v5602_v35, %v5606_v30  ;;  %v9360_v30 = vpack.i.bf16 %v11468_v2, %v11463_v42 }
0x29e8   :  { %v5612_v5 = vmul.f32 1.442695, %v5610_v31 }
0x29ea   :  { %9641 = vpow2.f32 %v5612_v5 }
0x29ec   :  { %v5577_v14 = vpop.permute.xlu1 %5576 }
0x29ed   :  { %v5463_v12 = vpop.permute.xlu2 %5462 }
0x29ee   :  { %5483 = vmatpush.msra.mxu0 %v5463_v12 }
0x29f0   :  { %9102 = vmatpush.xpose.msk.msrb.mxu0 %vm156_vm1, %v5577_v14  ;;  %v9642_v10 = vpop.eup %9641 }
0x29f1   :  { %v5616_v58 = vsel %vm156_vm1, %v9642_v10, 0.0 }
0x29f2   :  { %5617 = vadd.xlane.f32.xlu1 %v5616_v58 }
0x29f5   :  { %5626 = vrot.lane.b32.xlu0 %v11463_v42, %s9816_s23  ;;  %v5575_v55 = vpop.permute.xlu2 %5574  ;;  %v9131_v42 = vld [vmem:[%s12421_s2 + $0x398] sm:$0xff] }
0x29fd   :  { %5711 = vrot.lane.b32.xlu0 %v11435_v28, %s9817_s12  ;;  %v5738_v27 = vpop.permute.xlu2 %5737 }
0x2a05   :  { %5739 = vrot.lane.b32.xlu0 %v11443_v37, %s9817_s12 }
0x2a0b   :  { %5709 = vrot.lane.b32.xlu1 %v11385_v4, %s9817_s12 }
0x2a19   :  { %v5351_v17 = vpop.f32.mrf.mxu0 }
0x2a1a   :  { %9099 = vmatmul.msk.f32.gmra.mxu2 %vm156_vm1, %v5351_v17 }
0x2a54   :  { %v5429_v22 = vpop.xlane.xlu0 %5428 }
0x2a55   :  { %9643 = vrcp.f32 %v5429_v22 }
0x2a5b   :  { %v9644_v16 = vpop.eup %9643 }
0x2a5c   :  { %v5433_v25 = vmul.f32 %v9644_v16, %v9640_v50 }
0x2a5e   :  { %9095 = vmatmul.msk.f32.vlgmr.msra.gmra.mxu0 %vm156_vm1, %v5433_v25 }
0x2a65   :  { %v5618_v39 = vpop.xlane.xlu1 %5617 }
0x2a66   :  { %9645 = vrcp.f32 %v5618_v39  ;;  %9103 = vmatmul.msk.f32.vlgmr.msrb.gmra.mxu0 %vm156_vm1, %v5575_v55 }
0x2a67   :  { %v5627_v28 = vpop.permute.xlu0 %5626 }
0x2a68   :  { %5647 = vmatpush.msra.mxu3 %v5627_v28  ;;  %v9129_v28 = vld [vmem:[%s12421_s2 + $0x388] sm:$0xff] }
0x2a6c   :  { %v9646_v37 = vpop.eup %9645 }
0x2a6d   :  { %v5624_v54 = vmul.f32 %v9646_v37, %v9642_v10  ;;  %v9128_v37 = vld [vmem:[%s12421_s2 + $0x380] sm:$0xff] }
0x2a6f   :  { %9104 = vmatmul.msk.f32.vlgmr.msra.gmra.mxu3 %vm156_vm1, %v5624_v54  ;;  %v5712_v4 = vpop.permute.xlu0 %5711 }
0x2a70   :  { %9108 = vmatpush.xpose.msk.msrb.mxu2 %vm156_vm1, %v5712_v4  ;;  %v9083_v4 = vld [vmem:[%s12421_s2 + $0x378] sm:$0xff] }
0x2a77   :  { %v5740_v44 = vpop.permute.xlu0 %5739 }
0x2a78   :  { %9110 = vmatpush.xpose.msk.msrb.mxu3 %vm156_vm1, %v5740_v44  ;;  %v9137_v44 = vld [vmem:[%s12421_s2 + $0x3b8] sm:$0xff] }
0x2a7b   :  { %9111 = vmatmul.msk.f32.vlgmr.msrb.gmra.mxu3 %vm156_vm1, %v5738_v27  ;;  %v9136_v27 = vld [vmem:[%s12421_s2 + $0x3b0] sm:$0xff] }
0x2a7c   :  { %5862 = vmatpush.msra.mxu3 %v9083_v4 }
0x2a7d   :  { %v5710_v32 = vpop.permute.xlu1 %5709 }
0x2a7e   :  { %9109 = vmatmul.msk.f32.vlgmr.msrb.gmra.mxu2 %vm156_vm1, %v5710_v32  ;;  %6005 = vmatpush.msrb.mxu3 %v9137_v44  ;;  %v9135_v32 = vld [vmem:[%s12421_s2 + $0x3a8] sm:$0xff] }
0x2a80   :  { %6006 = vmatpush.msrb.mxu3 %v9136_v27 }
0x2a82   :  { %6007 = vmatpush.msrb.mxu3 %v9135_v32 }
0x2a84   :  { %6008 = vmatpush.msrb.mxu3 %v9134_v62  ;;  %v9415_v62 = vld [vmem:[%s12422_s3 + $0x1e] ss:$0 sm:$0xff] }
0x2a9d   :  { %v11543_v1 = vpop.f32.mrf.mxu2 }
0x2adb   :  { %v5485_v38 = vpop.f32.mrf.mxu0 }
0x2adc   :  { %9097 = vmatmul.msk.f32.gmra.mxu1 %vm156_vm1, %v5485_v38 }
0x2ae3   :  { %v5599_v23 = vpop.f32.mrf.mxu0 }
0x2ae4   :  { %v5603_v9 = vmul.f32 0.17677669, %v5599_v23 }
0x2ae6   :  { %v5607_v8 = vsel %vm156_vm1, %v5603_v9, -inf }
0x2ae7   :  { %5608 = vmax.xlane.f32.xlu0 %v5607_v8 }
0x2af2   :  { %v5649_v34 = vpop.f32.mrf.mxu3 }
0x2af3   :  { %9106 = vmatmul.msk.f32.vlgmr.msra.gmra.mxu1 %vm156_vm1, %v5649_v34 }
0x2afe   :  { %v5762_v7 = vpop.f32.mrf.mxu3 }
0x2aff   :  { %v5766_v57 = vmul.f32 0.17677669, %v5762_v7  ;;  %v9119_v7 = vld [vmem:[%s12423_s4 + $0xd8] sm:$0xff] }
0x2b01   :  { %v5734_v19 = vpop.f32.mrf.mxu2  ;;  %v5770_v41 = vsel %vm156_vm1, %v5766_v57, -inf }
0x2b02   :  { %v5765_v26 = vmul.f32 0.17677669, %v5734_v19  ;;  %5771 = vmax.xlane.f32.xlu2 %v5770_v41  ;;  %v9117_v19 = vld [vmem:[%s12423_s4 + $0xc8] sm:$0xff]  ;;  %v9116_v41 = vld [vmem:[%s12423_s4 + $0xc0] sm:$0xff] }
0x2b04   :  { %v5767_v33 = vsel %vm156_vm1, %v5765_v26, -inf }
0x2b05   :  { %5768 = vmax.xlane.f32.xlu1 %v5767_v33  ;;  %v9125_v33 = vld [vmem:[%s12425_s6 + $0xd8] sm:$0xff] }
0x2b06   :  { %5939 = vmatpush.msrb.mxu1 %v9125_v33 }
0x2b1a   :  { %5652 = vrot.lane.b32.xlu2 %v11468_v2, %s9816_s23  ;;  %v9130_v2 = vld [vmem:[%s12421_s2 + $0x390] sm:$0xff] }
0x2b5a   :  { %v5609_v45 = vpop.xlane.xlu0 %5608 }
0x2b5b   :  { %v5611_v11 = vsub.f32 %v5603_v9, %v5609_v45  ;;  %v9411_v9 = vld [vmem:[%s12422_s3 + $0x1c] ss:$0 sm:$0xff]  ;;  %v9124_v45 = vld [vmem:[%s12425_s6 + $0xd0] sm:$0xff] }
0x2b5c   :  { %5940 = vmatpush.msrb.mxu1 %v9124_v45 }
0x2b5d   :  { %v5614_v52 = vmul.f32 1.442695, %v5611_v11  ;;  %v9123_v11 = vld [vmem:[%s12425_s6 + $0xc8] sm:$0xff] }
0x2b5e   :  { %5941 = vmatpush.msrb.mxu1 %v9123_v11 }
0x2b5f   :  { %9647 = vpow2.f32 %v5614_v52  ;;  %v9143_v52 = vld [vmem:[%s12421_s2 + $0x3d8] sm:$0xff] }
0x2b65   :  { %v9648_v21 = vpop.eup %9647 }
0x2b66   :  { %v5619_v6 = vsel %vm156_vm1, %v9648_v21, 0.0 }
0x2b67   :  { %5620 = vadd.xlane.f32.xlu0 %v5619_v6  ;;  %v9142_v6 = vld [vmem:[%s12421_s2 + $0x3d0] sm:$0xff] }
0x2b75   :  { %v5772_v29 = vpop.xlane.xlu2 %5771 }
0x2b76   :  { %v5774_v35 = vsub.f32 %v5766_v57, %v5772_v29  ;;  %v9118_v57 = vld [vmem:[%s12423_s4 + $0xd0] sm:$0xff]  ;;  %v9141_v29 = vld [vmem:[%s12421_s2 + $0x3c8] sm:$0xff] }
0x2b78   :  { %v5777_v56 = vmul.f32 1.442695, %v5774_v35  ;;  %v5769_v51 = vpop.xlane.xlu1 %5768 }
0x2b79   :  { %v5773_v49 = vsub.f32 %v5765_v26, %v5769_v51  ;;  %v5511_v26 = vpop.f32.mrf.mxu1 }
0x2b7a   :  { %9649 = vpow2.f32 %v5777_v56  ;;  %v9140_v56 = vld [vmem:[%s12421_s2 + $0x3c0] sm:$0xff] }
0x2b7b   :  { %v5775_v43 = vmul.f32 1.442695, %v5773_v49  ;;  %v5541_v49 = vadd.f32 %v11540_v18, %v5511_v26 }
0x2b7d   :  { %9651 = vpow2.f32 %v5775_v43  ;;  %v5653_v53 = vpop.permute.xlu2 %5652 }
0x2b7e   :  { %5673 = vmatpush.msra.mxu0 %v5653_v53 }
0x2b80   :  { %v9650_v15 = vpop.eup %9649 }
0x2b81   :  { %v5782_v63 = vsel %vm156_vm1, %v9650_v15, 0.0  ;;  %v5514_v35 = vpop.f32.mrf.mxu1 }
0x2b82   :  { %5783 = vadd.xlane.f32.xlu0 %v5782_v63  ;;  %v9412_v63 = vld [vmem:[%s12422_s3 + $0x1b] ss:$0 sm:$0xff] }
0x2b83   :  { %v9652_v50 = vpop.eup %9651 }
0x2b84   :  { %v5779_v0 = vsel %vm156_vm1, %v9652_v50, 0.0 }
0x2b85   :  { %5780 = vadd.xlane.f32.xlu1 %v5779_v0 }
0x2b89   :  { %v5701_v51 = vpop.f32.mrf.mxu1 }
0x2b8a   :  { %v5707_v43 = vadd.f32 %v5701_v51, %v5541_v49 }
0x2b9e   :  { %9361 = vrot.lane.b32.xlu1 %v9360_v30, %s9817_s12  ;;  %v5544_v30 = vadd.f32 %v11543_v1, %v5514_v35 }
0x2bda   :  { %v5621_v31 = vpop.xlane.xlu0 %5620 }
0x2bdb   :  { %9653 = vrcp.f32 %v5621_v31 }
0x2be1   :  { %v9654_v5 = vpop.eup %9653 }
0x2be2   :  { %v5625_v12 = vmul.f32 %v9654_v5, %v9648_v21  ;;  %v9122_v21 = vld [vmem:[%s12425_s6 + $0xc0] sm:$0xff] }
0x2be3   :  { %5942 = vmatpush.msrb.mxu1 %v9122_v21 }
0x2be4   :  { %9105 = vmatmul.msk.f32.vlgmr.msra.gmra.mxu0 %vm156_vm1, %v5625_v12 }
0x2bf5   :  { %v5784_v14 = vpop.xlane.xlu0 %5783 }
0x2bf6   :  { %9655 = vrcp.f32 %v5784_v14 }
0x2bf8   :  { %v5781_v10 = vpop.xlane.xlu1 %5780 }
0x2bf9   :  { %9657 = vrcp.f32 %v5781_v10 }
0x2bfc   :  { %v9656_v58 = vpop.eup %9655 }
0x2bfd   :  { %v5788_v55 = vmul.f32 %v9656_v58, %v9650_v15  ;;  %v9413_v58 = vld [vmem:[%s12422_s3 + $0x1d] ss:$0 sm:$0xff] }
0x2bff   :  { %v9658_v17 = vpop.eup %9657 }
0x2c00   :  { %v5787_v39 = vmul.f32 %v9658_v17, %v9652_v50 }
0x2c10   :  { %v9362_v22 = vpop.permute.xlu1 %9361 }
0x2c11   :  { %v9364_v16 = vunpack.i.h.bf16 %v9362_v22  ;;  %v9363_v25 = vunpack.i.l.bf16 %v9362_v22 }
0x2c13   :  { %5810 = vmatpush.msrb.mxu0 %v9363_v25  ;;  %5836 = vmatpush.msra.mxu2 %v9364_v16 }
0x2c14   :  { %9112 = vmatmul.msk.f32.vlgmr.msrb.gmra.mxu0 %vm156_vm1, %v5787_v39  ;;  %9113 = vmatmul.msk.f32.vlgmr.msra.gmra.mxu2 %vm156_vm1, %v5788_v55  ;;  %v9414_v39 = vld [vmem:[%s12424_s5 + $0x6] ss:$0 sm:$0xff] }
0x2c15   :  { %5975 = vmatpush.msrb.mxu2 %v9131_v42  ;;  %5903 = vmatpush.msra.mxu0 %v9119_v7 }
0x2c17   :  { %5976 = vmatpush.msrb.mxu2 %v9130_v2  ;;  %5904 = vmatpush.msra.mxu0 %v9118_v57 }
0x2c19   :  { %5977 = vmatpush.msrb.mxu2 %v9129_v28  ;;  %5905 = vmatpush.msra.mxu0 %v9117_v19 }
0x2c1b   :  { %5978 = vmatpush.msrb.mxu2 %v9128_v37  ;;  %5906 = vmatpush.msra.mxu0 %v9116_v41 }
0x2c1c   :  { %9132 = vmatmul.msk.f32.vlgmr.msrb.gmra.mxu2 %vm61_vm0, %v11139_v46 }
0x2c1d   :  { %6035 = vmatpush.msrb.mxu0 %v9143_v52 }
0x2c1f   :  { %6036 = vmatpush.msrb.mxu0 %v9142_v6 }
0x2c21   :  { %6037 = vmatpush.msrb.mxu0 %v9141_v29 }
0x2c23   :  { %6038 = vmatpush.msrb.mxu0 %v9140_v56 }
0x2c24   :  { %9133 = vmatmul.msk.f32.gmra.mxu2 %vm61_vm0, %v11153_v47 }
0x2c61   :  { %v5675_v54 = vpop.f32.mrf.mxu0 }
0x2c62   :  { %9107 = vmatmul.msk.f32.gmra.mxu1 %vm156_vm1, %v5675_v54 }
0x2c91   :  { %v5812_v38 = vpop.f32.mrf.mxu0 }
0x2c92   :  { %9114 = vmatmul.msk.f32.vlgmr.msra.gmra.mxu3 %vm156_vm1, %v5812_v38 }
0x2c97   :  { %v5838_v23 = vpop.f32.mrf.mxu2 }
0x2c9a   :  { %9115 = vmatmul.msk.f32.gmra.mxu3 %vm156_vm1, %v5838_v23 }
0x2c9f   :  { %v5980_v8 = vpop.f32.mrf.mxu2 }
0x2ca0   :  { %v11595_v34 = vadd.f32 %v9411_v9, %v5980_v8 }
0x2ca2   :  { %6173 = vrot.lane.b32.xlu2 %v11595_v34, %s9815_s18  ;;  %9138 = vmatmul.msk.f32.vlgmr.msrb.gmra.mxu3 %vm61_vm0, %v11139_v46 }
0x2ca7   :  { %v5983_v16 = vpop.f32.mrf.mxu2 }
0x2ca8   :  { %v11671_v55 = vadd.f32 %v9411_v9, %v5983_v16 }
0x2caa   :  { %9139 = vmatmul.msk.f32.gmra.mxu3 %vm61_vm0, %v11153_v47 }
0x2cdf   :  { %v5704_v0 = vpop.f32.mrf.mxu1 }
0x2ce0   :  { %v5708_v5 = vadd.f32 %v5704_v0, %v5544_v30 }
0x2cfc   :  { %v6174_v54 = vpop.permute.xlu2 %6173 }
0x2d15   :  { %v5864_v53 = vpop.f32.mrf.mxu3 }
0x2d16   :  { %v5870_v15 = vadd.f32 %v5864_v53, %v5707_v43 }
0x2d18   :  { %v5872_v50 = vadd.f32 %v5870_v15, %v11139_v46 }
0x2d1a   :  { %v11645_v31 = vadd.f32 %v9412_v63, %v5872_v50 }
0x2d1c   :  { %9120 = vmatmul.msk.f32.vlgmr.msra.gmra.mxu0 %vm61_vm0, %v11645_v31 }
0x2d1d   :  { %v5867_v12 = vpop.f32.mrf.mxu3 }
0x2d1e   :  { %v5871_v18 = vadd.f32 %v5867_v12, %v5708_v5 }
0x2d20   :  { %v5873_v14 = vadd.f32 %v5871_v18, %v11153_v47 }
0x2d22   :  { %v11650_v10 = vadd.f32 %v9412_v63, %v5873_v14 }
0x2d24   :  { %9121 = vmatmul.msk.f32.gmra.mxu0 %vm61_vm0, %v11650_v10 }
0x2d25   :  { %v6010_v1 = vpop.f32.mrf.mxu3 }
0x2d26   :  { %v11657_v17 = vadd.f32 %v9413_v58, %v6010_v1 }
0x2d28   :  { %6175 = vrot.lane.b32.xlu0 %v11657_v17, %s9815_s18  ;;  %9150 = vmatpush.xpose.msk.msra.mxu1 %vm156_vm1, %v11657_v17 }
0x2d2c   :  { %9144 = vmatmul.msk.f32.vlgmr.msrb.gmra.mxu0 %vm61_vm0, %v11139_v46 }
0x2d2d   :  { %v6013_v22 = vpop.f32.mrf.mxu3 }
0x2d2e   :  { %v11665_v25 = vadd.f32 %v9413_v58, %v6013_v22 }
0x2d30   :  { %9152 = vmatpush.xpose.msk.msra.mxu2 %vm156_vm1, %v11665_v25  ;;  %6203 = vrot.lane.b32.xlu0 %v11665_v25, %s9815_s18 }
0x2d33   :  { %9153 = vmatmul.msk.f32.vlgmr.msra.gmra.mxu2 %vm156_vm1, %v11671_v55 }
0x2d34   :  { %9145 = vmatmul.msk.f32.gmra.mxu0 %vm61_vm0, %v11153_v47 }
0x2d38   :  { %6201 = vrot.lane.b32.xlu0 %v11671_v55, %s9815_s18 }
0x2d99   :  { %v5908_v42 = vpop.f32.mrf.mxu0 }
0x2d9a   :  { %v5909_v2 = vadd.f32 %v9414_v39, %v5908_v42  ;;  %v6176_v28 = vpop.permute.xlu0 %6175 }
0x2d9b   :  { %9156 = vmatpush.xpose.msk.msra.mxu3 %vm156_vm1, %v6176_v28 }
0x2d9c   :  { %v5914_v37 = vmax.f32 %v5909_v2, 0.0 }
0x2d9e   :  { %9126 = vmatmul.msk.f32.vlgmr.msrb.gmra.mxu1 %vm61_vm0, %v5914_v37  ;;  %9157 = vmatmul.msk.f32.vlgmr.msra.gmra.mxu3 %vm156_vm1, %v6174_v54 }
0x2da1   :  { %v5911_v4 = vpop.f32.mrf.mxu0 }
0x2da2   :  { %v5912_v44 = vadd.f32 %v9414_v39, %v5911_v4  ;;  %v6204_v27 = vpop.permute.xlu0 %6203 }
0x2da3   :  { %9158 = vmatpush.xpose.msk.msra.mxu0 %vm156_vm1, %v6204_v27 }
0x2da4   :  { %v5915_v32 = vmax.f32 %v5912_v44, 0.0 }
0x2da6   :  { %9127 = vmatmul.msk.f32.gmra.mxu1 %vm61_vm0, %v5915_v32 }
0x2da9   :  { %v6040_v38 = vpop.f32.mrf.mxu0 }
0x2daa   :  { %v11690_v23 = vadd.f32 %v9415_v62, %v6040_v38  ;;  %v6202_v9 = vpop.permute.xlu0 %6201 }
0x2dab   :  { %9159 = vmatmul.msk.f32.vlgmr.msra.gmra.mxu0 %vm156_vm1, %v6202_v9 }
0x2dac   :  { %6145 = vmatpush.msrb.mxu1 %v11690_v23 }
0x2dae   :  { %9151 = vmatmul.msk.f32.vlgmr.msra.gmra.mxu1 %vm156_vm1, %v11595_v34 }
0x2db1   :  { %v6043_v8 = vpop.f32.mrf.mxu0 }
0x2db2   :  { %v11696_v7 = vadd.f32 %v9415_v62, %v6043_v8 }
0x2db4   :  { %6168 = vmatpush.msrb.mxu2 %v11696_v7 }
0x2db6   :  { %v6100_v21 = vpop.f32.mrf.mxu2 }
0x2db7   :  { %v6104_v6 = vmul.f32 0.17677669, %v6100_v21 }
0x2db9   :  { %v6108_v29 = vsel %vm156_vm1, %v6104_v6, -inf }
0x2e1b   :  { %v11699_v57 = vpop.f32.mrf.mxu1 }
0x2e21   :  { %v6198_v19 = vpop.f32.mrf.mxu3 }
0x2e22   :  { %v6229_v41 = vmul.f32 0.17677669, %v6198_v19 }
0x2e23   :  { %v11701_v26 = vpop.f32.mrf.mxu1 }
0x2e24   :  { %v6231_v33 = vsel %vm156_vm1, %v6229_v41, -inf }
0x2e25   :  { %6232 = vmax.xlane.f32.xlu1 %v6231_v33 }
0x2e28   :  { %v6226_v14 = vpop.f32.mrf.mxu0 }
0x2e29   :  { %v6230_v22 = vmul.f32 0.17677669, %v6226_v14 }
0x2e2b   :  { %v6074_v45 = vpop.f32.mrf.mxu1  ;;  %v6234_v16 = vsel %vm156_vm1, %v6230_v22, -inf }
0x2e2c   :  { %v6103_v11 = vmul.f32 0.17677669, %v6074_v45 }
0x2e2e   :  { %v6105_v52 = vsel %vm156_vm1, %v6103_v11, -inf }
0x2e2f   :  { %6106 = vmax.xlane.f32.xlu2 %v6105_v52 }
0x2e3e   :  { %6254 = vrot.lane.b32.xlu1 %v11690_v23, %s9815_s18 }
0x2e68   :  { %6109 = vmax.xlane.f32.xlu1 %v6108_v29 }
0x2e98   :  { %v6233_v35 = vpop.xlane.xlu1 %6232 }
0x2e99   :  { %v6237_v56 = vsub.f32 %v6229_v41, %v6233_v35 }
0x2e9b   :  { %v6239_v51 = vmul.f32 1.442695, %v6237_v56 }
0x2e9d   :  { %9659 = vpow2.f32 %v6239_v51 }
0x2ea2   :  { %v6107_v49 = vpop.xlane.xlu2 %6106 }
0x2ea3   :  { %v9660_v43 = vpop.eup %9659  ;;  %v6111_v53 = vsub.f32 %v6103_v11, %v6107_v49  ;;  %v9147_v11 = vld [vmem:[%s12421_s2 + $0x3e8] sm:$0xff] }
0x2ea4   :  { %v6243_v15 = vsel %vm156_vm1, %v9660_v43, 0.0  ;;  %6328 = vmatpush.msrb.mxu3 %v9147_v11 }
0x2ea5   :  { %v6113_v63 = vmul.f32 1.442695, %v6111_v53  ;;  %6244 = vadd.xlane.f32.xlu2 %v6243_v15 }
0x2ea7   :  { %9661 = vpow2.f32 %v6113_v63 }
0x2ead   :  { %v9662_v50 = vpop.eup %9661 }
0x2eae   :  { %v6117_v0 = vsel %vm156_vm1, %v9662_v50, 0.0 }
0x2eaf   :  { %6118 = vadd.xlane.f32.xlu0 %v6117_v0 }
0x2eb0   :  { %v6255_v30 = vpop.permute.xlu1 %6254 }
0x2eb1   :  { %6275 = vmatpush.msra.mxu1 %v6255_v30 }
0x2ebd   :  { %6367 = vrot.lane.b32.xlu2 %v11657_v17, %s9816_s23 }
0x2ec3   :  { %6365 = vrot.lane.b32.xlu0 %v11595_v34, %s9816_s23 }
0x2edb   :  { %v6110_v5 = vpop.xlane.xlu1 %6109 }
0x2edc   :  { %v6112_v12 = vsub.f32 %v6104_v6, %v6110_v5 }
0x2ede   :  { %v6115_v18 = vmul.f32 1.442695, %v6112_v12 }
0x2ee0   :  { %9663 = vpow2.f32 %v6115_v18 }
0x2ee6   :  { %v9664_v58 = vpop.eup %9663 }
0x2ee7   :  { %v6120_v1 = vsel %vm156_vm1, %v9664_v58, 0.0 }
0x2ee8   :  { %6121 = vadd.xlane.f32.xlu2 %v6120_v1 }
0x2eed   :  { %6235 = vmax.xlane.f32.xlu0 %v6234_v16 }
0x2f01   :  { %6393 = vrot.lane.b32.xlu0 %v11671_v55, %s9816_s23 }
0x2f09   :  { %6530 = vrot.lane.b32.xlu0 %v11657_v17, %s9817_s12 }
0x2f11   :  { %6445 = vrot.lane.b32.xlu0 %v11690_v23, %s9816_s23 }
0x2f18   :  { %v6245_v39 = vpop.xlane.xlu2 %6244 }
0x2f19   :  { %6556 = vrot.lane.b32.xlu0 %v11671_v55, %s9817_s12  ;;  %v9146_v55 = vld [vmem:[%s12421_s2 + $0x3e0] sm:$0xff] }
0x2f1a   :  { %6357 = vmatpush.msrb.mxu0 %v9146_v55 }
0x2f20   :  { %v6368_v37 = vpop.permute.xlu2 %6367 }
0x2f22   :  { %v6119_v42 = vpop.xlane.xlu0 %6118 }
0x2f23   :  { %9665 = vrcp.f32 %v6119_v42 }
0x2f24   :  { %9667 = vrcp.f32 %v6245_v39 }
0x2f29   :  { %v9666_v2 = vpop.eup %9665 }
0x2f2a   :  { %v6125_v28 = vmul.f32 %v9666_v2, %v9662_v50  ;;  %v9668_v54 = vpop.eup %9667 }
0x2f2b   :  { %v6251_v4 = vmul.f32 %v9668_v54, %v9660_v43 }
0x2f2c   :  { %9154 = vmatmul.msk.f32.vlgmr.msrb.gmra.mxu1 %vm156_vm1, %v6125_v28 }
0x2f2d   :  { %9166 = vmatpush.xpose.msk.msrb.mxu1 %vm156_vm1, %v6368_v37 }
0x2f34   :  { %9160 = vmatmul.msk.f32.vlgmr.msra.gmra.mxu1 %vm156_vm1, %v6251_v4  ;;  %v9148_v4 = vld [vmem:[%s12421_s2 + $0x3f0] sm:$0xff] }
0x2f35   :  { %v6366_v17 = vpop.permute.xlu0 %6365  ;;  %6518 = vmatpush.msra.mxu3 %v9148_v4  ;;  %v9183_v4 = vld [vmem:[%s12423_s4 + $0xe8] sm:$0xff] }
0x2f3c   :  { %9167 = vmatmul.msk.f32.vlgmr.msrb.gmra.mxu1 %vm156_vm1, %v6366_v17 }
0x2f5b   :  { %v6122_v44 = vpop.xlane.xlu2 %6121 }
0x2f5c   :  { %9669 = vrcp.f32 %v6122_v44 }
0x2f60   :  { %v6236_v27 = vpop.xlane.xlu0 %6235 }
0x2f61   :  { %v6238_v32 = vsub.f32 %v6230_v22, %v6236_v27 }
0x2f62   :  { %v9670_v62 = vpop.eup %9669 }
0x2f63   :  { %v6126_v38 = vmul.f32 %v9670_v62, %v9664_v58  ;;  %v6241_v9 = vmul.f32 1.442695, %v6238_v32 }
0x2f65   :  { %9671 = vpow2.f32 %v6241_v9  ;;  %9155 = vmatmul.msk.f32.vlgmr.msrb.gmra.mxu2 %vm156_vm1, %v6126_v38 }
0x2f6b   :  { %v9672_v8 = vpop.eup %9671 }
0x2f6c   :  { %v6246_v19 = vsel %vm156_vm1, %v9672_v8, 0.0 }
0x2f6d   :  { %6247 = vadd.xlane.f32.xlu2 %v6246_v19 }
0x2f73   :  { %v6394_v41 = vpop.permute.xlu0 %6393 }
0x2f7b   :  { %v6531_v33 = vpop.permute.xlu0 %6530 }
0x2f7c   :  { %9174 = vmatpush.xpose.msk.msra.mxu0 %vm156_vm1, %v6531_v33 }
0x2f83   :  { %v6446_v45 = vpop.permute.xlu0 %6445 }
0x2f84   :  { %6466 = vmatpush.msra.mxu1 %v6446_v45 }
0x2f85   :  { %6395 = vrot.lane.b32.xlu2 %v11665_v25, %s9816_s23 }
0x2f8b   :  { %v6557_v42 = vpop.permute.xlu0 %6556 }
0x2f8d   :  { %6528 = vrot.lane.b32.xlu2 %v11595_v34, %s9817_s12 }
0x2f95   :  { %6558 = vrot.lane.b32.xlu2 %v11665_v25, %s9817_s12 }
0x2fa9   :  { %v6147_v52 = vpop.f32.mrf.mxu1 }
0x2faa   :  { %9164 = vmatmul.msk.f32.vlgmr.msrb.gmra.mxu0 %vm156_vm1, %v6147_v52 }
0x2fb1   :  { %v6277_v21 = vpop.f32.mrf.mxu1 }
0x2fb2   :  { %9162 = vmatmul.msk.f32.vlgmr.msrb.gmra.mxu3 %vm156_vm1, %v6277_v21 }
0x2fb9   :  { %v6390_v6 = vpop.f32.mrf.mxu1 }
0x2fba   :  { %v6421_v29 = vmul.f32 0.17677669, %v6390_v6 }
0x2fbc   :  { %v6423_v35 = vsel %vm156_vm1, %v6421_v29, -inf }
0x2fbd   :  { %6424 = vmax.xlane.f32.xlu1 %v6423_v35 }
0x2fd6   :  { %6281 = vrot.lane.b32.xlu1 %v11696_v7, %s9815_s18 }
0x2fe0   :  { %v6248_v34 = vpop.xlane.xlu2 %6247 }
0x2fe8   :  { %v6170_v56 = vpop.f32.mrf.mxu2  ;;  %v6396_v51 = vpop.permute.xlu2 %6395 }
0x2fe9   :  { %9165 = vmatmul.msk.f32.gmra.mxu0 %vm156_vm1, %v6170_v56 }
0x2ff0   :  { %v6529_v25 = vpop.permute.xlu2 %6528 }
0x2ff1   :  { %9175 = vmatmul.msk.f32.vlgmr.msra.gmra.mxu0 %vm156_vm1, %v6529_v25 }
0x2ff8   :  { %v6559_v49 = vpop.permute.xlu2 %6558 }
0x2ff9   :  { %9176 = vmatpush.xpose.msk.msrb.mxu1 %vm156_vm1, %v6559_v49 }
0x3027   :  { %v11755_v12 = vpop.f32.mrf.mxu0 }
0x3030   :  { %v6425_v43 = vpop.xlane.xlu1 %6424 }
0x3031   :  { %v6429_v53 = vsub.f32 %v6421_v29, %v6425_v43 }
0x3033   :  { %v6431_v15 = vmul.f32 1.442695, %v6429_v53 }
0x3035   :  { %9673 = vpow2.f32 %v6431_v15 }
0x3036   :  { %9675 = vrcp.f32 %v6248_v34 }
0x303b   :  { %v9674_v63 = vpop.eup %9673 }
0x303c   :  { %v6435_v50 = vsel %vm156_vm1, %v9674_v63, 0.0  ;;  %v9676_v0 = vpop.eup %9675 }
0x303d   :  { %6436 = vadd.xlane.f32.xlu1 %v6435_v50  ;;  %v6252_v30 = vmul.f32 %v9676_v0, %v9672_v8 }
0x3048   :  { %v6282_v5 = vpop.permute.xlu1 %6281 }
0x3049   :  { %6302 = vmatpush.msra.mxu2 %v6282_v5 }
0x304a   :  { %9161 = vmatmul.msk.f32.vlgmr.msra.gmra.mxu2 %vm156_vm1, %v6252_v30 }
0x304b   :  { %9168 = vmatpush.xpose.msk.msrb.mxu2 %vm156_vm1, %v6396_v51 }
0x3052   :  { %9169 = vmatmul.msk.f32.vlgmr.msrb.gmra.mxu2 %vm156_vm1, %v6394_v41 }
0x3066   :  { %v11757_v18 = vpop.f32.mrf.mxu0 }
0x306e   :  { %v6553_v14 = vpop.f32.mrf.mxu0 }
0x306f   :  { %v6584_v58 = vmul.f32 0.17677669, %v6553_v14  ;;  %v9200_v14 = vld [vmem:[%s12427_s8 + $0xb0] sm:$0xff] }
0x3071   :  { %v6586_v1 = vsel %vm156_vm1, %v6584_v58, -inf }
0x3072   :  { %6587 = vmax.xlane.f32.xlu0 %v6586_v1  ;;  %v9410_v1 = vld [vmem:[%s12426_s7 + $0x5] ss:$0 sm:$0xff] }
0x30b0   :  { %v6437_v22 = vpop.xlane.xlu1 %6436 }
0x30b1   :  { %9677 = vrcp.f32 %v6437_v22  ;;  %v9199_v22 = vld [vmem:[%s12427_s8 + $0xa8] sm:$0xff] }
0x30b7   :  { %v9678_v16 = vpop.eup %9677 }
0x30b8   :  { %v6443_v39 = vmul.f32 %v9678_v16, %v9674_v63  ;;  %v9149_v63 = vld [vmem:[%s12421_s2 + $0x3f8] sm:$0xff]  ;;  %v9198_v16 = vld [vmem:[%s12427_s8 + $0xa0] sm:$0xff] }
0x30ba   :  { %9170 = vmatmul.msk.f32.vlgmr.msra.gmra.mxu1 %vm156_vm1, %v6443_v39 }
0x30bb   :  { %6681 = vmatpush.msra.mxu1 %v9149_v63  ;;  %v9206_v63 = vld [vmem:[%s12427_s8 + $0xe0] sm:$0xff] }
0x30c2   :  { %9177 = vmatmul.msk.f32.vlgmr.msrb.gmra.mxu1 %vm156_vm1, %v6557_v42 }
0x30cd   :  { %v6304_v2 = vpop.f32.mrf.mxu2 }
0x30ce   :  { %9163 = vmatmul.msk.f32.gmra.mxu3 %vm156_vm1, %v6304_v2  ;;  %v9197_v2 = vld [vmem:[%s12427_s8 + $0x98] sm:$0xff] }
0x30cf   :  { %6842 = vmatpush.msrb.mxu1 %v9197_v2 }
0x30d5   :  { %v6418_v28 = vpop.f32.mrf.mxu2 }
0x30d6   :  { %v6422_v37 = vmul.f32 0.17677669, %v6418_v28  ;;  %v9196_v28 = vld [vmem:[%s12427_s8 + $0x90] sm:$0xff] }
0x30d7   :  { %6843 = vmatpush.msrb.mxu1 %v9196_v28 }
0x30d8   :  { %v6426_v54 = vsel %vm156_vm1, %v6422_v37, -inf }
0x30d9   :  { %6427 = vmax.xlane.f32.xlu2 %v6426_v54  ;;  %v9184_v54 = vld [vmem:[%s12423_s4 + $0xf0] sm:$0xff] }
0x30e5   :  { %v6588_v32 = vpop.xlane.xlu0 %6587 }
0x30e6   :  { %v6592_v9 = vsub.f32 %v6584_v58, %v6588_v32  ;;  %v5131_v58 = vadd.f32 %v11472_v59, %v11398_v24  ;;  %v5132_v24 = vadd.f32 %v11474_v60, %v11428_v36  ;;  %v9194_v36 = vld [vmem:[%s12427_s8 + $0x80] sm:$0xff]  ;;  %v9185_v60 = vld [vmem:[%s12423_s4 + $0xf8] sm:$0xff]  ;;  %v9219_v32 = vld [vmem:[%s12421_s2 + $0x408] sm:$0xff] }
0x30e8   :  { %v6594_v41 = vmul.f32 1.442695, %v6592_v9  ;;  %v5135_v39 = vadd.f32 %v9410_v1, %v5131_v58  ;;  %v5136_v59 = vadd.f32 %v9410_v1, %v5132_v24  ;;  %v6330_v9 = vpop.f32.mrf.mxu3  ;;  %v9190_v1 = vld [vmem:[%s12425_s6 + $0xf0] sm:$0xff]  ;;  %v9188_v24 = vld [vmem:[%s12425_s6 + $0xe0] sm:$0xff] }
0x30f1   :  { %6471 = vrot.lane.b32.xlu2 %v11696_v7, %s9816_s23 }
0x3137   :  { %v6468_v17 = vpop.f32.mrf.mxu1 }
0x3138   :  { %9172 = vmatmul.msk.f32.vlgmr.msra.gmra.mxu3 %vm156_vm1, %v6468_v17  ;;  %v9182_v17 = vld [vmem:[%s12423_s4 + $0xe0] sm:$0xff] }
0x313f   :  { %v6581_v19 = vpop.f32.mrf.mxu1 }
0x3140   :  { %v6585_v33 = vmul.f32 0.17677669, %v6581_v19 }
0x3142   :  { %v6589_v45 = vsel %vm156_vm1, %v6585_v33, -inf }
0x314c   :  { %v6428_v55 = vpop.xlane.xlu2 %6427 }
0x314d   :  { %v6430_v44 = vsub.f32 %v6422_v37, %v6428_v55  ;;  %v9195_v37 = vld [vmem:[%s12427_s8 + $0x88] sm:$0xff]  ;;  %v9221_v55 = vld [vmem:[%s12421_s2 + $0x418] sm:$0xff] }
0x314e   :  { %6844 = vmatpush.msrb.mxu1 %v9195_v37 }
0x314f   :  { %v6433_v27 = vmul.f32 1.442695, %v6430_v44  ;;  %v9220_v44 = vld [vmem:[%s12421_s2 + $0x410] sm:$0xff] }
0x3150   :  { %6845 = vmatpush.msrb.mxu1 %v9194_v36 }
0x3151   :  { %9679 = vpow2.f32 %v6433_v27  ;;  %v11840_v27 = vld [vmem:[%s12429_s10] sm:$0x1] }
0x3152   :  { %9681 = vpow2.f32 %v6594_v41  ;;  %v4306_v41 = vadd.f32 %v11254_v40, %v11198_v61  ;;  %v9417_v40 = vld [vmem:[%s12422_s3 + $0x1f] ss:$0 sm:$0xff] }
0x3154   :  { %v6472_v62 = vpop.permute.xlu2 %6471 }
0x3155   :  { %6492 = vmatpush.msra.mxu2 %v6472_v62  ;;  %v6935_v62 = vrot.slane %v11840_v27, 7 }
0x3157   :  { %v9680_v38 = vpop.eup %9679 }
0x3158   :  { %v6438_v8 = vsel %vm156_vm1, %v9680_v38, 0.0  ;;  %v9682_v11 = vpop.eup %9681 }
0x3159   :  { %6439 = vadd.xlane.f32.xlu1 %v6438_v8  ;;  %v6598_v52 = vsel %vm156_vm1, %v9682_v11, 0.0  ;;  %v6937_v8 = vsel %vm6936_vm2, %v6935_v62, %v11840_v27 }
0x3161   :  { %6590 = vmax.xlane.f32.xlu1 %v6589_v45  ;;  %v6333_v45 = vpop.f32.mrf.mxu3 }
0x3162   :  { %v6363_v58 = vadd.f32 %v11757_v18, %v6333_v45  ;;  %v9420_v18 = vld [vmem:[%s12422_s3 + $0x20] ss:$0 sm:$0xff] }
0x3169   :  { %6599 = vadd.xlane.f32.xlu1 %v6598_v52  ;;  %v4307_v52 = vadd.f32 %v11256_v3, %v11204_v20  ;;  %v9209_v20 = vld [vmem:[%s12427_s8 + $0xf8] sm:$0xff] }
0x316a   :  { %v9226_v3 = vld [vmem:[%s12421_s2 + $0x438] sm:$0xff] }
0x3182   :  { %6608 = vrot.lane.b32.xlu1 %v11690_v23, %s9817_s12 }
0x31cc   :  { %v6440_v21 = vpop.xlane.xlu1 %6439 }
0x31cd   :  { %9683 = vrcp.f32 %v6440_v21  ;;  %v6520_v21 = vpop.f32.mrf.mxu3 }
0x31d3   :  { %v9684_v6 = vpop.eup %9683 }
0x31d4   :  { %v6444_v29 = vmul.f32 %v9684_v6, %v9680_v38  ;;  %v6591_v35 = vpop.xlane.xlu1 %6590  ;;  %v9218_v38 = vld [vmem:[%s12421_s2 + $0x400] sm:$0xff]  ;;  %v6360_v6 = vadd.f32 %v11755_v12, %v6330_v9  ;;  %v9232_v12 = vld [vmem:[%s12421_s2 + $0x458] sm:$0xff] }
0x31d5   :  { %v6593_v34 = vsub.f32 %v6585_v33, %v6591_v35  ;;  %v9404_v33 = vld [vmem:[%s12426_s7 + $0x4] ss:$0 sm:$0xff] }
0x31d6   :  { %9171 = vmatmul.msk.f32.vlgmr.msra.gmra.mxu2 %vm156_vm1, %v6444_v29  ;;  %v4311_v29 = vadd.f32 %v9404_v33, %v4307_v52  ;;  %v6526_v35 = vadd.f32 %v6520_v21, %v6360_v6  ;;  %v9203_v52 = vld [vmem:[%s12427_s8 + $0xc8] sm:$0xff]  ;;  %v9202_v21 = vld [vmem:[%s12427_s8 + $0xc0] sm:$0xff] }
0x31d7   :  { %v6596_v56 = vmul.f32 1.442695, %v6593_v34  ;;  %v9421_v6 = vld [vmem:[%s12422_s3 + $0x21] ss:$0 sm:$0xff] }
0x31d9   :  { %9685 = vpow2.f32 %v6596_v56 }
0x31dc   :  { %v6600_v49 = vpop.xlane.xlu1 %6599 }
0x31dd   :  { %9687 = vrcp.f32 %v6600_v49  ;;  %v9225_v49 = vld [vmem:[%s12421_s2 + $0x430] sm:$0xff] }
0x31df   :  { %v9686_v51 = vpop.eup %9685 }
0x31e0   :  { %v6601_v25 = vsel %vm156_vm1, %v9686_v51, 0.0 }
0x31e1   :  { %6602 = vadd.xlane.f32.xlu0 %v6601_v25  ;;  %v9208_v25 = vld [vmem:[%s12427_s8 + $0xf0] sm:$0xff] }
0x31e3   :  { %v9688_v43 = vpop.eup %9687 }
0x31e4   :  { %v6606_v53 = vmul.f32 %v9688_v43, %v9682_v11  ;;  %v4310_v11 = vadd.f32 %v9404_v33, %v4306_v41  ;;  %v9231_v43 = vld [vmem:[%s12421_s2 + $0x450] sm:$0xff] }
0x31f4   :  { %v6609_v15 = vpop.permute.xlu1 %6608 }
0x31f5   :  { %6634 = vrot.lane.b32.xlu0 %v11696_v7, %s9817_s12  ;;  %6629 = vmatpush.msrb.mxu2 %v6609_v15  ;;  %v9201_v7 = vld [vmem:[%s12427_s8 + $0xb8] sm:$0xff]  ;;  %v9224_v15 = vld [vmem:[%s12421_s2 + $0x428] sm:$0xff] }
0x31f6   :  { %9178 = vmatmul.msk.f32.vlgmr.msrb.gmra.mxu2 %vm156_vm1, %v6606_v53  ;;  %v9207_v53 = vld [vmem:[%s12427_s8 + $0xe8] sm:$0xff] }
0x31f7   :  { %6722 = vmatpush.msra.mxu2 %v9185_v60 }
0x31f9   :  { %6723 = vmatpush.msra.mxu2 %v9184_v54  ;;  %v9418_v54 = vld [vmem:[%s12428_s9 + $0x2] ss:$0 sm:$0xff] }
0x31fb   :  { %6724 = vmatpush.msra.mxu2 %v9183_v4 }
0x31fd   :  { %6725 = vmatpush.msra.mxu2 %v9182_v17 }
0x31ff   :  { %6876 = vmatpush.msrb.mxu2 %v9209_v20 }
0x3201   :  { %6877 = vmatpush.msrb.mxu2 %v9208_v25 }
0x3203   :  { %6878 = vmatpush.msrb.mxu2 %v9207_v53 }
0x3205   :  { %6879 = vmatpush.msrb.mxu2 %v9206_v63 }
0x3254   :  { %v6603_v50 = vpop.xlane.xlu0 %6602 }
0x3255   :  { %9689 = vrcp.f32 %v6603_v50  ;;  %v9223_v50 = vld [vmem:[%s12421_s2 + $0x420] sm:$0xff] }
0x3259   :  { %v6494_v23 = vpop.f32.mrf.mxu2 }
0x325a   :  { %9173 = vmatmul.msk.f32.gmra.mxu3 %vm156_vm1, %v6494_v23  ;;  %v9230_v23 = vld [vmem:[%s12421_s2 + $0x448] sm:$0xff] }
0x325b   :  { %v9690_v0 = vpop.eup %9689 }
0x325c   :  { %v6607_v30 = vmul.f32 %v9690_v0, %v9686_v51  ;;  %v9229_v0 = vld [vmem:[%s12421_s2 + $0x440] sm:$0xff] }
0x3267   :  { %v6635_v5 = vpop.permute.xlu0 %6634 }
0x3268   :  { %6655 = vmatpush.msrb.mxu0 %v6635_v5  ;;  %v9191_v5 = vld [vmem:[%s12425_s6 + $0xf8] sm:$0xff] }
0x3269   :  { %9179 = vmatmul.msk.f32.vlgmr.msrb.gmra.mxu0 %vm156_vm1, %v6607_v30  ;;  %6758 = vmatpush.msrb.mxu3 %v9191_v5 }
0x326a   :  { %6813 = vmatpush.msra.mxu0 %v9201_v7 }
0x326b   :  { %6759 = vmatpush.msrb.mxu3 %v9190_v1 }
0x326c   :  { %6814 = vmatpush.msra.mxu0 %v9200_v14 }
0x326e   :  { %6815 = vmatpush.msra.mxu0 %v9199_v22 }
0x3270   :  { %6816 = vmatpush.msra.mxu0 %v9198_v16  ;;  %v9189_v16 = vld [vmem:[%s12425_s6 + $0xe8] sm:$0xff] }
0x3271   :  { %9210 = vmatmul.msk.f32.vlgmr.msra.gmra.mxu0 %vm61_vm0, %v5135_v39  ;;  %6760 = vmatpush.msrb.mxu3 %v9189_v16 }
0x3272   :  { %6952 = vmatpush.msrb.mxu0 %v9221_v55  ;;  %v5950_v55 = vadd.f32 %v11699_v57, %v11645_v31  ;;  %v5951_v57 = vadd.f32 %v11701_v26, %v11650_v10  ;;  %v9204_v26 = vld [vmem:[%s12427_s8 + $0xd0] sm:$0xff] }
0x3273   :  { %6761 = vmatpush.msrb.mxu3 %v9188_v24  ;;  %v9424_v24 = vld [vmem:[%s12428_s9 + $0x3] ss:$0 sm:$0xff] }
0x3274   :  { %6953 = vmatpush.msrb.mxu0 %v9220_v44  ;;  %v9416_v44 = vld [vmem:[%s12426_s7 + $0x6] ss:$0 sm:$0xff] }
0x3275   :  { %v5955_v41 = vadd.f32 %v9416_v44, %v5951_v57 }
0x3276   :  { %6954 = vmatpush.msrb.mxu0 %v9219_v32 }
0x3278   :  { %6955 = vmatpush.msrb.mxu0 %v9218_v38  ;;  %v5954_v38 = vadd.f32 %v9416_v44, %v5950_v55 }
0x3279   :  { %v6631_v42 = vpop.f32.mrf.mxu2  ;;  %9211 = vmatmul.msk.f32.gmra.mxu0 %vm61_vm0, %v5136_v59 }
0x327a   :  { %9180 = vmatmul.msk.f32.vlgmr.msra.gmra.mxu1 %vm156_vm1, %v6631_v42  ;;  %6985 = vmatpush.msra.mxu0 %v9226_v3 }
0x327b   :  { %7015 = vmatpush.msra.mxu1 %v9232_v12 }
0x327c   :  { %6986 = vmatpush.msra.mxu0 %v9225_v49  ;;  %v9423_v49 = vld [vmem:[%s12426_s7 + $0x7] ss:$0 sm:$0xff] }
0x327d   :  { %7016 = vmatpush.msra.mxu1 %v9231_v43 }
0x327e   :  { %6987 = vmatpush.msra.mxu0 %v9224_v15 }
0x327f   :  { %7017 = vmatpush.msra.mxu1 %v9230_v23 }
0x3280   :  { %6988 = vmatpush.msra.mxu0 %v9223_v50 }
0x3281   :  { %9222 = vmatmul.msk.f32.vlgmr.msrb.gmra.mxu0 %vm61_vm0, %v6937_v8  ;;  %7018 = vmatpush.msra.mxu1 %v9229_v0 }
0x32dd   :  { %v6523_v14 = vpop.f32.mrf.mxu3 }
0x32de   :  { %v6527_v22 = vadd.f32 %v6523_v14, %v6363_v58 }
0x32e6   :  { %v6657_v19 = vpop.f32.mrf.mxu0 }
0x32e7   :  { %9181 = vmatmul.msk.f32.gmra.mxu1 %vm156_vm1, %v6657_v19 }
0x32ee   :  { %v6818_v30 = vpop.f32.mrf.mxu0 }
0x32ef   :  { %9212 = vmatmul.msk.f32.vlgmr.msrb.gmra.mxu1 %vm61_vm0, %v4310_v11 }
0x32f6   :  { %v6821_v7 = vpop.f32.mrf.mxu0 }
0x32f7   :  { %v6683_v34 = vpop.f32.mrf.mxu1  ;;  %9213 = vmatmul.msk.f32.gmra.mxu1 %vm61_vm0, %v4311_v29 }
0x32f8   :  { %v6689_v61 = vadd.f32 %v6683_v34, %v6526_v35  ;;  %v9422_v35 = vld [vmem:[%s12422_s3 + $0x22] ss:$0 sm:$0xff] }
0x32fa   :  { %v6691_v56 = vadd.f32 %v6689_v61, %v11139_v46 }
0x32fc   :  { %v11867_v51 = vadd.f32 %v9417_v40, %v6691_v56 }
0x32fe   :  { %9186 = vmatmul.msk.f32.vlgmr.msra.gmra.mxu2 %vm61_vm0, %v11867_v51  ;;  %v6957_v42 = vpop.f32.mrf.mxu0 }
0x32ff   :  { %v11924_v28 = vadd.f32 %v9420_v18, %v6957_v42 }
0x3301   :  { %v7032_v36 = vrot.slane %v11924_v28, 1  ;;  %v11930_v60 = vperm.slane %v11924_v28, 0 }
0x3303   :  { %v11939_v17 = vperm.slane %v7032_v36, 0  ;;  %7155 = vrot.lane.b32.xlu1 %v11930_v60, %s9815_s18 }
0x3305   :  { %7184 = vrot.lane.b32.xlu0 %v11939_v17, %s9815_s18 }
0x3364   :  { %v6686_v39 = vpop.f32.mrf.mxu1 }
0x3365   :  { %v6690_v59 = vadd.f32 %v6686_v39, %v6527_v22 }
0x3367   :  { %v6692_v2 = vadd.f32 %v6690_v59, %v11153_v47 }
0x3369   :  { %v11926_v37 = vadd.f32 %v9417_v40, %v6692_v2 }
0x336b   :  { %9187 = vmatmul.msk.f32.gmra.mxu2 %vm61_vm0, %v11926_v37 }
0x336c   :  { %v6847_v4 = vpop.f32.mrf.mxu1 }
0x336d   :  { %v6848_v32 = vadd.f32 %v6847_v4, %v6818_v30 }
0x336f   :  { %v6854_v62 = vadd.f32 %v9418_v54, %v6848_v32 }
0x3371   :  { %v6856_v9 = vadd.f32 %v6854_v62, %v10923_v13  ;;  %v9419_v13 = vld [vmem:[%s12424_s5 + $0x7] ss:$0 sm:$0xff] }
0x3373   :  { %6921 = vst.msk [vmem:[#allocation3] sm:$0xff] %vm61_vm0, %v6856_v9  ;;  %9214 = vmatmul.msk.f32.vlgmr.msrb.gmra.mxu2 %vm61_vm0, %v5954_v38  ;;  %9227 = vmatmul.msk.f32.vlgmr.msra.gmra.mxu0 %vm61_vm0, %v6856_v9 }
0x3374   :  { %9233 = vmatmul.msk.f32.vlgmr.msra.gmra.mxu1 %vm61_vm0, %v6856_v9  ;;  %v6850_v31 = vpop.f32.mrf.mxu1 }
0x3375   :  { %v6851_v8 = vadd.f32 %v6850_v31, %v6821_v7  ;;  %v7156_v0 = vpop.permute.xlu1 %7155 }
0x3377   :  { %v6855_v19 = vadd.f32 %v9418_v54, %v6851_v8  ;;  %v7185_v5 = vpop.permute.xlu0 %7184 }
0x3379   :  { %v6857_v33 = vadd.f32 %v6855_v19, %v10936_v48  ;;  %v9205_v48 = vld [vmem:[%s12427_s8 + $0xd8] sm:$0xff] }
0x337a   :  { %6905 = vmatpush.msra.mxu3 %v9205_v48 }
0x337b   :  { %6922 = vst.msk [vmem:[#allocation3 + $0x8] sm:$0xff] %vm61_vm0, %v6857_v33  ;;  %9215 = vmatmul.msk.f32.gmra.mxu2 %vm61_vm0, %v5955_v41  ;;  %9228 = vmatmul.msk.f32.gmra.mxu0 %vm61_vm0, %v6857_v33 }
0x337c   :  { %9234 = vmatmul.msk.f32.gmra.mxu1 %vm61_vm0, %v6857_v33  ;;  %6906 = vmatpush.msra.mxu3 %v9204_v26 }
0x337e   :  { %6907 = vmatpush.msra.mxu3 %v9203_v52 }
0x3380   :  { %6908 = vmatpush.msra.mxu3 %v9202_v21 }
0x3381   :  { %v6727_v45 = vpop.f32.mrf.mxu2 }
0x3382   :  { %v6728_v11 = vadd.f32 %v9419_v13, %v6727_v45 }
0x3384   :  { %v6733_v10 = vmax.f32 %v6728_v11, 0.0 }
0x3386   :  { %9192 = vmatmul.msk.f32.vlgmr.msrb.gmra.mxu3 %vm61_vm0, %v6733_v10 }
0x33ee   :  { %v6730_v29 = vpop.f32.mrf.mxu2 }
0x33ef   :  { %v6731_v34 = vadd.f32 %v9419_v13, %v6730_v29 }
0x33f0   :  { %v6990_v61 = vpop.f32.mrf.mxu0 }
0x33f1   :  { %v6734_v40 = vmax.f32 %v6731_v34, 0.0  ;;  %v11984_v56 = vadd.f32 %v9421_v6, %v6990_v61  ;;  %v7020_v20 = vpop.f32.mrf.mxu1 }
0x33f2   :  { %v11986_v3 = vadd.f32 %v9422_v35, %v7020_v20 }
0x33f3   :  { %9193 = vmatmul.msk.f32.gmra.mxu3 %vm61_vm0, %v6734_v40  ;;  %7157 = vrot.lane.b32.xlu2 %v11984_v56, %s9815_s18 }
0x33f4   :  { %9239 = vmatpush.xpose.msk.msra.mxu2 %vm156_vm1, %v11984_v56 }
0x33f7   :  { %9240 = vmatmul.msk.f32.vlgmr.msra.gmra.mxu2 %vm156_vm1, %v11924_v28 }
0x33f8   :  { %7126 = vmatpush.msrb.mxu2 %v11986_v3  ;;  %v6993_v12 = vpop.f32.mrf.mxu0 }
0x33f9   :  { %v11996_v25 = vadd.f32 %v9421_v6, %v6993_v12  ;;  %v7023_v53 = vpop.f32.mrf.mxu1 }
0x33fa   :  { %v12006_v63 = vadd.f32 %v9422_v35, %v7023_v53 }
0x33fb   :  { %7186 = vrot.lane.b32.xlu2 %v11996_v25, %s9815_s18  ;;  %9241 = vmatpush.xpose.msk.msrb.mxu3 %vm156_vm1, %v11996_v25 }
0x3409   :  { %v6763_v43 = vpop.f32.mrf.mxu3 }
0x340a   :  { %v6769_v15 = vadd.f32 %v6763_v43, %v11867_v51  ;;  %v6881_v51 = vpop.f32.mrf.mxu2 }
0x340c   :  { %v6773_v23 = vadd.f32 %v9423_v49, %v6769_v15 }
0x340e   :  { %9216 = vmatmul.msk.f32.vlgmr.msra.gmra.mxu3 %vm61_vm0, %v6773_v23 }
0x340f   :  { %7149 = vmatpush.msra.mxu3 %v12006_v63 }
0x3412   :  { %v6884_v7 = vpop.f32.mrf.mxu2 }
0x344d   :  { %v7158_v50 = vpop.permute.xlu2 %7157 }
0x344e   :  { %9245 = vmatpush.xpose.msk.msrb.mxu0 %vm156_vm1, %v7158_v50 }
0x3451   :  { %9246 = vmatmul.msk.f32.vlgmr.msrb.gmra.mxu0 %vm156_vm1, %v7156_v0 }
0x3455   :  { %v7187_v30 = vpop.permute.xlu2 %7186 }
0x3456   :  { %9247 = vmatpush.xpose.msk.msrb.mxu1 %vm156_vm1, %v7187_v30 }
0x3459   :  { %9248 = vmatmul.msk.f32.vlgmr.msrb.gmra.mxu1 %vm156_vm1, %v7185_v5  ;;  %v9236_v5 = vld [vmem:[%s12421_s2 + $0x468] sm:$0xff] }
0x345a   :  { %7311 = vmatpush.msra.mxu0 %v9236_v5  ;;  %v9237_v5 = vld [vmem:[%s12421_s2 + $0x470] sm:$0xff] }
0x3476   :  { %v6766_v14 = vpop.f32.mrf.mxu3 }
0x3477   :  { %v6770_v58 = vadd.f32 %v6766_v14, %v11926_v37 }
0x3479   :  { %v6774_v1 = vadd.f32 %v9423_v49, %v6770_v58 }
0x347a   :  { %v7055_v22 = vpop.f32.mrf.mxu2 }
0x347b   :  { %v7083_v16 = vmul.f32 0.17677669, %v7055_v22  ;;  %9217 = vmatmul.msk.f32.gmra.mxu3 %vm61_vm0, %v6774_v1 }
0x347d   :  { %v7086_v39 = vsel %vm7085_vm3, %v7083_v16, -inf }
0x347e   :  { %7087 = vmax.xlane.f32.xlu1 %v7086_v39 }
0x3483   :  { %9242 = vmatmul.msk.f32.vlgmr.msrb.gmra.mxu3 %vm156_vm1, %v7032_v36 }
0x3491   :  { %v6910_v59 = vpop.f32.mrf.mxu3 }
0x3492   :  { %v6911_v18 = vadd.f32 %v6910_v59, %v6881_v51 }
0x3494   :  { %v6917_v42 = vadd.f32 %v9424_v24, %v6911_v18 }
0x3496   :  { %v12024_v2 = vadd.f32 %v6917_v42, %v11139_v46 }
0x3498   :  { %6923 = vst.msk [vmem:[#allocation5] sm:$0xff] %vm61_vm0, %v12024_v2 }
0x34ce   :  { %v7180_v37 = vpop.f32.mrf.mxu0 }
0x34cf   :  { %v7212_v54 = vmul.f32 0.17677669, %v7180_v37 }
0x34d1   :  { %v7214_v4 = vsel %vm7085_vm3, %v7212_v54, -inf }
0x34d2   :  { %7215 = vmax.xlane.f32.xlu2 %v7214_v4 }
0x34d6   :  { %v7209_v31 = vpop.f32.mrf.mxu1 }
0x34d7   :  { %v7213_v57 = vmul.f32 0.17677669, %v7209_v31 }
0x34d9   :  { %v7217_v8 = vsel %vm7085_vm3, %v7213_v57, -inf }
0x34ea   :  { %7237 = vrot.lane.b32.xlu2 %v11986_v3, %s9815_s18 }
0x34f1   :  { %v7088_v28 = vpop.xlane.xlu1 %7087 }
0x34f2   :  { %v7092_v36 = vsub.f32 %v7083_v16, %v7088_v28 }
0x34f4   :  { %v7094_v55 = vmul.f32 1.442695, %v7092_v36 }
0x34f6   :  { %9691 = vpow2.f32 %v7094_v55 }
0x34fc   :  { %v9692_v44 = vpop.eup %9691 }
0x34fd   :  { %v7098_v32 = vsel %vm7085_vm3, %v9692_v44, 0.0 }
0x34fe   :  { %7099 = vadd.xlane.f32.xlu0 %v7098_v32  ;;  %v6913_v46 = vpop.f32.mrf.mxu3 }
0x34ff   :  { %v6914_v62 = vadd.f32 %v6913_v46, %v6884_v7 }
0x3501   :  { %v6918_v38 = vadd.f32 %v9424_v24, %v6914_v62 }
0x3503   :  { %v12033_v9 = vadd.f32 %v6918_v38, %v11153_v47 }
0x3505   :  { %6924 = vst.msk [vmem:[#allocation5 + $0x8] sm:$0xff] %vm61_vm0, %v12033_v9 }
0x3506   :  { %v7080_v19 = vpop.f32.mrf.mxu3 }
0x3507   :  { %v7084_v41 = vmul.f32 0.17677669, %v7080_v19 }
0x3509   :  { %v7089_v33 = vsel %vm7085_vm3, %v7084_v41, -inf }
0x3512   :  { %7344 = vrot.lane.b32.xlu0 %v11984_v56, %s9816_s23 }
0x3513   :  { %7218 = vmax.xlane.f32.xlu2 %v7217_v8 }
0x353c   :  { %7090 = vmax.xlane.f32.xlu0 %v7089_v33 }
0x3545   :  { %v7216_v13 = vpop.xlane.xlu2 %7215 }
0x3546   :  { %v7220_v45 = vsub.f32 %v7212_v54, %v7216_v13  ;;  %v9235_v54 = vld [vmem:[%s12421_s2 + $0x460] sm:$0xff] }
0x3547   :  { %7337 = vmatpush.msra.mxu1 %v9235_v54  ;;  %v9238_v54 = vld [vmem:[%s12421_s2 + $0x478] sm:$0xff] }
0x3548   :  { %v7222_v47 = vmul.f32 1.442695, %v7220_v45 }
0x354a   :  { %9693 = vpow2.f32 %v7222_v47 }
0x354d   :  { %v7238_v11 = vpop.permute.xlu2 %7237 }
0x354e   :  { %7258 = vmatpush.msra.mxu2 %v7238_v11 }
0x3550   :  { %v9694_v10 = vpop.eup %9693  ;;  %7264 = vrot.lane.b32.xlu0 %v12006_v63, %s9815_s18 }
0x3551   :  { %v7226_v48 = vsel %vm7085_vm3, %v9694_v10, 0.0 }
0x3552   :  { %7227 = vadd.xlane.f32.xlu1 %v7226_v48 }
0x356b   :  { %7342 = vrot.lane.b32.xlu1 %v11930_v60, %s9816_s23 }
0x3571   :  { %v7100_v26 = vpop.xlane.xlu0 %7099 }
0x3572   :  { %9695 = vrcp.f32 %v7100_v26 }
0x3578   :  { %v9696_v52 = vpop.eup %9695 }
0x3579   :  { %v7106_v21 = vmul.f32 %v9696_v52, %v9692_v44 }
0x357b   :  { %9243 = vmatmul.msk.f32.vlgmr.msrb.gmra.mxu2 %vm156_vm1, %v7106_v21 }
0x3584   :  { %v7345_v6 = vpop.permute.xlu0 %7344 }
0x3585   :  { %9253 = vmatpush.xpose.msk.msrb.mxu2 %vm156_vm1, %v7345_v6 }
0x3586   :  { %v7219_v29 = vpop.xlane.xlu2 %7218 }
0x3587   :  { %v7221_v35 = vsub.f32 %v7213_v57, %v7219_v29 }
0x3589   :  { %v7224_v34 = vmul.f32 1.442695, %v7221_v35 }
0x358b   :  { %9697 = vpow2.f32 %v7224_v34 }
0x3591   :  { %v9698_v61 = vpop.eup %9697 }
0x3592   :  { %v7229_v40 = vsel %vm7085_vm3, %v9698_v61, 0.0 }
0x3593   :  { %7230 = vadd.xlane.f32.xlu2 %v7229_v40 }
0x35ab   :  { %7372 = vrot.lane.b32.xlu2 %v11996_v25, %s9816_s23 }
0x35af   :  { %v7091_v20 = vpop.xlane.xlu0 %7090 }
0x35b0   :  { %v7093_v12 = vsub.f32 %v7084_v41, %v7091_v20 }
0x35b2   :  { %v7096_v49 = vmul.f32 1.442695, %v7093_v12 }
0x35b4   :  { %9699 = vpow2.f32 %v7096_v49 }
0x35ba   :  { %v9700_v43 = vpop.eup %9699 }
0x35bb   :  { %v7101_v53 = vsel %vm7085_vm3, %v9700_v43, 0.0 }
0x35bc   :  { %7102 = vadd.xlane.f32.xlu1 %v7101_v53 }
0x35c2   :  { %v7265_v15 = vpop.permute.xlu0 %7264 }
0x35c3   :  { %7285 = vmatpush.msrb.mxu3 %v7265_v15 }
0x35c5   :  { %v7228_v23 = vpop.xlane.xlu1 %7227 }
0x35c6   :  { %9701 = vrcp.f32 %v7228_v23 }
0x35cc   :  { %v9702_v50 = vpop.eup %9701 }
0x35cd   :  { %v7234_v0 = vmul.f32 %v9702_v50, %v9694_v10 }
0x35cf   :  { %9249 = vmatmul.msk.f32.vlgmr.msra.gmra.mxu2 %vm156_vm1, %v7234_v0 }
0x35d0   :  { %7495 = vmatpush.msra.mxu2 %v9237_v5 }
0x35d5   :  { %7370 = vrot.lane.b32.xlu1 %v11939_v17, %s9816_s23 }
0x35dd   :  { %7422 = vrot.lane.b32.xlu1 %v11986_v3, %s9816_s23  ;;  %v7343_v30 = vpop.permute.xlu1 %7342 }
0x35de   :  { %9254 = vmatmul.msk.f32.vlgmr.msrb.gmra.mxu2 %vm156_vm1, %v7343_v30 }
0x35e5   :  { %7531 = vrot.lane.b32.xlu1 %v11996_v25, %s9817_s12 }
0x35ed   :  { %7503 = vrot.lane.b32.xlu1 %v11984_v56, %s9817_s12 }
0x35f5   :  { %7529 = vrot.lane.b32.xlu1 %v11939_v17, %s9817_s12 }
0x35fe   :  { %v7128_v16 = vpop.f32.mrf.mxu2 }
0x3606   :  { %v7231_v51 = vpop.xlane.xlu2 %7230 }
0x360e   :  { %v7373_v1 = vpop.permute.xlu2 %7372 }
0x362f   :  { %v7103_v7 = vpop.xlane.xlu1 %7102 }
0x3630   :  { %9703 = vrcp.f32 %v7103_v7 }
0x3631   :  { %9705 = vrcp.f32 %v7231_v51 }
0x3636   :  { %v9704_v14 = vpop.eup %9703 }
0x3637   :  { %v7107_v58 = vmul.f32 %v9704_v14, %v9700_v43  ;;  %v9706_v56 = vpop.eup %9705 }
0x3638   :  { %v7235_v25 = vmul.f32 %v9706_v56, %v9698_v61 }
0x3639   :  { %9244 = vmatmul.msk.f32.vlgmr.msra.gmra.mxu3 %vm156_vm1, %v7107_v58 }
0x363a   :  { %9255 = vmatpush.xpose.msk.msra.mxu3 %vm156_vm1, %v7373_v1 }
0x3641   :  { %9250 = vmatmul.msk.f32.vlgmr.msrb.gmra.mxu3 %vm156_vm1, %v7235_v25 }
0x3647   :  { %v7371_v17 = vpop.permute.xlu1 %7370 }
0x3649   :  { %9256 = vmatmul.msk.f32.vlgmr.msra.gmra.mxu3 %vm156_vm1, %v7371_v17 }
0x364f   :  { %v7423_v22 = vpop.permute.xlu1 %7422 }
0x3650   :  { %7443 = vmatpush.msrb.mxu0 %v7423_v22 }
0x3652   :  { %v7260_v24 = vpop.f32.mrf.mxu2 }
0x3657   :  { %v7532_v39 = vpop.permute.xlu1 %7531 }
0x365f   :  { %v7504_v59 = vpop.permute.xlu1 %7503 }
0x3660   :  { %9260 = vmatpush.xpose.msk.msrb.mxu3 %vm156_vm1, %v7504_v59 }
0x3661   :  { %v7367_v18 = vpop.f32.mrf.mxu2 }
0x3662   :  { %v7398_v42 = vmul.f32 0.17677669, %v7367_v18 }
0x3664   :  { %v7400_v37 = vsel %vm7085_vm3, %v7398_v42, -inf  ;;  %7654 = vmatpush.msra.mxu3 %v9238_v54 }
0x3665   :  { %7401 = vmax.xlane.f32.xlu0 %v7400_v37 }
0x3667   :  { %v7530_v33 = vpop.permute.xlu1 %7529 }
0x3679   :  { %7501 = vrot.lane.b32.xlu0 %v11930_v60, %s9817_s12 }
0x36bc   :  { %v7151_v4 = vpop.f32.mrf.mxu3 }
0x36bd   :  { %v7318_v28 = vrot.slane %v7151_v4, 7  ;;  %v9284_v4 = vld [vmem:[%s12421_s2 + $0x4b0] sm:$0xff] }
0x36bf   :  { %v7319_v36 = vsel %vm6936_vm2, %v7318_v28, %v7128_v16  ;;  %v9283_v28 = vld [vmem:[%s12421_s2 + $0x4a8] sm:$0xff] }
0x36c0   :  { %9252 = vmatmul.msk.f32.vlgmr.msra.gmra.mxu1 %vm156_vm1, %v7319_v36  ;;  %v9282_v36 = vld [vmem:[%s12421_s2 + $0x4a0] sm:$0xff] }
0x36c4   :  { %v7287_v55 = vpop.f32.mrf.mxu3 }
0x36c5   :  { %v7292_v44 = vrot.slane %v7287_v55, 7  ;;  %v9280_v55 = vld [vmem:[%s12421_s2 + $0x498] sm:$0xff] }
0x36c7   :  { %v7293_v32 = vsel %vm6936_vm2, %v7292_v44, %v7260_v24  ;;  %v9279_v44 = vld [vmem:[%s12421_s2 + $0x490] sm:$0xff] }
0x36c8   :  { %9251 = vmatmul.msk.f32.vlgmr.msra.gmra.mxu0 %vm156_vm1, %v7293_v32  ;;  %v12135_v32 = vld [vmem:[%s12429_s10 + $0x1] sm:$0x1] }
0x36c9   :  { %9262 = vmatpush.xpose.msk.msra.mxu0 %vm156_vm1, %v7532_v39 }
0x36cc   :  { %v7395_v60 = vpop.f32.mrf.mxu3 }
0x36cd   :  { %v7399_v46 = vmul.f32 0.17677669, %v7395_v60 }
0x36cf   :  { %v7403_v62 = vsel %vm7085_vm3, %v7399_v46, -inf }
0x36d0   :  { %7404 = vmax.xlane.f32.xlu1 %v7403_v62  ;;  %v7750_v62 = vrot.slane %v12135_v32, 7 }
0x36d8   :  { %v7402_v38 = vpop.xlane.xlu0 %7401 }
0x36d9   :  { %v7406_v31 = vsub.f32 %v7398_v42, %v7402_v38  ;;  %v9277_v38 = vld [vmem:[%s12421_s2 + $0x480] sm:$0xff] }
0x36db   :  { %v7408_v57 = vmul.f32 1.442695, %v7406_v31  ;;  %v7751_v31 = vsel %vm6936_vm2, %v7750_v62, %v12135_v32 }
0x36dd   :  { %9707 = vpow2.f32 %v7408_v57 }
0x36e3   :  { %v9708_v8 = vpop.eup %9707 }
0x36e4   :  { %v7412_v19 = vsel %vm7085_vm3, %v9708_v8, 0.0 }
0x36e5   :  { %7413 = vadd.xlane.f32.xlu2 %v7412_v19 }
0x36eb   :  { %v7502_v41 = vpop.permute.xlu0 %7501 }
0x36ec   :  { %9261 = vmatmul.msk.f32.vlgmr.msrb.gmra.mxu3 %vm156_vm1, %v7502_v41 }
0x373d   :  { %v12102_v51 = vpop.f32.mrf.mxu1 }
0x3743   :  { %v7405_v13 = vpop.xlane.xlu1 %7404 }
0x3744   :  { %v7407_v45 = vsub.f32 %v7399_v46, %v7405_v13  ;;  %v9278_v46 = vld [vmem:[%s12421_s2 + $0x488] sm:$0xff]  ;;  %v9270_v13 = vld [vmem:[%s12423_s4 + $0x118] sm:$0xff] }
0x3745   :  { %v12093_v20 = vpop.f32.mrf.mxu0 }
0x3746   :  { %v7410_v47 = vmul.f32 1.442695, %v7407_v45  ;;  %v9274_v45 = vld [vmem:[%s12425_s6 + $0x110] sm:$0xff] }
0x3748   :  { %9709 = vpow2.f32 %v7410_v47  ;;  %v9269_v47 = vld [vmem:[%s12423_s4 + $0x110] sm:$0xff] }
0x374e   :  { %v9710_v11 = vpop.eup %9709 }
0x374f   :  { %v7415_v10 = vsel %vm7085_vm3, %v9710_v11, 0.0 }
0x3750   :  { %7416 = vadd.xlane.f32.xlu2 %v7415_v10  ;;  %v9268_v10 = vld [vmem:[%s12423_s4 + $0x108] sm:$0xff] }
0x3758   :  { %v7414_v48 = vpop.xlane.xlu2 %7413 }
0x3759   :  { %9711 = vrcp.f32 %v7414_v48  ;;  %v9272_v48 = vld [vmem:[%s12425_s6 + $0x100] sm:$0xff] }
0x375f   :  { %v9712_v26 = vpop.eup %9711 }
0x3760   :  { %v7420_v52 = vmul.f32 %v9712_v26, %v9708_v8  ;;  %v9267_v26 = vld [vmem:[%s12423_s4 + $0x100] sm:$0xff] }
0x3762   :  { %9257 = vmatmul.msk.f32.vlgmr.msrb.gmra.mxu0 %vm156_vm1, %v7420_v52  ;;  %v9291_v52 = vld [vmem:[%s12421_s2 + $0x4d8] sm:$0xff] }
0x3763   :  { %7695 = vmatpush.msrb.mxu0 %v9270_v13 }
0x3765   :  { %7696 = vmatpush.msrb.mxu0 %v9269_v47 }
0x3767   :  { %7697 = vmatpush.msrb.mxu0 %v9268_v10 }
0x3768   :  { %7448 = vrot.lane.b32.xlu2 %v12006_v63, %s9816_s23 }
0x3769   :  { %7698 = vmatpush.msrb.mxu0 %v9267_v26 }
0x376a   :  { %9263 = vmatmul.msk.f32.vlgmr.msra.gmra.mxu0 %vm156_vm1, %v7530_v33  ;;  %v9275_v33 = vld [vmem:[%s12425_s6 + $0x118] sm:$0xff] }
0x376b   :  { %7829 = vmatpush.msra.mxu0 %v9291_v52 }
0x376f   :  { %v7526_v21 = vpop.f32.mrf.mxu3 }
0x3770   :  { %v7557_v6 = vmul.f32 0.17677669, %v7526_v21  ;;  %v9290_v21 = vld [vmem:[%s12421_s2 + $0x4d0] sm:$0xff] }
0x3771   :  { %7830 = vmatpush.msra.mxu0 %v9290_v21 }
0x3772   :  { %v7559_v29 = vsel %vm7085_vm3, %v7557_v6, -inf }
0x3791   :  { %7560 = vmax.xlane.f32.xlu2 %v7559_v29  ;;  %v9288_v29 = vld [vmem:[%s12421_s2 + $0x4c0] sm:$0xff] }
0x37c3   :  { %v7417_v35 = vpop.xlane.xlu2 %7416 }
0x37c4   :  { %9713 = vrcp.f32 %v7417_v35  ;;  %v9427_v35 = vld [vmem:[%s12422_s3 + $0x24] ss:$0 sm:$0xff] }
0x37ca   :  { %v9714_v34 = vpop.eup %9713 }
0x37cb   :  { %v7421_v61 = vmul.f32 %v9714_v34, %v9710_v11  ;;  %v7449_v40 = vpop.permute.xlu2 %7448  ;;  %v9273_v11 = vld [vmem:[%s12425_s6 + $0x108] sm:$0xff] }
0x37cc   :  { %7469 = vmatpush.msrb.mxu1 %v7449_v40 }
0x37cd   :  { %9258 = vmatmul.msk.f32.vlgmr.msrb.gmra.mxu1 %vm156_vm1, %v7421_v61  ;;  %v7340_v61 = vadd.f32 %v12102_v51, %v12093_v20  ;;  %v9426_v20 = vld [vmem:[%s12422_s3 + $0x25] ss:$0 sm:$0xff] }
0x37df   :  { %v7445_v12 = vpop.f32.mrf.mxu0 }
0x37e7   :  { %v7554_v49 = vpop.f32.mrf.mxu0 }
0x37e8   :  { %v7558_v43 = vmul.f32 0.17677669, %v7554_v49 }
0x37ea   :  { %v7562_v53 = vsel %vm7085_vm3, %v7558_v43, -inf }
0x37eb   :  { %7563 = vmax.xlane.f32.xlu0 %v7562_v53 }
0x37ff   :  { %7607 = vrot.lane.b32.xlu0 %v12006_v63, %s9817_s12 }
0x3804   :  { %v7561_v15 = vpop.xlane.xlu2 %7560 }
0x3805   :  { %v7565_v23 = vsub.f32 %v7557_v6, %v7561_v15  ;;  %v9289_v6 = vld [vmem:[%s12421_s2 + $0x4c8] sm:$0xff] }
0x3806   :  { %7831 = vmatpush.msra.mxu0 %v9289_v6 }
0x3807   :  { %v7567_v50 = vmul.f32 1.442695, %v7565_v23 }
0x3808   :  { %7832 = vmatpush.msra.mxu0 %v9288_v29 }
0x3809   :  { %9715 = vpow2.f32 %v7567_v50 }
0x380f   :  { %v9716_v0 = vpop.eup %9715 }
0x3810   :  { %v7571_v30 = vsel %vm7085_vm3, %v9716_v0, 0.0 }
0x3811   :  { %7572 = vadd.xlane.f32.xlu1 %v7571_v30 }
0x384a   :  { %v7471_v7 = vpop.f32.mrf.mxu1 }
0x384b   :  { %v7476_v14 = vrot.slane %v7471_v7, 7 }
0x384d   :  { %v7477_v58 = vsel %vm6936_vm2, %v7476_v14, %v7445_v12 }
0x384e   :  { %9259 = vmatmul.msk.f32.vlgmr.msra.gmra.mxu2 %vm156_vm1, %v7477_v58 }
0x385e   :  { %v7564_v63 = vpop.xlane.xlu0 %7563 }
0x385f   :  { %v7566_v1 = vsub.f32 %v7558_v43, %v7564_v63 }
0x3861   :  { %v7569_v56 = vmul.f32 1.442695, %v7566_v1 }
0x3863   :  { %9717 = vpow2.f32 %v7569_v56 }
0x3869   :  { %v9718_v25 = vpop.eup %9717 }
0x386a   :  { %v7574_v17 = vsel %vm7085_vm3, %v9718_v25, 0.0 }
0x386b   :  { %7575 = vadd.xlane.f32.xlu1 %v7574_v17 }
0x3871   :  { %v7608_v22 = vpop.permute.xlu0 %7607 }
0x3872   :  { %7628 = vmatpush.msrb.mxu2 %v7608_v22 }
0x3874   :  { %7766 = vmatpush.msra.mxu2 %v9280_v55 }
0x3876   :  { %7767 = vmatpush.msra.mxu2 %v9279_v44 }
0x3878   :  { %7768 = vmatpush.msra.mxu2 %v9278_v46 }
0x387a   :  { %7769 = vmatpush.msra.mxu2 %v9277_v38 }
0x3884   :  { %7581 = vrot.lane.b32.xlu1 %v11986_v3, %s9817_s12  ;;  %v7573_v16 = vpop.xlane.xlu1 %7572  ;;  %v9285_v3 = vld [vmem:[%s12421_s2 + $0x4b8] sm:$0xff] }
0x3885   :  { %7799 = vmatpush.msrb.mxu3 %v9285_v3 }
0x3887   :  { %7800 = vmatpush.msrb.mxu3 %v9284_v4 }
0x3889   :  { %7801 = vmatpush.msrb.mxu3 %v9283_v28 }
0x388b   :  { %7802 = vmatpush.msrb.mxu3 %v9282_v36 }
0x38d1   :  { %v7497_v60 = vpop.f32.mrf.mxu2 }
0x38d2   :  { %v7500_v12 = vadd.f32 %v7497_v60, %v7340_v61 }
0x38de   :  { %v7576_v39 = vpop.xlane.xlu1 %7575 }
0x38df   :  { %9719 = vrcp.f32 %v7576_v39 }
0x38e0   :  { %9721 = vrcp.f32 %v7573_v16 }
0x38e5   :  { %v9720_v24 = vpop.eup %9719 }
0x38e6   :  { %v7580_v59 = vmul.f32 %v9720_v24, %v9718_v25  ;;  %v9722_v18 = vpop.eup %9721 }
0x38e7   :  { %v7579_v42 = vmul.f32 %v9722_v18, %v9716_v0  ;;  %v9425_v0 = vld [vmem:[%s12422_s3 + $0x23] ss:$0 sm:$0xff] }
0x38e8   :  { %9265 = vmatmul.msk.f32.vlgmr.msrb.gmra.mxu2 %vm156_vm1, %v7580_v59 }
0x38f0   :  { %9281 = vmatmul.msk.f32.vlgmr.msra.gmra.mxu2 %vm61_vm0, %v7751_v31 }
0x38f6   :  { %v7582_v37 = vpop.permute.xlu1 %7581 }
0x38f7   :  { %7602 = vmatpush.msra.mxu1 %v7582_v37 }
0x38f8   :  { %9264 = vmatmul.msk.f32.vlgmr.msra.gmra.mxu1 %vm156_vm1, %v7579_v42 }
0x38f9   :  { %7724 = vmatpush.msrb.mxu1 %v9275_v33 }
0x38fb   :  { %7725 = vmatpush.msrb.mxu1 %v9274_v45 }
0x38fd   :  { %7726 = vmatpush.msrb.mxu1 %v9273_v11 }
0x38ff   :  { %7727 = vmatpush.msrb.mxu1 %v9272_v48 }
0x396b   :  { %v7630_v57 = vpop.f32.mrf.mxu2 }
0x396c   :  { %v7635_v8 = vrot.slane %v7630_v57, 7 }
0x3973   :  { %v7771_v34 = vpop.f32.mrf.mxu2 }
0x3974   :  { %v7772_v40 = vadd.f32 %v9427_v35, %v7771_v34 }
0x3975   :  { %v7604_v19 = vpop.f32.mrf.mxu1 }
0x3976   :  { %v7636_v41 = vsel %vm6936_vm2, %v7635_v8, %v7604_v19  ;;  %v12194_v43 = vperm.slane %v7772_v40, 0  ;;  %v7846_v58 = vrot.slane %v7772_v40, 1 }
0x3977   :  { %9266 = vmatmul.msk.f32.vlgmr.msra.gmra.mxu3 %vm156_vm1, %v7636_v41 }
0x3978   :  { %7968 = vrot.lane.b32.xlu2 %v12194_v43, %s9815_s18  ;;  %v12220_v1 = vperm.slane %v7846_v58, 0 }
0x397f   :  { %9286 = vmatmul.msk.f32.vlgmr.msrb.gmra.mxu3 %vm61_vm0, %v12024_v2 }
0x3987   :  { %9287 = vmatmul.msk.f32.gmra.mxu3 %vm61_vm0, %v12033_v9 }
0x39d2   :  { %v7969_v17 = vpop.permute.xlu2 %7968 }
0x39fa   :  { %v7656_v49 = vpop.f32.mrf.mxu3 }
0x39fb   :  { %v7659_v53 = vadd.f32 %v7656_v49, %v7500_v12 }
0x39fd   :  { %v7661_v15 = vrot.slane %v7659_v53, 1  ;;  %v7664_v23 = vadd.f32 %v7659_v53, %v11840_v27 }
0x39ff   :  { %v7665_v50 = vadd.f32 %v7661_v15, %v11840_v27  ;;  %v12208_v51 = vadd.f32 %v9425_v0, %v7664_v23 }
0x3a01   :  { %v12206_v30 = vadd.f32 %v9425_v0, %v7665_v50  ;;  %v9295_v0 = vld [vmem:[%s12421_s2 + $0x4e8] sm:$0xff] }
0x3a02   :  { %v7804_v5 = vpop.f32.mrf.mxu3 }
0x3a03   :  { %v7679_v7 = vrot.slane %v12206_v30, 7  ;;  %v12211_v14 = vadd.f32 %v9426_v20, %v7804_v5 }
0x3a05   :  { %7970 = vrot.lane.b32.xlu0 %v12211_v14, %s9815_s18  ;;  %9298 = vmatpush.xpose.msk.msra.mxu1 %vm156_vm1, %v12211_v14  ;;  %v7680_v27 = vsel %vm6936_vm2, %v7679_v7, %v12208_v51 }
0x3a06   :  { %9271 = vmatmul.msk.f32.vlgmr.msrb.gmra.mxu0 %vm61_vm0, %v7680_v27 }
0x3a0a   :  { %v7807_v63 = vpop.f32.mrf.mxu3 }
0x3a0b   :  { %v12222_v56 = vadd.f32 %v9426_v20, %v7807_v63 }
0x3a0d   :  { %7999 = vrot.lane.b32.xlu1 %v12222_v56, %s9815_s18  ;;  %9300 = vmatpush.xpose.msk.msrb.mxu2 %vm156_vm1, %v12222_v56 }
0x3a0e   :  { %9292 = vmatmul.msk.f32.vlgmr.msra.gmra.mxu0 %vm61_vm0, %v12024_v2  ;;  %7997 = vrot.lane.b32.xlu0 %v12220_v1, %s9815_s18  ;;  %v9428_v2 = vld [vmem:[%s12424_s5 + $0x8] ss:$0 sm:$0xff] }
0x3a10   :  { %9301 = vmatmul.msk.f32.vlgmr.msrb.gmra.mxu2 %vm156_vm1, %v7846_v58 }
0x3a16   :  { %9293 = vmatmul.msk.f32.gmra.mxu0 %vm61_vm0, %v12033_v9  ;;  %v9429_v9 = vld [vmem:[%s12422_s3 + $0x26] ss:$0 sm:$0xff] }
0x3a77   :  { %v7971_v25 = vpop.permute.xlu0 %7970 }
0x3a78   :  { %9304 = vmatpush.xpose.msk.msra.mxu3 %vm156_vm1, %v7971_v25 }
0x3a7b   :  { %9305 = vmatmul.msk.f32.vlgmr.msra.gmra.mxu3 %vm156_vm1, %v7969_v17 }
0x3a7c   :  { %8124 = vmatpush.msrb.mxu3 %v9295_v0 }
0x3a7f   :  { %v8000_v22 = vpop.permute.xlu1 %7999 }
0x3a80   :  { %9306 = vmatpush.xpose.msk.msrb.mxu0 %vm156_vm1, %v8000_v22  ;;  %v7998_v16 = vpop.permute.xlu0 %7997 }
0x3a83   :  { %v7700_v39 = vpop.f32.mrf.mxu0  ;;  %9307 = vmatmul.msk.f32.vlgmr.msrb.gmra.mxu0 %vm156_vm1, %v7998_v16 }
0x3a84   :  { %v7701_v24 = vadd.f32 %v9428_v2, %v7700_v39  ;;  %v9294_v39 = vld [vmem:[%s12421_s2 + $0x4e0] sm:$0xff] }
0x3a85   :  { %8150 = vmatpush.msra.mxu0 %v9294_v39 }
0x3a86   :  { %v7703_v59 = vmax.f32 %v7701_v24, 0.0 }
0x3a88   :  { %9276 = vmatmul.msk.f32.vlgmr.msrb.gmra.mxu1 %vm61_vm0, %v7703_v59 }
0x3a8b   :  { %v7834_v18 = vpop.f32.mrf.mxu0 }
0x3a8c   :  { %v12246_v42 = vadd.f32 %v9429_v9, %v7834_v18 }
0x3a8e   :  { %7939 = vmatpush.msrb.mxu1 %v12246_v42 }
0x3a90   :  { %9299 = vmatmul.msk.f32.vlgmr.msra.gmra.mxu1 %vm156_vm1, %v7772_v40 }
0x3a93   :  { %v7837_v37 = vpop.f32.mrf.mxu0  ;;  %v7894_v46 = vpop.f32.mrf.mxu2 }
0x3a94   :  { %v12250_v54 = vadd.f32 %v9429_v9, %v7837_v37  ;;  %v7898_v62 = vmul.f32 0.17677669, %v7894_v46 }
0x3a96   :  { %7962 = vmatpush.msra.mxu2 %v12250_v54  ;;  %v7902_v38 = vsel %vm7085_vm3, %v7898_v62, -inf }
0x3afe   :  { %v7993_v3 = vpop.f32.mrf.mxu3 }
0x3aff   :  { %v8025_v4 = vmul.f32 0.17677669, %v7993_v3 }
0x3b00   :  { %v8022_v48 = vpop.f32.mrf.mxu0 }
0x3b01   :  { %v8027_v28 = vsel %vm7085_vm3, %v8025_v4, -inf  ;;  %v8026_v52 = vmul.f32 0.17677669, %v8022_v48 }
0x3b02   :  { %8028 = vmax.xlane.f32.xlu0 %v8027_v28 }
0x3b03   :  { %v8030_v29 = vsel %vm7085_vm3, %v8026_v52, -inf }
0x3b05   :  { %v12254_v36 = vpop.f32.mrf.mxu1 }
0x3b0d   :  { %v7869_v55 = vpop.f32.mrf.mxu1 }
0x3b0e   :  { %v7897_v44 = vmul.f32 0.17677669, %v7869_v55 }
0x3b10   :  { %v7899_v60 = vsel %vm7085_vm3, %v7897_v44, -inf }
0x3b11   :  { %7900 = vmax.xlane.f32.xlu1 %v7899_v60 }
0x3b16   :  { %8050 = vrot.lane.b32.xlu0 %v12246_v42, %s9815_s18 }
0x3b40   :  { %7903 = vmax.xlane.f32.xlu0 %v7902_v38 }
0x3b75   :  { %v8029_v31 = vpop.xlane.xlu0 %8028 }
0x3b76   :  { %v8033_v57 = vsub.f32 %v8025_v4, %v8029_v31 }
0x3b78   :  { %v8035_v8 = vmul.f32 1.442695, %v8033_v57 }
0x3b7a   :  { %9723 = vpow2.f32 %v8035_v8 }
0x3b80   :  { %v9724_v19 = vpop.eup %9723 }
0x3b81   :  { %v8039_v41 = vsel %vm7085_vm3, %v9724_v19, 0.0 }
0x3b82   :  { %8040 = vadd.xlane.f32.xlu1 %v8039_v41 }
0x3b84   :  { %v7901_v33 = vpop.xlane.xlu1 %7900 }
0x3b85   :  { %v7905_v13 = vsub.f32 %v7897_v44, %v7901_v33 }
0x3b87   :  { %v7907_v45 = vmul.f32 1.442695, %v7905_v13 }
0x3b88   :  { %v8051_v47 = vpop.permute.xlu0 %8050 }
0x3b89   :  { %9725 = vpow2.f32 %v7907_v45  ;;  %8071 = vmatpush.msra.mxu1 %v8051_v47 }
0x3b8f   :  { %v9726_v11 = vpop.eup %9725 }
0x3b90   :  { %v7911_v10 = vsel %vm7085_vm3, %v9726_v11, 0.0 }
0x3b91   :  { %7912 = vadd.xlane.f32.xlu2 %v7911_v10 }
0x3b9b   :  { %8157 = vrot.lane.b32.xlu1 %v12211_v14, %s9816_s23 }
0x3ba9   :  { %8155 = vrot.lane.b32.xlu2 %v12194_v43, %s9816_s23 }
0x3bb3   :  { %v7904_v26 = vpop.xlane.xlu0 %7903 }
0x3bb4   :  { %v7906_v21 = vsub.f32 %v7898_v62, %v7904_v26 }
0x3bb6   :  { %v7909_v6 = vmul.f32 1.442695, %v7906_v21 }
0x3bb8   :  { %9727 = vpow2.f32 %v7909_v6 }
0x3bbe   :  { %v9728_v35 = vpop.eup %9727 }
0x3bbf   :  { %v7914_v34 = vsel %vm7085_vm3, %v9728_v35, 0.0 }
0x3bc5   :  { %8031 = vmax.xlane.f32.xlu1 %v8030_v29 }
0x3bd2   :  { %7915 = vadd.xlane.f32.xlu2 %v7914_v34 }
0x3bde   :  { %8185 = vrot.lane.b32.xlu1 %v12222_v56, %s9816_s23 }
0x3bea   :  { %8183 = vrot.lane.b32.xlu2 %v12220_v1, %s9816_s23 }
0x3bf2   :  { %8235 = vrot.lane.b32.xlu2 %v12246_v42, %s9816_s23 }
0x3bf5   :  { %v8041_v40 = vpop.xlane.xlu1 %8040 }
0x3bfa   :  { %8344 = vrot.lane.b32.xlu2 %v12222_v56, %s9817_s12 }
0x3c02   :  { %8316 = vrot.lane.b32.xlu2 %v12211_v14, %s9817_s12 }
0x3c04   :  { %v7913_v61 = vpop.xlane.xlu2 %7912 }
0x3c05   :  { %9729 = vrcp.f32 %v7913_v61 }
0x3c06   :  { %9731 = vrcp.f32 %v8041_v40 }
0x3c0a   :  { %8342 = vrot.lane.b32.xlu2 %v12220_v1, %s9817_s12 }
0x3c0b   :  { %v9730_v12 = vpop.eup %9729 }
0x3c0c   :  { %v7919_v49 = vmul.f32 %v9730_v12, %v9726_v11  ;;  %v9732_v15 = vpop.eup %9731  ;;  %v8156_v50 = vpop.permute.xlu2 %8155 }
0x3c0d   :  { %v8158_v53 = vpop.permute.xlu1 %8157  ;;  %v8047_v23 = vmul.f32 %v9732_v15, %v9724_v19  ;;  %v9365_v19 = vpack.i.bf16 %v12246_v42, %v12250_v54  ;;  %v9296_v42 = vld [vmem:[%s12421_s2 + $0x4f0] sm:$0xff] }
0x3c0e   :  { %9302 = vmatmul.msk.f32.vlgmr.msrb.gmra.mxu1 %vm156_vm1, %v7919_v49 }
0x3c0f   :  { %9312 = vmatpush.xpose.msk.msrb.mxu1 %vm156_vm1, %v8158_v53 }
0x3c12   :  { %8314 = vrot.lane.b32.xlu2 %v12194_v43, %s9817_s12 }
0x3c16   :  { %9308 = vmatmul.msk.f32.vlgmr.msra.gmra.mxu1 %vm156_vm1, %v8047_v23 }
0x3c17   :  { %8308 = vmatpush.msra.mxu1 %v9296_v42 }
0x3c1e   :  { %9313 = vmatmul.msk.f32.vlgmr.msrb.gmra.mxu1 %vm156_vm1, %v8156_v50 }
0x3c38   :  { %v8032_v20 = vpop.xlane.xlu1 %8031 }
0x3c39   :  { %v8034_v5 = vsub.f32 %v8026_v52, %v8032_v20 }
0x3c3b   :  { %v8037_v7 = vmul.f32 1.442695, %v8034_v5 }
0x3c3d   :  { %9733 = vpow2.f32 %v8037_v7 }
0x3c43   :  { %v9734_v14 = vpop.eup %9733 }
0x3c44   :  { %v8042_v27 = vsel %vm7085_vm3, %v9734_v14, 0.0 }
0x3c45   :  { %v7916_v58 = vpop.xlane.xlu2 %7915  ;;  %8043 = vadd.xlane.f32.xlu0 %v8042_v27 }
0x3c46   :  { %9735 = vrcp.f32 %v7916_v58 }
0x3c4c   :  { %v9736_v43 = vpop.eup %9735 }
0x3c4d   :  { %v7920_v63 = vmul.f32 %v9736_v43, %v9728_v35  ;;  %v8184_v1 = vpop.permute.xlu2 %8183 }
0x3c4f   :  { %9303 = vmatmul.msk.f32.vlgmr.msra.gmra.mxu2 %vm156_vm1, %v7920_v63 }
0x3c50   :  { %v8186_v4 = vpop.permute.xlu1 %8185 }
0x3c55   :  { %v8236_v56 = vpop.permute.xlu2 %8235 }
0x3c56   :  { %8256 = vmatpush.msra.mxu3 %v8236_v56 }
0x3c59   :  { %8077 = vrot.lane.b32.xlu0 %v12250_v54, %s9815_s18  ;;  %s9819_s18 = smov 128  }
0x3c5d   :  { %v8345_v24 = vpop.permute.xlu2 %8344 }
0x3c65   :  { %v8317_v18 = vpop.permute.xlu2 %8316 }
0x3c6d   :  { %v8343_v28 = vpop.permute.xlu2 %8342 }
0x3c75   :  { %v8315_v46 = vpop.permute.xlu2 %8314 }
0x3c8b   :  { %v7941_v25 = vpop.f32.mrf.mxu1 }
0x3c93   :  { %v8073_v17 = vpop.f32.mrf.mxu1 }
0x3c9b   :  { %v8180_v22 = vpop.f32.mrf.mxu1 }
0x3c9c   :  { %v8211_v2 = vmul.f32 0.17677669, %v8180_v22 }
0x3c9e   :  { %v8213_v16 = vsel %vm7085_vm3, %v8211_v2, -inf }
0x3c9f   :  { %8214 = vmax.xlane.f32.xlu0 %v8213_v16 }
0x3cb8   :  { %v8044_v59 = vpop.xlane.xlu0 %8043 }
0x3cb9   :  { %9737 = vrcp.f32 %v8044_v59 }
0x3cbf   :  { %v9738_v9 = vpop.eup %9737 }
0x3cc0   :  { %v8048_v37 = vmul.f32 %v9738_v9, %v9734_v14 }
0x3ccb   :  { %v8078_v3 = vpop.permute.xlu0 %8077 }
0x3ccc   :  { %8098 = vmatpush.msrb.mxu2 %v8078_v3 }
0x3ccd   :  { %9309 = vmatmul.msk.f32.vlgmr.msrb.gmra.mxu2 %vm156_vm1, %v8048_v37 }
0x3cce   :  { %9314 = vmatpush.xpose.msk.msra.mxu2 %vm156_vm1, %v8186_v4 }
0x3cd2   :  { %9319 = vmatpush.xpose.msk.msrb.mxu2 %vm156_vm1, %v8317_v18  ;;  %v7964_v55 = vpop.f32.mrf.mxu2 }
0x3cd3   :  { %v8131_v44 = vrot.slane %v7964_v55, 7  ;;  %v9297_v55 = vld [vmem:[%s12421_s2 + $0x4f8] sm:$0xff] }
0x3cd5   :  { %v8132_v60 = vsel %vm6936_vm2, %v8131_v44, %v7941_v25  ;;  %9315 = vmatmul.msk.f32.vlgmr.msra.gmra.mxu2 %vm156_vm1, %v8184_v1  ;;  %v8558_v44 = vld [vmem:[%s12430_s11 + $0x18] sm:$0xff] }
0x3cd6   :  { %9311 = vmatmul.msk.f32.vlgmr.msra.gmra.mxu0 %vm156_vm1, %v8132_v60  ;;  %8467 = vmatpush.msra.mxu2 %v9297_v55  ;;  %v8557_v60 = vld [vmem:[%s12430_s11 + $0x10] sm:$0xff] }
0x3cdd   :  { %9320 = vmatmul.msk.f32.vlgmr.msrb.gmra.mxu2 %vm156_vm1, %v8315_v46  ;;  %v8556_v46 = vld [vmem:[%s12430_s11 + $0x8] sm:$0xff] }
0x3cde   :  { %8607 = vmatpush.msrb.mxu2 %v8558_v44 }
0x3ce0   :  { %8608 = vmatpush.msrb.mxu2 %v8557_v60 }
0x3ce2   :  { %8609 = vmatpush.msrb.mxu2 %v8556_v46 }
0x3d12   :  { %v8215_v62 = vpop.xlane.xlu0 %8214 }
0x3d13   :  { %v8219_v38 = vsub.f32 %v8211_v2, %v8215_v62  ;;  %v8555_v62 = vld [vmem:[%s12430_s11] sm:$0xff] }
0x3d14   :  { %8610 = vmatpush.msrb.mxu2 %v8555_v62 }
0x3d15   :  { %v8221_v31 = vmul.f32 1.442695, %v8219_v38 }
0x3d17   :  { %9739 = vpow2.f32 %v8221_v31  ;;  %v7733_v31 = vrot.slane %v12254_v36, 1 }
0x3d1d   :  { %v9740_v57 = vpop.eup %9739 }
0x3d1e   :  { %v8225_v8 = vsel %vm7085_vm3, %v9740_v57, 0.0 }
0x3d1f   :  { %8226 = vadd.xlane.f32.xlu1 %v8225_v8  ;;  %v7737_v8 = vadd.f32 %v7733_v31, %v12206_v30  ;;  %v9329_v30 = vld [vmem:[%s12423_s4 + $0x138] sm:$0xff] }
0x3d38   :  { %8261 = vrot.lane.b32.xlu1 %v12250_v54, %s9816_s23  ;;  %s9820_s23 = smov 8  }
0x3d39   :  { %8636 = dma.vmem_to_hbm [thread:$0]  %s8629_s19, 256, %s8631_s20, [#allocation4], %s9819_s18, %s9819_s18, %s9820_s23  }
0x3d40   :  { %9366 = vrot.lane.b32.xlu1 %v9365_v19, %s9817_s12  ;;  %v9430_v19 = vld [vmem:[%s12426_s7 + $0x8] ss:$0 sm:$0xff]  ;;  %s9821_s12 = smov [#allocation5]  }
0x3d50   :  { %v8100_v41 = vpop.f32.mrf.mxu2 }
0x3d51   :  { %v8105_v33 = vrot.slane %v8100_v41, 7 }
0x3d53   :  { %v8106_v13 = vsel %vm6936_vm2, %v8105_v33, %v8073_v17  ;;  %v8152_v16 = vpop.f32.mrf.mxu0 }
0x3d54   :  { %9310 = vmatmul.msk.f32.vlgmr.msrb.gmra.mxu3 %vm156_vm1, %v8106_v13  ;;  %v7741_v13 = vadd.f32 %v9430_v19, %v7737_v8 }
0x3d55   :  { %9321 = vmatpush.xpose.msk.msrb.mxu3 %vm156_vm1, %v8345_v24 }
0x3d58   :  { %v8208_v45 = vpop.f32.mrf.mxu2 }
0x3d59   :  { %v8212_v47 = vmul.f32 0.17677669, %v8208_v45 }
0x3d5b   :  { %v8216_v11 = vsel %vm7085_vm3, %v8212_v47, -inf }
0x3d5c   :  { %8217 = vmax.xlane.f32.xlu0 %v8216_v11  ;;  %v8591_v11 = vrot.slane %v7741_v13, 7 }
0x3d60   :  { %v8339_v50 = vpop.f32.mrf.mxu2 }
0x3d61   :  { %v8370_v0 = vmul.f32 0.17677669, %v8339_v50  ;;  %v9432_v50 = vld [vmem:[%s12424_s5 + $0x9] ss:$0 sm:$0xff] }
0x3d63   :  { %v8372_v20 = vsel %vm7085_vm3, %v8370_v0, -inf }
0x3d92   :  { %v8227_v10 = vpop.xlane.xlu1 %8226 }
0x3d93   :  { %9741 = vrcp.f32 %v8227_v10 }
0x3d99   :  { %v9742_v54 = vpop.eup %9741 }
0x3d9a   :  { %v8233_v48 = vmul.f32 %v9742_v54, %v9740_v57  ;;  %v9328_v54 = vld [vmem:[%s12423_s4 + $0x130] sm:$0xff] }
0x3d9c   :  { %9316 = vmatmul.msk.f32.vlgmr.msra.gmra.mxu3 %vm156_vm1, %v8233_v48  ;;  %v9334_v48 = vld [vmem:[%s12425_s6 + $0x138] sm:$0xff] }
0x3d9d   :  { %8508 = vmatpush.msra.mxu3 %v9329_v30 }
0x3d9f   :  { %8509 = vmatpush.msra.mxu3 %v9328_v54 }
0x3da4   :  { %9322 = vmatmul.msk.f32.vlgmr.msrb.gmra.mxu3 %vm156_vm1, %v8343_v28 }
0x3daa   :  { %v8262_v26 = vpop.permute.xlu1 %8261 }
0x3dab   :  { %8282 = vmatpush.msrb.mxu0 %v8262_v26 }
0x3db2   :  { %v9367_v52 = vpop.permute.xlu1 %9366 }
0x3db3   :  { %v9369_v21 = vunpack.i.h.bf16 %v9367_v52  ;;  %v9368_v6 = vunpack.i.l.bf16 %v9367_v52 }
0x3db5   :  { %8415 = vmatpush.msra.mxu0 %v9369_v21  ;;  %8441 = vmatpush.msrb.mxu1 %v9368_v6 }
0x3dcf   :  { %v8218_v29 = vpop.xlane.xlu0 %8217 }
0x3dd0   :  { %v8220_v35 = vsub.f32 %v8212_v47, %v8218_v29  ;;  %v7736_v47 = vadd.f32 %v12254_v36, %v12208_v51  ;;  %v9327_v51 = vld [vmem:[%s12423_s4 + $0x128] sm:$0xff]  ;;  %v9326_v36 = vld [vmem:[%s12423_s4 + $0x120] sm:$0xff] }
0x3dd1   :  { %8510 = vmatpush.msra.mxu3 %v9327_v51 }
0x3dd2   :  { %v8223_v34 = vmul.f32 1.442695, %v8220_v35  ;;  %v7740_v10 = vadd.f32 %v9430_v19, %v7736_v47 }
0x3dd3   :  { %8511 = vmatpush.msra.mxu3 %v9326_v36 }
0x3dd4   :  { %9743 = vpow2.f32 %v8223_v34  ;;  %v8592_v42 = vsel %vm6936_vm2, %v8591_v11, %v7740_v10 }
0x3dd7   :  { %v12320_v12 = vpop.f32.mrf.mxu3 }
0x3dd8   :  { %v8153_v26 = vadd.f32 %v8152_v16, %v12320_v12  ;;  %v9333_v12 = vld [vmem:[%s12425_s6 + $0x130] sm:$0xff] }
0x3dda   :  { %v9744_v61 = vpop.eup %9743 }
0x3ddb   :  { %v8228_v40 = vsel %vm7085_vm3, %v9744_v61, 0.0 }
0x3ddc   :  { %8229 = vadd.xlane.f32.xlu2 %v8228_v40 }
0x3e1f   :  { %v8258_v49 = vpop.f32.mrf.mxu3 }
0x3e27   :  { %v8367_v53 = vpop.f32.mrf.mxu3 }
0x3e28   :  { %v8371_v15 = vmul.f32 0.17677669, %v8367_v53 }
0x3e2a   :  { %v8375_v23 = vsel %vm7085_vm3, %v8371_v15, -inf }
0x3e2b   :  { %8376 = vmax.xlane.f32.xlu0 %v8375_v23  ;;  %v9331_v23 = vld [vmem:[%s12425_s6 + $0x120] sm:$0xff] }
0x3e33   :  { %8373 = vmax.xlane.f32.xlu0 %v8372_v20 }
0x3e4f   :  { %v8230_v5 = vpop.xlane.xlu2 %8229 }
0x3e50   :  { %9745 = vrcp.f32 %v8230_v5 }
0x3e56   :  { %v9746_v7 = vpop.eup %9745 }
0x3e57   :  { %v8234_v14 = vmul.f32 %v9746_v7, %v9744_v61  ;;  %v9431_v61 = vld [vmem:[%s12422_s3 + $0x27] ss:$0 sm:$0xff]  ;;  %v8562_v7 = vld [vmem:[%s12430_s11 + $0x38] sm:$0xff] }
0x3e59   :  { %9317 = vmatmul.msk.f32.vlgmr.msrb.gmra.mxu0 %vm156_vm1, %v8234_v14  ;;  %v8561_v14 = vld [vmem:[%s12430_s11 + $0x30] sm:$0xff] }
0x3e5a   :  { %8537 = vmatpush.msrb.mxu0 %v9334_v48 }
0x3e5c   :  { %8538 = vmatpush.msrb.mxu0 %v9333_v12 }
0x3e9e   :  { %v8377_v27 = vpop.xlane.xlu0 %8376 }
0x3e9f   :  { %v8379_v58 = vsub.f32 %v8371_v15, %v8377_v27  ;;  %v8560_v27 = vld [vmem:[%s12430_s11 + $0x28] sm:$0xff] }
0x3ea1   :  { %v8382_v43 = vmul.f32 1.442695, %v8379_v58  ;;  %v8559_v58 = vld [vmem:[%s12430_s11 + $0x20] sm:$0xff] }
0x3ea3   :  { %9747 = vpow2.f32 %v8382_v43 }
0x3ea6   :  { %v8374_v63 = vpop.xlane.xlu0 %8373 }
0x3ea7   :  { %v8378_v1 = vsub.f32 %v8370_v0, %v8374_v63 }
0x3ea9   :  { %v9748_v56 = vpop.eup %9747  ;;  %v8380_v25 = vmul.f32 1.442695, %v8378_v1 }
0x3eaa   :  { %v8387_v17 = vsel %vm7085_vm3, %v9748_v56, 0.0 }
0x3eab   :  { %9749 = vpow2.f32 %v8380_v25  ;;  %8388 = vadd.xlane.f32.xlu0 %v8387_v17  ;;  %v9433_v25 = vld [vmem:[%s12426_s7 + $0x9] ss:$0 sm:$0xff]  ;;  %s8641_s7 = sshll.u32 %s9821_s12, 4  ;;  %s8642_s7 = int_to_ptr.vmem [resolvable:$true] %s8641_s7 }
0x3eac   :  { %8649 = dma.vmem_to_hbm [thread:$0]  %s8642_s7, 256, %s8644_s1, [#allocation6], %s9819_s18, %s9819_s18, %s9820_s23  }
0x3eb1   :  { %v9750_v22 = vpop.eup %9749 }
0x3eb2   :  { %v8384_v2 = vsel %vm7085_vm3, %v9750_v22, 0.0 }
0x3eb3   :  { %8385 = vadd.xlane.f32.xlu0 %v8384_v2 }
0x3ed6   :  { %v8284_v39 = vpop.f32.mrf.mxu0 }
0x3ed7   :  { %v8289_v24 = vrot.slane %v8284_v39, 7  ;;  %v9434_v39 = vld [vmem:[#allocation2] ss:$0 sm:$0xff] }
0x3ed9   :  { %v8290_v59 = vsel %vm6936_vm2, %v8289_v24, %v8258_v49 }
0x3eda   :  { %9318 = vmatmul.msk.f32.vlgmr.msra.gmra.mxu1 %vm156_vm1, %v8290_v59 }
0x3edb   :  { %8581 = vmatpush.msra.mxu1 %v8562_v7 }
0x3edd   :  { %8582 = vmatpush.msra.mxu1 %v8561_v14 }
0x3edf   :  { %8583 = vmatpush.msra.mxu1 %v8560_v27 }
0x3ee1   :  { %8584 = vmatpush.msra.mxu1 %v8559_v58 }
0x3f1e   :  { %v8389_v9 = vpop.xlane.xlu0 %8388 }
0x3f1f   :  { %9751 = vrcp.f32 %v8389_v9 }
0x3f25   :  { %v9752_v18 = vpop.eup %9751 }
0x3f26   :  { %v8393_v37 = vmul.f32 %v9752_v18, %v9748_v56  ;;  %v8386_v3 = vpop.xlane.xlu0 %8385 }
0x3f27   :  { %9753 = vrcp.f32 %v8386_v3 }
0x3f28   :  { %9324 = vmatmul.msk.f32.vlgmr.msrb.gmra.mxu1 %vm156_vm1, %v8393_v37 }
0x3f2d   :  { %v9754_v4 = vpop.eup %9753 }
0x3f2e   :  { %v8392_v28 = vmul.f32 %v9754_v4, %v9750_v22 }
0x3f30   :  { %9323 = vmatmul.msk.f32.vlgmr.msra.gmra.mxu0 %vm156_vm1, %v8392_v28 }
0x3f57   :  { %v8310_v38 = vpop.f32.mrf.mxu1 }
0x3f58   :  { %v8313_v52 = vadd.f32 %v8310_v38, %v8153_v26 }
0x3fa5   :  { %v8443_v57 = vpop.f32.mrf.mxu1 }
0x3fa6   :  { %v8448_v41 = vrot.slane %v8443_v57, 7 }
0x3fad   :  { %v8417_v33 = vpop.f32.mrf.mxu0 }
0x3fae   :  { %v8449_v45 = vsel %vm6936_vm2, %v8448_v41, %v8417_v33 }
0x3faf   :  { %9325 = vmatmul.msk.f32.vlgmr.msra.gmra.mxu2 %vm156_vm1, %v8449_v45 }
0x3fb7   :  { %9337 = vmatmul.msk.f32.vlgmr.msrb.gmra.mxu2 %vm61_vm0, %v8592_v42 }
0x4032   :  { %v8469_v21 = vpop.f32.mrf.mxu2 }
0x4033   :  { %v8472_v6 = vadd.f32 %v8469_v21, %v8313_v52 }
0x4035   :  { %v8474_v29 = vrot.slane %v8472_v6, 1  ;;  %v8477_v35 = vadd.f32 %v8472_v6, %v12135_v32 }
0x4037   :  { %v8478_v34 = vadd.f32 %v8474_v29, %v12135_v32  ;;  %v8481_v49 = vadd.f32 %v9431_v61, %v8477_v35  ;;  %v9332_v32 = vld [vmem:[%s12425_s6 + $0x128] sm:$0xff] }
0x4038   :  { %8539 = vmatpush.msrb.mxu0 %v9332_v32 }
0x4039   :  { %v8482_v40 = vadd.f32 %v9431_v61, %v8478_v34 }
0x403a   :  { %8540 = vmatpush.msrb.mxu0 %v9331_v23  ;;  %v8612_v24 = vpop.f32.mrf.mxu2 }
0x403b   :  { %v8492_v53 = vrot.slane %v8482_v40, 7 }
0x403d   :  { %v8493_v15 = vsel %vm6936_vm2, %v8492_v53, %v8481_v49 }
0x403e   :  { %9330 = vmatmul.msk.f32.vlgmr.msra.gmra.mxu3 %vm61_vm0, %v8493_v15 }
0x40c1   :  { %v8513_v0 = vpop.f32.mrf.mxu3 }
0x40c2   :  { %v8514_v20 = vadd.f32 %v9432_v50, %v8513_v0 }
0x40c4   :  { %v8516_v5 = vmax.f32 %v8514_v20, 0.0 }
0x40c6   :  { %9335 = vmatmul.msk.f32.vlgmr.msrb.gmra.mxu0 %vm61_vm0, %v8516_v5 }
0x4143   :  { %v8542_v43 = vpop.f32.mrf.mxu0 }
0x4144   :  { %v8546_v63 = vrot.slane %v8542_v43, 1  ;;  %v8549_v1 = vadd.f32 %v8542_v43, %v8481_v49 }
0x4146   :  { %v8550_v56 = vadd.f32 %v8546_v63, %v8482_v40  ;;  %v8553_v22 = vadd.f32 %v9433_v25, %v8549_v1 }
0x4148   :  { %v8554_v17 = vadd.f32 %v9433_v25, %v8550_v56 }
0x414a   :  { %v8565_v2 = vrot.slane %v8554_v17, 7 }
0x414c   :  { %v8566_v16 = vsel %vm6936_vm2, %v8565_v2, %v8553_v22 }
0x414d   :  { %9336 = vmatmul.msk.f32.vlgmr.msra.gmra.mxu1 %vm61_vm0, %v8566_v16 }
0x41ca   :  { %v8586_v59 = vpop.f32.mrf.mxu1 }
0x41cb   :  { %v8613_v9 = vadd.f32 %v8612_v24, %v8586_v59 }
0x41cd   :  { %v8619_v18 = vadd.f32 %v9434_v39, %v8613_v9 }
0x41cf   :  { %8621 = vst.msk [vmem:[%s12432_s13] sm:$0x3] %vm8620_vm4, %v8619_v18 }
0x41d0   :  { %9811 = dma.done.wait [#allocation4], 256  }
0x41d1   :  { %9812 = vsyncadd [#allocation4], 4294967040 }
0x41d2   :  { %9813 = dma.done.wait [#allocation6], 256  }
0x41d3   :  { %9814 = vsyncadd [#allocation6], 4294967040 }
0x41d4   :  { %8660 = vsyncpa [#allocation4], 1 }
0x41d5   :  { %8661 = vsyncpa [#allocation6], 1 }

</bundles_post_ra>
